<compile_context>
chip_gen: v7x
topology: tpu7x:2x2x1
jax: 0.10.0
libtpu: 0.0.40
codegen_flags: <defaults>
</compile_context>

<pallas_src>
import jax
import jax.numpy as jnp
from jax.experimental import pallas as pl
from jax.experimental.pallas import tpu as pltpu

EPS = 1e-5
LANES = 128


# ---------------------------------------------------------------------------
# Fused kernel: reflect-pad + conv3x3 + IN + ReLU + reflect-pad + conv3x3 + IN
# + residual, one batch element per grid step.
# ---------------------------------------------------------------------------
def fused_resnet_block_kernel(x_ref, mask_ref, w1_ref, b1_ref, w2_ref, b2_ref,
                              out_ref, xpf_ref, y1f_ref):
    """
    x_ref   : (1, H, W, C)  f32 input block (C lane-padded to mult. of 128)
    mask_ref: (H*(W+2), 1)  f32 1.0 on valid columns, 0.0 on wrap/junk columns
    w*_ref  : (9, C, C)     bf16 per-tap weights, tap = kh*3 + kw, (Cin, Cout)
    b*_ref  : (1, C)        f32 biases
    out_ref : (1, H, W, C)  f32
    xpf_ref : (Ra, C) bf16  flat reflect-padded input   (row stride W+2)
    y1f_ref : (Ra, C) bf16  flat reflect-padded stage-1 activation
    """
    _, h, w, c = x_ref.shape
    hp, wp = h + 2, w + 2
    rh = h * wp                 # rows of the junk-column conv-output layout
    r = hp * wp                 # rows holding real padded data
    r_alloc = xpf_ref.shape[0]  # r + small overhang (read only by junk cols)
    inv_hw = 1.0 / (h * w)

    valid = mask_ref[...] > 0.0                      # (rh, 1) bool

    # Keep the overhang rows finite/deterministic (they only ever feed masked
    # junk output columns of the deepest taps).
    tail = jnp.zeros((r_alloc - r, c), xpf_ref.dtype)
    xpf_ref[r:r_alloc, :] = tail
    y1f_ref[r:r_alloc, :] = tail

    def write_reflect_pad(dst_ref, get_row):
        # Reflect-pad an (h, w, c) image into dst_ref as flat rows with stride
        # wp. All writes come from values (no scratch read-back).
        for rr in range(hp):
            src = 1 if rr == 0 else (h - 2 if rr == hp - 1 else rr - 1)
            row = get_row(src).astype(dst_ref.dtype)              # (w, c)
            base = rr * wp
            dst_ref[base + 1:base + 1 + w, :] = row               # interior
            dst_ref[base:base + 1, :] = row[1:2]                  # left  <- col 1
            dst_ref[base + w + 1:base + w + 2, :] = row[w - 2:w - 1]  # right <- col W-2

    def conv3x3(src_ref, w_ref, b_ref):
        # 3x3 conv as 9 accumulated MXU matmuls over contiguous row-slices of
        # the flat padded image (no im2col, no per-tap reshape). bf16 operands,
        # f32 accumulation.
        acc = jnp.zeros((rh, c), jnp.float32)
        for di in range(3):
            for dj in range(3):
                off = di * wp + dj
                slab = src_ref[off:off + rh, :]                   # (rh, c) bf16
                acc = acc + jnp.dot(slab, w_ref[di * 3 + dj],
                                    preferred_element_type=jnp.float32)
        return acc + b_ref[...]

    def instance_norm(y):
        # Single-pass f32 stats over the valid (non-junk) columns only.
        # TODO(synk): switch to accumulated/two-pass stats when HW tiling lands.
        ym = jnp.where(valid, y, 0.0)
        mean = jnp.sum(ym, axis=0, keepdims=True) * inv_hw
        ex2 = jnp.sum(ym * ym, axis=0, keepdims=True) * inv_hw
        var = jnp.maximum(ex2 - mean * mean, 0.0)
        return (y - mean) * jax.lax.rsqrt(var + EPS)

    # ---- stage 1: reflect-pad(x) -> conv1 -> IN -> ReLU ---------------------
    write_reflect_pad(xpf_ref, lambda i: x_ref[0, i, :, :])
    y1 = jnp.maximum(instance_norm(conv3x3(xpf_ref, w1_ref, b1_ref)), 0.0)

    # ---- stage 2: reflect-pad(y1) (stays in VMEM) -> conv2 -> IN ------------
    write_reflect_pad(y1f_ref, lambda i: y1[i * wp:i * wp + w, :])
    y2 = instance_norm(conv3x3(y1f_ref, w2_ref, b2_ref))

    # ---- residual add (f32, from the already-loaded input block) ------------
    for i in range(h):
        out_ref[0, i, :, :] = x_ref[0, i, :, :] + y2[i * wp:i * wp + w, :]


# ---------------------------------------------------------------------------
# Wrapper
# ---------------------------------------------------------------------------
def _round_up(x, m):
    return (x + m - 1) // m * m


@jax.jit
def resnet_block_forward(x_nchw, params):
    """x_nchw: (N, C, H, W) f32 -> (N, C, H, W) f32.

    params = (w1, b1, w2, b2), conv weights in HWIO layout (3, 3, C, C).
    """
    w1, b1, w2, b2 = params
    n, c, h, w = x_nchw.shape
    assert h >= 2 and w >= 2, "reflection padding needs H, W >= 2"

    cp = _round_up(c, LANES)               # lane-dense channels
    pad_c = cp - c
    hp, wp = h + 2, w + 2
    rh = h * wp
    r = hp * wp
    r_alloc = _round_up(r + 2, 8)          # +2 overhang for the deepest taps

    # TODO(synk): keep the surrounding model channels-last to drop these two
    # boundary transposes.
    x_nhwc = jnp.transpose(x_nchw, (0, 2, 3, 1)).astype(jnp.float32)
    if pad_c:
        # TODO(synk): for true C < 128 fold taps into a larger-K matmul instead
        # of zero-padding both Cin and Cout (padded channels stay exactly 0).
        x_nhwc = jnp.pad(x_nhwc, ((0, 0), (0, 0), (0, 0), (0, pad_c)))
        w1 = jnp.pad(w1, ((0, 0), (0, 0), (0, pad_c), (0, pad_c)))
        w2 = jnp.pad(w2, ((0, 0), (0, 0), (0, pad_c), (0, pad_c)))
        b1 = jnp.pad(b1, ((0, pad_c),))
        b2 = jnp.pad(b2, ((0, pad_c),))

    w1r = w1.reshape(9, cp, cp).astype(jnp.bfloat16)
    w2r = w2.reshape(9, cp, cp).astype(jnp.bfloat16)
    b1r = b1.reshape(1, cp).astype(jnp.float32)
    b2r = b2.reshape(1, cp).astype(jnp.float32)

    # Valid-column mask for the junk-column layout (1.0 on image columns,
    # 0.0 on the 2 wrap columns per row).
    col = jnp.arange(rh, dtype=jnp.int32) % wp
    valid = (col < w).astype(jnp.float32).reshape(rh, 1)

    # VMEM budget from actual block + scratch sizes (double-buffered blocks).
    blk_io = h * w * cp * 4                        # x / out block
    w_bytes = 9 * cp * cp * 2                      # one bf16 weight tensor
    scr = 2 * r_alloc * cp * 2                     # two bf16 scratches
    tmp = 8 * rh * cp * 4                          # f32 temporaries (acc/y1/y2)
    need = 2 * (2 * blk_io) + 2 * (2 * w_bytes) + scr + tmp + (1 << 20)
    vmem_limit = int(min(100 * 2**20, max(32 * 2**20, need)))

    out = pl.pallas_call(
        fused_resnet_block_kernel,
        out_shape=jax.ShapeDtypeStruct((n, h, w, cp), jnp.float32),
        grid=(n,),
        in_specs=[
            pl.BlockSpec((1, h, w, cp), lambda i: (i, 0, 0, 0)),
            pl.BlockSpec((rh, 1), lambda i: (0, 0)),
            # TODO(synk): pipeline_mode=pl.Buffered(1) (or one-time DMA) for the
            # constant weight blocks once Cp is large enough to matter.
            pl.BlockSpec((9, cp, cp), lambda i: (0, 0, 0)),
            pl.BlockSpec((1, cp), lambda i: (0, 0)),
            pl.BlockSpec((9, cp, cp), lambda i: (0, 0, 0)),
            pl.BlockSpec((1, cp), lambda i: (0, 0)),
        ],
        out_specs=pl.BlockSpec((1, h, w, cp), lambda i: (i, 0, 0, 0)),
        scratch_shapes=[pltpu.VMEM((r_alloc, cp), jnp.bfloat16),
                        pltpu.VMEM((r_alloc, cp), jnp.bfloat16)],
        compiler_params=pltpu.CompilerParams(
            dimension_semantics=("parallel",),
            vmem_limit_bytes=vmem_limit,
        ),
    )(x_nhwc, valid, w1r, b1r, w2r, b2r)

    out = out[..., :c]                             # drop channel padding
    return jnp.transpose(out, (0, 3, 1, 2))        # -> NCHW


# ---------------------------------------------------------------------------
# Pure-JAX references
# ---------------------------------------------------------------------------
def _ref_forward(x_nchw, params, operand_dtype=jnp.float32):
    """Module semantics in f32. operand_dtype=bfloat16 additionally mirrors the
    kernel's MXU-operand rounding (accumulation / IN / residual stay f32)."""
    w1, b1, w2, b2 = params
    x = jnp.transpose(x_nchw, (0, 2, 3, 1)).astype(jnp.float32)

    def q(a):
        return a.astype(operand_dtype).astype(jnp.float32)

    def conv_in(z, w4d, b):
        zp = jnp.pad(q(z), ((0, 0), (1, 1), (1, 1), (0, 0)), mode="reflect")
        y = jax.lax.conv_general_dilated(
            zp, q(w4d), (1, 1), "VALID",
            dimension_numbers=("NHWC", "HWIO", "NHWC"),
            precision=jax.lax.Precision.HIGHEST) + b
        mean = jnp.mean(y, axis=(1, 2), keepdims=True)
        var = jnp.mean((y - mean) ** 2, axis=(1, 2), keepdims=True)
        return (y - mean) * jax.lax.rsqrt(var + EPS)

    h1 = jnp.maximum(conv_in(x, w1, b1), 0.0)
    out = x + conv_in(h1, w2, b2)
    return jnp.transpose(out, (0, 3, 1, 2))


# ---------------------------------------------------------------------------
if __name__ == "__main__":
    N, C, H, W = 2, 4, 16, 16
    key = jax.random.PRNGKey(0)
    kx, kw1, kb1, kw2, kb2 = jax.random.split(key, 5)

    x = jax.random.normal(kx, (N, C, H, W), dtype=jnp.float32)
    # Conv weights in HWIO layout (kh, kw, C_in, C_out); matches tap ordering.
    w1 = jax.random.normal(kw1, (3, 3, C, C), dtype=jnp.float32) * 0.1
    b1 = jax.random.normal(kb1, (C,), dtype=jnp.float32) * 0.1
    w2 = jax.random.normal(kw2, (3, 3, C, C), dtype=jnp.float32) * 0.1
    b2 = jax.random.normal(kb2, (C,), dtype=jnp.float32) * 0.1
    params = (w1, b1, w2, b2)

    out = jax.block_until_ready(resnet_block_forward(x, params))
    assert out.shape == (N, C, H, W)
    assert bool(jnp.all(jnp.isfinite(out)))

    # Tight check vs. a reference with the same bf16 MXU-operand rounding
    # (validates the kernel's fusion / padding / IN / residual logic).
    ref_bf16 = jax.block_until_ready(
        _ref_forward(x, params, operand_dtype=jnp.bfloat16))
    assert jnp.allclose(out, ref_bf16, atol=5e-3, rtol=5e-3), \
        "mismatch vs bf16-operand reference"

    # Sanity check vs. the true f32 module semantics (bf16 operand noise only).
    ref_f32 = jax.block_until_ready(_ref_forward(x, params))
    assert jnp.allclose(out, ref_f32, atol=5e-2, rtol=5e-2), \
        "mismatch vs f32 reference"

    print("KERNEL_OK")
</pallas_src>

<mosaic_0001>
module attributes {stable_mosaic.version = 11 : i64} {
  func.func @fused_resnet_block_kernel(%arg0: i32, %arg1: memref<1x16x16x128xf32, #tpu.memory_space<vmem>>, %arg2: memref<288x1xf32, #tpu.memory_space<vmem>>, %arg3: memref<9x128x128xbf16, #tpu.memory_space<vmem>>, %arg4: memref<1x128xf32, #tpu.memory_space<vmem>>, %arg5: memref<9x128x128xbf16, #tpu.memory_space<vmem>>, %arg6: memref<1x128xf32, #tpu.memory_space<vmem>>, %arg7: memref<1x16x16x128xf32, #tpu.memory_space<vmem>>, %arg8: memref<328x128xbf16, #tpu.memory_space<vmem>>, %arg9: memref<328x128xbf16, #tpu.memory_space<vmem>>) attributes {dimension_semantics = [#tpu.dimension_semantics<parallel>], iteration_bounds = array<i64: 2>, scalar_prefetch = 0 : i64, scratch_operands = 2 : i64, tpu.core_type = #tpu.core_type<tc>, window_params = [{transform_indices = @transform_0, window_bounds = array<i64: 1, 16, 16, 128>}, {pipeline_mode = #tpu.pipeline_mode<synchronous>, transform_indices = @transform_1, window_bounds = array<i64: 288, 1>}, {pipeline_mode = #tpu.pipeline_mode<synchronous>, transform_indices = @transform_2, window_bounds = array<i64: 9, 128, 128>}, {pipeline_mode = #tpu.pipeline_mode<synchronous>, transform_indices = @transform_3, window_bounds = array<i64: 1, 128>}, {pipeline_mode = #tpu.pipeline_mode<synchronous>, transform_indices = @transform_4, window_bounds = array<i64: 9, 128, 128>}, {pipeline_mode = #tpu.pipeline_mode<synchronous>, transform_indices = @transform_5, window_bounds = array<i64: 1, 128>}, {transform_indices = @transform_6, window_bounds = array<i64: 1, 16, 16, 128>}]} {
    %c0 = arith.constant 0 : index
    %c0_0 = arith.constant 0 : index
    %0 = vector.load %arg2[%c0, %c0_0] : memref<288x1xf32, #tpu.memory_space<vmem>>, vector<288x1xf32>
    %cst = arith.constant 0.000000e+00 : f32
    %1 = vector.broadcast %cst : f32 to vector<288x1xf32>
    %2 = arith.cmpf ogt, %0, %1 : vector<288x1xf32>
    %cst_1 = arith.constant 0.000000e+00 : bf16
    %3 = vector.broadcast %cst_1 : bf16 to vector<4x128xbf16>
    %c324 = arith.constant 324 : index
    %c0_2 = arith.constant 0 : index
    %4 = vector.load %arg8[%c324, %c0_2] : memref<328x128xbf16, #tpu.memory_space<vmem>>, vector<4x128xbf16>
    tpu.vector_store %arg8[%c324, %c0_2], %3 {strides = array<i32>} : memref<328x128xbf16, #tpu.memory_space<vmem>>, vector<4x128xbf16>,
    %c324_3 = arith.constant 324 : index
    %c0_4 = arith.constant 0 : index
    %5 = vector.load %arg9[%c324_3, %c0_4] : memref<328x128xbf16, #tpu.memory_space<vmem>>, vector<4x128xbf16>
    tpu.vector_store %arg9[%c324_3, %c0_4], %3 {strides = array<i32>} : memref<328x128xbf16, #tpu.memory_space<vmem>>, vector<4x128xbf16>,
    %c0_5 = arith.constant 0 : index
    %c1 = arith.constant 1 : index
    %c0_6 = arith.constant 0 : index
    %c0_7 = arith.constant 0 : index
    %6 = vector.load %arg1[%c0_5, %c1, %c0_6, %c0_7] : memref<1x16x16x128xf32, #tpu.memory_space<vmem>>, vector<1x1x16x128xf32>
    %7 = vector.shape_cast %6 : vector<1x1x16x128xf32> to vector<16x128xf32>
    %8 = arith.truncf %7 : vector<16x128xf32> to vector<16x128xbf16>
    %c1_8 = arith.constant 1 : index
    %c0_9 = arith.constant 0 : index
    %9 = vector.load %arg8[%c1_8, %c0_9] : memref<328x128xbf16, #tpu.memory_space<vmem>>, vector<16x128xbf16>
    tpu.vector_store %arg8[%c1_8, %c0_9], %8 {strides = array<i32>} : memref<328x128xbf16, #tpu.memory_space<vmem>>, vector<16x128xbf16>,
    %10 = vector.extract_strided_slice %8 {offsets = [1, 0], sizes = [1, 128], strides = [1, 1]} : vector<16x128xbf16> to vector<1x128xbf16>
    %c0_10 = arith.constant 0 : index
    %c0_11 = arith.constant 0 : index
    %11 = vector.load %arg8[%c0_10, %c0_11] : memref<328x128xbf16, #tpu.memory_space<vmem>>, vector<1x128xbf16>
    tpu.vector_store %arg8[%c0_10, %c0_11], %10 {strides = array<i32>} : memref<328x128xbf16, #tpu.memory_space<vmem>>, vector<1x128xbf16>,
    %12 = vector.extract_strided_slice %8 {offsets = [14, 0], sizes = [1, 128], strides = [1, 1]} : vector<16x128xbf16> to vector<1x128xbf16>
    %c17 = arith.constant 17 : index
    %c0_12 = arith.constant 0 : index
    %13 = vector.load %arg8[%c17, %c0_12] : memref<328x128xbf16, #tpu.memory_space<vmem>>, vector<1x128xbf16>
    tpu.vector_store %arg8[%c17, %c0_12], %12 {strides = array<i32>} : memref<328x128xbf16, #tpu.memory_space<vmem>>, vector<1x128xbf16>,
    %c0_13 = arith.constant 0 : index
    %c0_14 = arith.constant 0 : index
    %c0_15 = arith.constant 0 : index
    %c0_16 = arith.constant 0 : index
    %14 = vector.load %arg1[%c0_13, %c0_14, %c0_15, %c0_16] : memref<1x16x16x128xf32, #tpu.memory_space<vmem>>, vector<1x1x16x128xf32>
    %15 = vector.shape_cast %14 : vector<1x1x16x128xf32> to vector<16x128xf32>
    %16 = arith.truncf %15 : vector<16x128xf32> to vector<16x128xbf16>
    %c19 = arith.constant 19 : index
    %c0_17 = arith.constant 0 : index
    %17 = vector.load %arg8[%c19, %c0_17] : memref<328x128xbf16, #tpu.memory_space<vmem>>, vector<16x128xbf16>
    tpu.vector_store %arg8[%c19, %c0_17], %16 {strides = array<i32>} : memref<328x128xbf16, #tpu.memory_space<vmem>>, vector<16x128xbf16>,
    %18 = vector.extract_strided_slice %16 {offsets = [1, 0], sizes = [1, 128], strides = [1, 1]} : vector<16x128xbf16> to vector<1x128xbf16>
    %c18 = arith.constant 18 : index
    %c0_18 = arith.constant 0 : index
    %19 = vector.load %arg8[%c18, %c0_18] : memref<328x128xbf16, #tpu.memory_space<vmem>>, vector<1x128xbf16>
    tpu.vector_store %arg8[%c18, %c0_18], %18 {strides = array<i32>} : memref<328x128xbf16, #tpu.memory_space<vmem>>, vector<1x128xbf16>,
    %20 = vector.extract_strided_slice %16 {offsets = [14, 0], sizes = [1, 128], strides = [1, 1]} : vector<16x128xbf16> to vector<1x128xbf16>
    %c35 = arith.constant 35 : index
    %c0_19 = arith.constant 0 : index
    %21 = vector.load %arg8[%c35, %c0_19] : memref<328x128xbf16, #tpu.memory_space<vmem>>, vector<1x128xbf16>
    tpu.vector_store %arg8[%c35, %c0_19], %20 {strides = array<i32>} : memref<328x128xbf16, #tpu.memory_space<vmem>>, vector<1x128xbf16>,
    %c0_20 = arith.constant 0 : index
    %c1_21 = arith.constant 1 : index
    %c0_22 = arith.constant 0 : index
    %c0_23 = arith.constant 0 : index
    %22 = vector.load %arg1[%c0_20, %c1_21, %c0_22, %c0_23] : memref<1x16x16x128xf32, #tpu.memory_space<vmem>>, vector<1x1x16x128xf32>
    %23 = vector.shape_cast %22 : vector<1x1x16x128xf32> to vector<16x128xf32>
    %24 = arith.truncf %23 : vector<16x128xf32> to vector<16x128xbf16>
    %c37 = arith.constant 37 : index
    %c0_24 = arith.constant 0 : index
    %25 = vector.load %arg8[%c37, %c0_24] : memref<328x128xbf16, #tpu.memory_space<vmem>>, vector<16x128xbf16>
    tpu.vector_store %arg8[%c37, %c0_24], %24 {strides = array<i32>} : memref<328x128xbf16, #tpu.memory_space<vmem>>, vector<16x128xbf16>,
    %26 = vector.extract_strided_slice %24 {offsets = [1, 0], sizes = [1, 128], strides = [1, 1]} : vector<16x128xbf16> to vector<1x128xbf16>
    %c36 = arith.constant 36 : index
    %c0_25 = arith.constant 0 : index
    %27 = vector.load %arg8[%c36, %c0_25] : memref<328x128xbf16, #tpu.memory_space<vmem>>, vector<1x128xbf16>
    tpu.vector_store %arg8[%c36, %c0_25], %26 {strides = array<i32>} : memref<328x128xbf16, #tpu.memory_space<vmem>>, vector<1x128xbf16>,
    %28 = vector.extract_strided_slice %24 {offsets = [14, 0], sizes = [1, 128], strides = [1, 1]} : vector<16x128xbf16> to vector<1x128xbf16>
    %c53 = arith.constant 53 : index
    %c0_26 = arith.constant 0 : index
    %29 = vector.load %arg8[%c53, %c0_26] : memref<328x128xbf16, #tpu.memory_space<vmem>>, vector<1x128xbf16>
    tpu.vector_store %arg8[%c53, %c0_26], %28 {strides = array<i32>} : memref<328x128xbf16, #tpu.memory_space<vmem>>, vector<1x128xbf16>,
    %c0_27 = arith.constant 0 : index
    %c2 = arith.constant 2 : index
    %c0_28 = arith.constant 0 : index
    %c0_29 = arith.constant 0 : index
    %30 = vector.load %arg1[%c0_27, %c2, %c0_28, %c0_29] : memref<1x16x16x128xf32, #tpu.memory_space<vmem>>, vector<1x1x16x128xf32>
    %31 = vector.shape_cast %30 : vector<1x1x16x128xf32> to vector<16x128xf32>
    %32 = arith.truncf %31 : vector<16x128xf32> to vector<16x128xbf16>
    %c55 = arith.constant 55 : index
    %c0_30 = arith.constant 0 : index
    %33 = vector.load %arg8[%c55, %c0_30] : memref<328x128xbf16, #tpu.memory_space<vmem>>, vector<16x128xbf16>
    tpu.vector_store %arg8[%c55, %c0_30], %32 {strides = array<i32>} : memref<328x128xbf16, #tpu.memory_space<vmem>>, vector<16x128xbf16>,
    %34 = vector.extract_strided_slice %32 {offsets = [1, 0], sizes = [1, 128], strides = [1, 1]} : vector<16x128xbf16> to vector<1x128xbf16>
    %c54 = arith.constant 54 : index
    %c0_31 = arith.constant 0 : index
    %35 = vector.load %arg8[%c54, %c0_31] : memref<328x128xbf16, #tpu.memory_space<vmem>>, vector<1x128xbf16>
    tpu.vector_store %arg8[%c54, %c0_31], %34 {strides = array<i32>} : memref<328x128xbf16, #tpu.memory_space<vmem>>, vector<1x128xbf16>,
    %36 = vector.extract_strided_slice %32 {offsets = [14, 0], sizes = [1, 128], strides = [1, 1]} : vector<16x128xbf16> to vector<1x128xbf16>
    %c71 = arith.constant 71 : index
    %c0_32 = arith.constant 0 : index
    %37 = vector.load %arg8[%c71, %c0_32] : memref<328x128xbf16, #tpu.memory_space<vmem>>, vector<1x128xbf16>
    tpu.vector_store %arg8[%c71, %c0_32], %36 {strides = array<i32>} : memref<328x128xbf16, #tpu.memory_space<vmem>>, vector<1x128xbf16>,
    %c0_33 = arith.constant 0 : index
    %c3 = arith.constant 3 : index
    %c0_34 = arith.constant 0 : index
    %c0_35 = arith.constant 0 : index
    %38 = vector.load %arg1[%c0_33, %c3, %c0_34, %c0_35] : memref<1x16x16x128xf32, #tpu.memory_space<vmem>>, vector<1x1x16x128xf32>
    %39 = vector.shape_cast %38 : vector<1x1x16x128xf32> to vector<16x128xf32>
    %40 = arith.truncf %39 : vector<16x128xf32> to vector<16x128xbf16>
    %c73 = arith.constant 73 : index
    %c0_36 = arith.constant 0 : index
    %41 = vector.load %arg8[%c73, %c0_36] : memref<328x128xbf16, #tpu.memory_space<vmem>>, vector<16x128xbf16>
    tpu.vector_store %arg8[%c73, %c0_36], %40 {strides = array<i32>} : memref<328x128xbf16, #tpu.memory_space<vmem>>, vector<16x128xbf16>,
    %42 = vector.extract_strided_slice %40 {offsets = [1, 0], sizes = [1, 128], strides = [1, 1]} : vector<16x128xbf16> to vector<1x128xbf16>
    %c72 = arith.constant 72 : index
    %c0_37 = arith.constant 0 : index
    %43 = vector.load %arg8[%c72, %c0_37] : memref<328x128xbf16, #tpu.memory_space<vmem>>, vector<1x128xbf16>
    tpu.vector_store %arg8[%c72, %c0_37], %42 {strides = array<i32>} : memref<328x128xbf16, #tpu.memory_space<vmem>>, vector<1x128xbf16>,
    %44 = vector.extract_strided_slice %40 {offsets = [14, 0], sizes = [1, 128], strides = [1, 1]} : vector<16x128xbf16> to vector<1x128xbf16>
    %c89 = arith.constant 89 : index
    %c0_38 = arith.constant 0 : index
    %45 = vector.load %arg8[%c89, %c0_38] : memref<328x128xbf16, #tpu.memory_space<vmem>>, vector<1x128xbf16>
    tpu.vector_store %arg8[%c89, %c0_38], %44 {strides = array<i32>} : memref<328x128xbf16, #tpu.memory_space<vmem>>, vector<1x128xbf16>,
    %c0_39 = arith.constant 0 : index
    %c4 = arith.constant 4 : index
    %c0_40 = arith.constant 0 : index
    %c0_41 = arith.constant 0 : index
    %46 = vector.load %arg1[%c0_39, %c4, %c0_40, %c0_41] : memref<1x16x16x128xf32, #tpu.memory_space<vmem>>, vector<1x1x16x128xf32>
    %47 = vector.shape_cast %46 : vector<1x1x16x128xf32> to vector<16x128xf32>
    %48 = arith.truncf %47 : vector<16x128xf32> to vector<16x128xbf16>
    %c91 = arith.constant 91 : index
    %c0_42 = arith.constant 0 : index
    %49 = vector.load %arg8[%c91, %c0_42] : memref<328x128xbf16, #tpu.memory_space<vmem>>, vector<16x128xbf16>
    tpu.vector_store %arg8[%c91, %c0_42], %48 {strides = array<i32>} : memref<328x128xbf16, #tpu.memory_space<vmem>>, vector<16x128xbf16>,
    %50 = vector.extract_strided_slice %48 {offsets = [1, 0], sizes = [1, 128], strides = [1, 1]} : vector<16x128xbf16> to vector<1x128xbf16>
    %c90 = arith.constant 90 : index
    %c0_43 = arith.constant 0 : index
    %51 = vector.load %arg8[%c90, %c0_43] : memref<328x128xbf16, #tpu.memory_space<vmem>>, vector<1x128xbf16>
    tpu.vector_store %arg8[%c90, %c0_43], %50 {strides = array<i32>} : memref<328x128xbf16, #tpu.memory_space<vmem>>, vector<1x128xbf16>,
    %52 = vector.extract_strided_slice %48 {offsets = [14, 0], sizes = [1, 128], strides = [1, 1]} : vector<16x128xbf16> to vector<1x128xbf16>
    %c107 = arith.constant 107 : index
    %c0_44 = arith.constant 0 : index
    %53 = vector.load %arg8[%c107, %c0_44] : memref<328x128xbf16, #tpu.memory_space<vmem>>, vector<1x128xbf16>
    tpu.vector_store %arg8[%c107, %c0_44], %52 {strides = array<i32>} : memref<328x128xbf16, #tpu.memory_space<vmem>>, vector<1x128xbf16>,
    %c0_45 = arith.constant 0 : index
    %c5 = arith.constant 5 : index
    %c0_46 = arith.constant 0 : index
    %c0_47 = arith.constant 0 : index
    %54 = vector.load %arg1[%c0_45, %c5, %c0_46, %c0_47] : memref<1x16x16x128xf32, #tpu.memory_space<vmem>>, vector<1x1x16x128xf32>
    %55 = vector.shape_cast %54 : vector<1x1x16x128xf32> to vector<16x128xf32>
    %56 = arith.truncf %55 : vector<16x128xf32> to vector<16x128xbf16>
    %c109 = arith.constant 109 : index
    %c0_48 = arith.constant 0 : index
    %57 = vector.load %arg8[%c109, %c0_48] : memref<328x128xbf16, #tpu.memory_space<vmem>>, vector<16x128xbf16>
    tpu.vector_store %arg8[%c109, %c0_48], %56 {strides = array<i32>} : memref<328x128xbf16, #tpu.memory_space<vmem>>, vector<16x128xbf16>,
    %58 = vector.extract_strided_slice %56 {offsets = [1, 0], sizes = [1, 128], strides = [1, 1]} : vector<16x128xbf16> to vector<1x128xbf16>
    %c108 = arith.constant 108 : index
    %c0_49 = arith.constant 0 : index
    %59 = vector.load %arg8[%c108, %c0_49] : memref<328x128xbf16, #tpu.memory_space<vmem>>, vector<1x128xbf16>
    tpu.vector_store %arg8[%c108, %c0_49], %58 {strides = array<i32>} : memref<328x128xbf16, #tpu.memory_space<vmem>>, vector<1x128xbf16>,
    %60 = vector.extract_strided_slice %56 {offsets = [14, 0], sizes = [1, 128], strides = [1, 1]} : vector<16x128xbf16> to vector<1x128xbf16>
    %c125 = arith.constant 125 : index
    %c0_50 = arith.constant 0 : index
    %61 = vector.load %arg8[%c125, %c0_50] : memref<328x128xbf16, #tpu.memory_space<vmem>>, vector<1x128xbf16>
    tpu.vector_store %arg8[%c125, %c0_50], %60 {strides = array<i32>} : memref<328x128xbf16, #tpu.memory_space<vmem>>, vector<1x128xbf16>,
    %c0_51 = arith.constant 0 : index
    %c6 = arith.constant 6 : index
    %c0_52 = arith.constant 0 : index
    %c0_53 = arith.constant 0 : index
    %62 = vector.load %arg1[%c0_51, %c6, %c0_52, %c0_53] : memref<1x16x16x128xf32, #tpu.memory_space<vmem>>, vector<1x1x16x128xf32>
    %63 = vector.shape_cast %62 : vector<1x1x16x128xf32> to vector<16x128xf32>
    %64 = arith.truncf %63 : vector<16x128xf32> to vector<16x128xbf16>
    %c127 = arith.constant 127 : index
    %c0_54 = arith.constant 0 : index
    %65 = vector.load %arg8[%c127, %c0_54] : memref<328x128xbf16, #tpu.memory_space<vmem>>, vector<16x128xbf16>
    tpu.vector_store %arg8[%c127, %c0_54], %64 {strides = array<i32>} : memref<328x128xbf16, #tpu.memory_space<vmem>>, vector<16x128xbf16>,
    %66 = vector.extract_strided_slice %64 {offsets = [1, 0], sizes = [1, 128], strides = [1, 1]} : vector<16x128xbf16> to vector<1x128xbf16>
    %c126 = arith.constant 126 : index
    %c0_55 = arith.constant 0 : index
    %67 = vector.load %arg8[%c126, %c0_55] : memref<328x128xbf16, #tpu.memory_space<vmem>>, vector<1x128xbf16>
    tpu.vector_store %arg8[%c126, %c0_55], %66 {strides = array<i32>} : memref<328x128xbf16, #tpu.memory_space<vmem>>, vector<1x128xbf16>,
    %68 = vector.extract_strided_slice %64 {offsets = [14, 0], sizes = [1, 128], strides = [1, 1]} : vector<16x128xbf16> to vector<1x128xbf16>
    %c143 = arith.constant 143 : index
    %c0_56 = arith.constant 0 : index
    %69 = vector.load %arg8[%c143, %c0_56] : memref<328x128xbf16, #tpu.memory_space<vmem>>, vector<1x128xbf16>
    tpu.vector_store %arg8[%c143, %c0_56], %68 {strides = array<i32>} : memref<328x128xbf16, #tpu.memory_space<vmem>>, vector<1x128xbf16>,
    %c0_57 = arith.constant 0 : index
    %c7 = arith.constant 7 : index
    %c0_58 = arith.constant 0 : index
    %c0_59 = arith.constant 0 : index
    %70 = vector.load %arg1[%c0_57, %c7, %c0_58, %c0_59] : memref<1x16x16x128xf32, #tpu.memory_space<vmem>>, vector<1x1x16x128xf32>
    %71 = vector.shape_cast %70 : vector<1x1x16x128xf32> to vector<16x128xf32>
    %72 = arith.truncf %71 : vector<16x128xf32> to vector<16x128xbf16>
    %c145 = arith.constant 145 : index
    %c0_60 = arith.constant 0 : index
    %73 = vector.load %arg8[%c145, %c0_60] : memref<328x128xbf16, #tpu.memory_space<vmem>>, vector<16x128xbf16>
    tpu.vector_store %arg8[%c145, %c0_60], %72 {strides = array<i32>} : memref<328x128xbf16, #tpu.memory_space<vmem>>, vector<16x128xbf16>,
    %74 = vector.extract_strided_slice %72 {offsets = [1, 0], sizes = [1, 128], strides = [1, 1]} : vector<16x128xbf16> to vector<1x128xbf16>
    %c144 = arith.constant 144 : index
    %c0_61 = arith.constant 0 : index
    %75 = vector.load %arg8[%c144, %c0_61] : memref<328x128xbf16, #tpu.memory_space<vmem>>, vector<1x128xbf16>
    tpu.vector_store %arg8[%c144, %c0_61], %74 {strides = array<i32>} : memref<328x128xbf16, #tpu.memory_space<vmem>>, vector<1x128xbf16>,
    %76 = vector.extract_strided_slice %72 {offsets = [14, 0], sizes = [1, 128], strides = [1, 1]} : vector<16x128xbf16> to vector<1x128xbf16>
    %c161 = arith.constant 161 : index
    %c0_62 = arith.constant 0 : index
    %77 = vector.load %arg8[%c161, %c0_62] : memref<328x128xbf16, #tpu.memory_space<vmem>>, vector<1x128xbf16>
    tpu.vector_store %arg8[%c161, %c0_62], %76 {strides = array<i32>} : memref<328x128xbf16, #tpu.memory_space<vmem>>, vector<1x128xbf16>,
    %c0_63 = arith.constant 0 : index
    %c8 = arith.constant 8 : index
    %c0_64 = arith.constant 0 : index
    %c0_65 = arith.constant 0 : index
    %78 = vector.load %arg1[%c0_63, %c8, %c0_64, %c0_65] : memref<1x16x16x128xf32, #tpu.memory_space<vmem>>, vector<1x1x16x128xf32>
    %79 = vector.shape_cast %78 : vector<1x1x16x128xf32> to vector<16x128xf32>
    %80 = arith.truncf %79 : vector<16x128xf32> to vector<16x128xbf16>
    %c163 = arith.constant 163 : index
    %c0_66 = arith.constant 0 : index
    %81 = vector.load %arg8[%c163, %c0_66] : memref<328x128xbf16, #tpu.memory_space<vmem>>, vector<16x128xbf16>
    tpu.vector_store %arg8[%c163, %c0_66], %80 {strides = array<i32>} : memref<328x128xbf16, #tpu.memory_space<vmem>>, vector<16x128xbf16>,
    %82 = vector.extract_strided_slice %80 {offsets = [1, 0], sizes = [1, 128], strides = [1, 1]} : vector<16x128xbf16> to vector<1x128xbf16>
    %c162 = arith.constant 162 : index
    %c0_67 = arith.constant 0 : index
    %83 = vector.load %arg8[%c162, %c0_67] : memref<328x128xbf16, #tpu.memory_space<vmem>>, vector<1x128xbf16>
    tpu.vector_store %arg8[%c162, %c0_67], %82 {strides = array<i32>} : memref<328x128xbf16, #tpu.memory_space<vmem>>, vector<1x128xbf16>,
    %84 = vector.extract_strided_slice %80 {offsets = [14, 0], sizes = [1, 128], strides = [1, 1]} : vector<16x128xbf16> to vector<1x128xbf16>
    %c179 = arith.constant 179 : index
    %c0_68 = arith.constant 0 : index
    %85 = vector.load %arg8[%c179, %c0_68] : memref<328x128xbf16, #tpu.memory_space<vmem>>, vector<1x128xbf16>
    tpu.vector_store %arg8[%c179, %c0_68], %84 {strides = array<i32>} : memref<328x128xbf16, #tpu.memory_space<vmem>>, vector<1x128xbf16>,
    %c0_69 = arith.constant 0 : index
    %c9 = arith.constant 9 : index
    %c0_70 = arith.constant 0 : index
    %c0_71 = arith.constant 0 : index
    %86 = vector.load %arg1[%c0_69, %c9, %c0_70, %c0_71] : memref<1x16x16x128xf32, #tpu.memory_space<vmem>>, vector<1x1x16x128xf32>
    %87 = vector.shape_cast %86 : vector<1x1x16x128xf32> to vector<16x128xf32>
    %88 = arith.truncf %87 : vector<16x128xf32> to vector<16x128xbf16>
    %c181 = arith.constant 181 : index
    %c0_72 = arith.constant 0 : index
    %89 = vector.load %arg8[%c181, %c0_72] : memref<328x128xbf16, #tpu.memory_space<vmem>>, vector<16x128xbf16>
    tpu.vector_store %arg8[%c181, %c0_72], %88 {strides = array<i32>} : memref<328x128xbf16, #tpu.memory_space<vmem>>, vector<16x128xbf16>,
    %90 = vector.extract_strided_slice %88 {offsets = [1, 0], sizes = [1, 128], strides = [1, 1]} : vector<16x128xbf16> to vector<1x128xbf16>
    %c180 = arith.constant 180 : index
    %c0_73 = arith.constant 0 : index
    %91 = vector.load %arg8[%c180, %c0_73] : memref<328x128xbf16, #tpu.memory_space<vmem>>, vector<1x128xbf16>
    tpu.vector_store %arg8[%c180, %c0_73], %90 {strides = array<i32>} : memref<328x128xbf16, #tpu.memory_space<vmem>>, vector<1x128xbf16>,
    %92 = vector.extract_strided_slice %88 {offsets = [14, 0], sizes = [1, 128], strides = [1, 1]} : vector<16x128xbf16> to vector<1x128xbf16>
    %c197 = arith.constant 197 : index
    %c0_74 = arith.constant 0 : index
    %93 = vector.load %arg8[%c197, %c0_74] : memref<328x128xbf16, #tpu.memory_space<vmem>>, vector<1x128xbf16>
    tpu.vector_store %arg8[%c197, %c0_74], %92 {strides = array<i32>} : memref<328x128xbf16, #tpu.memory_space<vmem>>, vector<1x128xbf16>,
    %c0_75 = arith.constant 0 : index
    %c10 = arith.constant 10 : index
    %c0_76 = arith.constant 0 : index
    %c0_77 = arith.constant 0 : index
    %94 = vector.load %arg1[%c0_75, %c10, %c0_76, %c0_77] : memref<1x16x16x128xf32, #tpu.memory_space<vmem>>, vector<1x1x16x128xf32>
    %95 = vector.shape_cast %94 : vector<1x1x16x128xf32> to vector<16x128xf32>
    %96 = arith.truncf %95 : vector<16x128xf32> to vector<16x128xbf16>
    %c199 = arith.constant 199 : index
    %c0_78 = arith.constant 0 : index
    %97 = vector.load %arg8[%c199, %c0_78] : memref<328x128xbf16, #tpu.memory_space<vmem>>, vector<16x128xbf16>
    tpu.vector_store %arg8[%c199, %c0_78], %96 {strides = array<i32>} : memref<328x128xbf16, #tpu.memory_space<vmem>>, vector<16x128xbf16>,
    %98 = vector.extract_strided_slice %96 {offsets = [1, 0], sizes = [1, 128], strides = [1, 1]} : vector<16x128xbf16> to vector<1x128xbf16>
    %c198 = arith.constant 198 : index
    %c0_79 = arith.constant 0 : index
    %99 = vector.load %arg8[%c198, %c0_79] : memref<328x128xbf16, #tpu.memory_space<vmem>>, vector<1x128xbf16>
    tpu.vector_store %arg8[%c198, %c0_79], %98 {strides = array<i32>} : memref<328x128xbf16, #tpu.memory_space<vmem>>, vector<1x128xbf16>,
    %100 = vector.extract_strided_slice %96 {offsets = [14, 0], sizes = [1, 128], strides = [1, 1]} : vector<16x128xbf16> to vector<1x128xbf16>
    %c215 = arith.constant 215 : index
    %c0_80 = arith.constant 0 : index
    %101 = vector.load %arg8[%c215, %c0_80] : memref<328x128xbf16, #tpu.memory_space<vmem>>, vector<1x128xbf16>
    tpu.vector_store %arg8[%c215, %c0_80], %100 {strides = array<i32>} : memref<328x128xbf16, #tpu.memory_space<vmem>>, vector<1x128xbf16>,
    %c0_81 = arith.constant 0 : index
    %c11 = arith.constant 11 : index
    %c0_82 = arith.constant 0 : index
    %c0_83 = arith.constant 0 : index
    %102 = vector.load %arg1[%c0_81, %c11, %c0_82, %c0_83] : memref<1x16x16x128xf32, #tpu.memory_space<vmem>>, vector<1x1x16x128xf32>
    %103 = vector.shape_cast %102 : vector<1x1x16x128xf32> to vector<16x128xf32>
    %104 = arith.truncf %103 : vector<16x128xf32> to vector<16x128xbf16>
    %c217 = arith.constant 217 : index
    %c0_84 = arith.constant 0 : index
    %105 = vector.load %arg8[%c217, %c0_84] : memref<328x128xbf16, #tpu.memory_space<vmem>>, vector<16x128xbf16>
    tpu.vector_store %arg8[%c217, %c0_84], %104 {strides = array<i32>} : memref<328x128xbf16, #tpu.memory_space<vmem>>, vector<16x128xbf16>,
    %106 = vector.extract_strided_slice %104 {offsets = [1, 0], sizes = [1, 128], strides = [1, 1]} : vector<16x128xbf16> to vector<1x128xbf16>
    %c216 = arith.constant 216 : index
    %c0_85 = arith.constant 0 : index
    %107 = vector.load %arg8[%c216, %c0_85] : memref<328x128xbf16, #tpu.memory_space<vmem>>, vector<1x128xbf16>
    tpu.vector_store %arg8[%c216, %c0_85], %106 {strides = array<i32>} : memref<328x128xbf16, #tpu.memory_space<vmem>>, vector<1x128xbf16>,
    %108 = vector.extract_strided_slice %104 {offsets = [14, 0], sizes = [1, 128], strides = [1, 1]} : vector<16x128xbf16> to vector<1x128xbf16>
    %c233 = arith.constant 233 : index
    %c0_86 = arith.constant 0 : index
    %109 = vector.load %arg8[%c233, %c0_86] : memref<328x128xbf16, #tpu.memory_space<vmem>>, vector<1x128xbf16>
    tpu.vector_store %arg8[%c233, %c0_86], %108 {strides = array<i32>} : memref<328x128xbf16, #tpu.memory_space<vmem>>, vector<1x128xbf16>,
    %c0_87 = arith.constant 0 : index
    %c12 = arith.constant 12 : index
    %c0_88 = arith.constant 0 : index
    %c0_89 = arith.constant 0 : index
    %110 = vector.load %arg1[%c0_87, %c12, %c0_88, %c0_89] : memref<1x16x16x128xf32, #tpu.memory_space<vmem>>, vector<1x1x16x128xf32>
    %111 = vector.shape_cast %110 : vector<1x1x16x128xf32> to vector<16x128xf32>
    %112 = arith.truncf %111 : vector<16x128xf32> to vector<16x128xbf16>
    %c235 = arith.constant 235 : index
    %c0_90 = arith.constant 0 : index
    %113 = vector.load %arg8[%c235, %c0_90] : memref<328x128xbf16, #tpu.memory_space<vmem>>, vector<16x128xbf16>
    tpu.vector_store %arg8[%c235, %c0_90], %112 {strides = array<i32>} : memref<328x128xbf16, #tpu.memory_space<vmem>>, vector<16x128xbf16>,
    %114 = vector.extract_strided_slice %112 {offsets = [1, 0], sizes = [1, 128], strides = [1, 1]} : vector<16x128xbf16> to vector<1x128xbf16>
    %c234 = arith.constant 234 : index
    %c0_91 = arith.constant 0 : index
    %115 = vector.load %arg8[%c234, %c0_91] : memref<328x128xbf16, #tpu.memory_space<vmem>>, vector<1x128xbf16>
    tpu.vector_store %arg8[%c234, %c0_91], %114 {strides = array<i32>} : memref<328x128xbf16, #tpu.memory_space<vmem>>, vector<1x128xbf16>,
    %116 = vector.extract_strided_slice %112 {offsets = [14, 0], sizes = [1, 128], strides = [1, 1]} : vector<16x128xbf16> to vector<1x128xbf16>
    %c251 = arith.constant 251 : index
    %c0_92 = arith.constant 0 : index
    %117 = vector.load %arg8[%c251, %c0_92] : memref<328x128xbf16, #tpu.memory_space<vmem>>, vector<1x128xbf16>
    tpu.vector_store %arg8[%c251, %c0_92], %116 {strides = array<i32>} : memref<328x128xbf16, #tpu.memory_space<vmem>>, vector<1x128xbf16>,
    %c0_93 = arith.constant 0 : index
    %c13 = arith.constant 13 : index
    %c0_94 = arith.constant 0 : index
    %c0_95 = arith.constant 0 : index
    %118 = vector.load %arg1[%c0_93, %c13, %c0_94, %c0_95] : memref<1x16x16x128xf32, #tpu.memory_space<vmem>>, vector<1x1x16x128xf32>
    %119 = vector.shape_cast %118 : vector<1x1x16x128xf32> to vector<16x128xf32>
    %120 = arith.truncf %119 : vector<16x128xf32> to vector<16x128xbf16>
    %c253 = arith.constant 253 : index
    %c0_96 = arith.constant 0 : index
    %121 = vector.load %arg8[%c253, %c0_96] : memref<328x128xbf16, #tpu.memory_space<vmem>>, vector<16x128xbf16>
    tpu.vector_store %arg8[%c253, %c0_96], %120 {strides = array<i32>} : memref<328x128xbf16, #tpu.memory_space<vmem>>, vector<16x128xbf16>,
    %122 = vector.extract_strided_slice %120 {offsets = [1, 0], sizes = [1, 128], strides = [1, 1]} : vector<16x128xbf16> to vector<1x128xbf16>
    %c252 = arith.constant 252 : index
    %c0_97 = arith.constant 0 : index
    %123 = vector.load %arg8[%c252, %c0_97] : memref<328x128xbf16, #tpu.memory_space<vmem>>, vector<1x128xbf16>
    tpu.vector_store %arg8[%c252, %c0_97], %122 {strides = array<i32>} : memref<328x128xbf16, #tpu.memory_space<vmem>>, vector<1x128xbf16>,
    %124 = vector.extract_strided_slice %120 {offsets = [14, 0], sizes = [1, 128], strides = [1, 1]} : vector<16x128xbf16> to vector<1x128xbf16>
    %c269 = arith.constant 269 : index
    %c0_98 = arith.constant 0 : index
    %125 = vector.load %arg8[%c269, %c0_98] : memref<328x128xbf16, #tpu.memory_space<vmem>>, vector<1x128xbf16>
    tpu.vector_store %arg8[%c269, %c0_98], %124 {strides = array<i32>} : memref<328x128xbf16, #tpu.memory_space<vmem>>, vector<1x128xbf16>,
    %c0_99 = arith.constant 0 : index
    %c14 = arith.constant 14 : index
    %c0_100 = arith.constant 0 : index
    %c0_101 = arith.constant 0 : index
    %126 = vector.load %arg1[%c0_99, %c14, %c0_100, %c0_101] : memref<1x16x16x128xf32, #tpu.memory_space<vmem>>, vector<1x1x16x128xf32>
    %127 = vector.shape_cast %126 : vector<1x1x16x128xf32> to vector<16x128xf32>
    %128 = arith.truncf %127 : vector<16x128xf32> to vector<16x128xbf16>
    %c271 = arith.constant 271 : index
    %c0_102 = arith.constant 0 : index
    %129 = vector.load %arg8[%c271, %c0_102] : memref<328x128xbf16, #tpu.memory_space<vmem>>, vector<16x128xbf16>
    tpu.vector_store %arg8[%c271, %c0_102], %128 {strides = array<i32>} : memref<328x128xbf16, #tpu.memory_space<vmem>>, vector<16x128xbf16>,
    %130 = vector.extract_strided_slice %128 {offsets = [1, 0], sizes = [1, 128], strides = [1, 1]} : vector<16x128xbf16> to vector<1x128xbf16>
    %c270 = arith.constant 270 : index
    %c0_103 = arith.constant 0 : index
    %131 = vector.load %arg8[%c270, %c0_103] : memref<328x128xbf16, #tpu.memory_space<vmem>>, vector<1x128xbf16>
    tpu.vector_store %arg8[%c270, %c0_103], %130 {strides = array<i32>} : memref<328x128xbf16, #tpu.memory_space<vmem>>, vector<1x128xbf16>,
    %132 = vector.extract_strided_slice %128 {offsets = [14, 0], sizes = [1, 128], strides = [1, 1]} : vector<16x128xbf16> to vector<1x128xbf16>
    %c287 = arith.constant 287 : index
    %c0_104 = arith.constant 0 : index
    %133 = vector.load %arg8[%c287, %c0_104] : memref<328x128xbf16, #tpu.memory_space<vmem>>, vector<1x128xbf16>
    tpu.vector_store %arg8[%c287, %c0_104], %132 {strides = array<i32>} : memref<328x128xbf16, #tpu.memory_space<vmem>>, vector<1x128xbf16>,
    %c0_105 = arith.constant 0 : index
    %c15 = arith.constant 15 : index
    %c0_106 = arith.constant 0 : index
    %c0_107 = arith.constant 0 : index
    %134 = vector.load %arg1[%c0_105, %c15, %c0_106, %c0_107] : memref<1x16x16x128xf32, #tpu.memory_space<vmem>>, vector<1x1x16x128xf32>
    %135 = vector.shape_cast %134 : vector<1x1x16x128xf32> to vector<16x128xf32>
    %136 = arith.truncf %135 : vector<16x128xf32> to vector<16x128xbf16>
    %c289 = arith.constant 289 : index
    %c0_108 = arith.constant 0 : index
    %137 = vector.load %arg8[%c289, %c0_108] : memref<328x128xbf16, #tpu.memory_space<vmem>>, vector<16x128xbf16>
    tpu.vector_store %arg8[%c289, %c0_108], %136 {strides = array<i32>} : memref<328x128xbf16, #tpu.memory_space<vmem>>, vector<16x128xbf16>,
    %138 = vector.extract_strided_slice %136 {offsets = [1, 0], sizes = [1, 128], strides = [1, 1]} : vector<16x128xbf16> to vector<1x128xbf16>
    %c288 = arith.constant 288 : index
    %c0_109 = arith.constant 0 : index
    %139 = vector.load %arg8[%c288, %c0_109] : memref<328x128xbf16, #tpu.memory_space<vmem>>, vector<1x128xbf16>
    tpu.vector_store %arg8[%c288, %c0_109], %138 {strides = array<i32>} : memref<328x128xbf16, #tpu.memory_space<vmem>>, vector<1x128xbf16>,
    %140 = vector.extract_strided_slice %136 {offsets = [14, 0], sizes = [1, 128], strides = [1, 1]} : vector<16x128xbf16> to vector<1x128xbf16>
    %c305 = arith.constant 305 : index
    %c0_110 = arith.constant 0 : index
    %141 = vector.load %arg8[%c305, %c0_110] : memref<328x128xbf16, #tpu.memory_space<vmem>>, vector<1x128xbf16>
    tpu.vector_store %arg8[%c305, %c0_110], %140 {strides = array<i32>} : memref<328x128xbf16, #tpu.memory_space<vmem>>, vector<1x128xbf16>,
    %c0_111 = arith.constant 0 : index
    %c14_112 = arith.constant 14 : index
    %c0_113 = arith.constant 0 : index
    %c0_114 = arith.constant 0 : index
    %142 = vector.load %arg1[%c0_111, %c14_112, %c0_113, %c0_114] : memref<1x16x16x128xf32, #tpu.memory_space<vmem>>, vector<1x1x16x128xf32>
    %143 = vector.shape_cast %142 : vector<1x1x16x128xf32> to vector<16x128xf32>
    %144 = arith.truncf %143 : vector<16x128xf32> to vector<16x128xbf16>
    %c307 = arith.constant 307 : index
    %c0_115 = arith.constant 0 : index
    %145 = vector.load %arg8[%c307, %c0_115] : memref<328x128xbf16, #tpu.memory_space<vmem>>, vector<16x128xbf16>
    tpu.vector_store %arg8[%c307, %c0_115], %144 {strides = array<i32>} : memref<328x128xbf16, #tpu.memory_space<vmem>>, vector<16x128xbf16>,
    %146 = vector.extract_strided_slice %144 {offsets = [1, 0], sizes = [1, 128], strides = [1, 1]} : vector<16x128xbf16> to vector<1x128xbf16>
    %c306 = arith.constant 306 : index
    %c0_116 = arith.constant 0 : index
    %147 = vector.load %arg8[%c306, %c0_116] : memref<328x128xbf16, #tpu.memory_space<vmem>>, vector<1x128xbf16>
    tpu.vector_store %arg8[%c306, %c0_116], %146 {strides = array<i32>} : memref<328x128xbf16, #tpu.memory_space<vmem>>, vector<1x128xbf16>,
    %148 = vector.extract_strided_slice %144 {offsets = [14, 0], sizes = [1, 128], strides = [1, 1]} : vector<16x128xbf16> to vector<1x128xbf16>
    %c323 = arith.constant 323 : index
    %c0_117 = arith.constant 0 : index
    %149 = vector.load %arg8[%c323, %c0_117] : memref<328x128xbf16, #tpu.memory_space<vmem>>, vector<1x128xbf16>
    tpu.vector_store %arg8[%c323, %c0_117], %148 {strides = array<i32>} : memref<328x128xbf16, #tpu.memory_space<vmem>>, vector<1x128xbf16>,
    %cst_118 = arith.constant 0.000000e+00 : f32
    %150 = vector.broadcast %cst_118 : f32 to vector<288x128xf32>
    %c0_119 = arith.constant 0 : index
    %c0_120 = arith.constant 0 : index
    %151 = vector.load %arg8[%c0_119, %c0_120] : memref<328x128xbf16, #tpu.memory_space<vmem>>, vector<288x128xbf16>
    %c0_121 = arith.constant 0 : index
    %c0_122 = arith.constant 0 : index
    %c0_123 = arith.constant 0 : index
    %152 = vector.load %arg3[%c0_121, %c0_122, %c0_123] : memref<9x128x128xbf16, #tpu.memory_space<vmem>>, vector<1x128x128xbf16>
    %153 = vector.shape_cast %152 : vector<1x128x128xbf16> to vector<128x128xbf16>
    %cst_124 = arith.constant dense<0.000000e+00> : vector<288x128xf32>
    %154 = tpu.matmul %151, %153, %cst_124 {dimension_numbers = #tpu.dot_dimension_numbers<[1], [0], [0], [1], [0, 0, 1, 1], [], []>} : vector<288x128xbf16>, vector<128x128xbf16>, vector<288x128xf32> -> vector<288x128xf32>
    %155 = arith.addf %150, %154 : vector<288x128xf32>
    %c1_125 = arith.constant 1 : index
    %c0_126 = arith.constant 0 : index
    %156 = vector.load %arg8[%c1_125, %c0_126] : memref<328x128xbf16, #tpu.memory_space<vmem>>, vector<288x128xbf16>
    %c1_127 = arith.constant 1 : index
    %c0_128 = arith.constant 0 : index
    %c0_129 = arith.constant 0 : index
    %157 = vector.load %arg3[%c1_127, %c0_128, %c0_129] : memref<9x128x128xbf16, #tpu.memory_space<vmem>>, vector<1x128x128xbf16>
    %158 = vector.shape_cast %157 : vector<1x128x128xbf16> to vector<128x128xbf16>
    %cst_130 = arith.constant dense<0.000000e+00> : vector<288x128xf32>
    %159 = tpu.matmul %156, %158, %cst_130 {dimension_numbers = #tpu.dot_dimension_numbers<[1], [0], [0], [1], [0, 0, 1, 1], [], []>} : vector<288x128xbf16>, vector<128x128xbf16>, vector<288x128xf32> -> vector<288x128xf32>
    %160 = arith.addf %155, %159 : vector<288x128xf32>
    %c2_131 = arith.constant 2 : index
    %c0_132 = arith.constant 0 : index
    %161 = vector.load %arg8[%c2_131, %c0_132] : memref<328x128xbf16, #tpu.memory_space<vmem>>, vector<288x128xbf16>
    %c2_133 = arith.constant 2 : index
    %c0_134 = arith.constant 0 : index
    %c0_135 = arith.constant 0 : index
    %162 = vector.load %arg3[%c2_133, %c0_134, %c0_135] : memref<9x128x128xbf16, #tpu.memory_space<vmem>>, vector<1x128x128xbf16>
    %163 = vector.shape_cast %162 : vector<1x128x128xbf16> to vector<128x128xbf16>
    %cst_136 = arith.constant dense<0.000000e+00> : vector<288x128xf32>
    %164 = tpu.matmul %161, %163, %cst_136 {dimension_numbers = #tpu.dot_dimension_numbers<[1], [0], [0], [1], [0, 0, 1, 1], [], []>} : vector<288x128xbf16>, vector<128x128xbf16>, vector<288x128xf32> -> vector<288x128xf32>
    %165 = arith.addf %160, %164 : vector<288x128xf32>
    %c18_137 = arith.constant 18 : index
    %c0_138 = arith.constant 0 : index
    %166 = vector.load %arg8[%c18_137, %c0_138] : memref<328x128xbf16, #tpu.memory_space<vmem>>, vector<288x128xbf16>
    %c3_139 = arith.constant 3 : index
    %c0_140 = arith.constant 0 : index
    %c0_141 = arith.constant 0 : index
    %167 = vector.load %arg3[%c3_139, %c0_140, %c0_141] : memref<9x128x128xbf16, #tpu.memory_space<vmem>>, vector<1x128x128xbf16>
    %168 = vector.shape_cast %167 : vector<1x128x128xbf16> to vector<128x128xbf16>
    %cst_142 = arith.constant dense<0.000000e+00> : vector<288x128xf32>
    %169 = tpu.matmul %166, %168, %cst_142 {dimension_numbers = #tpu.dot_dimension_numbers<[1], [0], [0], [1], [0, 0, 1, 1], [], []>} : vector<288x128xbf16>, vector<128x128xbf16>, vector<288x128xf32> -> vector<288x128xf32>
    %170 = arith.addf %165, %169 : vector<288x128xf32>
    %c19_143 = arith.constant 19 : index
    %c0_144 = arith.constant 0 : index
    %171 = vector.load %arg8[%c19_143, %c0_144] : memref<328x128xbf16, #tpu.memory_space<vmem>>, vector<288x128xbf16>
    %c4_145 = arith.constant 4 : index
    %c0_146 = arith.constant 0 : index
    %c0_147 = arith.constant 0 : index
    %172 = vector.load %arg3[%c4_145, %c0_146, %c0_147] : memref<9x128x128xbf16, #tpu.memory_space<vmem>>, vector<1x128x128xbf16>
    %173 = vector.shape_cast %172 : vector<1x128x128xbf16> to vector<128x128xbf16>
    %cst_148 = arith.constant dense<0.000000e+00> : vector<288x128xf32>
    %174 = tpu.matmul %171, %173, %cst_148 {dimension_numbers = #tpu.dot_dimension_numbers<[1], [0], [0], [1], [0, 0, 1, 1], [], []>} : vector<288x128xbf16>, vector<128x128xbf16>, vector<288x128xf32> -> vector<288x128xf32>
    %175 = arith.addf %170, %174 : vector<288x128xf32>
    %c20 = arith.constant 20 : index
    %c0_149 = arith.constant 0 : index
    %176 = vector.load %arg8[%c20, %c0_149] : memref<328x128xbf16, #tpu.memory_space<vmem>>, vector<288x128xbf16>
    %c5_150 = arith.constant 5 : index
    %c0_151 = arith.constant 0 : index
    %c0_152 = arith.constant 0 : index
    %177 = vector.load %arg3[%c5_150, %c0_151, %c0_152] : memref<9x128x128xbf16, #tpu.memory_space<vmem>>, vector<1x128x128xbf16>
    %178 = vector.shape_cast %177 : vector<1x128x128xbf16> to vector<128x128xbf16>
    %cst_153 = arith.constant dense<0.000000e+00> : vector<288x128xf32>
    %179 = tpu.matmul %176, %178, %cst_153 {dimension_numbers = #tpu.dot_dimension_numbers<[1], [0], [0], [1], [0, 0, 1, 1], [], []>} : vector<288x128xbf16>, vector<128x128xbf16>, vector<288x128xf32> -> vector<288x128xf32>
    %180 = arith.addf %175, %179 : vector<288x128xf32>
    %c36_154 = arith.constant 36 : index
    %c0_155 = arith.constant 0 : index
    %181 = vector.load %arg8[%c36_154, %c0_155] : memref<328x128xbf16, #tpu.memory_space<vmem>>, vector<288x128xbf16>
    %c6_156 = arith.constant 6 : index
    %c0_157 = arith.constant 0 : index
    %c0_158 = arith.constant 0 : index
    %182 = vector.load %arg3[%c6_156, %c0_157, %c0_158] : memref<9x128x128xbf16, #tpu.memory_space<vmem>>, vector<1x128x128xbf16>
    %183 = vector.shape_cast %182 : vector<1x128x128xbf16> to vector<128x128xbf16>
    %cst_159 = arith.constant dense<0.000000e+00> : vector<288x128xf32>
    %184 = tpu.matmul %181, %183, %cst_159 {dimension_numbers = #tpu.dot_dimension_numbers<[1], [0], [0], [1], [0, 0, 1, 1], [], []>} : vector<288x128xbf16>, vector<128x128xbf16>, vector<288x128xf32> -> vector<288x128xf32>
    %185 = arith.addf %180, %184 : vector<288x128xf32>
    %c37_160 = arith.constant 37 : index
    %c0_161 = arith.constant 0 : index
    %186 = vector.load %arg8[%c37_160, %c0_161] : memref<328x128xbf16, #tpu.memory_space<vmem>>, vector<288x128xbf16>
    %c7_162 = arith.constant 7 : index
    %c0_163 = arith.constant 0 : index
    %c0_164 = arith.constant 0 : index
    %187 = vector.load %arg3[%c7_162, %c0_163, %c0_164] : memref<9x128x128xbf16, #tpu.memory_space<vmem>>, vector<1x128x128xbf16>
    %188 = vector.shape_cast %187 : vector<1x128x128xbf16> to vector<128x128xbf16>
    %cst_165 = arith.constant dense<0.000000e+00> : vector<288x128xf32>
    %189 = tpu.matmul %186, %188, %cst_165 {dimension_numbers = #tpu.dot_dimension_numbers<[1], [0], [0], [1], [0, 0, 1, 1], [], []>} : vector<288x128xbf16>, vector<128x128xbf16>, vector<288x128xf32> -> vector<288x128xf32>
    %190 = arith.addf %185, %189 : vector<288x128xf32>
    %c38 = arith.constant 38 : index
    %c0_166 = arith.constant 0 : index
    %191 = vector.load %arg8[%c38, %c0_166] : memref<328x128xbf16, #tpu.memory_space<vmem>>, vector<288x128xbf16>
    %c8_167 = arith.constant 8 : index
    %c0_168 = arith.constant 0 : index
    %c0_169 = arith.constant 0 : index
    %192 = vector.load %arg3[%c8_167, %c0_168, %c0_169] : memref<9x128x128xbf16, #tpu.memory_space<vmem>>, vector<1x128x128xbf16>
    %193 = vector.shape_cast %192 : vector<1x128x128xbf16> to vector<128x128xbf16>
    %cst_170 = arith.constant dense<0.000000e+00> : vector<288x128xf32>
    %194 = tpu.matmul %191, %193, %cst_170 {dimension_numbers = #tpu.dot_dimension_numbers<[1], [0], [0], [1], [0, 0, 1, 1], [], []>} : vector<288x128xbf16>, vector<128x128xbf16>, vector<288x128xf32> -> vector<288x128xf32>
    %195 = arith.addf %190, %194 : vector<288x128xf32>
    %c0_171 = arith.constant 0 : index
    %c0_172 = arith.constant 0 : index
    %196 = vector.load %arg4[%c0_171, %c0_172] : memref<1x128xf32, #tpu.memory_space<vmem>>, vector<1x128xf32>
    %197 = vector.broadcast %196 : vector<1x128xf32> to vector<288x128xf32>
    %198 = arith.addf %195, %197 : vector<288x128xf32>
    %cst_173 = arith.constant 0.000000e+00 : f32
    %199 = vector.shape_cast %2 : vector<288x1xi1> to vector<288x1xi1>
    %200 = vector.broadcast %199 : vector<288x1xi1> to vector<288x128xi1>
    %201 = vector.broadcast %cst_173 : f32 to vector<288x128xf32>
    %202 = arith.select %200, %198, %201 : vector<288x128xi1>, vector<288x128xf32>
    %cst_174 = arith.constant dense<0.000000e+00> : vector<128xf32>
    %203 = vector.multi_reduction <add>, %202, %cst_174 [0] : vector<288x128xf32> to vector<128xf32>
    %204 = vector.shape_cast %203 : vector<128xf32> to vector<1x128xf32>
    %cst_175 = arith.constant 3.906250e-03 : f32
    %205 = vector.broadcast %cst_175 : f32 to vector<1x128xf32>
    %206 = arith.mulf %204, %205 : vector<1x128xf32>
    %207 = arith.mulf %202, %202 : vector<288x128xf32>
    %cst_176 = arith.constant dense<0.000000e+00> : vector<128xf32>
    %208 = vector.multi_reduction <add>, %207, %cst_176 [0] : vector<288x128xf32> to vector<128xf32>
    %209 = vector.shape_cast %208 : vector<128xf32> to vector<1x128xf32>
    %cst_177 = arith.constant 3.906250e-03 : f32
    %210 = vector.broadcast %cst_177 : f32 to vector<1x128xf32>
    %211 = arith.mulf %209, %210 : vector<1x128xf32>
    %212 = arith.mulf %206, %206 : vector<1x128xf32>
    %213 = arith.subf %211, %212 : vector<1x128xf32>
    %cst_178 = arith.constant 0.000000e+00 : f32
    %214 = vector.broadcast %cst_178 : f32 to vector<1x128xf32>
    %215 = arith.maximumf %213, %214 : vector<1x128xf32>
    %216 = vector.broadcast %206 : vector<1x128xf32> to vector<288x128xf32>
    %217 = arith.subf %198, %216 : vector<288x128xf32>
    %cst_179 = arith.constant 9.99999974E-6 : f32
    %218 = vector.broadcast %cst_179 : f32 to vector<1x128xf32>
    %219 = arith.addf %215, %218 : vector<1x128xf32>
    %220 = math.rsqrt %219 : vector<1x128xf32>
    %221 = vector.broadcast %220 : vector<1x128xf32> to vector<288x128xf32>
    %222 = arith.mulf %217, %221 : vector<288x128xf32>
    %cst_180 = arith.constant 0.000000e+00 : f32
    %223 = vector.broadcast %cst_180 : f32 to vector<288x128xf32>
    %224 = arith.maximumf %222, %223 : vector<288x128xf32>
    %225 = vector.extract_strided_slice %224 {offsets = [18, 0], sizes = [16, 128], strides = [1, 1]} : vector<288x128xf32> to vector<16x128xf32>
    %226 = arith.truncf %225 : vector<16x128xf32> to vector<16x128xbf16>
    %c1_181 = arith.constant 1 : index
    %c0_182 = arith.constant 0 : index
    %227 = vector.load %arg9[%c1_181, %c0_182] : memref<328x128xbf16, #tpu.memory_space<vmem>>, vector<16x128xbf16>
    tpu.vector_store %arg9[%c1_181, %c0_182], %226 {strides = array<i32>} : memref<328x128xbf16, #tpu.memory_space<vmem>>, vector<16x128xbf16>,
    %228 = vector.extract_strided_slice %226 {offsets = [1, 0], sizes = [1, 128], strides = [1, 1]} : vector<16x128xbf16> to vector<1x128xbf16>
    %c0_183 = arith.constant 0 : index
    %c0_184 = arith.constant 0 : index
    %229 = vector.load %arg9[%c0_183, %c0_184] : memref<328x128xbf16, #tpu.memory_space<vmem>>, vector<1x128xbf16>
    tpu.vector_store %arg9[%c0_183, %c0_184], %228 {strides = array<i32>} : memref<328x128xbf16, #tpu.memory_space<vmem>>, vector<1x128xbf16>,
    %230 = vector.extract_strided_slice %226 {offsets = [14, 0], sizes = [1, 128], strides = [1, 1]} : vector<16x128xbf16> to vector<1x128xbf16>
    %c17_185 = arith.constant 17 : index
    %c0_186 = arith.constant 0 : index
    %231 = vector.load %arg9[%c17_185, %c0_186] : memref<328x128xbf16, #tpu.memory_space<vmem>>, vector<1x128xbf16>
    tpu.vector_store %arg9[%c17_185, %c0_186], %230 {strides = array<i32>} : memref<328x128xbf16, #tpu.memory_space<vmem>>, vector<1x128xbf16>,
    %232 = vector.extract_strided_slice %224 {offsets = [0, 0], sizes = [16, 128], strides = [1, 1]} : vector<288x128xf32> to vector<16x128xf32>
    %233 = arith.truncf %232 : vector<16x128xf32> to vector<16x128xbf16>
    %c19_187 = arith.constant 19 : index
    %c0_188 = arith.constant 0 : index
    %234 = vector.load %arg9[%c19_187, %c0_188] : memref<328x128xbf16, #tpu.memory_space<vmem>>, vector<16x128xbf16>
    tpu.vector_store %arg9[%c19_187, %c0_188], %233 {strides = array<i32>} : memref<328x128xbf16, #tpu.memory_space<vmem>>, vector<16x128xbf16>,
    %235 = vector.extract_strided_slice %233 {offsets = [1, 0], sizes = [1, 128], strides = [1, 1]} : vector<16x128xbf16> to vector<1x128xbf16>
    %c18_189 = arith.constant 18 : index
    %c0_190 = arith.constant 0 : index
    %236 = vector.load %arg9[%c18_189, %c0_190] : memref<328x128xbf16, #tpu.memory_space<vmem>>, vector<1x128xbf16>
    tpu.vector_store %arg9[%c18_189, %c0_190], %235 {strides = array<i32>} : memref<328x128xbf16, #tpu.memory_space<vmem>>, vector<1x128xbf16>,
    %237 = vector.extract_strided_slice %233 {offsets = [14, 0], sizes = [1, 128], strides = [1, 1]} : vector<16x128xbf16> to vector<1x128xbf16>
    %c35_191 = arith.constant 35 : index
    %c0_192 = arith.constant 0 : index
    %238 = vector.load %arg9[%c35_191, %c0_192] : memref<328x128xbf16, #tpu.memory_space<vmem>>, vector<1x128xbf16>
    tpu.vector_store %arg9[%c35_191, %c0_192], %237 {strides = array<i32>} : memref<328x128xbf16, #tpu.memory_space<vmem>>, vector<1x128xbf16>,
    %239 = vector.extract_strided_slice %224 {offsets = [18, 0], sizes = [16, 128], strides = [1, 1]} : vector<288x128xf32> to vector<16x128xf32>
    %240 = arith.truncf %239 : vector<16x128xf32> to vector<16x128xbf16>
    %c37_193 = arith.constant 37 : index
    %c0_194 = arith.constant 0 : index
    %241 = vector.load %arg9[%c37_193, %c0_194] : memref<328x128xbf16, #tpu.memory_space<vmem>>, vector<16x128xbf16>
    tpu.vector_store %arg9[%c37_193, %c0_194], %240 {strides = array<i32>} : memref<328x128xbf16, #tpu.memory_space<vmem>>, vector<16x128xbf16>,
    %242 = vector.extract_strided_slice %240 {offsets = [1, 0], sizes = [1, 128], strides = [1, 1]} : vector<16x128xbf16> to vector<1x128xbf16>
    %c36_195 = arith.constant 36 : index
    %c0_196 = arith.constant 0 : index
    %243 = vector.load %arg9[%c36_195, %c0_196] : memref<328x128xbf16, #tpu.memory_space<vmem>>, vector<1x128xbf16>
    tpu.vector_store %arg9[%c36_195, %c0_196], %242 {strides = array<i32>} : memref<328x128xbf16, #tpu.memory_space<vmem>>, vector<1x128xbf16>,
    %244 = vector.extract_strided_slice %240 {offsets = [14, 0], sizes = [1, 128], strides = [1, 1]} : vector<16x128xbf16> to vector<1x128xbf16>
    %c53_197 = arith.constant 53 : index
    %c0_198 = arith.constant 0 : index
    %245 = vector.load %arg9[%c53_197, %c0_198] : memref<328x128xbf16, #tpu.memory_space<vmem>>, vector<1x128xbf16>
    tpu.vector_store %arg9[%c53_197, %c0_198], %244 {strides = array<i32>} : memref<328x128xbf16, #tpu.memory_space<vmem>>, vector<1x128xbf16>,
    %246 = vector.extract_strided_slice %224 {offsets = [36, 0], sizes = [16, 128], strides = [1, 1]} : vector<288x128xf32> to vector<16x128xf32>
    %247 = arith.truncf %246 : vector<16x128xf32> to vector<16x128xbf16>
    %c55_199 = arith.constant 55 : index
    %c0_200 = arith.constant 0 : index
    %248 = vector.load %arg9[%c55_199, %c0_200] : memref<328x128xbf16, #tpu.memory_space<vmem>>, vector<16x128xbf16>
    tpu.vector_store %arg9[%c55_199, %c0_200], %247 {strides = array<i32>} : memref<328x128xbf16, #tpu.memory_space<vmem>>, vector<16x128xbf16>,
    %249 = vector.extract_strided_slice %247 {offsets = [1, 0], sizes = [1, 128], strides = [1, 1]} : vector<16x128xbf16> to vector<1x128xbf16>
    %c54_201 = arith.constant 54 : index
    %c0_202 = arith.constant 0 : index
    %250 = vector.load %arg9[%c54_201, %c0_202] : memref<328x128xbf16, #tpu.memory_space<vmem>>, vector<1x128xbf16>
    tpu.vector_store %arg9[%c54_201, %c0_202], %249 {strides = array<i32>} : memref<328x128xbf16, #tpu.memory_space<vmem>>, vector<1x128xbf16>,
    %251 = vector.extract_strided_slice %247 {offsets = [14, 0], sizes = [1, 128], strides = [1, 1]} : vector<16x128xbf16> to vector<1x128xbf16>
    %c71_203 = arith.constant 71 : index
    %c0_204 = arith.constant 0 : index
    %252 = vector.load %arg9[%c71_203, %c0_204] : memref<328x128xbf16, #tpu.memory_space<vmem>>, vector<1x128xbf16>
    tpu.vector_store %arg9[%c71_203, %c0_204], %251 {strides = array<i32>} : memref<328x128xbf16, #tpu.memory_space<vmem>>, vector<1x128xbf16>,
    %253 = vector.extract_strided_slice %224 {offsets = [54, 0], sizes = [16, 128], strides = [1, 1]} : vector<288x128xf32> to vector<16x128xf32>
    %254 = arith.truncf %253 : vector<16x128xf32> to vector<16x128xbf16>
    %c73_205 = arith.constant 73 : index
    %c0_206 = arith.constant 0 : index
    %255 = vector.load %arg9[%c73_205, %c0_206] : memref<328x128xbf16, #tpu.memory_space<vmem>>, vector<16x128xbf16>
    tpu.vector_store %arg9[%c73_205, %c0_206], %254 {strides = array<i32>} : memref<328x128xbf16, #tpu.memory_space<vmem>>, vector<16x128xbf16>,
    %256 = vector.extract_strided_slice %254 {offsets = [1, 0], sizes = [1, 128], strides = [1, 1]} : vector<16x128xbf16> to vector<1x128xbf16>
    %c72_207 = arith.constant 72 : index
    %c0_208 = arith.constant 0 : index
    %257 = vector.load %arg9[%c72_207, %c0_208] : memref<328x128xbf16, #tpu.memory_space<vmem>>, vector<1x128xbf16>
    tpu.vector_store %arg9[%c72_207, %c0_208], %256 {strides = array<i32>} : memref<328x128xbf16, #tpu.memory_space<vmem>>, vector<1x128xbf16>,
    %258 = vector.extract_strided_slice %254 {offsets = [14, 0], sizes = [1, 128], strides = [1, 1]} : vector<16x128xbf16> to vector<1x128xbf16>
    %c89_209 = arith.constant 89 : index
    %c0_210 = arith.constant 0 : index
    %259 = vector.load %arg9[%c89_209, %c0_210] : memref<328x128xbf16, #tpu.memory_space<vmem>>, vector<1x128xbf16>
    tpu.vector_store %arg9[%c89_209, %c0_210], %258 {strides = array<i32>} : memref<328x128xbf16, #tpu.memory_space<vmem>>, vector<1x128xbf16>,
    %260 = vector.extract_strided_slice %224 {offsets = [72, 0], sizes = [16, 128], strides = [1, 1]} : vector<288x128xf32> to vector<16x128xf32>
    %261 = arith.truncf %260 : vector<16x128xf32> to vector<16x128xbf16>
    %c91_211 = arith.constant 91 : index
    %c0_212 = arith.constant 0 : index
    %262 = vector.load %arg9[%c91_211, %c0_212] : memref<328x128xbf16, #tpu.memory_space<vmem>>, vector<16x128xbf16>
    tpu.vector_store %arg9[%c91_211, %c0_212], %261 {strides = array<i32>} : memref<328x128xbf16, #tpu.memory_space<vmem>>, vector<16x128xbf16>,
    %263 = vector.extract_strided_slice %261 {offsets = [1, 0], sizes = [1, 128], strides = [1, 1]} : vector<16x128xbf16> to vector<1x128xbf16>
    %c90_213 = arith.constant 90 : index
    %c0_214 = arith.constant 0 : index
    %264 = vector.load %arg9[%c90_213, %c0_214] : memref<328x128xbf16, #tpu.memory_space<vmem>>, vector<1x128xbf16>
    tpu.vector_store %arg9[%c90_213, %c0_214], %263 {strides = array<i32>} : memref<328x128xbf16, #tpu.memory_space<vmem>>, vector<1x128xbf16>,
    %265 = vector.extract_strided_slice %261 {offsets = [14, 0], sizes = [1, 128], strides = [1, 1]} : vector<16x128xbf16> to vector<1x128xbf16>
    %c107_215 = arith.constant 107 : index
    %c0_216 = arith.constant 0 : index
    %266 = vector.load %arg9[%c107_215, %c0_216] : memref<328x128xbf16, #tpu.memory_space<vmem>>, vector<1x128xbf16>
    tpu.vector_store %arg9[%c107_215, %c0_216], %265 {strides = array<i32>} : memref<328x128xbf16, #tpu.memory_space<vmem>>, vector<1x128xbf16>,
    %267 = vector.extract_strided_slice %224 {offsets = [90, 0], sizes = [16, 128], strides = [1, 1]} : vector<288x128xf32> to vector<16x128xf32>
    %268 = arith.truncf %267 : vector<16x128xf32> to vector<16x128xbf16>
    %c109_217 = arith.constant 109 : index
    %c0_218 = arith.constant 0 : index
    %269 = vector.load %arg9[%c109_217, %c0_218] : memref<328x128xbf16, #tpu.memory_space<vmem>>, vector<16x128xbf16>
    tpu.vector_store %arg9[%c109_217, %c0_218], %268 {strides = array<i32>} : memref<328x128xbf16, #tpu.memory_space<vmem>>, vector<16x128xbf16>,
    %270 = vector.extract_strided_slice %268 {offsets = [1, 0], sizes = [1, 128], strides = [1, 1]} : vector<16x128xbf16> to vector<1x128xbf16>
    %c108_219 = arith.constant 108 : index
    %c0_220 = arith.constant 0 : index
    %271 = vector.load %arg9[%c108_219, %c0_220] : memref<328x128xbf16, #tpu.memory_space<vmem>>, vector<1x128xbf16>
    tpu.vector_store %arg9[%c108_219, %c0_220], %270 {strides = array<i32>} : memref<328x128xbf16, #tpu.memory_space<vmem>>, vector<1x128xbf16>,
    %272 = vector.extract_strided_slice %268 {offsets = [14, 0], sizes = [1, 128], strides = [1, 1]} : vector<16x128xbf16> to vector<1x128xbf16>
    %c125_221 = arith.constant 125 : index
    %c0_222 = arith.constant 0 : index
    %273 = vector.load %arg9[%c125_221, %c0_222] : memref<328x128xbf16, #tpu.memory_space<vmem>>, vector<1x128xbf16>
    tpu.vector_store %arg9[%c125_221, %c0_222], %272 {strides = array<i32>} : memref<328x128xbf16, #tpu.memory_space<vmem>>, vector<1x128xbf16>,
    %274 = vector.extract_strided_slice %224 {offsets = [108, 0], sizes = [16, 128], strides = [1, 1]} : vector<288x128xf32> to vector<16x128xf32>
    %275 = arith.truncf %274 : vector<16x128xf32> to vector<16x128xbf16>
    %c127_223 = arith.constant 127 : index
    %c0_224 = arith.constant 0 : index
    %276 = vector.load %arg9[%c127_223, %c0_224] : memref<328x128xbf16, #tpu.memory_space<vmem>>, vector<16x128xbf16>
    tpu.vector_store %arg9[%c127_223, %c0_224], %275 {strides = array<i32>} : memref<328x128xbf16, #tpu.memory_space<vmem>>, vector<16x128xbf16>,
    %277 = vector.extract_strided_slice %275 {offsets = [1, 0], sizes = [1, 128], strides = [1, 1]} : vector<16x128xbf16> to vector<1x128xbf16>
    %c126_225 = arith.constant 126 : index
    %c0_226 = arith.constant 0 : index
    %278 = vector.load %arg9[%c126_225, %c0_226] : memref<328x128xbf16, #tpu.memory_space<vmem>>, vector<1x128xbf16>
    tpu.vector_store %arg9[%c126_225, %c0_226], %277 {strides = array<i32>} : memref<328x128xbf16, #tpu.memory_space<vmem>>, vector<1x128xbf16>,
    %279 = vector.extract_strided_slice %275 {offsets = [14, 0], sizes = [1, 128], strides = [1, 1]} : vector<16x128xbf16> to vector<1x128xbf16>
    %c143_227 = arith.constant 143 : index
    %c0_228 = arith.constant 0 : index
    %280 = vector.load %arg9[%c143_227, %c0_228] : memref<328x128xbf16, #tpu.memory_space<vmem>>, vector<1x128xbf16>
    tpu.vector_store %arg9[%c143_227, %c0_228], %279 {strides = array<i32>} : memref<328x128xbf16, #tpu.memory_space<vmem>>, vector<1x128xbf16>,
    %281 = vector.extract_strided_slice %224 {offsets = [126, 0], sizes = [16, 128], strides = [1, 1]} : vector<288x128xf32> to vector<16x128xf32>
    %282 = arith.truncf %281 : vector<16x128xf32> to vector<16x128xbf16>
    %c145_229 = arith.constant 145 : index
    %c0_230 = arith.constant 0 : index
    %283 = vector.load %arg9[%c145_229, %c0_230] : memref<328x128xbf16, #tpu.memory_space<vmem>>, vector<16x128xbf16>
    tpu.vector_store %arg9[%c145_229, %c0_230], %282 {strides = array<i32>} : memref<328x128xbf16, #tpu.memory_space<vmem>>, vector<16x128xbf16>,
    %284 = vector.extract_strided_slice %282 {offsets = [1, 0], sizes = [1, 128], strides = [1, 1]} : vector<16x128xbf16> to vector<1x128xbf16>
    %c144_231 = arith.constant 144 : index
    %c0_232 = arith.constant 0 : index
    %285 = vector.load %arg9[%c144_231, %c0_232] : memref<328x128xbf16, #tpu.memory_space<vmem>>, vector<1x128xbf16>
    tpu.vector_store %arg9[%c144_231, %c0_232], %284 {strides = array<i32>} : memref<328x128xbf16, #tpu.memory_space<vmem>>, vector<1x128xbf16>,
    %286 = vector.extract_strided_slice %282 {offsets = [14, 0], sizes = [1, 128], strides = [1, 1]} : vector<16x128xbf16> to vector<1x128xbf16>
    %c161_233 = arith.constant 161 : index
    %c0_234 = arith.constant 0 : index
    %287 = vector.load %arg9[%c161_233, %c0_234] : memref<328x128xbf16, #tpu.memory_space<vmem>>, vector<1x128xbf16>
    tpu.vector_store %arg9[%c161_233, %c0_234], %286 {strides = array<i32>} : memref<328x128xbf16, #tpu.memory_space<vmem>>, vector<1x128xbf16>,
    %288 = vector.extract_strided_slice %224 {offsets = [144, 0], sizes = [16, 128], strides = [1, 1]} : vector<288x128xf32> to vector<16x128xf32>
    %289 = arith.truncf %288 : vector<16x128xf32> to vector<16x128xbf16>
    %c163_235 = arith.constant 163 : index
    %c0_236 = arith.constant 0 : index
    %290 = vector.load %arg9[%c163_235, %c0_236] : memref<328x128xbf16, #tpu.memory_space<vmem>>, vector<16x128xbf16>
    tpu.vector_store %arg9[%c163_235, %c0_236], %289 {strides = array<i32>} : memref<328x128xbf16, #tpu.memory_space<vmem>>, vector<16x128xbf16>,
    %291 = vector.extract_strided_slice %289 {offsets = [1, 0], sizes = [1, 128], strides = [1, 1]} : vector<16x128xbf16> to vector<1x128xbf16>
    %c162_237 = arith.constant 162 : index
    %c0_238 = arith.constant 0 : index
    %292 = vector.load %arg9[%c162_237, %c0_238] : memref<328x128xbf16, #tpu.memory_space<vmem>>, vector<1x128xbf16>
    tpu.vector_store %arg9[%c162_237, %c0_238], %291 {strides = array<i32>} : memref<328x128xbf16, #tpu.memory_space<vmem>>, vector<1x128xbf16>,
    %293 = vector.extract_strided_slice %289 {offsets = [14, 0], sizes = [1, 128], strides = [1, 1]} : vector<16x128xbf16> to vector<1x128xbf16>
    %c179_239 = arith.constant 179 : index
    %c0_240 = arith.constant 0 : index
    %294 = vector.load %arg9[%c179_239, %c0_240] : memref<328x128xbf16, #tpu.memory_space<vmem>>, vector<1x128xbf16>
    tpu.vector_store %arg9[%c179_239, %c0_240], %293 {strides = array<i32>} : memref<328x128xbf16, #tpu.memory_space<vmem>>, vector<1x128xbf16>,
    %295 = vector.extract_strided_slice %224 {offsets = [162, 0], sizes = [16, 128], strides = [1, 1]} : vector<288x128xf32> to vector<16x128xf32>
    %296 = arith.truncf %295 : vector<16x128xf32> to vector<16x128xbf16>
    %c181_241 = arith.constant 181 : index
    %c0_242 = arith.constant 0 : index
    %297 = vector.load %arg9[%c181_241, %c0_242] : memref<328x128xbf16, #tpu.memory_space<vmem>>, vector<16x128xbf16>
    tpu.vector_store %arg9[%c181_241, %c0_242], %296 {strides = array<i32>} : memref<328x128xbf16, #tpu.memory_space<vmem>>, vector<16x128xbf16>,
    %298 = vector.extract_strided_slice %296 {offsets = [1, 0], sizes = [1, 128], strides = [1, 1]} : vector<16x128xbf16> to vector<1x128xbf16>
    %c180_243 = arith.constant 180 : index
    %c0_244 = arith.constant 0 : index
    %299 = vector.load %arg9[%c180_243, %c0_244] : memref<328x128xbf16, #tpu.memory_space<vmem>>, vector<1x128xbf16>
    tpu.vector_store %arg9[%c180_243, %c0_244], %298 {strides = array<i32>} : memref<328x128xbf16, #tpu.memory_space<vmem>>, vector<1x128xbf16>,
    %300 = vector.extract_strided_slice %296 {offsets = [14, 0], sizes = [1, 128], strides = [1, 1]} : vector<16x128xbf16> to vector<1x128xbf16>
    %c197_245 = arith.constant 197 : index
    %c0_246 = arith.constant 0 : index
    %301 = vector.load %arg9[%c197_245, %c0_246] : memref<328x128xbf16, #tpu.memory_space<vmem>>, vector<1x128xbf16>
    tpu.vector_store %arg9[%c197_245, %c0_246], %300 {strides = array<i32>} : memref<328x128xbf16, #tpu.memory_space<vmem>>, vector<1x128xbf16>,
    %302 = vector.extract_strided_slice %224 {offsets = [180, 0], sizes = [16, 128], strides = [1, 1]} : vector<288x128xf32> to vector<16x128xf32>
    %303 = arith.truncf %302 : vector<16x128xf32> to vector<16x128xbf16>
    %c199_247 = arith.constant 199 : index
    %c0_248 = arith.constant 0 : index
    %304 = vector.load %arg9[%c199_247, %c0_248] : memref<328x128xbf16, #tpu.memory_space<vmem>>, vector<16x128xbf16>
    tpu.vector_store %arg9[%c199_247, %c0_248], %303 {strides = array<i32>} : memref<328x128xbf16, #tpu.memory_space<vmem>>, vector<16x128xbf16>,
    %305 = vector.extract_strided_slice %303 {offsets = [1, 0], sizes = [1, 128], strides = [1, 1]} : vector<16x128xbf16> to vector<1x128xbf16>
    %c198_249 = arith.constant 198 : index
    %c0_250 = arith.constant 0 : index
    %306 = vector.load %arg9[%c198_249, %c0_250] : memref<328x128xbf16, #tpu.memory_space<vmem>>, vector<1x128xbf16>
    tpu.vector_store %arg9[%c198_249, %c0_250], %305 {strides = array<i32>} : memref<328x128xbf16, #tpu.memory_space<vmem>>, vector<1x128xbf16>,
    %307 = vector.extract_strided_slice %303 {offsets = [14, 0], sizes = [1, 128], strides = [1, 1]} : vector<16x128xbf16> to vector<1x128xbf16>
    %c215_251 = arith.constant 215 : index
    %c0_252 = arith.constant 0 : index
    %308 = vector.load %arg9[%c215_251, %c0_252] : memref<328x128xbf16, #tpu.memory_space<vmem>>, vector<1x128xbf16>
    tpu.vector_store %arg9[%c215_251, %c0_252], %307 {strides = array<i32>} : memref<328x128xbf16, #tpu.memory_space<vmem>>, vector<1x128xbf16>,
    %309 = vector.extract_strided_slice %224 {offsets = [198, 0], sizes = [16, 128], strides = [1, 1]} : vector<288x128xf32> to vector<16x128xf32>
    %310 = arith.truncf %309 : vector<16x128xf32> to vector<16x128xbf16>
    %c217_253 = arith.constant 217 : index
    %c0_254 = arith.constant 0 : index
    %311 = vector.load %arg9[%c217_253, %c0_254] : memref<328x128xbf16, #tpu.memory_space<vmem>>, vector<16x128xbf16>
    tpu.vector_store %arg9[%c217_253, %c0_254], %310 {strides = array<i32>} : memref<328x128xbf16, #tpu.memory_space<vmem>>, vector<16x128xbf16>,
    %312 = vector.extract_strided_slice %310 {offsets = [1, 0], sizes = [1, 128], strides = [1, 1]} : vector<16x128xbf16> to vector<1x128xbf16>
    %c216_255 = arith.constant 216 : index
    %c0_256 = arith.constant 0 : index
    %313 = vector.load %arg9[%c216_255, %c0_256] : memref<328x128xbf16, #tpu.memory_space<vmem>>, vector<1x128xbf16>
    tpu.vector_store %arg9[%c216_255, %c0_256], %312 {strides = array<i32>} : memref<328x128xbf16, #tpu.memory_space<vmem>>, vector<1x128xbf16>,
    %314 = vector.extract_strided_slice %310 {offsets = [14, 0], sizes = [1, 128], strides = [1, 1]} : vector<16x128xbf16> to vector<1x128xbf16>
    %c233_257 = arith.constant 233 : index
    %c0_258 = arith.constant 0 : index
    %315 = vector.load %arg9[%c233_257, %c0_258] : memref<328x128xbf16, #tpu.memory_space<vmem>>, vector<1x128xbf16>
    tpu.vector_store %arg9[%c233_257, %c0_258], %314 {strides = array<i32>} : memref<328x128xbf16, #tpu.memory_space<vmem>>, vector<1x128xbf16>,
    %316 = vector.extract_strided_slice %224 {offsets = [216, 0], sizes = [16, 128], strides = [1, 1]} : vector<288x128xf32> to vector<16x128xf32>
    %317 = arith.truncf %316 : vector<16x128xf32> to vector<16x128xbf16>
    %c235_259 = arith.constant 235 : index
    %c0_260 = arith.constant 0 : index
    %318 = vector.load %arg9[%c235_259, %c0_260] : memref<328x128xbf16, #tpu.memory_space<vmem>>, vector<16x128xbf16>
    tpu.vector_store %arg9[%c235_259, %c0_260], %317 {strides = array<i32>} : memref<328x128xbf16, #tpu.memory_space<vmem>>, vector<16x128xbf16>,
    %319 = vector.extract_strided_slice %317 {offsets = [1, 0], sizes = [1, 128], strides = [1, 1]} : vector<16x128xbf16> to vector<1x128xbf16>
    %c234_261 = arith.constant 234 : index
    %c0_262 = arith.constant 0 : index
    %320 = vector.load %arg9[%c234_261, %c0_262] : memref<328x128xbf16, #tpu.memory_space<vmem>>, vector<1x128xbf16>
    tpu.vector_store %arg9[%c234_261, %c0_262], %319 {strides = array<i32>} : memref<328x128xbf16, #tpu.memory_space<vmem>>, vector<1x128xbf16>,
    %321 = vector.extract_strided_slice %317 {offsets = [14, 0], sizes = [1, 128], strides = [1, 1]} : vector<16x128xbf16> to vector<1x128xbf16>
    %c251_263 = arith.constant 251 : index
    %c0_264 = arith.constant 0 : index
    %322 = vector.load %arg9[%c251_263, %c0_264] : memref<328x128xbf16, #tpu.memory_space<vmem>>, vector<1x128xbf16>
    tpu.vector_store %arg9[%c251_263, %c0_264], %321 {strides = array<i32>} : memref<328x128xbf16, #tpu.memory_space<vmem>>, vector<1x128xbf16>,
    %323 = vector.extract_strided_slice %224 {offsets = [234, 0], sizes = [16, 128], strides = [1, 1]} : vector<288x128xf32> to vector<16x128xf32>
    %324 = arith.truncf %323 : vector<16x128xf32> to vector<16x128xbf16>
    %c253_265 = arith.constant 253 : index
    %c0_266 = arith.constant 0 : index
    %325 = vector.load %arg9[%c253_265, %c0_266] : memref<328x128xbf16, #tpu.memory_space<vmem>>, vector<16x128xbf16>
    tpu.vector_store %arg9[%c253_265, %c0_266], %324 {strides = array<i32>} : memref<328x128xbf16, #tpu.memory_space<vmem>>, vector<16x128xbf16>,
    %326 = vector.extract_strided_slice %324 {offsets = [1, 0], sizes = [1, 128], strides = [1, 1]} : vector<16x128xbf16> to vector<1x128xbf16>
    %c252_267 = arith.constant 252 : index
    %c0_268 = arith.constant 0 : index
    %327 = vector.load %arg9[%c252_267, %c0_268] : memref<328x128xbf16, #tpu.memory_space<vmem>>, vector<1x128xbf16>
    tpu.vector_store %arg9[%c252_267, %c0_268], %326 {strides = array<i32>} : memref<328x128xbf16, #tpu.memory_space<vmem>>, vector<1x128xbf16>,
    %328 = vector.extract_strided_slice %324 {offsets = [14, 0], sizes = [1, 128], strides = [1, 1]} : vector<16x128xbf16> to vector<1x128xbf16>
    %c269_269 = arith.constant 269 : index
    %c0_270 = arith.constant 0 : index
    %329 = vector.load %arg9[%c269_269, %c0_270] : memref<328x128xbf16, #tpu.memory_space<vmem>>, vector<1x128xbf16>
    tpu.vector_store %arg9[%c269_269, %c0_270], %328 {strides = array<i32>} : memref<328x128xbf16, #tpu.memory_space<vmem>>, vector<1x128xbf16>,
    %330 = vector.extract_strided_slice %224 {offsets = [252, 0], sizes = [16, 128], strides = [1, 1]} : vector<288x128xf32> to vector<16x128xf32>
    %331 = arith.truncf %330 : vector<16x128xf32> to vector<16x128xbf16>
    %c271_271 = arith.constant 271 : index
    %c0_272 = arith.constant 0 : index
    %332 = vector.load %arg9[%c271_271, %c0_272] : memref<328x128xbf16, #tpu.memory_space<vmem>>, vector<16x128xbf16>
    tpu.vector_store %arg9[%c271_271, %c0_272], %331 {strides = array<i32>} : memref<328x128xbf16, #tpu.memory_space<vmem>>, vector<16x128xbf16>,
    %333 = vector.extract_strided_slice %331 {offsets = [1, 0], sizes = [1, 128], strides = [1, 1]} : vector<16x128xbf16> to vector<1x128xbf16>
    %c270_273 = arith.constant 270 : index
    %c0_274 = arith.constant 0 : index
    %334 = vector.load %arg9[%c270_273, %c0_274] : memref<328x128xbf16, #tpu.memory_space<vmem>>, vector<1x128xbf16>
    tpu.vector_store %arg9[%c270_273, %c0_274], %333 {strides = array<i32>} : memref<328x128xbf16, #tpu.memory_space<vmem>>, vector<1x128xbf16>,
    %335 = vector.extract_strided_slice %331 {offsets = [14, 0], sizes = [1, 128], strides = [1, 1]} : vector<16x128xbf16> to vector<1x128xbf16>
    %c287_275 = arith.constant 287 : index
    %c0_276 = arith.constant 0 : index
    %336 = vector.load %arg9[%c287_275, %c0_276] : memref<328x128xbf16, #tpu.memory_space<vmem>>, vector<1x128xbf16>
    tpu.vector_store %arg9[%c287_275, %c0_276], %335 {strides = array<i32>} : memref<328x128xbf16, #tpu.memory_space<vmem>>, vector<1x128xbf16>,
    %337 = vector.extract_strided_slice %224 {offsets = [270, 0], sizes = [16, 128], strides = [1, 1]} : vector<288x128xf32> to vector<16x128xf32>
    %338 = arith.truncf %337 : vector<16x128xf32> to vector<16x128xbf16>
    %c289_277 = arith.constant 289 : index
    %c0_278 = arith.constant 0 : index
    %339 = vector.load %arg9[%c289_277, %c0_278] : memref<328x128xbf16, #tpu.memory_space<vmem>>, vector<16x128xbf16>
    tpu.vector_store %arg9[%c289_277, %c0_278], %338 {strides = array<i32>} : memref<328x128xbf16, #tpu.memory_space<vmem>>, vector<16x128xbf16>,
    %340 = vector.extract_strided_slice %338 {offsets = [1, 0], sizes = [1, 128], strides = [1, 1]} : vector<16x128xbf16> to vector<1x128xbf16>
    %c288_279 = arith.constant 288 : index
    %c0_280 = arith.constant 0 : index
    %341 = vector.load %arg9[%c288_279, %c0_280] : memref<328x128xbf16, #tpu.memory_space<vmem>>, vector<1x128xbf16>
    tpu.vector_store %arg9[%c288_279, %c0_280], %340 {strides = array<i32>} : memref<328x128xbf16, #tpu.memory_space<vmem>>, vector<1x128xbf16>,
    %342 = vector.extract_strided_slice %338 {offsets = [14, 0], sizes = [1, 128], strides = [1, 1]} : vector<16x128xbf16> to vector<1x128xbf16>
    %c305_281 = arith.constant 305 : index
    %c0_282 = arith.constant 0 : index
    %343 = vector.load %arg9[%c305_281, %c0_282] : memref<328x128xbf16, #tpu.memory_space<vmem>>, vector<1x128xbf16>
    tpu.vector_store %arg9[%c305_281, %c0_282], %342 {strides = array<i32>} : memref<328x128xbf16, #tpu.memory_space<vmem>>, vector<1x128xbf16>,
    %344 = vector.extract_strided_slice %224 {offsets = [252, 0], sizes = [16, 128], strides = [1, 1]} : vector<288x128xf32> to vector<16x128xf32>
    %345 = arith.truncf %344 : vector<16x128xf32> to vector<16x128xbf16>
    %c307_283 = arith.constant 307 : index
    %c0_284 = arith.constant 0 : index
    %346 = vector.load %arg9[%c307_283, %c0_284] : memref<328x128xbf16, #tpu.memory_space<vmem>>, vector<16x128xbf16>
    tpu.vector_store %arg9[%c307_283, %c0_284], %345 {strides = array<i32>} : memref<328x128xbf16, #tpu.memory_space<vmem>>, vector<16x128xbf16>,
    %347 = vector.extract_strided_slice %345 {offsets = [1, 0], sizes = [1, 128], strides = [1, 1]} : vector<16x128xbf16> to vector<1x128xbf16>
    %c306_285 = arith.constant 306 : index
    %c0_286 = arith.constant 0 : index
    %348 = vector.load %arg9[%c306_285, %c0_286] : memref<328x128xbf16, #tpu.memory_space<vmem>>, vector<1x128xbf16>
    tpu.vector_store %arg9[%c306_285, %c0_286], %347 {strides = array<i32>} : memref<328x128xbf16, #tpu.memory_space<vmem>>, vector<1x128xbf16>,
    %349 = vector.extract_strided_slice %345 {offsets = [14, 0], sizes = [1, 128], strides = [1, 1]} : vector<16x128xbf16> to vector<1x128xbf16>
    %c323_287 = arith.constant 323 : index
    %c0_288 = arith.constant 0 : index
    %350 = vector.load %arg9[%c323_287, %c0_288] : memref<328x128xbf16, #tpu.memory_space<vmem>>, vector<1x128xbf16>
    tpu.vector_store %arg9[%c323_287, %c0_288], %349 {strides = array<i32>} : memref<328x128xbf16, #tpu.memory_space<vmem>>, vector<1x128xbf16>,
    %cst_289 = arith.constant 0.000000e+00 : f32
    %351 = vector.broadcast %cst_289 : f32 to vector<288x128xf32>
    %c0_290 = arith.constant 0 : index
    %c0_291 = arith.constant 0 : index
    %352 = vector.load %arg9[%c0_290, %c0_291] : memref<328x128xbf16, #tpu.memory_space<vmem>>, vector<288x128xbf16>
    %c0_292 = arith.constant 0 : index
    %c0_293 = arith.constant 0 : index
    %c0_294 = arith.constant 0 : index
    %353 = vector.load %arg5[%c0_292, %c0_293, %c0_294] : memref<9x128x128xbf16, #tpu.memory_space<vmem>>, vector<1x128x128xbf16>
    %354 = vector.shape_cast %353 : vector<1x128x128xbf16> to vector<128x128xbf16>
    %cst_295 = arith.constant dense<0.000000e+00> : vector<288x128xf32>
    %355 = tpu.matmul %352, %354, %cst_295 {dimension_numbers = #tpu.dot_dimension_numbers<[1], [0], [0], [1], [0, 0, 1, 1], [], []>} : vector<288x128xbf16>, vector<128x128xbf16>, vector<288x128xf32> -> vector<288x128xf32>
    %356 = arith.addf %351, %355 : vector<288x128xf32>
    %c1_296 = arith.constant 1 : index
    %c0_297 = arith.constant 0 : index
    %357 = vector.load %arg9[%c1_296, %c0_297] : memref<328x128xbf16, #tpu.memory_space<vmem>>, vector<288x128xbf16>
    %c1_298 = arith.constant 1 : index
    %c0_299 = arith.constant 0 : index
    %c0_300 = arith.constant 0 : index
    %358 = vector.load %arg5[%c1_298, %c0_299, %c0_300] : memref<9x128x128xbf16, #tpu.memory_space<vmem>>, vector<1x128x128xbf16>
    %359 = vector.shape_cast %358 : vector<1x128x128xbf16> to vector<128x128xbf16>
    %cst_301 = arith.constant dense<0.000000e+00> : vector<288x128xf32>
    %360 = tpu.matmul %357, %359, %cst_301 {dimension_numbers = #tpu.dot_dimension_numbers<[1], [0], [0], [1], [0, 0, 1, 1], [], []>} : vector<288x128xbf16>, vector<128x128xbf16>, vector<288x128xf32> -> vector<288x128xf32>
    %361 = arith.addf %356, %360 : vector<288x128xf32>
    %c2_302 = arith.constant 2 : index
    %c0_303 = arith.constant 0 : index
    %362 = vector.load %arg9[%c2_302, %c0_303] : memref<328x128xbf16, #tpu.memory_space<vmem>>, vector<288x128xbf16>
    %c2_304 = arith.constant 2 : index
    %c0_305 = arith.constant 0 : index
    %c0_306 = arith.constant 0 : index
    %363 = vector.load %arg5[%c2_304, %c0_305, %c0_306] : memref<9x128x128xbf16, #tpu.memory_space<vmem>>, vector<1x128x128xbf16>
    %364 = vector.shape_cast %363 : vector<1x128x128xbf16> to vector<128x128xbf16>
    %cst_307 = arith.constant dense<0.000000e+00> : vector<288x128xf32>
    %365 = tpu.matmul %362, %364, %cst_307 {dimension_numbers = #tpu.dot_dimension_numbers<[1], [0], [0], [1], [0, 0, 1, 1], [], []>} : vector<288x128xbf16>, vector<128x128xbf16>, vector<288x128xf32> -> vector<288x128xf32>
    %366 = arith.addf %361, %365 : vector<288x128xf32>
    %c18_308 = arith.constant 18 : index
    %c0_309 = arith.constant 0 : index
    %367 = vector.load %arg9[%c18_308, %c0_309] : memref<328x128xbf16, #tpu.memory_space<vmem>>, vector<288x128xbf16>
    %c3_310 = arith.constant 3 : index
    %c0_311 = arith.constant 0 : index
    %c0_312 = arith.constant 0 : index
    %368 = vector.load %arg5[%c3_310, %c0_311, %c0_312] : memref<9x128x128xbf16, #tpu.memory_space<vmem>>, vector<1x128x128xbf16>
    %369 = vector.shape_cast %368 : vector<1x128x128xbf16> to vector<128x128xbf16>
    %cst_313 = arith.constant dense<0.000000e+00> : vector<288x128xf32>
    %370 = tpu.matmul %367, %369, %cst_313 {dimension_numbers = #tpu.dot_dimension_numbers<[1], [0], [0], [1], [0, 0, 1, 1], [], []>} : vector<288x128xbf16>, vector<128x128xbf16>, vector<288x128xf32> -> vector<288x128xf32>
    %371 = arith.addf %366, %370 : vector<288x128xf32>
    %c19_314 = arith.constant 19 : index
    %c0_315 = arith.constant 0 : index
    %372 = vector.load %arg9[%c19_314, %c0_315] : memref<328x128xbf16, #tpu.memory_space<vmem>>, vector<288x128xbf16>
    %c4_316 = arith.constant 4 : index
    %c0_317 = arith.constant 0 : index
    %c0_318 = arith.constant 0 : index
    %373 = vector.load %arg5[%c4_316, %c0_317, %c0_318] : memref<9x128x128xbf16, #tpu.memory_space<vmem>>, vector<1x128x128xbf16>
    %374 = vector.shape_cast %373 : vector<1x128x128xbf16> to vector<128x128xbf16>
    %cst_319 = arith.constant dense<0.000000e+00> : vector<288x128xf32>
    %375 = tpu.matmul %372, %374, %cst_319 {dimension_numbers = #tpu.dot_dimension_numbers<[1], [0], [0], [1], [0, 0, 1, 1], [], []>} : vector<288x128xbf16>, vector<128x128xbf16>, vector<288x128xf32> -> vector<288x128xf32>
    %376 = arith.addf %371, %375 : vector<288x128xf32>
    %c20_320 = arith.constant 20 : index
    %c0_321 = arith.constant 0 : index
    %377 = vector.load %arg9[%c20_320, %c0_321] : memref<328x128xbf16, #tpu.memory_space<vmem>>, vector<288x128xbf16>
    %c5_322 = arith.constant 5 : index
    %c0_323 = arith.constant 0 : index
    %c0_324 = arith.constant 0 : index
    %378 = vector.load %arg5[%c5_322, %c0_323, %c0_324] : memref<9x128x128xbf16, #tpu.memory_space<vmem>>, vector<1x128x128xbf16>
    %379 = vector.shape_cast %378 : vector<1x128x128xbf16> to vector<128x128xbf16>
    %cst_325 = arith.constant dense<0.000000e+00> : vector<288x128xf32>
    %380 = tpu.matmul %377, %379, %cst_325 {dimension_numbers = #tpu.dot_dimension_numbers<[1], [0], [0], [1], [0, 0, 1, 1], [], []>} : vector<288x128xbf16>, vector<128x128xbf16>, vector<288x128xf32> -> vector<288x128xf32>
    %381 = arith.addf %376, %380 : vector<288x128xf32>
    %c36_326 = arith.constant 36 : index
    %c0_327 = arith.constant 0 : index
    %382 = vector.load %arg9[%c36_326, %c0_327] : memref<328x128xbf16, #tpu.memory_space<vmem>>, vector<288x128xbf16>
    %c6_328 = arith.constant 6 : index
    %c0_329 = arith.constant 0 : index
    %c0_330 = arith.constant 0 : index
    %383 = vector.load %arg5[%c6_328, %c0_329, %c0_330] : memref<9x128x128xbf16, #tpu.memory_space<vmem>>, vector<1x128x128xbf16>
    %384 = vector.shape_cast %383 : vector<1x128x128xbf16> to vector<128x128xbf16>
    %cst_331 = arith.constant dense<0.000000e+00> : vector<288x128xf32>
    %385 = tpu.matmul %382, %384, %cst_331 {dimension_numbers = #tpu.dot_dimension_numbers<[1], [0], [0], [1], [0, 0, 1, 1], [], []>} : vector<288x128xbf16>, vector<128x128xbf16>, vector<288x128xf32> -> vector<288x128xf32>
    %386 = arith.addf %381, %385 : vector<288x128xf32>
    %c37_332 = arith.constant 37 : index
    %c0_333 = arith.constant 0 : index
    %387 = vector.load %arg9[%c37_332, %c0_333] : memref<328x128xbf16, #tpu.memory_space<vmem>>, vector<288x128xbf16>
    %c7_334 = arith.constant 7 : index
    %c0_335 = arith.constant 0 : index
    %c0_336 = arith.constant 0 : index
    %388 = vector.load %arg5[%c7_334, %c0_335, %c0_336] : memref<9x128x128xbf16, #tpu.memory_space<vmem>>, vector<1x128x128xbf16>
    %389 = vector.shape_cast %388 : vector<1x128x128xbf16> to vector<128x128xbf16>
    %cst_337 = arith.constant dense<0.000000e+00> : vector<288x128xf32>
    %390 = tpu.matmul %387, %389, %cst_337 {dimension_numbers = #tpu.dot_dimension_numbers<[1], [0], [0], [1], [0, 0, 1, 1], [], []>} : vector<288x128xbf16>, vector<128x128xbf16>, vector<288x128xf32> -> vector<288x128xf32>
    %391 = arith.addf %386, %390 : vector<288x128xf32>
    %c38_338 = arith.constant 38 : index
    %c0_339 = arith.constant 0 : index
    %392 = vector.load %arg9[%c38_338, %c0_339] : memref<328x128xbf16, #tpu.memory_space<vmem>>, vector<288x128xbf16>
    %c8_340 = arith.constant 8 : index
    %c0_341 = arith.constant 0 : index
    %c0_342 = arith.constant 0 : index
    %393 = vector.load %arg5[%c8_340, %c0_341, %c0_342] : memref<9x128x128xbf16, #tpu.memory_space<vmem>>, vector<1x128x128xbf16>
    %394 = vector.shape_cast %393 : vector<1x128x128xbf16> to vector<128x128xbf16>
    %cst_343 = arith.constant dense<0.000000e+00> : vector<288x128xf32>
    %395 = tpu.matmul %392, %394, %cst_343 {dimension_numbers = #tpu.dot_dimension_numbers<[1], [0], [0], [1], [0, 0, 1, 1], [], []>} : vector<288x128xbf16>, vector<128x128xbf16>, vector<288x128xf32> -> vector<288x128xf32>
    %396 = arith.addf %391, %395 : vector<288x128xf32>
    %c0_344 = arith.constant 0 : index
    %c0_345 = arith.constant 0 : index
    %397 = vector.load %arg6[%c0_344, %c0_345] : memref<1x128xf32, #tpu.memory_space<vmem>>, vector<1x128xf32>
    %398 = vector.broadcast %397 : vector<1x128xf32> to vector<288x128xf32>
    %399 = arith.addf %396, %398 : vector<288x128xf32>
    %cst_346 = arith.constant 0.000000e+00 : f32
    %400 = vector.shape_cast %2 : vector<288x1xi1> to vector<288x1xi1>
    %401 = vector.broadcast %400 : vector<288x1xi1> to vector<288x128xi1>
    %402 = vector.broadcast %cst_346 : f32 to vector<288x128xf32>
    %403 = arith.select %401, %399, %402 : vector<288x128xi1>, vector<288x128xf32>
    %cst_347 = arith.constant dense<0.000000e+00> : vector<128xf32>
    %404 = vector.multi_reduction <add>, %403, %cst_347 [0] : vector<288x128xf32> to vector<128xf32>
    %405 = vector.shape_cast %404 : vector<128xf32> to vector<1x128xf32>
    %cst_348 = arith.constant 3.906250e-03 : f32
    %406 = vector.broadcast %cst_348 : f32 to vector<1x128xf32>
    %407 = arith.mulf %405, %406 : vector<1x128xf32>
    %408 = arith.mulf %403, %403 : vector<288x128xf32>
    %cst_349 = arith.constant dense<0.000000e+00> : vector<128xf32>
    %409 = vector.multi_reduction <add>, %408, %cst_349 [0] : vector<288x128xf32> to vector<128xf32>
    %410 = vector.shape_cast %409 : vector<128xf32> to vector<1x128xf32>
    %cst_350 = arith.constant 3.906250e-03 : f32
    %411 = vector.broadcast %cst_350 : f32 to vector<1x128xf32>
    %412 = arith.mulf %410, %411 : vector<1x128xf32>
    %413 = arith.mulf %407, %407 : vector<1x128xf32>
    %414 = arith.subf %412, %413 : vector<1x128xf32>
    %cst_351 = arith.constant 0.000000e+00 : f32
    %415 = vector.broadcast %cst_351 : f32 to vector<1x128xf32>
    %416 = arith.maximumf %414, %415 : vector<1x128xf32>
    %417 = vector.broadcast %407 : vector<1x128xf32> to vector<288x128xf32>
    %418 = arith.subf %399, %417 : vector<288x128xf32>
    %cst_352 = arith.constant 9.99999974E-6 : f32
    %419 = vector.broadcast %cst_352 : f32 to vector<1x128xf32>
    %420 = arith.addf %416, %419 : vector<1x128xf32>
    %421 = math.rsqrt %420 : vector<1x128xf32>
    %422 = vector.broadcast %421 : vector<1x128xf32> to vector<288x128xf32>
    %423 = arith.mulf %418, %422 : vector<288x128xf32>
    %c0_353 = arith.constant 0 : index
    %c0_354 = arith.constant 0 : index
    %c0_355 = arith.constant 0 : index
    %c0_356 = arith.constant 0 : index
    %424 = vector.load %arg1[%c0_353, %c0_354, %c0_355, %c0_356] : memref<1x16x16x128xf32, #tpu.memory_space<vmem>>, vector<1x1x16x128xf32>
    %425 = vector.shape_cast %424 : vector<1x1x16x128xf32> to vector<16x128xf32>
    %426 = vector.extract_strided_slice %423 {offsets = [0, 0], sizes = [16, 128], strides = [1, 1]} : vector<288x128xf32> to vector<16x128xf32>
    %427 = arith.addf %425, %426 : vector<16x128xf32>
    %c0_357 = arith.constant 0 : index
    %c0_358 = arith.constant 0 : index
    %c0_359 = arith.constant 0 : index
    %c0_360 = arith.constant 0 : index
    %428 = vector.load %arg7[%c0_357, %c0_358, %c0_359, %c0_360] : memref<1x16x16x128xf32, #tpu.memory_space<vmem>>, vector<1x1x16x128xf32>
    %429 = vector.shape_cast %428 : vector<1x1x16x128xf32> to vector<16x128xf32>
    %430 = vector.shape_cast %427 : vector<16x128xf32> to vector<1x1x16x128xf32>
    tpu.vector_store %arg7[%c0_357, %c0_358, %c0_359, %c0_360], %430 {strides = array<i32>} : memref<1x16x16x128xf32, #tpu.memory_space<vmem>>, vector<1x1x16x128xf32>,
    %c0_361 = arith.constant 0 : index
    %c1_362 = arith.constant 1 : index
    %c0_363 = arith.constant 0 : index
    %c0_364 = arith.constant 0 : index
    %431 = vector.load %arg1[%c0_361, %c1_362, %c0_363, %c0_364] : memref<1x16x16x128xf32, #tpu.memory_space<vmem>>, vector<1x1x16x128xf32>
    %432 = vector.shape_cast %431 : vector<1x1x16x128xf32> to vector<16x128xf32>
    %433 = vector.extract_strided_slice %423 {offsets = [18, 0], sizes = [16, 128], strides = [1, 1]} : vector<288x128xf32> to vector<16x128xf32>
    %434 = arith.addf %432, %433 : vector<16x128xf32>
    %c0_365 = arith.constant 0 : index
    %c1_366 = arith.constant 1 : index
    %c0_367 = arith.constant 0 : index
    %c0_368 = arith.constant 0 : index
    %435 = vector.load %arg7[%c0_365, %c1_366, %c0_367, %c0_368] : memref<1x16x16x128xf32, #tpu.memory_space<vmem>>, vector<1x1x16x128xf32>
    %436 = vector.shape_cast %435 : vector<1x1x16x128xf32> to vector<16x128xf32>
    %437 = vector.shape_cast %434 : vector<16x128xf32> to vector<1x1x16x128xf32>
    tpu.vector_store %arg7[%c0_365, %c1_366, %c0_367, %c0_368], %437 {strides = array<i32>} : memref<1x16x16x128xf32, #tpu.memory_space<vmem>>, vector<1x1x16x128xf32>,
    %c0_369 = arith.constant 0 : index
    %c2_370 = arith.constant 2 : index
    %c0_371 = arith.constant 0 : index
    %c0_372 = arith.constant 0 : index
    %438 = vector.load %arg1[%c0_369, %c2_370, %c0_371, %c0_372] : memref<1x16x16x128xf32, #tpu.memory_space<vmem>>, vector<1x1x16x128xf32>
    %439 = vector.shape_cast %438 : vector<1x1x16x128xf32> to vector<16x128xf32>
    %440 = vector.extract_strided_slice %423 {offsets = [36, 0], sizes = [16, 128], strides = [1, 1]} : vector<288x128xf32> to vector<16x128xf32>
    %441 = arith.addf %439, %440 : vector<16x128xf32>
    %c0_373 = arith.constant 0 : index
    %c2_374 = arith.constant 2 : index
    %c0_375 = arith.constant 0 : index
    %c0_376 = arith.constant 0 : index
    %442 = vector.load %arg7[%c0_373, %c2_374, %c0_375, %c0_376] : memref<1x16x16x128xf32, #tpu.memory_space<vmem>>, vector<1x1x16x128xf32>
    %443 = vector.shape_cast %442 : vector<1x1x16x128xf32> to vector<16x128xf32>
    %444 = vector.shape_cast %441 : vector<16x128xf32> to vector<1x1x16x128xf32>
    tpu.vector_store %arg7[%c0_373, %c2_374, %c0_375, %c0_376], %444 {strides = array<i32>} : memref<1x16x16x128xf32, #tpu.memory_space<vmem>>, vector<1x1x16x128xf32>,
    %c0_377 = arith.constant 0 : index
    %c3_378 = arith.constant 3 : index
    %c0_379 = arith.constant 0 : index
    %c0_380 = arith.constant 0 : index
    %445 = vector.load %arg1[%c0_377, %c3_378, %c0_379, %c0_380] : memref<1x16x16x128xf32, #tpu.memory_space<vmem>>, vector<1x1x16x128xf32>
    %446 = vector.shape_cast %445 : vector<1x1x16x128xf32> to vector<16x128xf32>
    %447 = vector.extract_strided_slice %423 {offsets = [54, 0], sizes = [16, 128], strides = [1, 1]} : vector<288x128xf32> to vector<16x128xf32>
    %448 = arith.addf %446, %447 : vector<16x128xf32>
    %c0_381 = arith.constant 0 : index
    %c3_382 = arith.constant 3 : index
    %c0_383 = arith.constant 0 : index
    %c0_384 = arith.constant 0 : index
    %449 = vector.load %arg7[%c0_381, %c3_382, %c0_383, %c0_384] : memref<1x16x16x128xf32, #tpu.memory_space<vmem>>, vector<1x1x16x128xf32>
    %450 = vector.shape_cast %449 : vector<1x1x16x128xf32> to vector<16x128xf32>
    %451 = vector.shape_cast %448 : vector<16x128xf32> to vector<1x1x16x128xf32>
    tpu.vector_store %arg7[%c0_381, %c3_382, %c0_383, %c0_384], %451 {strides = array<i32>} : memref<1x16x16x128xf32, #tpu.memory_space<vmem>>, vector<1x1x16x128xf32>,
    %c0_385 = arith.constant 0 : index
    %c4_386 = arith.constant 4 : index
    %c0_387 = arith.constant 0 : index
    %c0_388 = arith.constant 0 : index
    %452 = vector.load %arg1[%c0_385, %c4_386, %c0_387, %c0_388] : memref<1x16x16x128xf32, #tpu.memory_space<vmem>>, vector<1x1x16x128xf32>
    %453 = vector.shape_cast %452 : vector<1x1x16x128xf32> to vector<16x128xf32>
    %454 = vector.extract_strided_slice %423 {offsets = [72, 0], sizes = [16, 128], strides = [1, 1]} : vector<288x128xf32> to vector<16x128xf32>
    %455 = arith.addf %453, %454 : vector<16x128xf32>
    %c0_389 = arith.constant 0 : index
    %c4_390 = arith.constant 4 : index
    %c0_391 = arith.constant 0 : index
    %c0_392 = arith.constant 0 : index
    %456 = vector.load %arg7[%c0_389, %c4_390, %c0_391, %c0_392] : memref<1x16x16x128xf32, #tpu.memory_space<vmem>>, vector<1x1x16x128xf32>
    %457 = vector.shape_cast %456 : vector<1x1x16x128xf32> to vector<16x128xf32>
    %458 = vector.shape_cast %455 : vector<16x128xf32> to vector<1x1x16x128xf32>
    tpu.vector_store %arg7[%c0_389, %c4_390, %c0_391, %c0_392], %458 {strides = array<i32>} : memref<1x16x16x128xf32, #tpu.memory_space<vmem>>, vector<1x1x16x128xf32>,
    %c0_393 = arith.constant 0 : index
    %c5_394 = arith.constant 5 : index
    %c0_395 = arith.constant 0 : index
    %c0_396 = arith.constant 0 : index
    %459 = vector.load %arg1[%c0_393, %c5_394, %c0_395, %c0_396] : memref<1x16x16x128xf32, #tpu.memory_space<vmem>>, vector<1x1x16x128xf32>
    %460 = vector.shape_cast %459 : vector<1x1x16x128xf32> to vector<16x128xf32>
    %461 = vector.extract_strided_slice %423 {offsets = [90, 0], sizes = [16, 128], strides = [1, 1]} : vector<288x128xf32> to vector<16x128xf32>
    %462 = arith.addf %460, %461 : vector<16x128xf32>
    %c0_397 = arith.constant 0 : index
    %c5_398 = arith.constant 5 : index
    %c0_399 = arith.constant 0 : index
    %c0_400 = arith.constant 0 : index
    %463 = vector.load %arg7[%c0_397, %c5_398, %c0_399, %c0_400] : memref<1x16x16x128xf32, #tpu.memory_space<vmem>>, vector<1x1x16x128xf32>
    %464 = vector.shape_cast %463 : vector<1x1x16x128xf32> to vector<16x128xf32>
    %465 = vector.shape_cast %462 : vector<16x128xf32> to vector<1x1x16x128xf32>
    tpu.vector_store %arg7[%c0_397, %c5_398, %c0_399, %c0_400], %465 {strides = array<i32>} : memref<1x16x16x128xf32, #tpu.memory_space<vmem>>, vector<1x1x16x128xf32>,
    %c0_401 = arith.constant 0 : index
    %c6_402 = arith.constant 6 : index
    %c0_403 = arith.constant 0 : index
    %c0_404 = arith.constant 0 : index
    %466 = vector.load %arg1[%c0_401, %c6_402, %c0_403, %c0_404] : memref<1x16x16x128xf32, #tpu.memory_space<vmem>>, vector<1x1x16x128xf32>
    %467 = vector.shape_cast %466 : vector<1x1x16x128xf32> to vector<16x128xf32>
    %468 = vector.extract_strided_slice %423 {offsets = [108, 0], sizes = [16, 128], strides = [1, 1]} : vector<288x128xf32> to vector<16x128xf32>
    %469 = arith.addf %467, %468 : vector<16x128xf32>
    %c0_405 = arith.constant 0 : index
    %c6_406 = arith.constant 6 : index
    %c0_407 = arith.constant 0 : index
    %c0_408 = arith.constant 0 : index
    %470 = vector.load %arg7[%c0_405, %c6_406, %c0_407, %c0_408] : memref<1x16x16x128xf32, #tpu.memory_space<vmem>>, vector<1x1x16x128xf32>
    %471 = vector.shape_cast %470 : vector<1x1x16x128xf32> to vector<16x128xf32>
    %472 = vector.shape_cast %469 : vector<16x128xf32> to vector<1x1x16x128xf32>
    tpu.vector_store %arg7[%c0_405, %c6_406, %c0_407, %c0_408], %472 {strides = array<i32>} : memref<1x16x16x128xf32, #tpu.memory_space<vmem>>, vector<1x1x16x128xf32>,
    %c0_409 = arith.constant 0 : index
    %c7_410 = arith.constant 7 : index
    %c0_411 = arith.constant 0 : index
    %c0_412 = arith.constant 0 : index
    %473 = vector.load %arg1[%c0_409, %c7_410, %c0_411, %c0_412] : memref<1x16x16x128xf32, #tpu.memory_space<vmem>>, vector<1x1x16x128xf32>
    %474 = vector.shape_cast %473 : vector<1x1x16x128xf32> to vector<16x128xf32>
    %475 = vector.extract_strided_slice %423 {offsets = [126, 0], sizes = [16, 128], strides = [1, 1]} : vector<288x128xf32> to vector<16x128xf32>
    %476 = arith.addf %474, %475 : vector<16x128xf32>
    %c0_413 = arith.constant 0 : index
    %c7_414 = arith.constant 7 : index
    %c0_415 = arith.constant 0 : index
    %c0_416 = arith.constant 0 : index
    %477 = vector.load %arg7[%c0_413, %c7_414, %c0_415, %c0_416] : memref<1x16x16x128xf32, #tpu.memory_space<vmem>>, vector<1x1x16x128xf32>
    %478 = vector.shape_cast %477 : vector<1x1x16x128xf32> to vector<16x128xf32>
    %479 = vector.shape_cast %476 : vector<16x128xf32> to vector<1x1x16x128xf32>
    tpu.vector_store %arg7[%c0_413, %c7_414, %c0_415, %c0_416], %479 {strides = array<i32>} : memref<1x16x16x128xf32, #tpu.memory_space<vmem>>, vector<1x1x16x128xf32>,
    %c0_417 = arith.constant 0 : index
    %c8_418 = arith.constant 8 : index
    %c0_419 = arith.constant 0 : index
    %c0_420 = arith.constant 0 : index
    %480 = vector.load %arg1[%c0_417, %c8_418, %c0_419, %c0_420] : memref<1x16x16x128xf32, #tpu.memory_space<vmem>>, vector<1x1x16x128xf32>
    %481 = vector.shape_cast %480 : vector<1x1x16x128xf32> to vector<16x128xf32>
    %482 = vector.extract_strided_slice %423 {offsets = [144, 0], sizes = [16, 128], strides = [1, 1]} : vector<288x128xf32> to vector<16x128xf32>
    %483 = arith.addf %481, %482 : vector<16x128xf32>
    %c0_421 = arith.constant 0 : index
    %c8_422 = arith.constant 8 : index
    %c0_423 = arith.constant 0 : index
    %c0_424 = arith.constant 0 : index
    %484 = vector.load %arg7[%c0_421, %c8_422, %c0_423, %c0_424] : memref<1x16x16x128xf32, #tpu.memory_space<vmem>>, vector<1x1x16x128xf32>
    %485 = vector.shape_cast %484 : vector<1x1x16x128xf32> to vector<16x128xf32>
    %486 = vector.shape_cast %483 : vector<16x128xf32> to vector<1x1x16x128xf32>
    tpu.vector_store %arg7[%c0_421, %c8_422, %c0_423, %c0_424], %486 {strides = array<i32>} : memref<1x16x16x128xf32, #tpu.memory_space<vmem>>, vector<1x1x16x128xf32>,
    %c0_425 = arith.constant 0 : index
    %c9_426 = arith.constant 9 : index
    %c0_427 = arith.constant 0 : index
    %c0_428 = arith.constant 0 : index
    %487 = vector.load %arg1[%c0_425, %c9_426, %c0_427, %c0_428] : memref<1x16x16x128xf32, #tpu.memory_space<vmem>>, vector<1x1x16x128xf32>
    %488 = vector.shape_cast %487 : vector<1x1x16x128xf32> to vector<16x128xf32>
    %489 = vector.extract_strided_slice %423 {offsets = [162, 0], sizes = [16, 128], strides = [1, 1]} : vector<288x128xf32> to vector<16x128xf32>
    %490 = arith.addf %488, %489 : vector<16x128xf32>
    %c0_429 = arith.constant 0 : index
    %c9_430 = arith.constant 9 : index
    %c0_431 = arith.constant 0 : index
    %c0_432 = arith.constant 0 : index
    %491 = vector.load %arg7[%c0_429, %c9_430, %c0_431, %c0_432] : memref<1x16x16x128xf32, #tpu.memory_space<vmem>>, vector<1x1x16x128xf32>
    %492 = vector.shape_cast %491 : vector<1x1x16x128xf32> to vector<16x128xf32>
    %493 = vector.shape_cast %490 : vector<16x128xf32> to vector<1x1x16x128xf32>
    tpu.vector_store %arg7[%c0_429, %c9_430, %c0_431, %c0_432], %493 {strides = array<i32>} : memref<1x16x16x128xf32, #tpu.memory_space<vmem>>, vector<1x1x16x128xf32>,
    %c0_433 = arith.constant 0 : index
    %c10_434 = arith.constant 10 : index
    %c0_435 = arith.constant 0 : index
    %c0_436 = arith.constant 0 : index
    %494 = vector.load %arg1[%c0_433, %c10_434, %c0_435, %c0_436] : memref<1x16x16x128xf32, #tpu.memory_space<vmem>>, vector<1x1x16x128xf32>
    %495 = vector.shape_cast %494 : vector<1x1x16x128xf32> to vector<16x128xf32>
    %496 = vector.extract_strided_slice %423 {offsets = [180, 0], sizes = [16, 128], strides = [1, 1]} : vector<288x128xf32> to vector<16x128xf32>
    %497 = arith.addf %495, %496 : vector<16x128xf32>
    %c0_437 = arith.constant 0 : index
    %c10_438 = arith.constant 10 : index
    %c0_439 = arith.constant 0 : index
    %c0_440 = arith.constant 0 : index
    %498 = vector.load %arg7[%c0_437, %c10_438, %c0_439, %c0_440] : memref<1x16x16x128xf32, #tpu.memory_space<vmem>>, vector<1x1x16x128xf32>
    %499 = vector.shape_cast %498 : vector<1x1x16x128xf32> to vector<16x128xf32>
    %500 = vector.shape_cast %497 : vector<16x128xf32> to vector<1x1x16x128xf32>
    tpu.vector_store %arg7[%c0_437, %c10_438, %c0_439, %c0_440], %500 {strides = array<i32>} : memref<1x16x16x128xf32, #tpu.memory_space<vmem>>, vector<1x1x16x128xf32>,
    %c0_441 = arith.constant 0 : index
    %c11_442 = arith.constant 11 : index
    %c0_443 = arith.constant 0 : index
    %c0_444 = arith.constant 0 : index
    %501 = vector.load %arg1[%c0_441, %c11_442, %c0_443, %c0_444] : memref<1x16x16x128xf32, #tpu.memory_space<vmem>>, vector<1x1x16x128xf32>
    %502 = vector.shape_cast %501 : vector<1x1x16x128xf32> to vector<16x128xf32>
    %503 = vector.extract_strided_slice %423 {offsets = [198, 0], sizes = [16, 128], strides = [1, 1]} : vector<288x128xf32> to vector<16x128xf32>
    %504 = arith.addf %502, %503 : vector<16x128xf32>
    %c0_445 = arith.constant 0 : index
    %c11_446 = arith.constant 11 : index
    %c0_447 = arith.constant 0 : index
    %c0_448 = arith.constant 0 : index
    %505 = vector.load %arg7[%c0_445, %c11_446, %c0_447, %c0_448] : memref<1x16x16x128xf32, #tpu.memory_space<vmem>>, vector<1x1x16x128xf32>
    %506 = vector.shape_cast %505 : vector<1x1x16x128xf32> to vector<16x128xf32>
    %507 = vector.shape_cast %504 : vector<16x128xf32> to vector<1x1x16x128xf32>
    tpu.vector_store %arg7[%c0_445, %c11_446, %c0_447, %c0_448], %507 {strides = array<i32>} : memref<1x16x16x128xf32, #tpu.memory_space<vmem>>, vector<1x1x16x128xf32>,
    %c0_449 = arith.constant 0 : index
    %c12_450 = arith.constant 12 : index
    %c0_451 = arith.constant 0 : index
    %c0_452 = arith.constant 0 : index
    %508 = vector.load %arg1[%c0_449, %c12_450, %c0_451, %c0_452] : memref<1x16x16x128xf32, #tpu.memory_space<vmem>>, vector<1x1x16x128xf32>
    %509 = vector.shape_cast %508 : vector<1x1x16x128xf32> to vector<16x128xf32>
    %510 = vector.extract_strided_slice %423 {offsets = [216, 0], sizes = [16, 128], strides = [1, 1]} : vector<288x128xf32> to vector<16x128xf32>
    %511 = arith.addf %509, %510 : vector<16x128xf32>
    %c0_453 = arith.constant 0 : index
    %c12_454 = arith.constant 12 : index
    %c0_455 = arith.constant 0 : index
    %c0_456 = arith.constant 0 : index
    %512 = vector.load %arg7[%c0_453, %c12_454, %c0_455, %c0_456] : memref<1x16x16x128xf32, #tpu.memory_space<vmem>>, vector<1x1x16x128xf32>
    %513 = vector.shape_cast %512 : vector<1x1x16x128xf32> to vector<16x128xf32>
    %514 = vector.shape_cast %511 : vector<16x128xf32> to vector<1x1x16x128xf32>
    tpu.vector_store %arg7[%c0_453, %c12_454, %c0_455, %c0_456], %514 {strides = array<i32>} : memref<1x16x16x128xf32, #tpu.memory_space<vmem>>, vector<1x1x16x128xf32>,
    %c0_457 = arith.constant 0 : index
    %c13_458 = arith.constant 13 : index
    %c0_459 = arith.constant 0 : index
    %c0_460 = arith.constant 0 : index
    %515 = vector.load %arg1[%c0_457, %c13_458, %c0_459, %c0_460] : memref<1x16x16x128xf32, #tpu.memory_space<vmem>>, vector<1x1x16x128xf32>
    %516 = vector.shape_cast %515 : vector<1x1x16x128xf32> to vector<16x128xf32>
    %517 = vector.extract_strided_slice %423 {offsets = [234, 0], sizes = [16, 128], strides = [1, 1]} : vector<288x128xf32> to vector<16x128xf32>
    %518 = arith.addf %516, %517 : vector<16x128xf32>
    %c0_461 = arith.constant 0 : index
    %c13_462 = arith.constant 13 : index
    %c0_463 = arith.constant 0 : index
    %c0_464 = arith.constant 0 : index
    %519 = vector.load %arg7[%c0_461, %c13_462, %c0_463, %c0_464] : memref<1x16x16x128xf32, #tpu.memory_space<vmem>>, vector<1x1x16x128xf32>
    %520 = vector.shape_cast %519 : vector<1x1x16x128xf32> to vector<16x128xf32>
    %521 = vector.shape_cast %518 : vector<16x128xf32> to vector<1x1x16x128xf32>
    tpu.vector_store %arg7[%c0_461, %c13_462, %c0_463, %c0_464], %521 {strides = array<i32>} : memref<1x16x16x128xf32, #tpu.memory_space<vmem>>, vector<1x1x16x128xf32>,
    %c0_465 = arith.constant 0 : index
    %c14_466 = arith.constant 14 : index
    %c0_467 = arith.constant 0 : index
    %c0_468 = arith.constant 0 : index
    %522 = vector.load %arg1[%c0_465, %c14_466, %c0_467, %c0_468] : memref<1x16x16x128xf32, #tpu.memory_space<vmem>>, vector<1x1x16x128xf32>
    %523 = vector.shape_cast %522 : vector<1x1x16x128xf32> to vector<16x128xf32>
    %524 = vector.extract_strided_slice %423 {offsets = [252, 0], sizes = [16, 128], strides = [1, 1]} : vector<288x128xf32> to vector<16x128xf32>
    %525 = arith.addf %523, %524 : vector<16x128xf32>
    %c0_469 = arith.constant 0 : index
    %c14_470 = arith.constant 14 : index
    %c0_471 = arith.constant 0 : index
    %c0_472 = arith.constant 0 : index
    %526 = vector.load %arg7[%c0_469, %c14_470, %c0_471, %c0_472] : memref<1x16x16x128xf32, #tpu.memory_space<vmem>>, vector<1x1x16x128xf32>
    %527 = vector.shape_cast %526 : vector<1x1x16x128xf32> to vector<16x128xf32>
    %528 = vector.shape_cast %525 : vector<16x128xf32> to vector<1x1x16x128xf32>
    tpu.vector_store %arg7[%c0_469, %c14_470, %c0_471, %c0_472], %528 {strides = array<i32>} : memref<1x16x16x128xf32, #tpu.memory_space<vmem>>, vector<1x1x16x128xf32>,
    %c0_473 = arith.constant 0 : index
    %c15_474 = arith.constant 15 : index
    %c0_475 = arith.constant 0 : index
    %c0_476 = arith.constant 0 : index
    %529 = vector.load %arg1[%c0_473, %c15_474, %c0_475, %c0_476] : memref<1x16x16x128xf32, #tpu.memory_space<vmem>>, vector<1x1x16x128xf32>
    %530 = vector.shape_cast %529 : vector<1x1x16x128xf32> to vector<16x128xf32>
    %531 = vector.extract_strided_slice %423 {offsets = [270, 0], sizes = [16, 128], strides = [1, 1]} : vector<288x128xf32> to vector<16x128xf32>
    %532 = arith.addf %530, %531 : vector<16x128xf32>
    %c0_477 = arith.constant 0 : index
    %c15_478 = arith.constant 15 : index
    %c0_479 = arith.constant 0 : index
    %c0_480 = arith.constant 0 : index
    %533 = vector.load %arg7[%c0_477, %c15_478, %c0_479, %c0_480] : memref<1x16x16x128xf32, #tpu.memory_space<vmem>>, vector<1x1x16x128xf32>
    %534 = vector.shape_cast %533 : vector<1x1x16x128xf32> to vector<16x128xf32>
    %535 = vector.shape_cast %532 : vector<16x128xf32> to vector<1x1x16x128xf32>
    tpu.vector_store %arg7[%c0_477, %c15_478, %c0_479, %c0_480], %535 {strides = array<i32>} : memref<1x16x16x128xf32, #tpu.memory_space<vmem>>, vector<1x1x16x128xf32>,
    return
  }
  func.func @transform_0(%arg0: i32) -> (i32, i32, i32, i32) {
    %c0_i32 = arith.constant 0 : i32
    %c0_i32_0 = arith.constant 0 : i32
    %c0_i32_1 = arith.constant 0 : i32
    %c0_i32_2 = arith.constant 0 : i32
    return %arg0, %c0_i32, %c0_i32_0, %c0_i32_1 : i32, i32, i32, i32
  }
  func.func @transform_1(%arg0: i32) -> (i32, i32) {
    %c0_i32 = arith.constant 0 : i32
    %c0_i32_0 = arith.constant 0 : i32
    %c0_i32_1 = arith.constant 0 : i32
    return %c0_i32, %c0_i32_0 : i32, i32
  }
  func.func @transform_2(%arg0: i32) -> (i32, i32, i32) {
    %c0_i32 = arith.constant 0 : i32
    %c0_i32_0 = arith.constant 0 : i32
    %c0_i32_1 = arith.constant 0 : i32
    %c0_i32_2 = arith.constant 0 : i32
    return %c0_i32, %c0_i32_0, %c0_i32_1 : i32, i32, i32
  }
  func.func @transform_3(%arg0: i32) -> (i32, i32) {
    %c0_i32 = arith.constant 0 : i32
    %c0_i32_0 = arith.constant 0 : i32
    %c0_i32_1 = arith.constant 0 : i32
    return %c0_i32, %c0_i32_0 : i32, i32
  }
  func.func @transform_4(%arg0: i32) -> (i32, i32, i32) {
    %c0_i32 = arith.constant 0 : i32
    %c0_i32_0 = arith.constant 0 : i32
    %c0_i32_1 = arith.constant 0 : i32
    %c0_i32_2 = arith.constant 0 : i32
    return %c0_i32, %c0_i32_0, %c0_i32_1 : i32, i32, i32
  }
  func.func @transform_5(%arg0: i32) -> (i32, i32) {
    %c0_i32 = arith.constant 0 : i32
    %c0_i32_0 = arith.constant 0 : i32
    %c0_i32_1 = arith.constant 0 : i32
    return %c0_i32, %c0_i32_0 : i32, i32
  }
  func.func @transform_6(%arg0: i32) -> (i32, i32, i32, i32) {
    %c0_i32 = arith.constant 0 : i32
    %c0_i32_0 = arith.constant 0 : i32
    %c0_i32_1 = arith.constant 0 : i32
    %c0_i32_2 = arith.constant 0 : i32
    return %arg0, %c0_i32, %c0_i32_0, %c0_i32_1 : i32, i32, i32, i32
  }
}

</mosaic_0001>

<bundles_post_ra>
// kernel: resnet_block_forward.1
= control target key start
LH: loop header
LB: loop body
LE: loop exit
PB: predicated region body
PF: predicated region fallthrough
CT: control target
= control target key end

     0   :  { %s13759_s21 = smov 0   ;;  %s17636_s0 = inlined_call_operand.vmem [shape: f32[2,16,16,128], index: 0, kind: input, shape index: {}]   ;;  %s17637_s1 = inlined_call_operand.vmem [shape: f32[288,1], index: 1, kind: input, shape index: {}]   ;;  %s17638_s2 = inlined_call_operand.vmem [shape: bf16[9,128,128], index: 2, kind: input, shape index: {}]   ;;  %s17639_s3 = inlined_call_operand.vmem [shape: f32[1,128], index: 3, kind: input, shape index: {}]   ;;  %s17640_s4 = inlined_call_operand.vmem [shape: bf16[9,128,128], index: 4, kind: input, shape index: {}]   ;;  %s17641_s5 = inlined_call_operand.vmem [shape: f32[1,128], index: 5, kind: input, shape index: {}]   ;;  %s17642_s6 = inlined_call_operand.vmem [shape: f32[2,16,16,128], index: 6, kind: output, shape index: {}]  }
   0x1 LB: > { %s10594_s22 = sadd.s32 4294967295, %s13721_s21   ;;  %p10598_p0 = scmp.ge.s32.totalorder %s13721_s21, 1  ;;  %s13721_s21 = sphi %s13759_s21, %s16_s21  }
   0x2   : > { %p212_p1 = scmp.lt.s32.totalorder %s13721_s21, 3 }
   0x4   : > { %p213_p2 = pnand %p10598_p0, %p212_p1 }
   0x6   : > { %216 = sbr.rel (%p213_p2) target bundleno = 2063 (0x80f), region = 44 }
   0xd   : > { %v13412_v0 = vld [vmem:[%s17638_s2 + $0x40] sm:$0xff]   ;;  %p242_p3 = scmp.lt.s32.totalorder %s10594_s22, 1  ;;  %v13413_v1 = vld [vmem:[%s17638_s2 + $0x48] sm:$0xff]   ;;  %v13414_v2 = vld [vmem:[%s17638_s2 + $0x50] sm:$0xff]   ;;  %vm17644_vm0 = vcmask 1043456   ;;  %vm366_vm1 = vcmask 1040384  }
   0xe   : > { %11889 = vmatprep.subr.bf16.mxu0 %v13412_v0  ;;  %v13415_v3 = vld [vmem:[%s17638_s2 + $0x58] sm:$0xff]   ;;  %vm417_vm2 = vcmask 1043457   ;;  %vm336_vm3 = vsmask.f32 256  ;;  %vm337_vm4 = vsmask.f32 4368 }
   0xf   : > { %s18357_s22 = smov (!%p242_p3, %s10594_s22), 1  ;;  %11890 = vmatpush3.bf16.msra.mxu0 %v13412_v0  ;;  %vm360_vm5 = vsmask.f32 7938  ;;  %vm392_vm6 = vsmask.f32 1280  ;;  %v13416_v10 = vld [vmem:[%s17638_s2 + $0x60] sm:$0xff]   ;;  %vm13809_vm7 = vmor %vm336_vm3, %vm337_vm4 }
  0x10   : > { %11891 = vmatprep.subr.bf16.mxu0 %v13413_v1  ;;  %s11339_s29 = sshll.u32 %s18357_s22, 8  ;;  %v362_v16 = vld [vmem:[#allocation2] sm:$0xf]  ;;  %vm393_vm8 = vsmask.f32 5392  ;;  %vm13816_vm10 = vmand %vm17644_vm0, %vm360_vm5  ;;  %vm17643_vm11 = vcmask 1041408  }
  0x11   : > { %s13784_s8 = scalar_lea.vmem %s17636_s0, %s11339_s29  ;;  %vm17645_vm9 = vsmask.f32 7942  ;;  %vm13823_vm12 = vmand %vm366_vm1, %vm336_vm3  ;;  %v17797_v23 = vmov 0  ;;  %v368_v24 = vld [vmem:[#allocation2 + $0x8] sm:$0x1]  ;;  %vm431_vm13 = vcmask 1041409   ;;  %s17500_s11 = scalar_lea.vmem %s17642_s6, %s11339_s29 }
  0x12   : > { %v10603_v4 = vld [vmem:[%s13784_s8 + $0x10] sm:$0xff]  ;;  %v10604_v5 = vld [vmem:[%s13784_s8 + $0x18] sm:$0xff]  ;;  %v384_v8 = vld [vmem:[%s13784_s8] sm:$0xff]  ;;  %v17798_v23 = vsel %vm13823_vm12, 4294967295, %v17797_v23  ;;  %v17800_v41 = vmov 0  ;;  %v17803_v46 = vmov 0 }
  0x13   : > { %11892 = vmatpush3.bf16.msra.mxu0 %v13413_v1  ;;  %v13791_v6 = vpack.c.bf16 %v10603_v4, %v10603_v4  ;;  %v13793_v7 = vpack.c.bf16 %v10604_v5, %v10604_v5  ;;  %v385_v9 = vld [vmem:[%s13784_s8 + $0x8] sm:$0xff]  ;;  %v11343_v17 = vpack.c.bf16 %v384_v8, %v384_v8  ;;  %17799 = vst [vmem:[#allocation4_spill] sm:$0xff] %v17798_v23  ;;  %vm13839_vm14 = vmand %vm417_vm2, %vm17645_vm9  ;;  %v426_v44 = vld [vmem:[#allocation2 + $0x10] sm:$0x3]  ;;  %vm17647_vm2 = vsmask.f32 2304 }
  0x14   : > { %11893 = vmatprep.subr.bf16.mxu0 %v13414_v2  ;;  %v11344_v18 = vpack.c.bf16 %v385_v9, %v385_v9  ;;  %v13417_v33 = vld [vmem:[%s17638_s2 + $0x68] sm:$0xff]   ;;  %v17801_v41 = vsel %vm13839_vm14, 4294967295, %v17800_v41  ;;  %v13848_v45 = vld [vmem:[%s17638_s2 + $0x70] sm:$0xff]   ;;  %vm13852_vm15 = vmor %vm392_vm6, %vm393_vm8  ;;  %v17805_v51 = vmov 0  ;;  %vm452_vm4 = vsmask.f32 6416 }
  0x15   : > { %v13801_v11 = vshrl.u32 %v13791_v6, 16  ;;  %v343_v12 = vshll.u32 %v13791_v6, 16  ;;  %v348_v13 = vshrl.u32 %v13793_v7, 16  ;;  %v13806_v14 = vshll.u32 %v13793_v7, 16  ;;  %17802 = vst [vmem:[#allocation5_spill] sm:$0xff] %v17801_v41  ;;  %vm13860_vm3 = vmand %vm17643_vm11, %vm392_vm6  ;;  %v10617_v55 = vld [vmem:[%s13784_s8 + $0x20] sm:$0xff] }
  0x16   : > { %v396_v25 = vshrl.u32 %v11343_v17, 16  ;;  %v399_v26 = vshll.u32 %v11343_v17, 16  ;;  %v405_v27 = vshrl.u32 %v11344_v18, 16  ;;  %v408_v28 = vshll.u32 %v11344_v18, 16  ;;  %v420_v42 = vld [vmem:[#allocation2 + $0x8] sm:$0xe]  ;;  %vm13869_vm8 = vmand %vm366_vm1, %vm360_vm5 }
  0x17   : > { %11894 = vmatpush3.bf16.msra.mxu0 %v13414_v2  ;;  %v342_v19 = vrot.slane %v13801_v11, 7  ;;  %v350_v20 = vrot.slane %v348_v13, 7  ;;  %v10608_v22 = vrot.slane %v13806_v14, 11  ;;  %v17804_v46 = vsel %vm13852_vm15, 4294967295, %v17803_v46  ;;  %v479_v50 = vld [vmem:[#allocation2 + $0x10] sm:$0xc]  ;;  %vm13878_vm11 = vmor %vm17647_vm2, %vm452_vm4 }
  0x18   : > { %11895 = vmatprep.subr.bf16.mxu0 %v13415_v3  ;;  %v398_v34 = vrot.slane %v396_v25, 6  ;;  %v401_v35 = vrot.slane %v399_v26, 7  ;;  %v407_v36 = vrot.slane %v405_v27, 6  ;;  %v410_v37 = vrot.slane %v408_v28, 7  ;;  %v10618_v56 = vld [vmem:[%s13784_s8 + $0x28] sm:$0xff]  ;;  %v10621_v62 = vld [vmem:[%s13784_s8 + $0x30] sm:$0xff] }
  0x19   : > { %v345_v29 = vor.u32 %v343_v12, %v342_v19  ;;  %v346_v30 = vrot.slane %v342_v19, 4  ;;  %v353_v31 = vor.u32 %v13806_v14, %v350_v20  ;;  %v355_v32 = vrot.slane %v350_v20, 4  ;;  %v10622_v6 = vld [vmem:[%s13784_s8 + $0x38] sm:$0xff]  ;;  %v10627_v7 = vld [vmem:[%s13784_s8 + $0x40] sm:$0xff] }
  0x1a   : > { %v13843_v43 = vrot.slane %v396_v25, 7  ;;  %v402_v47 = vor.u32 %v401_v35, %v398_v34  ;;  %v411_v48 = vor.u32 %v410_v37, %v407_v36  ;;  %v13856_v49 = vrot.slane %v408_v28, 10  ;;  %v539_v35 = vld [vmem:[#allocation2 + $0x18] sm:$0x8]  ;;  %v10632_v36 = vld [vmem:[%s13784_s8 + $0x50] sm:$0xff] }
  0x1b   : > { %11896 = vmatpush3.bf16.msra.mxu0 %v13415_v3  ;;  %v354_v38 = vsel %vm13809_vm7, %v346_v30, %v353_v31  ;;  %v363_v39 = vsel %vm13816_vm10, %v345_v29, %v362_v16  ;;  %v369_v40 = vsel %vm13823_vm12, %v355_v32, %v368_v24  ;;  %v17806_v51 = vsel %vm13860_vm3, 4294967295, %v17805_v51  ;;  %v13419_v16 = vld [vmem:[%s17638_s2 + $0x78] sm:$0xff]   ;;  %v10628_v29 = vld [vmem:[%s13784_s8 + $0x48] sm:$0xff] }
  0x1c   : > { %11897 = vmatprep.subr.bf16.mxu0 %v13416_v10  ;;  %364 = vst [vmem:[#allocation2] sm:$0xf] %v363_v39  ;;  %365 = vst [vmem:[#allocation2 + $0x4] sm:$0xf] %v354_v38  ;;  %v457_v52 = vrot.slane %v13801_v11, 5  ;;  %v460_v53 = vrot.slane %v343_v12, 6  ;;  %v421_v60 = vsel %vm13839_vm14, %v402_v47, %v420_v42  ;;  %v11347_v18 = vpack.c.bf16 %v10617_v55, %v10617_v55 }
  0x1d   : > { %370 = vst [vmem:[#allocation2 + $0x8] sm:$0x1] %v369_v40  ;;  %17807 = vst [vmem:[#allocation6_spill] sm:$0xff] %v17806_v51  ;;  %v466_v54 = vrot.slane %v348_v13, 5  ;;  %v17808_v57 = vmov 0  ;;  %v403_v58 = vrot.slane %v402_v47, 4  ;;  %v13906_v19 = vpack.c.bf16 %v10618_v56, %v10618_v56 }
  0x1e   : > { %v17809_v57 = vsel %vm13869_vm8, 4294967295, %v17808_v57  ;;  %v413_v59 = vrot.slane %v411_v48, 4  ;;  %v469_v61 = vrot.slane %v13806_v14, 6  ;;  %422 = vst [vmem:[#allocation2 + $0x8] sm:$0xe] %v421_v60  ;;  %v17811_v63 = vmov 0 }
  0x1f   : > { %11898 = vmatpush3.bf16.msra.mxu0 %v13416_v10  ;;  %17810 = vst [vmem:[#allocation7_spill] sm:$0xff] %v17809_v57  ;;  %v17812_v63 = vsel %vm13878_vm11, 4294967295, %v17811_v63  ;;  %v461_v0 = vor.u32 %v460_v53, %v457_v52  ;;  %vm476_vm1 = vcmask 1043458   ;;  %vm17646_vm5 = vsmask.f32 7946  ;;  %v10633_v55 = vld [vmem:[%s13784_s8 + $0x58] sm:$0xff] }
  0x20   : > { %11899 = vmatprep.subr.bf16.mxu0 %v13417_v33  ;;  %vm483_vm0 = vcmask 1042432   ;;  %v412_v1 = vsel %vm13852_vm15, %v403_v58, %v411_v48  ;;  %v427_v2 = vsel %vm13860_vm3, %v413_v59, %v426_v44  ;;  %v470_v3 = vor.u32 %v469_v61, %v466_v54  ;;  %vm13887_vm9 = vmand %vm476_vm1, %vm17646_vm5  ;;  %v485_v12 = vld [vmem:[#allocation2 + $0x18] sm:$0x7] }
  0x21   : > { %v17813_v4 = vmov 0  ;;  %v488_v5 = vrot.slane %v13801_v11, 6  ;;  %423 = vst [vmem:[#allocation2 + $0xc] sm:$0xf] %v412_v1  ;;  %428 = vst [vmem:[#allocation2 + $0x10] sm:$0x3] %v427_v2  ;;  %v480_v9 = vsel %vm13887_vm9, %v461_v0, %v479_v50  ;;  %v13910_v26 = vpack.c.bf16 %v10621_v62, %v10621_v62 }
  0x22   : > { %v17814_v4 = vsel %vm13887_vm9, 4294967295, %v17813_v4  ;;  %v462_v8 = vrot.slane %v461_v0, 4  ;;  %vm13897_vm4 = vmand %vm483_vm0, %vm17647_vm2  ;;  %v17816_v10 = vmov 0  ;;  %v10616_v13 = vrot.slane %v13806_v14, 9  ;;  %481 = vst [vmem:[#allocation2 + $0x10] sm:$0xc] %v480_v9 }
  0x23   : > { %17815 = vst [vmem:[#allocation8_spill] sm:$0xff] %v17814_v4  ;;  %11900 = vmatpush3.bf16.msra.mxu0 %v13417_v33  ;;  %v17817_v10 = vsel %vm13897_vm4, 4294967295, %v17816_v10  ;;  %v472_v17 = vrot.slane %v470_v3, 4  ;;  %v374_v20 = vld [vmem:[#allocation2] sm:$0x1]  ;;  %v13912_v27 = vpack.c.bf16 %v10622_v6, %v10622_v6  ;;  %v13914_v28 = vpack.c.bf16 %v10627_v7, %v10627_v7  ;;  %vm13926_vm0 = vmand %vm431_vm13, %vm392_vm6 }
  0x24   : > { %17818 = vst [vmem:[#allocation9_spill] sm:$0xff] %v17817_v10  ;;  %11901 = vmatprep.subr.bf16.mxu0 %v13848_v45  ;;  %v381_v24 = vld [vmem:[#allocation2 + $0x8] sm:$0x1]  ;;  %v471_v25 = vsel %vm13878_vm11, %v462_v8, %v470_v3  ;;  %v375_v30 = vsel %vm13823_vm12, %v13801_v11, %v374_v20  ;;  %v17819_v32 = vmov 0  ;;  %v13933_v33 = vld [vmem:[%s17638_s2] sm:$0xff]   ;;  %v515_v37 = vshll.u32 %v11347_v18, 16 }
  0x25   : > { %v382_v31 = vsel %vm13869_vm8, %v10608_v22, %v381_v24  ;;  %v17820_v32 = vsel %vm13926_vm0, 4294967295, %v17819_v32  ;;  %482 = vst [vmem:[#allocation2 + $0x14] sm:$0xf] %v471_v25  ;;  %v486_v34 = vsel %vm13897_vm4, %v472_v17, %v485_v12  ;;  %376 = vst [vmem:[#allocation2] sm:$0x1] %v375_v30  ;;  %v17823_v22 = vmov 0 }
  0x26   : > { %17821 = vst [vmem:[#allocation10_spill] sm:$0xff] %v17820_v32  ;;  %383 = vst [vmem:[#allocation2 + $0x8] sm:$0x1] %v382_v31  ;;  %vm17822_vm6 = vsmask.f32 7942  ;;  %v518_v38 = vshrl.u32 %v11347_v18, 16  ;;  %v13954_v47 = vpack.c.bf16 %v10628_v29, %v10628_v29  ;;  %v13969_v60 = vpack.c.bf16 %v10632_v36, %v10632_v36 }
  0x27   : > { %11902 = vmatpush3.bf16.msra.mxu0 %v13848_v45  ;;  %vm13941_vm1 = vmand %vm431_vm13, %vm17822_vm6  ;;  %487 = vst [vmem:[#allocation2 + $0x18] sm:$0x7] %v486_v34  ;;  %v524_v39 = vshll.u32 %v13906_v19, 16  ;;  %vm17654_vm2 = vcmask 1043459   ;;  %v433_v40 = vld [vmem:[#allocation2 + $0x8] sm:$0x2] }
  0x28   : > { %v17824_v22 = vsel %vm13941_vm1, 4294967295, %v17823_v22  ;;  %11903 = vmatprep.subr.bf16.mxu0 %v13419_v16  ;;  %vm17826_vm5 = vsmask.f32 2304  ;;  %vm17827_vm4 = vcmask 1042434   ;;  %v17828_v42 = vmov 0  ;;  %v10637_v8 = vld [vmem:[%s13784_s8 + $0x60] sm:$0xff] }
  0x29   : > { %17825 = vst [vmem:[#allocation11_spill] sm:$0xff] %v17824_v22  ;;  %vm13948_vm11 = vmand %vm17827_vm4, %vm17826_vm5  ;;  %vm537_vm9 = vsmask.f32 7950  ;;  %v528_v44 = vshrl.u32 %v13906_v19, 16  ;;  %v567_v45 = vshrl.u32 %v13910_v26, 16  ;;  %v434_v48 = vsel %vm13926_vm0, %v13843_v43, %v433_v40  ;;  %v10638_v20 = vld [vmem:[%s13784_s8 + $0x68] sm:$0xff] }
  0x2a   : > { %v17829_v42 = vsel %vm13948_vm11, 4294967295, %v17828_v42  ;;  %v517_v50 = vrot.slane %v515_v37, 5  ;;  %v520_v52 = vrot.slane %v518_v38, 4  ;;  %v526_v53 = vrot.slane %v524_v39, 5  ;;  %vm13962_vm13 = vmand %vm17654_vm2, %vm537_vm9  ;;  %435 = vst [vmem:[#allocation2 + $0x8] sm:$0x2] %v434_v48 }
  0x2b   : > { %17830 = vst [vmem:[#allocation12_spill] sm:$0xff] %v17829_v42  ;;  %v17831_v54 = vmov 0  ;;  %v440_v56 = vld [vmem:[#allocation2 + $0x10] sm:$0x2]  ;;  %v13967_v58 = vrot.slane %v518_v38, 5  ;;  %v530_v59 = vrot.slane %v528_v44, 4  ;;  %v13971_v43 = vpack.c.bf16 %v10633_v55, %v10633_v55  ;;  %11904 = vmatpush3.bf16.msra.mxu0 %v13419_v16  ;;  %vm17835_vm5 = vmmov %vm17827_vm4 }
  0x2c   : > { %v17832_v54 = vsel %vm13962_vm13, 4294967295, %v17831_v54  ;;  %v441_v61 = vsel %vm13941_vm1, %v13856_v49, %v440_v56  ;;  %v492_v62 = vld [vmem:[#allocation2 + $0x10] sm:$0x4]  ;;  %vm17834_vm9 = vsmask.f32 7946  ;;  %v17836_v0 = vmov 0  ;;  %11941 = vmatprep.subr.bf16.mxu0 %v13933_v33 }
  0x2d   : > { %17833 = vst [vmem:[#allocation13_spill] sm:$0xff] %v17832_v54  ;;  %vm13978_vm4 = vmand %vm17835_vm5, %vm17834_vm9  ;;  %v521_v1 = vor.u32 %v520_v52, %v517_v50  ;;  %v540_v2 = vsel %vm13962_vm13, %v517_v50, %v539_v35  ;;  %v544_v3 = vld [vmem:[#allocation2 + $0x20] sm:$0xf]  ;;  %v569_v6 = vrot.slane %v567_v45, 7  ;;  %v586_v7 = vld [vmem:[#allocation2 + $0x24] sm:$0xf]  ;;  %v493_v49 = vsel %vm13948_vm11, %v488_v5, %v492_v62 }
  0x2e   : > { %v17837_v0 = vsel %vm13978_vm4, 4294967295, %v17836_v0  ;;  %v1233_v9 = vld [vmem:[#allocation2 + $0x4] sm:$0xf]  ;;  %442 = vst [vmem:[#allocation2 + $0x10] sm:$0x2] %v441_v61  ;;  %v17841_v12 = vmov 0  ;;  %v531_v16 = vor.u32 %v530_v59, %v526_v53  ;;  %v14009_v37 = vpack.c.bf16 %v10637_v8, %v10637_v8 }
  0x2f   : > { %17838 = vst [vmem:[#allocation14_spill] sm:$0xff] %v17837_v0  ;;  %vm17839_vm9 = vsmask.f32 7440  ;;  %vm17840_vm5 = vsmask.f32 3328  ;;  %v570_v17 = vshll.u32 %v13910_v26, 16  ;;  %v14033_v62 = vpack.c.bf16 %v10638_v20, %v10638_v20 }
  0x30   : > { %vm13994_vm2 = vmor %vm17840_vm5, %vm17839_vm9  ;;  %541 = vst [vmem:[#allocation2 + $0x18] sm:$0x8] %v540_v2  ;;  %v575_v18 = vshrl.u32 %v13912_v27, 16  ;;  %v522_v24 = vrot.slane %v521_v1, 4  ;;  %vm17845_vm1 = vcmask 1043456   ;;  %v573_v5 = vrot.slane %v569_v6, 4 }
  0x31   : > { %v17842_v12 = vsel %vm13994_vm2, 4294967295, %v17841_v12  ;;  %494 = vst [vmem:[#allocation2 + $0x10] sm:$0x4] %v493_v49  ;;  %vm17844_vm6 = vmmov %vm17840_vm5  ;;  %v578_v25 = vshll.u32 %v13912_v27, 16  ;;  %v615_v29 = vshrl.u32 %v13914_v28, 16  ;;  %v532_v34 = vrot.slane %v531_v16, 4 }
  0x32   : > { %17843 = vst [vmem:[#allocation15_spill] sm:$0xff] %v17842_v12  ;;  %vm14003_vm0 = vmand %vm17845_vm1, %vm17844_vm6  ;;  %v1232_v30 = vld [vmem:[#allocation2] sm:$0xf]  ;;  %v499_v31 = vld [vmem:[#allocation2 + $0x18] sm:$0x4]  ;;  %v572_v35 = vor.u32 %v570_v17, %v569_v6  ;;  %v577_v36 = vrot.slane %v575_v18, 7  ;;  %v527_v44 = vsel %vm13994_vm2, %v522_v24, %v526_v53 }
  0x33   : > { %v14011_v38 = vcombine.low %v1232_v30, %v1233_v9  ;;  %v500_v40 = vsel %vm13978_vm4, %v10616_v13, %v499_v31  ;;  %v590_v27 = vld [vmem:[#allocation2 + $0x2c] sm:$0x1]  ;;  %v14019_v48 = vrot.slane %v578_v25, 11  ;;  %542 = vst [vmem:[#allocation2 + $0x1c] sm:$0xf] %v527_v44  ;;  %v545_v50 = vsel %vm14003_vm0, %v532_v34, %v544_v3  ;;  %vm17848_vm1 = vmmov %vm17840_vm5 }
  0x34   : > { %501 = vst [vmem:[#allocation2 + $0x18] sm:$0x4] %v500_v40  ;;  %v587_v52 = vsel %vm13816_vm10, %v572_v35, %v586_v7  ;;  %v580_v55 = vor.u32 %v578_v25, %v577_v36  ;;  %v582_v56 = vrot.slane %v577_v36, 4  ;;  %v13421_v14 = vld [vmem:[#allocation2 + $0x8] sm:$0xff]   ;;  %vm17849_vm6 = vcmask 1043459  }
  0x35   : > { %v1397_v59 = vshrl.u32 %v14011_v38, 16  ;;  %v1399_v13 = vshll.u32 %v14011_v38, 16  ;;  %vm14029_vm9 = vmand %vm17849_vm6, %vm17848_vm1  ;;  %v17850_v53 = vmov 0  ;;  %546 = vst [vmem:[#allocation2 + $0x20] sm:$0xf] %v545_v50  ;;  %v617_v61 = vrot.slane %v615_v29, 6 }
  0x36   : > { %v17851_v53 = vsel %vm14029_vm9, 4294967295, %v17850_v53  ;;  %588 = vst [vmem:[#allocation2 + $0x24] sm:$0xf] %v587_v52  ;;  %v581_v1 = vsel %vm13809_vm7, %v573_v5, %v580_v55  ;;  %v591_v2 = vsel %vm13823_vm12, %v582_v56, %v590_v27  ;;  %v618_v3 = vshll.u32 %v13914_v28, 16 }
  0x37   : > { %17852 = vst [vmem:[#allocation16_spill] sm:$0xff] %v17851_v53  ;;  %v14040_v6 = vrot.slane %v615_v29, 7  ;;  %v1401_v7 = vrot.slane %v1399_v13, 1  ;;  %v1404_v8 = vshll.u32 %v13421_v14, 16  ;;  %v1408_v9 = vshrl.u32 %v13421_v14, 16 }
  0x38   : > { %v550_v49 = vld [vmem:[#allocation2 + $0x18] sm:$0x8]  ;;  %589 = vst [vmem:[#allocation2 + $0x28] sm:$0xf] %v581_v1  ;;  %592 = vst [vmem:[#allocation2 + $0x2c] sm:$0x1] %v591_v2  ;;  %vm17855_vm6 = vnez %v17814_v4 }
  0x39   : > { %v624_v16 = vshrl.u32 %v13954_v47, 16  ;;  %v13423_v17 = vld [vmem:[#allocation2 + $0x10] sm:$0xff]   ;;  %v551_v18 = vsel %vm14029_vm9, %v13967_v58, %v550_v49  ;;  %v620_v20 = vrot.slane %v618_v3, 7  ;;  %v627_v24 = vshll.u32 %v13954_v47, 16  ;;  %v636_v29 = vld [vmem:[#allocation2 + $0x2c] sm:$0xe] }
  0x3a   : > { %v664_v28 = vshrl.u32 %v13969_v60, 16  ;;  %v1402_v5 = vor.u32 %v1401_v7, %v1397_v59  ;;  %v1406_v25 = vrot.slane %v1404_v8, 1  ;;  %552 = vst [vmem:[#allocation2 + $0x18] sm:$0x8] %v551_v18  ;;  %v667_v31 = vshll.u32 %v13969_v60, 16  ;;  %v13426_v47 = vld [vmem:[%s17638_s2 + $0x8] sm:$0xff]  }
  0x3b   : > { %v626_v30 = vrot.slane %v624_v16, 6  ;;  %v1412_v34 = vshll.u32 %v13423_v17, 16  ;;  %v1416_v35 = vshrl.u32 %v13423_v17, 16  ;;  %v621_v36 = vor.u32 %v620_v20, %v617_v61  ;;  %v640_v1 = vld [vmem:[#allocation2 + $0x34] sm:$0x3] }
  0x3c   : > { %v629_v40 = vrot.slane %v627_v24, 7  ;;  %vm17853_vm5 = vsmask.f32 7424  ;;  %v1410_v27 = vor.u32 %v1408_v9, %v1406_v25  ;;  %v14053_v58 = vrot.slane %v627_v24, 10  ;;  %v554_v55 = vld [vmem:[#allocation2 + $0x20] sm:$0x8] }
  0x3d   : > { %v1407_v44 = vsel %vm17853_vm5, %v1402_v5, %v1406_v25  ;;  %v666_v50 = vrot.slane %v664_v28, 5  ;;  %v1414_v52 = vrot.slane %v1412_v34, 1  ;;  %v596_v56 = vld [vmem:[#allocation2 + $0x24] sm:$0x1]  ;;  %v637_v60 = vsel %vm13839_vm14, %v621_v36, %v636_v29  ;;  %v685_v3 = vld [vmem:[#allocation2 + $0x34] sm:$0xc]  ;;  %vm17854_vm1 = vmmov %vm17853_vm5 }
  0x3e   : > { %11905 = vmatprep.mubr.bf16.mxu0 %v1407_v44  ;;  %v622_v14 = vrot.slane %v621_v36, 4  ;;  %v630_v59 = vor.u32 %v629_v40, %v626_v30  ;;  %v555_v13 = vsel %vm13962_vm13, %v524_v39, %v554_v55  ;;  %v597_v61 = vsel %vm13823_vm12, %v567_v45, %v596_v56  ;;  %638 = vst [vmem:[#allocation2 + $0x2c] sm:$0xe] %v637_v60  ;;  %v13429_v16 = vld [vmem:[%s17638_s2 + $0x10] sm:$0xff]   ;;  %v734_v30 = vld [vmem:[#allocation2 + $0x3c] sm:$0x8] }
  0x3f   : > { %v669_v2 = vrot.slane %v667_v31, 6  ;;  %v14065_v7 = vrot.slane %v664_v28, 6  ;;  %v1415_v8 = vsel %vm17854_vm1, %v1410_v27, %v1414_v52  ;;  %v1418_v9 = vor.u32 %v1416_v35, %v1414_v52  ;;  %556 = vst [vmem:[#allocation2 + $0x20] sm:$0x8] %v555_v13  ;;  %598 = vst [vmem:[#allocation2 + $0x24] sm:$0x1] %v597_v61 }
  0x40   : > { %v602_v19 = vld [vmem:[#allocation2 + $0x2c] sm:$0x1]  ;;  %v631_v39 = vsel %vm13852_vm15, %v622_v14, %v630_v59  ;;  %v632_v49 = vrot.slane %v630_v59, 4  ;;  %11906 = vmatmul.mubr.bf16.vlgmr.msra.gmra.mrb[0].mxu0 %v1415_v8  ;;  %v673_v17 = vshrl.u32 %v13971_v43, 16  ;;  %v676_v18 = vshll.u32 %v13971_v43, 16  ;;  %v10641_v31 = vld [vmem:[%s13784_s8 + $0x70] sm:$0xff] }
  0x41   : > { %v603_v26 = vsel %vm13869_vm8, %v14019_v48, %v602_v19  ;;  %639 = vst [vmem:[#allocation2 + $0x30] sm:$0xf] %v631_v39  ;;  %v670_v45 = vor.u32 %v669_v2, %v666_v50  ;;  %11942 = vmatpush3.bf16.msra.mxu0 %v13933_v33  ;;  %v13424_v20 = vld [vmem:[#allocation2 + $0x18] sm:$0xff]   ;;  %v713_v48 = vshll.u32 %v14009_v37, 16  ;;  %v716_v28 = vshrl.u32 %v14009_v37, 16 }
  0x42   : > { %604 = vst [vmem:[#allocation2 + $0x2c] sm:$0x1] %v603_v26  ;;  %v641_v24 = vsel %vm13860_vm3, %v632_v49, %v640_v1  ;;  %v722_v5 = vshll.u32 %v14033_v62, 16  ;;  %11943 = vmatprep.subr.bf16.mxu0 %v13426_v47  ;;  %v675_v29 = vrot.slane %v673_v17, 5  ;;  %v678_v33 = vrot.slane %v676_v18, 6  ;;  %v10642_v55 = vld [vmem:[%s13784_s8 + $0x78] sm:$0xff] }
  0x43   : > { %642 = vst [vmem:[#allocation2 + $0x34] sm:$0x3] %v641_v24  ;;  %v686_v25 = vsel %vm17855_vm6, %v670_v45, %v685_v3  ;;  %v671_v43 = vrot.slane %v670_v45, 4  ;;  %v1420_v34 = vshll.u32 %v13424_v20, 16  ;;  %v1424_v35 = vshrl.u32 %v13424_v20, 16  ;;  %v13432_v13 = vld [vmem:[%s17638_s2 + $0x18] sm:$0xff]  }
  0x44   : > { %687 = vst [vmem:[#allocation2 + $0x34] sm:$0xc] %v686_v25  ;;  %v689_v36 = vld [vmem:[#allocation2 + $0x3c] sm:$0x7]  ;;  %v14087_v40 = vrot.slane %v676_v18, 9  ;;  %v715_v37 = vrot.slane %v713_v48, 5  ;;  %v679_v44 = vor.u32 %v678_v33, %v675_v29  ;;  %v14100_v61 = vpack.c.bf16 %v10641_v31, %v10641_v31 }
  0x45   : > { %v14089_v27 = vrot.slane %v716_v28, 5  ;;  %v718_v50 = vrot.slane %v716_v28, 4  ;;  %v724_v52 = vrot.slane %v722_v5, 5  ;;  %v1422_v56 = vrot.slane %v1420_v34, 1  ;;  %11944 = vmatpush3.bf16.msra.mxu0 %v13426_v47  ;;  %v645_v60 = vld [vmem:[#allocation2 + $0x2c] sm:$0x2] }
  0x46   : > { %v735_v14 = vsel %vm13962_vm13, %v715_v37, %v734_v30  ;;  %v726_v59 = vshrl.u32 %v14033_v62, 16  ;;  %v13425_v1 = vld [vmem:[#allocation2 + $0x20] sm:$0xff]   ;;  %vm17856_vm5 = vnez %v17820_v32  ;;  %11945 = vmatprep.subr.bf16.mxu0 %v13429_v16  ;;  %vm17857_vm1 = vnez %v17812_v63  ;;  %v10648_v34 = vld [vmem:[%s13784_s8 + $0x88] sm:$0xff] }
  0x47   : > { %v646_v2 = vsel %vm17856_vm5, %v14040_v6, %v645_v60  ;;  %v680_v47 = vsel %vm17857_vm1, %v671_v43, %v679_v44  ;;  %v681_v3 = vrot.slane %v679_v44, 4  ;;  %736 = vst [vmem:[#allocation2 + $0x3c] sm:$0x8] %v735_v14  ;;  %v719_v8 = vor.u32 %v718_v50, %v715_v37  ;;  %v738_v20 = vld [vmem:[#allocation2 + $0x44] sm:$0xf]  ;;  %v10652_v50 = vld [vmem:[%s13784_s8 + $0x90] sm:$0xff] }
  0x48   : > { %vm17858_vm6 = vsmask.f32 7424  ;;  %v1426_v39 = vor.u32 %v1424_v35, %v1422_v56  ;;  %647 = vst [vmem:[#allocation2 + $0x2c] sm:$0x2] %v646_v2  ;;  %688 = vst [vmem:[#allocation2 + $0x38] sm:$0xf] %v680_v47  ;;  %v11358_v26 = vpack.c.bf16 %v10642_v55, %v10642_v55  ;;  %vm17859_vm5 = vnez %v17817_v10 }
  0x49   : > { %v1423_v19 = vsel %vm17858_vm6, %v1418_v9, %v1422_v56  ;;  %v728_v49 = vrot.slane %v726_v59, 4  ;;  %v1428_v45 = vshll.u32 %v13425_v1, 16  ;;  %v1432_v17 = vshrl.u32 %v13425_v1, 16  ;;  %11946 = vmatpush3.bf16.msra.mxu0 %v13429_v16  ;;  %v10647_v43 = vld [vmem:[%s13784_s8 + $0x80] sm:$0xff]  ;;  %v779_v56 = vld [vmem:[#allocation2 + $0x48] sm:$0xf] }
  0x4a   : > { %11909 = vmatprep.mubr.bf16.mxu0 %v1423_v19  ;;  %v690_v6 = vsel %vm17859_vm5, %v681_v3, %v689_v36  ;;  %v720_v18 = vrot.slane %v719_v8, 4  ;;  %v651_v24 = vld [vmem:[#allocation2 + $0x34] sm:$0x2]  ;;  %v760_v9 = vshrl.u32 %v14100_v61, 16  ;;  %v763_v28 = vshll.u32 %v14100_v61, 16  ;;  %11947 = vmatprep.subr.bf16.mxu0 %v13432_v13  ;;  %v13435_v35 = vld [vmem:[%s17638_s2 + $0x20] sm:$0xff]  }
  0x4b   : > { %691 = vst [vmem:[#allocation2 + $0x3c] sm:$0x7] %v690_v6  ;;  %v729_v48 = vor.u32 %v728_v49, %v724_v52  ;;  %v768_v25 = vshrl.u32 %v11358_v26, 16  ;;  %v1430_v29 = vrot.slane %v1428_v45, 1  ;;  %vm17860_vm6 = vnez %v17824_v22  ;;  %v694_v30 = vld [vmem:[#allocation2 + $0x34] sm:$0x4] }
  0x4c   : > { %v652_v33 = vsel %vm17860_vm6, %v14053_v58, %v651_v24  ;;  %v725_v31 = vsel %vm13994_vm2, %v720_v18, %v724_v52  ;;  %v771_v16 = vshll.u32 %v11358_v26, 16  ;;  %v695_v36 = vsel %vm13948_vm11, %v14065_v7, %v694_v30  ;;  %v783_v3 = vld [vmem:[#allocation2 + $0x50] sm:$0x1] }
  0x4d   : > { %653 = vst [vmem:[#allocation2 + $0x34] sm:$0x2] %v652_v33  ;;  %v730_v37 = vrot.slane %v729_v48, 4  ;;  %737 = vst [vmem:[#allocation2 + $0x40] sm:$0xf] %v725_v31  ;;  %v762_v58 = vrot.slane %v760_v9, 7  ;;  %v1434_v55 = vor.u32 %v1432_v17, %v1430_v29  ;;  %v11359_v14 = vpack.c.bf16 %v10647_v43, %v10647_v43  ;;  %11948 = vmatpush3.bf16.msra.mxu0 %v13432_v13 }
  0x4e   : > { %v770_v44 = vrot.slane %v768_v25, 7  ;;  %vm17861_vm2 = vsmask.f32 7424  ;;  %696 = vst [vmem:[#allocation2 + $0x34] sm:$0x4] %v695_v36  ;;  %v14129_v60 = vrot.slane %v771_v16, 11  ;;  %v11360_v49 = vpack.c.bf16 %v10648_v34, %v10648_v34  ;;  %11949 = vmatprep.subr.bf16.mxu0 %v13435_v35 }
  0x4f   : > { %v1431_v52 = vsel %vm17861_vm2, %v1426_v39, %v1430_v29  ;;  %v743_v59 = vld [vmem:[#allocation2 + $0x3c] sm:$0x8]  ;;  %v739_v7 = vsel %vm14003_vm0, %v730_v37, %v738_v20  ;;  %v765_v1 = vor.u32 %v763_v28, %v762_v58  ;;  %v766_v2 = vrot.slane %v762_v58, 4  ;;  %v13427_v8 = vld [vmem:[#allocation2 + $0x28] sm:$0xff]   ;;  %v829_v31 = vld [vmem:[#allocation2 + $0x50] sm:$0xe] }
  0x50   : > { %11910 = vmatmul.mubr.bf16.gmra.mrb[4].mxu0 %v1431_v52  ;;  %v773_v47 = vor.u32 %v771_v16, %v770_v44  ;;  %v744_v19 = vsel %vm14029_vm9, %v14089_v27, %v743_v59  ;;  %740 = vst [vmem:[#allocation2 + $0x44] sm:$0xf] %v739_v7  ;;  %v775_v39 = vrot.slane %v770_v44, 4  ;;  %v14136_v26 = vpack.c.bf16 %v10652_v50, %v10652_v50  ;;  %v10653_v20 = vld [vmem:[%s13784_s8 + $0x98] sm:$0xff]  ;;  %v13438_v27 = vld [vmem:[%s17638_s2 + $0x28] sm:$0xff]   ;;  %v10657_v58 = vld [vmem:[%s13784_s8 + $0xa0] sm:$0xff] }
  0x51   : > { %745 = vst [vmem:[#allocation2 + $0x3c] sm:$0x8] %v744_v19  ;;  %v780_v17 = vsel %vm13816_vm10, %v765_v1, %v779_v56  ;;  %v808_v6 = vshrl.u32 %v11359_v14, 16  ;;  %v811_v18 = vshll.u32 %v11359_v14, 16  ;;  %v1436_v13 = vshll.u32 %v13427_v8, 16  ;;  %11950 = vmatpush3.bf16.msra.mxu0 %v13435_v35  ;;  %v13441_v44 = vld [vmem:[%s17638_s2 + $0x30] sm:$0xff]  }
  0x52   : > { %v774_v45 = vsel %vm13809_vm7, %v766_v2, %v773_v47  ;;  %v1440_v24 = vshrl.u32 %v13427_v8, 16  ;;  %v700_v48 = vld [vmem:[#allocation2 + $0x3c] sm:$0x4]  ;;  %781 = vst [vmem:[#allocation2 + $0x48] sm:$0xf] %v780_v17  ;;  %v784_v28 = vsel %vm13823_vm12, %v775_v39, %v783_v3  ;;  %v817_v25 = vshrl.u32 %v11360_v49, 16  ;;  %11951 = vmatprep.subr.bf16.mxu0 %v13438_v27 }
  0x53   : > { %782 = vst [vmem:[#allocation2 + $0x4c] sm:$0xf] %v774_v45  ;;  %v701_v43 = vsel %vm13978_vm4, %v14087_v40, %v700_v48  ;;  %785 = vst [vmem:[#allocation2 + $0x50] sm:$0x1] %v784_v28  ;;  %v810_v29 = vrot.slane %v808_v6, 6  ;;  %v813_v33 = vrot.slane %v811_v18, 7  ;;  %v11362_v37 = vpack.c.bf16 %v10653_v20, %v10653_v20 }
  0x54   : > { %v820_v30 = vshll.u32 %v11360_v49, 16  ;;  %v1438_v16 = vrot.slane %v1436_v13, 1  ;;  %702 = vst [vmem:[#allocation2 + $0x3c] sm:$0x4] %v701_v43  ;;  %v819_v34 = vrot.slane %v817_v25, 6  ;;  %v14151_v36 = vrot.slane %v808_v6, 7 }
  0x55   : > { %v13428_v50 = vld [vmem:[#allocation2 + $0x30] sm:$0xff]   ;;  %v814_v52 = vor.u32 %v813_v33, %v810_v29  ;;  %v857_v14 = vshrl.u32 %v14136_v26, 16  ;;  %v833_v1 = vld [vmem:[#allocation2 + $0x58] sm:$0x3]  ;;  %v860_v35 = vshll.u32 %v14136_v26, 16  ;;  %v866_v2 = vshrl.u32 %v11362_v37, 16  ;;  %11952 = vmatpush3.bf16.msra.mxu0 %v13438_v27 }
  0x56   : > { %v822_v40 = vrot.slane %v820_v30, 7  ;;  %v14157_v56 = vrot.slane %v820_v30, 10  ;;  %v1439_v59 = vsel %vm17861_vm2, %v1434_v55, %v1438_v16  ;;  %v1442_v7 = vor.u32 %v1440_v24, %v1438_v16  ;;  %v878_v6 = vld [vmem:[#allocation2 + $0x58] sm:$0xc]  ;;  %v10658_v18 = vld [vmem:[%s13784_s8 + $0xa8] sm:$0xff]  ;;  %11953 = vmatprep.subr.bf16.mxu0 %v13441_v44  ;;  %v10661_v29 = vld [vmem:[%s13784_s8 + $0xb0] sm:$0xff] }
  0x57   : > { %11913 = vmatprep.mubr.bf16.mxu0 %v1439_v59  ;;  %v1444_v47 = vshll.u32 %v13428_v50, 16  ;;  %v1448_v3 = vshrl.u32 %v13428_v50, 16  ;;  %v747_v8 = vld [vmem:[#allocation2 + $0x44] sm:$0x8]  ;;  %v815_v19 = vrot.slane %v814_v52, 4  ;;  %v830_v55 = vsel %vm13839_vm14, %v814_v52, %v829_v31  ;;  %v13444_v26 = vld [vmem:[%s17638_s2 + $0x38] sm:$0xff]  }
  0x58   : > { %v823_v39 = vor.u32 %v822_v40, %v819_v34  ;;  %v748_v49 = vsel %vm13962_vm13, %v722_v5, %v747_v8  ;;  %v859_v45 = vrot.slane %v857_v14, 5  ;;  %v862_v17 = vrot.slane %v860_v35, 6  ;;  %831 = vst [vmem:[#allocation2 + $0x50] sm:$0xe] %v830_v55  ;;  %v10662_v16 = vld [vmem:[%s13784_s8 + $0xb8] sm:$0xff]  ;;  %v10667_v52 = vld [vmem:[%s13784_s8 + $0xc0] sm:$0xff] }
  0x59   : > { %v1446_v20 = vrot.slane %v1444_v47, 1  ;;  %749 = vst [vmem:[#allocation2 + $0x44] sm:$0x8] %v748_v49  ;;  %v789_v13 = vld [vmem:[#allocation2 + $0x48] sm:$0x1]  ;;  %v14174_v24 = vpack.c.bf16 %v10657_v58, %v10657_v58  ;;  %v868_v25 = vrot.slane %v866_v2, 5  ;;  %11954 = vmatpush3.bf16.msra.mxu0 %v13441_v44  ;;  %v14208_v49 = vpack.c.bf16 %v10661_v29, %v10661_v29 }
  0x5a   : > { %v824_v62 = vsel %vm13852_vm15, %v815_v19, %v823_v39  ;;  %v825_v5 = vrot.slane %v823_v39, 4  ;;  %v790_v27 = vsel %vm13823_vm12, %v760_v9, %v789_v13  ;;  %v795_v48 = vld [vmem:[#allocation2 + $0x50] sm:$0x1]  ;;  %v863_v28 = vor.u32 %v862_v17, %v859_v45  ;;  %v14202_v35 = vld [vmem:[%s17638_s2 + $0x80] sm:$0xff]   ;;  %11955 = vmatprep.subr.bf16.mxu0 %v13444_v26 }
  0x5b   : > { %832 = vst [vmem:[#allocation2 + $0x54] sm:$0xf] %v824_v62  ;;  %v869_v43 = vshll.u32 %v11362_v37, 16  ;;  %v1447_v33 = vsel %vm17861_vm2, %v1442_v7, %v1446_v20  ;;  %v14182_v30 = vld [vmem:[#allocation2 + $0x38] sm:$0xff]   ;;  %v1450_v31 = vor.u32 %v1448_v3, %v1446_v20  ;;  %791 = vst [vmem:[#allocation2 + $0x48] sm:$0x1] %v790_v27  ;;  %v796_v61 = vsel %vm13869_vm8, %v14129_v60, %v795_v48 }
  0x5c   : > { %v834_v9 = vsel %vm13860_vm3, %v825_v5, %v833_v1  ;;  %11914 = vmatmul.mubr.bf16.gmra.mrb[8].mxu0 %v1447_v33  ;;  %797 = vst [vmem:[#allocation2 + $0x50] sm:$0x1] %v796_v61  ;;  %v864_v34 = vrot.slane %v863_v28, 4  ;;  %vm17862_vm15 = vnez %v17814_v4  ;;  %v885_v50 = vrot.slane %v857_v14, 6  ;;  %v882_v60 = vld [vmem:[#allocation2 + $0x60] sm:$0x7] }
  0x5d   : > { %835 = vst [vmem:[#allocation2 + $0x58] sm:$0x3] %v834_v9  ;;  %v871_v37 = vrot.slane %v869_v43, 6  ;;  %v879_v58 = vsel %vm17862_vm15, %v863_v28, %v878_v6  ;;  %v1452_v40 = vshll.u32 %v14182_v30, 16  ;;  %v1456_v59 = vshrl.u32 %v14182_v30, 16  ;;  %11956 = vmatpush3.bf16.msra.mxu0 %v13444_v26 }
  0x5e   : > { %880 = vst [vmem:[#allocation2 + $0x58] sm:$0xc] %v879_v58  ;;  %v14195_v7 = vrot.slane %v869_v43, 9  ;;  %v14197_v1 = vpack.c.bf16 %v10658_v18, %v10658_v18  ;;  %v906_v14 = vshll.u32 %v14174_v24, 16  ;;  %v909_v47 = vshrl.u32 %v14174_v24, 16  ;;  %11993 = vmatprep.subr.bf16.mxu0 %v14202_v35 }
  0x5f   : > { %v872_v2 = vor.u32 %v871_v37, %v868_v25  ;;  %v927_v3 = vld [vmem:[#allocation2 + $0x60] sm:$0x8]  ;;  %v1454_v8 = vrot.slane %v1452_v40, 1  ;;  %v838_v55 = vld [vmem:[#allocation2 + $0x50] sm:$0x2]  ;;  %v14214_v6 = vpack.c.bf16 %v10662_v16, %v10662_v16  ;;  %v14216_v18 = vpack.c.bf16 %v10667_v52, %v10667_v52 }
  0x60   : > { %v915_v19 = vshll.u32 %v14197_v1, 16  ;;  %v919_v39 = vshrl.u32 %v14197_v1, 16  ;;  %v14210_v44 = vld [vmem:[#allocation2 + $0x40] sm:$0xff]   ;;  %vm17863_vm15 = vnez %v17820_v32  ;;  %v908_v5 = vrot.slane %v906_v14, 5  ;;  %v931_v37 = vld [vmem:[#allocation2 + $0x68] sm:$0xf] }
  0x61   : > { %v873_v45 = vsel %vm17857_vm1, %v864_v34, %v872_v2  ;;  %v874_v17 = vrot.slane %v872_v2, 4  ;;  %v1455_v20 = vsel %vm17861_vm2, %v1450_v31, %v1454_v8  ;;  %v1458_v13 = vor.u32 %v1456_v59, %v1454_v8 }
  0x62   : > { %v839_v62 = vsel %vm17863_vm15, %v14151_v36, %v838_v55  ;;  %881 = vst [vmem:[#allocation2 + $0x5c] sm:$0xf] %v873_v45  ;;  %11917 = vmatprep.mubr.bf16.mxu0 %v1455_v20  ;;  %v1460_v24 = vshll.u32 %v14210_v44, 16  ;;  %v14223_v27 = vld [vmem:[#allocation2 + $0x48] sm:$0xff]   ;;  %v1464_v48 = vshrl.u32 %v14210_v44, 16  ;;  %v911_v25 = vrot.slane %v909_v47, 4 }
  0x63   : > { %840 = vst [vmem:[#allocation2 + $0x50] sm:$0x2] %v839_v62  ;;  %v883_v28 = vsel %vm17859_vm5, %v874_v17, %v882_v60  ;;  %v917_v36 = vrot.slane %v915_v19, 5  ;;  %v928_v26 = vsel %vm13962_vm13, %v908_v5, %v927_v3  ;;  %v934_v29 = vrot.slane %v909_v47, 5  ;;  %v10668_v60 = vld [vmem:[%s13784_s8 + $0xc8] sm:$0xff]  ;;  %v10672_v62 = vld [vmem:[%s13784_s8 + $0xd0] sm:$0xff] }
  0x64   : > { %v844_v43 = vld [vmem:[#allocation2 + $0x58] sm:$0x2]  ;;  %884 = vst [vmem:[#allocation2 + $0x60] sm:$0x7] %v883_v28  ;;  %v921_v33 = vrot.slane %v919_v39, 4  ;;  %v1462_v31 = vrot.slane %v1460_v24, 1  ;;  %v912_v52 = vor.u32 %v911_v25, %v908_v5 }
  0x65   : > { %v1468_v61 = vshll.u32 %v14223_v27, 16  ;;  %v1472_v9 = vshrl.u32 %v14223_v27, 16  ;;  %v845_v16 = vsel %vm17860_vm6, %v14157_v56, %v844_v43  ;;  %v887_v34 = vld [vmem:[#allocation2 + $0x58] sm:$0x4]  ;;  %929 = vst [vmem:[#allocation2 + $0x60] sm:$0x8] %v928_v26 }
  0x66   : > { %846 = vst [vmem:[#allocation2 + $0x58] sm:$0x2] %v845_v16  ;;  %v888_v58 = vsel %vm13948_vm11, %v885_v50, %v887_v34  ;;  %v922_v40 = vor.u32 %v921_v33, %v917_v36  ;;  %v953_v59 = vshrl.u32 %v14208_v49, 16  ;;  %v1463_v2 = vsel %vm17861_vm2, %v1458_v13, %v1462_v31  ;;  %v972_v3 = vld [vmem:[#allocation2 + $0x6c] sm:$0xf]  ;;  %vm17864_vm11 = vmmov %vm17861_vm2 }
  0x67   : > { %v1466_v14 = vor.u32 %v1464_v48, %v1462_v31  ;;  %v1470_v47 = vrot.slane %v1468_v61, 1  ;;  %889 = vst [vmem:[#allocation2 + $0x58] sm:$0x4] %v888_v58  ;;  %v956_v56 = vshll.u32 %v14208_v49, 16  ;;  %11918 = vmatmul.mubr.bf16.gmra.mrb[12].mxu0 %v1463_v2  ;;  %v913_v8 = vrot.slane %v912_v52, 4 }
  0x68   : > { %v923_v39 = vrot.slane %v922_v40, 4  ;;  %v955_v50 = vrot.slane %v953_v59, 7  ;;  %v961_v55 = vshrl.u32 %v14214_v6, 16  ;;  %v964_v17 = vshll.u32 %v14214_v6, 16  ;;  %v976_v43 = vld [vmem:[#allocation2 + $0x74] sm:$0x1] }
  0x69   : > { %v1471_v45 = vsel %vm17864_vm11, %v1466_v14, %v1470_v47  ;;  %v1001_v20 = vshrl.u32 %v14216_v18, 16  ;;  %v14250_v13 = vpack.c.bf16 %v10668_v60, %v10668_v60  ;;  %v1474_v24 = vor.u32 %v1472_v9, %v1470_v47  ;;  %v1022_v2 = vld [vmem:[#allocation2 + $0x74] sm:$0xe] }
  0x6a   : > { %11921 = vmatprep.mubr.bf16.mxu0 %v1471_v45  ;;  %v14253_v5 = vld [vmem:[#allocation2 + $0x50] sm:$0xff]   ;;  %vm17865_vm2 = vnez %v17842_v12  ;;  %v932_v28 = vsel %vm14003_vm0, %v923_v39, %v931_v37  ;;  %v958_v25 = vor.u32 %v956_v56, %v955_v50  ;;  %v959_v6 = vrot.slane %v955_v50, 4  ;;  %v10673_v50 = vld [vmem:[%s13784_s8 + $0xd8] sm:$0xff] }
  0x6b   : > { %v918_v48 = vsel %vm17865_vm2, %v913_v8, %v917_v36  ;;  %v893_v26 = vld [vmem:[#allocation2 + $0x60] sm:$0x4]  ;;  %933 = vst [vmem:[#allocation2 + $0x68] sm:$0xf] %v932_v28  ;;  %v963_v33 = vrot.slane %v961_v55, 7  ;;  %v1003_v31 = vrot.slane %v1001_v20, 6  ;;  %v14274_v56 = vpack.c.bf16 %v10672_v62, %v10672_v62 }
  0x6c   : > { %930 = vst [vmem:[#allocation2 + $0x64] sm:$0xf] %v918_v48  ;;  %v1004_v61 = vshll.u32 %v14216_v18, 16  ;;  %v1476_v9 = vshll.u32 %v14253_v5, 16  ;;  %v1480_v16 = vshrl.u32 %v14253_v5, 16  ;;  %v894_v36 = vsel %vm13978_vm4, %v14195_v7, %v893_v26 }
  0x6d   : > { %v936_v34 = vld [vmem:[#allocation2 + $0x60] sm:$0x8]  ;;  %v973_v37 = vsel %vm13816_vm10, %v958_v25, %v972_v3  ;;  %895 = vst [vmem:[#allocation2 + $0x60] sm:$0x4] %v894_v36  ;;  %v966_v52 = vor.u32 %v964_v17, %v963_v33  ;;  %v968_v40 = vrot.slane %v963_v33, 4  ;;  %v1010_v7 = vshrl.u32 %v14250_v13, 16 }
  0x6e   : > { %v937_v58 = vsel %vm14029_vm9, %v934_v29, %v936_v34  ;;  %974 = vst [vmem:[#allocation2 + $0x6c] sm:$0xf] %v973_v37  ;;  %v1006_v60 = vrot.slane %v1004_v61, 7  ;;  %v1478_v14 = vrot.slane %v1476_v9, 1  ;;  %v14271_v47 = vld [vmem:[#allocation2 + $0x58] sm:$0xff]   ;;  %v1013_v39 = vshll.u32 %v14250_v13, 16 }
  0x6f   : > { %938 = vst [vmem:[#allocation2 + $0x60] sm:$0x8] %v937_v58  ;;  %v967_v3 = vsel %vm13809_vm7, %v959_v6, %v966_v52  ;;  %v977_v29 = vsel %vm13823_vm12, %v968_v40, %v976_v43  ;;  %v1484_v48 = vshll.u32 %v14271_v47, 16  ;;  %v10666_v62 = vrot.slane %v964_v17, 11  ;;  %v10677_v6 = vld [vmem:[%s13784_s8 + $0xe0] sm:$0xff]  ;;  %v10678_v9 = vld [vmem:[%s13784_s8 + $0xe8] sm:$0xff] }
  0x70   : > { %v1007_v8 = vor.u32 %v1006_v60, %v1003_v31  ;;  %v1479_v55 = vsel %vm17864_vm11, %v1474_v24, %v1478_v14  ;;  %v1482_v45 = vor.u32 %v1480_v16, %v1478_v14  ;;  %975 = vst [vmem:[#allocation2 + $0x70] sm:$0xf] %v967_v3  ;;  %978 = vst [vmem:[#allocation2 + $0x74] sm:$0x1] %v977_v29  ;;  %v1012_v26 = vrot.slane %v1010_v7, 6 }
  0x71   : > { %11922 = vmatmul.mubr.bf16.gmra.mrb[16].mxu0 %v1479_v55  ;;  %v1015_v43 = vrot.slane %v1013_v39, 7  ;;  %v1486_v33 = vrot.slane %v1484_v48, 1  ;;  %v1488_v13 = vshrl.u32 %v14271_v47, 16  ;;  %v1026_v24 = vld [vmem:[#allocation2 + $0x7c] sm:$0x3]  ;;  %v14288_v61 = vpack.c.bf16 %v10673_v50, %v10673_v50 }
  0x72   : > { %v1023_v28 = vsel %vm13839_vm14, %v1007_v8, %v1022_v2  ;;  %v1008_v25 = vrot.slane %v1007_v8, 4  ;;  %v940_v31 = vld [vmem:[#allocation2 + $0x68] sm:$0x8]  ;;  %v1050_v36 = vshrl.u32 %v14274_v56, 16  ;;  %v1053_v34 = vshll.u32 %v14274_v56, 16 }
  0x73   : > { %1024 = vst [vmem:[#allocation2 + $0x74] sm:$0xe] %v1023_v28  ;;  %v941_v17 = vsel %vm13962_vm13, %v915_v19, %v940_v31  ;;  %v1016_v16 = vor.u32 %v1015_v43, %v1012_v26  ;;  %v1487_v37 = vsel %vm17864_vm11, %v1482_v45, %v1486_v33  ;;  %v1059_v52 = vshrl.u32 %v14288_v61, 16  ;;  %v1071_v56 = vld [vmem:[#allocation2 + $0x7c] sm:$0xc] }
  0x74   : > { %942 = vst [vmem:[#allocation2 + $0x68] sm:$0x8] %v941_v17  ;;  %v1062_v40 = vshll.u32 %v14288_v61, 16  ;;  %v14300_v60 = vpack.c.bf16 %v10677_v6, %v10677_v6  ;;  %11925 = vmatprep.mubr.bf16.mxu0 %v1487_v37  ;;  %vm17866_vm14 = vnez %v17804_v46  ;;  %v1052_v7 = vrot.slane %v1050_v36, 5  ;;  %v1075_v48 = vld [vmem:[#allocation2 + $0x84] sm:$0x7] }
  0x75   : > { %v982_v58 = vld [vmem:[#allocation2 + $0x6c] sm:$0x1]  ;;  %v1017_v2 = vsel %vm17866_vm14, %v1008_v25, %v1016_v16  ;;  %v1018_v14 = vrot.slane %v1016_v16, 4  ;;  %v1029_v3 = vrot.slane %v1001_v20, 7  ;;  %v1055_v29 = vrot.slane %v1053_v34, 6  ;;  %v10681_v6 = vld [vmem:[%s13784_s8 + $0xf0] sm:$0xff] }
  0x76   : > { %v14302_v1 = vld [vmem:[#allocation2 + $0x60] sm:$0xff]   ;;  %v983_v19 = vsel %vm13823_vm12, %v953_v59, %v982_v58  ;;  %1025 = vst [vmem:[#allocation2 + $0x78] sm:$0xf] %v1017_v2  ;;  %v1061_v8 = vrot.slane %v1059_v52, 5  ;;  %v1064_v50 = vrot.slane %v1062_v40, 6  ;;  %v1490_v55 = vor.u32 %v1488_v13, %v1486_v33 }
  0x77   : > { %984 = vst [vmem:[#allocation2 + $0x6c] sm:$0x1] %v983_v19  ;;  %v1492_v49 = vshll.u32 %v14302_v1, 16  ;;  %v988_v45 = vld [vmem:[#allocation2 + $0x74] sm:$0x1]  ;;  %v1027_v59 = vsel %vm13860_vm3, %v1018_v14, %v1026_v24  ;;  %v14315_v28 = vpack.c.bf16 %v10678_v9, %v10678_v9  ;;  %v10671_v18 = vrot.slane %v1013_v39, 10 }
  0x78   : > { %v989_v25 = vsel %vm13869_vm8, %v10666_v62, %v988_v45  ;;  %1028 = vst [vmem:[#allocation2 + $0x7c] sm:$0x3] %v1027_v59  ;;  %v1056_v20 = vor.u32 %v1055_v29, %v1052_v7  ;;  %v1065_v26 = vor.u32 %v1064_v50, %v1061_v8  ;;  %v1120_v43 = vld [vmem:[#allocation2 + $0x84] sm:$0x8]  ;;  %v1099_v13 = vshll.u32 %v14300_v60, 16 }
  0x79   : > { %v1494_v31 = vrot.slane %v1492_v49, 1  ;;  %990 = vst [vmem:[#allocation2 + $0x74] sm:$0x1] %v989_v25  ;;  %v1102_v61 = vshrl.u32 %v14300_v60, 16  ;;  %v1108_v24 = vshll.u32 %v14315_v28, 16  ;;  %vm17867_vm11 = vnez %v17814_v4 }
  0x7a   : > { %v1031_v33 = vld [vmem:[#allocation2 + $0x74] sm:$0x2]  ;;  %v1072_v62 = vsel %vm17867_vm11, %v1056_v20, %v1071_v56  ;;  %v1057_v39 = vrot.slane %v1056_v20, 4  ;;  %v1067_v17 = vrot.slane %v1065_v26, 4  ;;  %vm17868_vm14 = vsmask.f32 7424 }
  0x7b   : > { %v1032_v9 = vsel %vm17863_vm15, %v1029_v3, %v1031_v33  ;;  %v1495_v16 = vsel %vm17868_vm14, %v1490_v55, %v1494_v31  ;;  %v1496_v34 = vshrl.u32 %v14302_v1, 16  ;;  %1073 = vst [vmem:[#allocation2 + $0x7c] sm:$0xc] %v1072_v62  ;;  %v1101_v37 = vrot.slane %v1099_v13, 5  ;;  %v1124_v20 = vld [vmem:[#allocation2 + $0x8c] sm:$0xf] }
  0x7c   : > { %1033 = vst [vmem:[#allocation2 + $0x74] sm:$0x2] %v1032_v9  ;;  %11926 = vmatmul.mubr.bf16.gmra.mrb[20].mxu0 %v1495_v16  ;;  %v1066_v58 = vsel %vm17857_vm1, %v1057_v39, %v1065_v26  ;;  %v1076_v52 = vsel %vm17859_vm5, %v1067_v17, %v1075_v48  ;;  %v1104_v60 = vrot.slane %v1102_v61, 4  ;;  %v1110_v19 = vrot.slane %v1108_v24, 5 }
  0x7d   : > { %1074 = vst [vmem:[#allocation2 + $0x80] sm:$0xf] %v1066_v58  ;;  %1077 = vst [vmem:[#allocation2 + $0x84] sm:$0x7] %v1076_v52  ;;  %v1121_v14 = vsel %vm13962_vm13, %v1101_v37, %v1120_v43  ;;  %v1112_v7 = vshrl.u32 %v14315_v28, 16  ;;  %v11373_v56 = vpack.c.bf16 %v10681_v6, %v10681_v6  ;;  %v1078_v3 = vrot.slane %v1050_v36, 6 }
  0x7e   : > { %v14335_v2 = vld [vmem:[#allocation2 + $0x68] sm:$0xff]   ;;  %v10676_v63 = vrot.slane %v1062_v40, 9  ;;  %1122 = vst [vmem:[#allocation2 + $0x84] sm:$0x8] %v1121_v14  ;;  %v1105_v29 = vor.u32 %v1104_v60, %v1101_v37  ;;  %v1498_v8 = vor.u32 %v1496_v34, %v1494_v31  ;;  %v1165_v6 = vld [vmem:[#allocation2 + $0x90] sm:$0xf]  ;;  %vm17869_vm1 = vnez %v17829_v42 }
  0x7f   : > { %v1500_v50 = vshll.u32 %v14335_v2, 16  ;;  %v1037_v55 = vld [vmem:[#allocation2 + $0x7c] sm:$0x2]  ;;  %v1114_v49 = vrot.slane %v1112_v7, 4  ;;  %v1146_v45 = vshrl.u32 %v11373_v56, 16  ;;  %v1504_v59 = vshrl.u32 %v14335_v2, 16 }
  0x80   : > { %v1038_v48 = vsel %vm17860_vm6, %v10671_v18, %v1037_v55  ;;  %v1106_v25 = vrot.slane %v1105_v29, 4  ;;  %v1149_v26 = vshll.u32 %v11373_v56, 16  ;;  %v1127_v13 = vrot.slane %v1102_v61, 5 }
  0x81   : > { %v1502_v43 = vrot.slane %v1500_v50, 1  ;;  %1039 = vst [vmem:[#allocation2 + $0x7c] sm:$0x2] %v1038_v48  ;;  %v1115_v36 = vor.u32 %v1114_v49, %v1110_v19  ;;  %v14344_v40 = vrot.slane %v1146_v45, 7  ;;  %vm17875_vm5 = vcmask 1045504  }
  0x82   : > { %v1080_v33 = vld [vmem:[#allocation2 + $0x7c] sm:$0x4]  ;;  %v1111_v9 = vsel %vm17865_vm2, %v1106_v25, %v1110_v19 }
  0x83   : > { %v14346_v31 = vld [vmem:[#allocation2 + $0x70] sm:$0xff]   ;;  %v1503_v62 = vsel %vm17868_vm14, %v1498_v8, %v1502_v43  ;;  %v1081_v18 = vsel %vm17869_vm1, %v1078_v3, %v1080_v33  ;;  %v1116_v39 = vrot.slane %v1115_v36, 4  ;;  %1123 = vst [vmem:[#allocation2 + $0x88] sm:$0xf] %v1111_v9  ;;  %v1506_v17 = vor.u32 %v1504_v59, %v1502_v43 }
  0x84   : > { %11929 = vmatprep.mubr.bf16.mxu0 %v1503_v62  ;;  %v1508_v16 = vshll.u32 %v14346_v31, 16  ;;  %1082 = vst [vmem:[#allocation2 + $0x7c] sm:$0x4] %v1081_v18  ;;  %v1086_v34 = vld [vmem:[#allocation2 + $0x84] sm:$0x4]  ;;  %v1151_v37 = vor.u32 %v1149_v26, %v14344_v40  ;;  %v1512_v56 = vshrl.u32 %v14346_v31, 16 }
  0x85   : > { %v1087_v61 = vsel %vm13978_vm4, %v10676_v63, %v1086_v34  ;;  %v1129_v58 = vld [vmem:[#allocation2 + $0x84] sm:$0x8]  ;;  %v1125_v52 = vsel %vm14003_vm0, %v1116_v39, %v1124_v20  ;;  %vm17870_vm4 = vmmov %vm17868_vm14 }
  0x86   : > { %v1510_v60 = vrot.slane %v1508_v16, 1  ;;  %1088 = vst [vmem:[#allocation2 + $0x84] sm:$0x4] %v1087_v61  ;;  %v1130_v19 = vsel %vm14029_vm9, %v1127_v13, %v1129_v58  ;;  %1126 = vst [vmem:[#allocation2 + $0x8c] sm:$0xf] %v1125_v52  ;;  %v1166_v14 = vsel %vm13816_vm10, %v1151_v37, %v1165_v6  ;;  %v13448_v37 = vld [vmem:[%s17638_s2 + $0x88] sm:$0xff]  }
  0x87   : > { %1131 = vst [vmem:[#allocation2 + $0x84] sm:$0x8] %v1130_v19  ;;  %1167 = vst [vmem:[#allocation2 + $0x90] sm:$0xf] %v1166_v14  ;;  %v14394_v61 = vld [vmem:[#allocation2 + $0x8] sm:$0xff]   ;;  %v14398_v58 = vld [vmem:[#allocation2 + $0x10] sm:$0xff]  }
  0x88   : > { %v1511_v7 = vsel %vm17868_vm14, %v1506_v17, %v1510_v60  ;;  %v1514_v63 = vor.u32 %v1512_v56, %v1510_v60  ;;  %vm17872_vm9 = vmmov %vm17870_vm4  ;;  %v13449_v52 = vld [vmem:[%s17638_s2 + $0x90] sm:$0xff]   ;;  %v14407_v60 = vld [vmem:[#allocation2 + $0x18] sm:$0xff]  }
  0x89   : > { %11930 = vmatmul.mubr.bf16.gmra.mrb[24].mxu0 %v1511_v7  ;;  %v13451_v19 = vld [vmem:[%s17638_s2 + $0xa0] sm:$0xff]   ;;  %v13452_v14 = vld [vmem:[%s17638_s2 + $0xa8] sm:$0xff]   ;;  %v14422_v56 = vld [vmem:[#allocation2 + $0x30] sm:$0xff]  }
  0x8a   : > { %v14419_v7 = vld [vmem:[#allocation2 + $0x28] sm:$0xff]  }
  0x8b   : > { %v14365_v3 = vld [vmem:[#allocation2 + $0x78] sm:$0xff]   ;;  %v2061_v15 = vrot.slane %v14419_v7, 1 }
  0x8c   : > { %v1516_v29 = vshll.u32 %v14365_v3, 16  ;;  %v1520_v8 = vshrl.u32 %v14365_v3, 16 }
  0x8d   : > { %v1133_v50 = vld [vmem:[#allocation2 + $0x8c] sm:$0x8] }
  0x8e   : > { %v14369_v55 = vld [vmem:[#allocation2 + $0x80] sm:$0xff]   ;;  %v1134_v49 = vsel %vm13962_vm13, %v1108_v24, %v1133_v50  ;;  %v1175_v59 = vld [vmem:[#allocation2 + $0x90] sm:$0x1]  ;;  %v1518_v48 = vrot.slane %v1516_v29, 1  ;;  %v13454_v29 = vld [vmem:[%s17638_s2 + $0xb8] sm:$0xff]  }
  0x8f   : > { %1135 = vst [vmem:[#allocation2 + $0x8c] sm:$0x8] %v1134_v49  ;;  %v1176_v25 = vsel %vm13823_vm12, %v1146_v45, %v1175_v59  ;;  %v1524_v20 = vshll.u32 %v14369_v55, 16  ;;  %v1528_v6 = vshrl.u32 %v14369_v55, 16  ;;  %v2030_v50 = vld [vmem:[#allocation2] sm:$0xe] }
  0x90   : > { %1177 = vst [vmem:[#allocation2 + $0x90] sm:$0x1] %v1176_v25  ;;  %v1519_v26 = vsel %vm17868_vm14, %v1514_v63, %v1518_v48  ;;  %v1522_v43 = vor.u32 %v1520_v8, %v1518_v48  ;;  %vm17871_vm14 = vmmov %vm17870_vm4  ;;  %v13453_v63 = vld [vmem:[%s17638_s2 + $0xb0] sm:$0xff]   ;;  %v13456_v8 = vld [vmem:[%s17638_s2 + $0xc0] sm:$0xff]  }
  0x91   : > { %11933 = vmatprep.mubr.bf16.mxu0 %v1519_v26  ;;  %v1526_v36 = vrot.slane %v1524_v20, 1  ;;  %v13690_v59 = vld [vmem:[#allocation2 + $0x4] sm:$0xf] }
  0x92   : > { %v10759_v48 = vcombine.low %v2030_v50, %v13690_v59  ;;  %v13694_v59 = vld [vmem:[#allocation2 + $0x50] sm:$0xff]  }
  0x93   : > { %v1527_v28 = vsel %vm17870_vm4, %v1522_v43, %v1526_v36  ;;  %v1530_v13 = vor.u32 %v1528_v6, %v1526_v36  ;;  %vm17671_vm4 = vcmask 1046528   ;;  %v1152_v36 = vrot.slane %v14344_v40, 4 }
  0x94   : > { %11934 = vmatmul.mubr.bf16.gmra.mrb[28].mxu0 %v1527_v28  ;;  %v2055_v28 = vrot.slane %v14398_v58, 1 }
  0x96   : > { %v14381_v24 = vld [vmem:[#allocation2 + $0x88] sm:$0xff]  }
  0x97   : > { %v14383_v33 = vld [vmem:[#allocation2 + $0x90] ss:$0 sps:$4 sm:$0x11]   ;;  %v1532_v45 = vshll.u32 %v14381_v24, 16  ;;  %v1536_v9 = vshrl.u32 %v14381_v24, 16 }
  0x98   : > { %v1540_v62 = vshll.u32 %v14383_v33, 16 }
  0x99   : > { %v1534_v18 = vrot.slane %v1532_v45, 1  ;;  %v2057_v45 = vrot.slane %v14407_v60, 1 }
  0x9a   : > { %v1542_v39 = vrot.slane %v1540_v62, 1 }
  0x9b   : > { %v1535_v17 = vsel %vm17871_vm14, %v1530_v13, %v1534_v18  ;;  %v1538_v16 = vor.u32 %v1536_v9, %v1534_v18  ;;  %vm17673_vm14 = vcmask 1045504  }
  0x9c   : > { %11937 = vmatprep.mubr.bf16.mxu0 %v1535_v17  ;;  %v2058_v17 = vsel %vm17671_vm4, %v2055_v28, %v2057_v45 }
  0x9d   : > { %v1543_v34 = vsel %vm17872_vm9, %v1538_v16, %v1542_v39  ;;  %v13457_v39 = vld [vmem:[%s17638_s2 + $0xc8] sm:$0xff]   ;;  %vm17672_vm9 = vsmask.f32 6400 }
  0x9e   : > { %11938 = vmatmul.mubr.bf16.gmra.mrb[32].mxu0 %v1543_v34  ;;  %v13458_v34 = vld [vmem:[%s17638_s2 + $0xd0] sm:$0xff]  }
  0x9f   : > { %11957 = vmatprep.mubr.bf16.mxu0 %v14011_v38  ;;  %v13450_v38 = vld [vmem:[%s17638_s2 + $0x98] sm:$0xff]  }
  0xa6   : > { %11958 = vmatmul.mubr.bf16.vlgmr.msra.gmra.mrb[0].mxu0 %v14394_v61 }
  0xa7   : > { %11994 = vmatpush3.bf16.msra.mxu0 %v14202_v35  ;;  %11961 = vmatprep.mubr.bf16.mxu0 %v14398_v58  ;;  %v14410_v35 = vld [vmem:[#allocation2 + $0x20] sm:$0xff]  }
  0xa8   : > { %11995 = vmatprep.subr.bf16.mxu0 %v13448_v37  ;;  %v2059_v16 = vrot.slane %v14410_v35, 1 }
  0xaa   : > { %v2062_v58 = vsel %vm17671_vm4, %v2059_v16, %v2061_v15 }
  0xab   : > { %11996 = vmatpush3.bf16.msra.mxu0 %v13448_v37  ;;  %v2060_v37 = vsel %vm17671_vm4, %v2057_v45, %v2059_v16 }
  0xac   : > { %11997 = vmatprep.subr.bf16.mxu0 %v13449_v52 }
  0xae   : > { %11962 = vmatmul.mubr.bf16.gmra.mrb[4].mxu0 %v14407_v60 }
  0xaf   : > { %11965 = vmatprep.mubr.bf16.mxu0 %v14410_v35  ;;  %11998 = vmatpush3.bf16.msra.mxu0 %v13449_v52  ;;  %v2063_v52 = vrot.slane %v14422_v56, 1  ;;  %v13460_v35 = vld [vmem:[%s17638_s2 + $0xe0] sm:$0xff]  }
  0xb0   : > { %11999 = vmatprep.subr.bf16.mxu0 %v13450_v38 }
  0xb3   : > { %12000 = vmatpush3.bf16.msra.mxu0 %v13450_v38  ;;  %v13691_v38 = vld [vmem:[#allocation2 + $0x38] sm:$0xff]  }
  0xb4   : > { %12001 = vmatprep.subr.bf16.mxu0 %v13451_v19  ;;  %v2065_v60 = vrot.slane %v13691_v38, 1  ;;  %v14513_v38 = vld [vmem:[#allocation2 + $0x10] sm:$0xff]  }
  0xb6   : > { %11966 = vmatmul.mubr.bf16.gmra.mrb[8].mxu0 %v14419_v7  ;;  %v2066_v7 = vsel %vm17671_vm4, %v2063_v52, %v2065_v60 }
  0xb7   : > { %11969 = vmatprep.mubr.bf16.mxu0 %v14422_v56  ;;  %12002 = vmatpush3.bf16.msra.mxu0 %v13451_v19  ;;  %v13461_v19 = vld [vmem:[%s17638_s2 + $0xe8] sm:$0xff]   ;;  %v13692_v56 = vld [vmem:[#allocation2 + $0x40] sm:$0xff]  }
  0xb8   : > { %12003 = vmatprep.subr.bf16.mxu0 %v13452_v14 }
  0xbb   : > { %12004 = vmatpush3.bf16.msra.mxu0 %v13452_v14  ;;  %v2064_v14 = vsel %vm17671_vm4, %v2061_v15, %v2063_v52 }
  0xbc   : > { %12005 = vmatprep.subr.bf16.mxu0 %v13453_v63 }
  0xbe   : > { %11970 = vmatmul.mubr.bf16.gmra.mrb[12].mxu0 %v14182_v30  ;;  %v10682_v30 = vld [vmem:[%s13784_s8 + $0xf8] sm:$0xff] }
  0xbf   : > { %11973 = vmatprep.mubr.bf16.mxu0 %v14210_v44  ;;  %12006 = vmatpush3.bf16.msra.mxu0 %v13453_v63  ;;  %v11374_v44 = vpack.c.bf16 %v10682_v30, %v10682_v30  ;;  %v2067_v63 = vrot.slane %v13692_v56, 1  ;;  %v13462_v30 = vld [vmem:[%s17638_s2 + $0xf0] sm:$0xff]  }
  0xc0   : > { %12007 = vmatprep.subr.bf16.mxu0 %v13454_v29 }
  0xc1   : > { %v1154_v49 = vshrl.u32 %v11374_v44, 16  ;;  %v1157_v43 = vshll.u32 %v11374_v44, 16  ;;  %v2068_v44 = vsel %vm17671_vm4, %v2065_v60, %v2067_v63 }
  0xc3   : > { %12008 = vmatpush3.bf16.msra.mxu0 %v13454_v29  ;;  %v1156_v25 = vrot.slane %v1154_v49, 7  ;;  %v10686_v13 = vrot.slane %v1157_v43, 11  ;;  %v13693_v29 = vld [vmem:[#allocation2 + $0x48] sm:$0xff]   ;;  %v13463_v49 = vld [vmem:[%s17638_s2 + $0xf8] sm:$0xff]  }
  0xc4   : > { %12045 = vmatprep.subr.bf16.mxu0 %v13456_v8 }
  0xc5   : > { %v1159_v6 = vor.u32 %v1157_v43, %v1156_v25  ;;  %v2077_v43 = vrot.slane %v14335_v2, 1 }
  0xc6   : > { %11974 = vmatmul.mubr.bf16.gmra.mrb[16].mxu0 %v14223_v27  ;;  %v1161_v27 = vrot.slane %v1156_v25, 4  ;;  %v13695_v25 = vld [vmem:[#allocation2 + $0x58] sm:$0xff]  }
  0xc7   : > { %11977 = vmatprep.mubr.bf16.mxu0 %v14253_v5  ;;  %v1169_v5 = vld [vmem:[#allocation2 + $0x98] sm:$0x1]  ;;  %v1160_v9 = vsel %vm13809_vm7, %v1152_v36, %v1159_v6  ;;  %vm17873_vm7 = vnez %v17801_v41 }
  0xc8   : > { %v1170_v20 = vsel %vm13823_vm12, %v1161_v27, %v1169_v5  ;;  %1168 = vst [vmem:[#allocation2 + $0x94] sm:$0xf] %v1160_v9  ;;  %v2073_v27 = vrot.slane %v13695_v25, 1  ;;  %v13466_v5 = vld [vmem:[%s17638_s2 + $0x100] sm:$0xff]  }
  0xc9   : > { %1171 = vst [vmem:[#allocation2 + $0x98] sm:$0x1] %v1170_v20  ;;  %v13696_v20 = vld [vmem:[#allocation2 + $0x60] sm:$0xff]  }
  0xca   : > { %v10687_v9 = vld [vmem:[%s13784_s8 + $0xe0] sm:$0xff] }
  0xce   : > { %11978 = vmatmul.mubr.bf16.gmra.mrb[20].mxu0 %v14271_v47  ;;  %v2052_v47 = vrot.slane %v10759_v48, 1  ;;  %v2071_v48 = vrot.slane %v13694_v59, 1  ;;  %v13470_v59 = vld [vmem:[%s17638_s2 + $0x108] sm:$0xff]  }
  0xcf   : > { %11981 = vmatprep.mubr.bf16.mxu0 %v14302_v1  ;;  %v2053_v1 = vrot.slane %v14394_v61, 1  ;;  %v13459_v61 = vld [vmem:[%s17638_s2 + $0xd8] sm:$0xff]  }
  0xd0   : > { %v1181_v62 = vld [vmem:[#allocation2 + $0x98] sm:$0x1] }
  0xd1   : > { %v2054_v26 = vsel %vm17671_vm4, %v2052_v47, %v2053_v1  ;;  %v1182_v18 = vsel %vm13869_vm8, %v10686_v13, %v1181_v62  ;;  %v2056_v40 = vsel %vm17671_vm4, %v2053_v1, %v2055_v28  ;;  %v2074_v1 = vsel %vm17671_vm4, %v2071_v48, %v2073_v27  ;;  %vm17876_vm8 = vmmov %vm17875_vm5 }
  0xd2   : > { %1183 = vst [vmem:[#allocation2 + $0x98] sm:$0x1] %v1182_v18  ;;  %v2079_v28 = vrot.slane %v14346_v31, 1  ;;  %v2081_v13 = vrot.slane %v14365_v3, 1  ;;  %v11375_v18 = vpack.c.bf16 %v10687_v9, %v10687_v9 }
  0xd4   : > { %v2080_v45 = vsel %vm17671_vm4, %v2077_v43, %v2079_v28  ;;  %v2082_v62 = vsel %vm17671_vm4, %v2079_v28, %v2081_v13  ;;  %v13479_v28 = vld [vmem:[%s17638_s2 + $0x120] sm:$0xff]  }
  0xd6   : > { %11982 = vmatmul.mubr.bf16.gmra.mrb[24].mxu0 %v14335_v2  ;;  %v2083_v2 = vrot.slane %v14369_v55, 1 }
  0xd7   : > { %11985 = vmatprep.mubr.bf16.mxu0 %v14346_v31  ;;  %v14504_v31 = vld [vmem:[#allocation2 + $0xc] sm:$0xf] }
  0xde   : > { %11986 = vmatmul.mubr.bf16.gmra.mrb[28].mxu0 %v14365_v3 }
  0xdf   : > { %11989 = vmatprep.mubr.bf16.mxu0 %v14369_v55 }
  0xe6   : > { %11990 = vmatmul.mubr.bf16.gmra.mrb[32].mxu0 %v14381_v24 }
  0xe7   : > { %12009 = vmatprep.mubr.bf16.mxu0 %v2054_v26  ;;  %v2075_v26 = vrot.slane %v13696_v20, 1  ;;  %v14546_v20 = vld [vmem:[#allocation2 + $0x38] sm:$0xff]  }
  0xe9   : > { %v2076_v36 = vsel %vm17671_vm4, %v2073_v27, %v2075_v26  ;;  %v2078_v6 = vsel %vm17671_vm4, %v2075_v26, %v2077_v43  ;;  %v14549_v43 = vld [vmem:[#allocation2 + $0x40] sm:$0xff]  }
  0xee   : > { %12010 = vmatmul.mubr.bf16.vlgmr.msra.gmra.mrb[0].mxu0 %v2056_v40  ;;  %v1196_v40 = vshll.u32 %v11375_v18, 16 }
  0xef   : > { %12046 = vmatpush3.bf16.msra.mxu0 %v13456_v8  ;;  %12013 = vmatprep.mubr.bf16.mxu0 %v2058_v17  ;;  %v2069_v8 = vrot.slane %v13693_v29, 1  ;;  %v2085_v17 = vrot.slane %v14381_v24, 1  ;;  %v2087_v24 = vrot.slane %v14383_v33, 1 }
  0xf0   : > { %12047 = vmatprep.subr.bf16.mxu0 %v13457_v39  ;;  %v1198_v15 = vrot.slane %v1196_v40, 7 }
  0xf1   : > { %v2070_v50 = vsel %vm17671_vm4, %v2067_v63, %v2069_v8  ;;  %v2072_v47 = vsel %vm17671_vm4, %v2069_v8, %v2071_v48  ;;  %v14525_v63 = vld [vmem:[#allocation2 + $0x20] sm:$0xff]   ;;  %v14538_v48 = vld [vmem:[#allocation2 + $0x30] sm:$0xff]  }
  0xf2   : > { %v2524_v27 = vrot.slane %v14538_v48, 1 }
  0xf3   : > { %12048 = vmatpush3.bf16.msra.mxu0 %v13457_v39  ;;  %v1193_v39 = vshrl.u32 %v11375_v18, 16  ;;  %v13482_v18 = vld [vmem:[%s17638_s2 + $0x128] sm:$0xff]  }
  0xf4   : > { %12049 = vmatprep.subr.bf16.mxu0 %v13458_v34 }
  0xf5   : > { %v1195_v16 = vrot.slane %v1193_v39, 6 }
  0xf6   : > { %12014 = vmatmul.mubr.bf16.gmra.mrb[4].mxu0 %v2060_v37  ;;  %v2084_v37 = vsel %vm17671_vm4, %v2081_v13, %v2083_v2 }
  0xf7   : > { %12017 = vmatprep.mubr.bf16.mxu0 %v2062_v58  ;;  %12050 = vmatpush3.bf16.msra.mxu0 %v13458_v34  ;;  %v2368_v34 = vld [vmem:[#allocation2 + $0x8] sm:$0xe]  ;;  %v14506_v3 = vor.u32 %v1198_v15, %v1195_v16  ;;  %v2086_v58 = vsel %vm17671_vm4, %v2083_v2, %v2085_v17  ;;  %v13485_v2 = vld [vmem:[%s17638_s2 + $0x130] sm:$0xff]   ;;  %v14574_v16 = vld [vmem:[#allocation2 + $0x58] sm:$0xff]  }
  0xf8   : > { %12051 = vmatprep.subr.bf16.mxu0 %v13459_v61  ;;  %v14511_v52 = vcombine.low %v2368_v34, %v14504_v31  ;;  %v14577_v34 = vld [vmem:[#allocation2 + $0x60] sm:$0xff]  }
  0xfa   : > { %v2515_v60 = vrot.slane %v14511_v52, 1 }
  0xfb   : > { %12052 = vmatpush3.bf16.msra.mxu0 %v13459_v61  ;;  %v1214_v61 = vld [vmem:[#allocation2 + $0x98] sm:$0xe] }
  0xfc   : > { %12053 = vmatprep.subr.bf16.mxu0 %v13460_v35  ;;  %v1215_v55 = vsel %vm17873_vm7, %v14506_v3, %v1214_v61  ;;  %v2534_v61 = vrot.slane %v14574_v16, 1 }
  0xfd   : > { %1216 = vst [vmem:[#allocation2 + $0x98] sm:$0xe] %v1215_v55  ;;  %v14587_v55 = vld [vmem:[%s17638_s2 + $0x140] sm:$0xff]  }
  0xfe   : > { %12018 = vmatmul.mubr.bf16.gmra.mrb[8].mxu0 %v2064_v14  ;;  %v14522_v14 = vld [vmem:[#allocation2 + $0x18] sm:$0xff]  }
  0xff   : > { %12021 = vmatprep.mubr.bf16.mxu0 %v2066_v7  ;;  %12054 = vmatpush3.bf16.msra.mxu0 %v13460_v35  ;;  %v2516_v35 = vrot.slane %v14513_v38, 1  ;;  %v1221_v7 = vrot.slane %v1193_v39, 7  ;;  %v2518_v33 = vrot.slane %v14522_v14, 1 }
 0x100   : > { %12055 = vmatprep.subr.bf16.mxu0 %v13461_v19 }
 0x101   : > { %v2517_v56 = vsel %vm17671_vm4, %v2515_v60, %v2516_v35  ;;  %v14590_v60 = vld [vmem:[#allocation2 + $0x68] sm:$0xff]  }
 0x103   : > { %12056 = vmatpush3.bf16.msra.mxu0 %v13461_v19  ;;  %v2088_v19 = vsel %vm17671_vm4, %v2085_v17, %v2087_v24 }
 0x104   : > { %12057 = vmatprep.subr.bf16.mxu0 %v13462_v30  ;;  %v1223_v29 = vld [vmem:[#allocation2 + $0x98] sm:$0x2] }
 0x105   : > { %v1224_v8 = vsel %vm17863_vm15, %v1221_v7, %v1223_v29  ;;  %v2538_v7 = vrot.slane %v14590_v60, 1 }
 0x106   : > { %12022 = vmatmul.mubr.bf16.gmra.mrb[12].mxu0 %v2068_v44  ;;  %1225 = vst [vmem:[#allocation2 + $0x98] sm:$0x2] %v1224_v8  ;;  %v2519_v44 = vsel %vm17671_vm4, %v2516_v35, %v2518_v33  ;;  %v14599_v8 = vld [vmem:[#allocation2 + $0x78] sm:$0xff]  }
 0x107   : > { %12025 = vmatprep.mubr.bf16.mxu0 %v2070_v50  ;;  %12058 = vmatpush3.bf16.msra.mxu0 %v13462_v30  ;;  %v2520_v30 = vrot.slane %v14525_v63, 1  ;;  %v14532_v50 = vld [vmem:[#allocation2 + $0x28] sm:$0xff]  }
 0x108   : > { %12059 = vmatprep.subr.bf16.mxu0 %v13463_v49  ;;  %v2522_v25 = vrot.slane %v14532_v50, 1 }
 0x10a   : > { %v2525_v26 = vsel %vm17671_vm4, %v2522_v25, %v2524_v27 }
 0x10b   : > { %12060 = vmatpush3.bf16.msra.mxu0 %v13463_v49  ;;  %v2521_v49 = vsel %vm17671_vm4, %v2518_v33, %v2520_v30 }
 0x10c   : > { %12097 = vmatprep.subr.bf16.mxu0 %v13466_v5 }
 0x10e   : > { %12026 = vmatmul.mubr.bf16.gmra.mrb[16].mxu0 %v2072_v47  ;;  %v13473_v47 = vld [vmem:[%s17638_s2 + $0x110] sm:$0xff]  }
 0x10f   : > { %12029 = vmatprep.mubr.bf16.mxu0 %v2074_v1  ;;  %v2523_v1 = vsel %vm17671_vm4, %v2520_v30, %v2522_v25  ;;  %v14602_v30 = vld [vmem:[#allocation2 + $0x80] sm:$0xff]   ;;  %v14607_v25 = vld [vmem:[#allocation2 + $0x88] sm:$0xff]  }
 0x116   : > { %12030 = vmatmul.mubr.bf16.gmra.mrb[20].mxu0 %v2076_v36  ;;  %v2526_v36 = vrot.slane %v14546_v20, 1 }
 0x117   : > { %12033 = vmatprep.mubr.bf16.mxu0 %v2078_v6  ;;  %v2528_v6 = vrot.slane %v14549_v43, 1 }
 0x118   : > { %v2527_v13 = vsel %vm17671_vm4, %v2524_v27, %v2526_v36  ;;  %v14609_v27 = vld [vmem:[#allocation2 + $0x90] sm:$0xff]  }
 0x119   : > { %v2529_v9 = vsel %vm17671_vm4, %v2526_v36, %v2528_v6  ;;  %v2857_v36 = vshll.u32 %v14511_v52, 16 }
 0x11e   : > { %12034 = vmatmul.mubr.bf16.gmra.mrb[24].mxu0 %v2080_v45  ;;  %v14560_v45 = vld [vmem:[#allocation2 + $0x48] sm:$0xff]  }
 0x11f   : > { %12037 = vmatprep.mubr.bf16.mxu0 %v2082_v62  ;;  %v14563_v62 = vld [vmem:[#allocation2 + $0x50] sm:$0xff]   ;;  %v2530_v39 = vrot.slane %v14560_v45, 1 }
 0x120   : > { %v2532_v40 = vrot.slane %v14563_v62, 1 }
 0x121   : > { %v2531_v17 = vsel %vm17671_vm4, %v2528_v6, %v2530_v39  ;;  %v2862_v6 = vshrl.u32 %v14513_v38, 16 }
 0x122   : > { %v2533_v15 = vsel %vm17671_vm4, %v2530_v39, %v2532_v40  ;;  %v2535_v24 = vsel %vm17671_vm4, %v2532_v40, %v2534_v61  ;;  %v2859_v40 = vrot.slane %v2857_v36, 2  ;;  %v2898_v36 = vshrl.u32 %v14538_v48, 16 }
 0x126   : > { %12038 = vmatmul.mubr.bf16.gmra.mrb[28].mxu0 %v2084_v37  ;;  %v13488_v37 = vld [vmem:[%s17638_s2 + $0x138] sm:$0xff]  }
 0x127   : > { %12041 = vmatprep.mubr.bf16.mxu0 %v2086_v58  ;;  %v2536_v58 = vrot.slane %v14577_v34, 1 }
 0x129   : > { %v2537_v35 = vsel %vm17671_vm4, %v2534_v61, %v2536_v58  ;;  %v2539_v29 = vsel %vm17671_vm4, %v2536_v58, %v2538_v7 }
 0x12e   : > { %12042 = vmatmul.mubr.bf16.gmra.mrb[32].mxu0 %v2088_v19  ;;  %v14593_v19 = vld [vmem:[#allocation2 + $0x70] sm:$0xff]  }
 0x12f   : > { %12061 = vmatprep.mubr.bf16.mxu0 %v2517_v56  ;;  %v2540_v56 = vrot.slane %v14593_v19, 1 }
 0x131   : > { %v2541_v33 = vsel %vm17671_vm4, %v2538_v7, %v2540_v56 }
 0x136   : > { %12062 = vmatmul.mubr.bf16.vlgmr.msra.gmra.mrb[0].mxu0 %v2519_v44  ;;  %v2542_v44 = vrot.slane %v14599_v8, 1 }
 0x137   : > { %12098 = vmatpush3.bf16.msra.mxu0 %v13466_v5  ;;  %12065 = vmatprep.mubr.bf16.mxu0 %v2521_v49  ;;  %v13476_v5 = vld [vmem:[%s17638_s2 + $0x118] sm:$0xff]   ;;  %v2544_v49 = vrot.slane %v14602_v30, 1 }
 0x138   : > { %12099 = vmatprep.subr.bf16.mxu0 %v13470_v59 }
 0x13b   : > { %12100 = vmatpush3.bf16.msra.mxu0 %v13470_v59  ;;  %v2543_v59 = vsel %vm17671_vm4, %v2540_v56, %v2542_v44 }
 0x13c   : > { %12101 = vmatprep.subr.bf16.mxu0 %v13473_v47 }
 0x13e   : > { %12066 = vmatmul.mubr.bf16.gmra.mrb[4].mxu0 %v2523_v1  ;;  %v2546_v1 = vrot.slane %v14607_v25, 1 }
 0x13f   : > { %12069 = vmatprep.mubr.bf16.mxu0 %v2525_v26  ;;  %12102 = vmatpush3.bf16.msra.mxu0 %v13473_v47  ;;  %v2545_v47 = vsel %vm17671_vm4, %v2542_v44, %v2544_v49  ;;  %v2548_v26 = vrot.slane %v14609_v27, 1 }
 0x140   : > { %12103 = vmatprep.subr.bf16.mxu0 %v13476_v5 }
 0x143   : > { %12104 = vmatpush3.bf16.msra.mxu0 %v13476_v5  ;;  %v2854_v5 = vshrl.u32 %v14511_v52, 16  ;;  %v2874_v52 = vshll.u32 %v14522_v14, 16 }
 0x144   : > { %12105 = vmatprep.subr.bf16.mxu0 %v13479_v28 }
 0x145   : > { %v2856_v39 = vrot.slane %v2854_v5, 1 }
 0x146   : > { %12070 = vmatmul.mubr.bf16.gmra.mrb[8].mxu0 %v2527_v13  ;;  %v2547_v13 = vsel %vm17671_vm4, %v2544_v49, %v2546_v1 }
 0x147   : > { %12073 = vmatprep.mubr.bf16.mxu0 %v2529_v9  ;;  %12106 = vmatpush3.bf16.msra.mxu0 %v13479_v28  ;;  %v2865_v28 = vshll.u32 %v14513_v38, 16  ;;  %v2549_v9 = vsel %vm17671_vm4, %v2546_v1, %v2548_v26  ;;  %v2860_v61 = vor.u32 %v2859_v40, %v2856_v39  ;;  %v2892_v1 = vshll.u32 %v14532_v50, 16 }
 0x148   : > { %12107 = vmatprep.subr.bf16.mxu0 %v13482_v18  ;;  %v2900_v39 = vrot.slane %v2898_v36, 1  ;;  %v13495_v36 = vld [vmem:[%s17638_s2 + $0x160] sm:$0xff]  }
 0x14b   : > { %12108 = vmatpush3.bf16.msra.mxu0 %v13482_v18  ;;  %v13490_v18 = vld [vmem:[#allocation2 + $0x98] ss:$0 sps:$4 sm:$0x11]  }
 0x14c   : > { %12109 = vmatprep.subr.bf16.mxu0 %v13485_v2 }
 0x14e   : > { %12074 = vmatmul.mubr.bf16.gmra.mrb[12].mxu0 %v2531_v17  ;;  %v2867_v17 = vrot.slane %v2865_v28, 2 }
 0x14f   : > { %12077 = vmatprep.mubr.bf16.mxu0 %v2533_v15  ;;  %12110 = vmatpush3.bf16.msra.mxu0 %v13485_v2  ;;  %v2864_v2 = vrot.slane %v2862_v6, 1  ;;  %v2550_v15 = vrot.slane %v13490_v18, 1  ;;  %v2901_v6 = vshll.u32 %v14538_v48, 16  ;;  %v13492_v18 = vld [vmem:[%s17638_s2 + $0x148] sm:$0xff]  }
 0x150   : > { %12111 = vmatprep.subr.bf16.mxu0 %v13488_v37 }
 0x151   : > { %v2868_v58 = vor.u32 %v2867_v17, %v2864_v2  ;;  %v2551_v7 = vsel %vm17671_vm4, %v2548_v26, %v2550_v15  ;;  %v2903_v40 = vrot.slane %v2901_v6, 2  ;;  %v2907_v17 = vshrl.u32 %v14546_v20, 16 }
 0x152   : > { %v2910_v15 = vshll.u32 %v14546_v20, 16  ;;  %vm17874_vm4 = vnez %v17804_v46 }
 0x153   : > { %12112 = vmatpush3.bf16.msra.mxu0 %v13488_v37  ;;  %v2871_v37 = vshrl.u32 %v14522_v14, 16 }
 0x154   : > { %12149 = vmatprep.subr.bf16.mxu0 %v14587_v55 }
 0x155   : > { %v2873_v56 = vrot.slane %v2871_v37, 1  ;;  %v2904_v37 = vor.u32 %v2903_v40, %v2900_v39  ;;  %v13496_v39 = vld [vmem:[%s17638_s2 + $0x168] sm:$0xff]  }
 0x156   : > { %12078 = vmatmul.mubr.bf16.gmra.mrb[16].mxu0 %v2535_v24  ;;  %v2880_v24 = vshrl.u32 %v14525_v63, 16 }
 0x157   : > { %12081 = vmatprep.mubr.bf16.mxu0 %v2537_v35  ;;  %v2883_v35 = vshll.u32 %v14525_v63, 16 }
 0x158   : > { %v2882_v44 = vrot.slane %v2880_v24, 1 }
 0x159   : > { %v2885_v49 = vrot.slane %v2883_v35, 2  ;;  %v2912_v35 = vrot.slane %v2910_v15, 2 }
 0x15b   : > { %v2886_v5 = vor.u32 %v2885_v49, %v2882_v44  ;;  %v2925_v49 = vshrl.u32 %v14560_v45, 16 }
 0x15e   : > { %12082 = vmatmul.mubr.bf16.gmra.mrb[20].mxu0 %v2539_v29  ;;  %v2876_v29 = vrot.slane %v2874_v52, 2  ;;  %v13493_v52 = vld [vmem:[%s17638_s2 + $0x150] sm:$0xff]  }
 0x15f   : > { %12085 = vmatprep.mubr.bf16.mxu0 %v2541_v33  ;;  %v2869_v33 = vsel %vm17672_vm9, %v2860_v61, %v2868_v58  ;;  %v2916_v61 = vshrl.u32 %v14549_v43, 16 }
 0x166   : > { %12086 = vmatmul.mubr.bf16.gmra.mrb[24].mxu0 %v2543_v59  ;;  %v2877_v59 = vor.u32 %v2876_v29, %v2873_v56  ;;  %v2918_v56 = vrot.slane %v2916_v61, 1  ;;  %v13497_v61 = vld [vmem:[%s17638_s2 + $0x170] sm:$0xff]  }
 0x167   : > { %12089 = vmatprep.mubr.bf16.mxu0 %v2545_v47  ;;  %v2889_v47 = vshrl.u32 %v14532_v50, 16 }
 0x168   : > { %v2878_v26 = vsel %vm17672_vm9, %v2868_v58, %v2877_v59  ;;  %v2919_v58 = vshll.u32 %v14549_v43, 16 }
 0x169   : > { %v2891_v28 = vrot.slane %v2889_v47, 1 }
 0x16a   : > { %v2921_v29 = vrot.slane %v2919_v58, 2 }
 0x16c   : > { %v2922_v47 = vor.u32 %v2921_v29, %v2918_v56  ;;  %v13498_v29 = vld [vmem:[%s17638_s2 + $0x178] sm:$0xff]  }
 0x16e   : > { %12090 = vmatmul.mubr.bf16.gmra.mrb[28].mxu0 %v2547_v13  ;;  %v2894_v13 = vrot.slane %v2892_v1, 2  ;;  %v2934_v1 = vshrl.u32 %v14563_v62, 16 }
 0x16f   : > { %12093 = vmatprep.mubr.bf16.mxu0 %v2549_v9  ;;  %v2887_v9 = vsel %vm17672_vm9, %v2877_v59, %v2886_v5  ;;  %v2928_v59 = vshll.u32 %v14560_v45, 16 }
 0x170   : > { %v2895_v2 = vor.u32 %v2894_v13, %v2891_v28 }
 0x171   : > { %v2930_v28 = vrot.slane %v2928_v59, 2 }
 0x172   : > { %v2896_v24 = vsel %vm17672_vm9, %v2886_v5, %v2895_v2  ;;  %v2937_v5 = vshll.u32 %v14563_v62, 16 }
 0x176   : > { %12094 = vmatmul.mubr.bf16.gmra.mrb[32].mxu0 %v2551_v7  ;;  %v2905_v7 = vsel %vm17672_vm9, %v2895_v2, %v2904_v37  ;;  %v2943_v2 = vshrl.u32 %v14574_v16, 16 }
 0x177   : > { %12113 = vmatprep.mubr.bf16.mxu0 %v2869_v33  ;;  %v13494_v33 = vld [vmem:[%s17638_s2 + $0x158] sm:$0xff]  }
 0x17e   : > { %12114 = vmatmul.mubr.bf16.vlgmr.msra.gmra.mrb[0].mxu0 %v2878_v26  ;;  %v2927_v26 = vrot.slane %v2925_v49, 1  ;;  %v2964_v49 = vshll.u32 %v14590_v60, 16 }
 0x17f   : > { %12150 = vmatpush3.bf16.msra.mxu0 %v14587_v55  ;;  %12117 = vmatprep.mubr.bf16.mxu0 %v2887_v9  ;;  %v2909_v55 = vrot.slane %v2907_v17, 1  ;;  %v2936_v9 = vrot.slane %v2934_v1, 1  ;;  %v2946_v17 = vshll.u32 %v14574_v16, 16  ;;  %v2973_v1 = vshll.u32 %v14593_v19, 16 }
 0x180   : > { %12151 = vmatprep.subr.bf16.mxu0 %v13492_v18  ;;  %v2931_v40 = vor.u32 %v2930_v28, %v2927_v26  ;;  %v2966_v26 = vrot.slane %v2964_v49, 2 }
 0x181   : > { %v2913_v44 = vor.u32 %v2912_v35, %v2909_v55  ;;  %v2948_v55 = vrot.slane %v2946_v17, 2  ;;  %v2988_v17 = vshrl.u32 %v14602_v30, 16 }
 0x182   : > { %v2932_v58 = vsel %vm17672_vm9, %v2922_v47, %v2931_v40 }
 0x183   : > { %12152 = vmatpush3.bf16.msra.mxu0 %v13492_v18  ;;  %v2914_v6 = vsel %vm17672_vm9, %v2904_v37, %v2913_v44  ;;  %v2923_v13 = vsel %vm17672_vm9, %v2913_v44, %v2922_v47  ;;  %v2939_v18 = vrot.slane %v2937_v5, 2  ;;  %v2952_v37 = vshrl.u32 %v14577_v34, 16  ;;  %v14679_v5 = vld [vmem:[%s17638_s2 + $0x180] sm:$0xff]  }
 0x184   : > { %12153 = vmatprep.subr.bf16.mxu0 %v13493_v52  ;;  %v2961_v44 = vshrl.u32 %v14590_v60, 16  ;;  %v2970_v47 = vshrl.u32 %v14593_v19, 16 }
 0x185   : > { %v2940_v15 = vor.u32 %v2939_v18, %v2936_v9  ;;  %v2975_v9 = vrot.slane %v2973_v1, 2  ;;  %v14695_v1 = vld [vmem:[#allocation2 + $0x98] ss:$0 sps:$4 sm:$0x33]  }
 0x186   : > { %12118 = vmatmul.mubr.bf16.gmra.mrb[4].mxu0 %v2896_v24  ;;  %v2945_v24 = vrot.slane %v2943_v2, 1 }
 0x187   : > { %12121 = vmatprep.mubr.bf16.mxu0 %v2905_v7  ;;  %12154 = vmatpush3.bf16.msra.mxu0 %v13493_v52  ;;  %v2955_v52 = vshll.u32 %v14577_v34, 16  ;;  %v2941_v35 = vsel %vm17672_vm9, %v2931_v40, %v2940_v15  ;;  %v2954_v7 = vrot.slane %v2952_v37, 1  ;;  %v2982_v40 = vshll.u32 %v14599_v8, 16 }
 0x188   : > { %12155 = vmatprep.subr.bf16.mxu0 %v13494_v33 }
 0x189   : > { %v2957_v56 = vrot.slane %v2955_v52, 2 }
 0x18b   : > { %12156 = vmatpush3.bf16.msra.mxu0 %v13494_v33  ;;  %v2949_v33 = vor.u32 %v2948_v55, %v2945_v24  ;;  %v2958_v59 = vor.u32 %v2957_v56, %v2954_v7  ;;  %v2990_v24 = vrot.slane %v2988_v17, 1  ;;  %v2997_v7 = vshrl.u32 %v14607_v25, 16 }
 0x18c   : > { %12157 = vmatprep.subr.bf16.mxu0 %v13495_v36  ;;  %v3000_v56 = vshll.u32 %v14607_v25, 16 }
 0x18d   : > { %v2959_v28 = vsel %vm17672_vm9, %v2949_v33, %v2958_v59 }
 0x18e   : > { %12122 = vmatmul.mubr.bf16.gmra.mrb[8].mxu0 %v2914_v6  ;;  %v2963_v6 = vrot.slane %v2961_v44, 1  ;;  %v3009_v44 = vshll.u32 %v14609_v27, 16 }
 0x18f   : > { %12125 = vmatprep.mubr.bf16.mxu0 %v2923_v13  ;;  %12158 = vmatpush3.bf16.msra.mxu0 %v13495_v36  ;;  %v2950_v36 = vsel %vm17672_vm9, %v2940_v15, %v2949_v33  ;;  %v2972_v13 = vrot.slane %v2970_v47, 1  ;;  %v2991_v15 = vshll.u32 %v14602_v30, 16  ;;  %v3006_v33 = vshrl.u32 %v14609_v27, 16 }
 0x190   : > { %12159 = vmatprep.subr.bf16.mxu0 %v13496_v39  ;;  %v2967_v18 = vor.u32 %v2966_v26, %v2963_v6  ;;  %v3002_v47 = vrot.slane %v3000_v56, 2  ;;  %v3011_v26 = vrot.slane %v3009_v44, 2  ;;  %v1218_v44 = vld [vmem:[#allocation2 + $0xa0] sm:$0x3] }
 0x191   : > { %v2976_v2 = vor.u32 %v2975_v9, %v2972_v13  ;;  %v2993_v55 = vrot.slane %v2991_v15, 2  ;;  %v3008_v6 = vrot.slane %v3006_v33, 1  ;;  %v3302_v15 = vld [vmem:[#allocation2 + $0x8] sm:$0xc] }
 0x192   : > { %v2968_v37 = vsel %vm17672_vm9, %v2958_v59, %v2967_v18  ;;  %v2999_v59 = vrot.slane %v2997_v7, 1 }
 0x193   : > { %12160 = vmatpush3.bf16.msra.mxu0 %v13496_v39  ;;  %v2979_v39 = vshrl.u32 %v14599_v8, 16 }
 0x194   : > { %12161 = vmatprep.subr.bf16.mxu0 %v13497_v61  ;;  %v3003_v9 = vor.u32 %v3002_v47, %v2999_v59  ;;  %v3325_v59 = vrot.slane %v14513_v38, 2 }
 0x195   : > { %v2981_v52 = vrot.slane %v2979_v39, 1  ;;  %v3018_v39 = vshll.u32 %v14695_v1, 16 }
 0x196   : > { %12126 = vmatmul.mubr.bf16.gmra.mrb[12].mxu0 %v2932_v58  ;;  %v2977_v58 = vsel %vm17672_vm9, %v2967_v18, %v2976_v2  ;;  %v3015_v18 = vshrl.u32 %v14695_v1, 16 }
 0x197   : > { %12129 = vmatprep.mubr.bf16.mxu0 %v2941_v35  ;;  %12162 = vmatpush3.bf16.msra.mxu0 %v13497_v61  ;;  %v2984_v61 = vrot.slane %v2982_v40, 2  ;;  %v3012_v40 = vor.u32 %v3011_v26, %v3008_v6  ;;  %v3327_v6 = vrot.slane %v14522_v14, 2  ;;  %v3331_v14 = vrot.slane %v14532_v50, 2 }
 0x198   : > { %12163 = vmatprep.subr.bf16.mxu0 %v13498_v29  ;;  %v3335_v50 = vrot.slane %v14546_v20, 2  ;;  %v3339_v20 = vrot.slane %v14560_v45, 2  ;;  %v3343_v45 = vrot.slane %v14574_v16, 2  ;;  %v3349_v16 = vrot.slane %v14593_v19, 2 }
 0x199   : > { %v2985_v35 = vor.u32 %v2984_v61, %v2981_v52  ;;  %v3357_v19 = vrot.slane %v14609_v27, 2 }
 0x19b   : > { %12164 = vmatpush3.bf16.msra.mxu0 %v13498_v29  ;;  %v2994_v29 = vor.u32 %v2993_v55, %v2990_v24  ;;  %v2986_v49 = vsel %vm17672_vm9, %v2976_v2, %v2985_v35  ;;  %v3020_v24 = vrot.slane %v3018_v39, 2  ;;  %v3013_v55 = vsel %vm17672_vm9, %v3003_v9, %v3012_v40 }
 0x19c   : > { %12201 = vmatprep.subr.bf16.mxu0 %v14679_v5 }
 0x19d   : > { %v3004_v61 = vsel %vm17672_vm9, %v2994_v29, %v3003_v9 }
 0x19e   : > { %12130 = vmatmul.mubr.bf16.gmra.mrb[16].mxu0 %v2950_v36  ;;  %v2995_v36 = vsel %vm17672_vm9, %v2985_v35, %v2994_v29  ;;  %v10852_v35 = vcombine.low %v3302_v15, %v14504_v31  ;;  %v1200_v31 = vrot.slane %v14506_v3, 4  ;;  %v13502_v3 = vld [vmem:[%s17638_s2 + $0x188] sm:$0xff]   ;;  %v13505_v15 = vld [vmem:[%s17638_s2 + $0x1a0] sm:$0xff]  }
 0x19f   : > { %12133 = vmatprep.mubr.bf16.mxu0 %v2959_v28  ;;  %v10688_v28 = vld [vmem:[%s13784_s8 + $0xe8] sm:$0xff] }
 0x1a0   : > { %v11376_v13 = vpack.c.bf16 %v10688_v28, %v10688_v28  ;;  %v3329_v28 = vrot.slane %v14525_v63, 2  ;;  %v3333_v63 = vrot.slane %v14538_v48, 2  ;;  %v3337_v48 = vrot.slane %v14549_v43, 2 }
 0x1a1   : > { %v3341_v43 = vrot.slane %v14563_v62, 2  ;;  %v3345_v62 = vrot.slane %v14577_v34, 2 }
 0x1a2   : > { %v1202_v17 = vshrl.u32 %v11376_v13, 16  ;;  %v1205_v2 = vshll.u32 %v11376_v13, 16  ;;  %v3330_v39 = vsel %vm17673_vm14, %v3327_v6, %v3329_v28 }
 0x1a4   : > { %v1207_v52 = vrot.slane %v1205_v2, 7  ;;  %v10691_v26 = vrot.slane %v1205_v2, 10  ;;  %v3334_v2 = vsel %vm17673_vm14, %v3331_v14, %v3333_v63 }
 0x1a6   : > { %12134 = vmatmul.mubr.bf16.gmra.mrb[20].mxu0 %v2968_v37  ;;  %v1204_v37 = vrot.slane %v1202_v17, 6  ;;  %v3332_v17 = vsel %vm17673_vm14, %v3329_v28, %v3331_v14 }
 0x1a7   : > { %12137 = vmatprep.mubr.bf16.mxu0 %v2977_v58  ;;  %v3017_v58 = vrot.slane %v3015_v18, 1  ;;  %v3328_v18 = vsel %vm17673_vm14, %v3325_v59, %v3327_v6  ;;  %v14769_v6 = vld [vmem:[#allocation2 + $0x14] sm:$0xf] }
 0x1a8   : > { %v1208_v7 = vor.u32 %v1207_v52, %v1204_v37  ;;  %v3336_v37 = vsel %vm17673_vm14, %v3333_v63, %v3335_v50  ;;  %v3338_v52 = vsel %vm17673_vm14, %v3335_v50, %v3337_v48 }
 0x1a9   : > { %v3021_v33 = vor.u32 %v3020_v24, %v3017_v58  ;;  %v13507_v58 = vld [vmem:[%s17638_s2 + $0x1b0] sm:$0xff]   ;;  %v3340_v24 = vsel %vm17673_vm14, %v3337_v48, %v3339_v20 }
 0x1aa   : > { %v1210_v56 = vrot.slane %v1208_v7, 4  ;;  %v1209_v38 = vsel %vm17874_vm4, %v1200_v31, %v1208_v7  ;;  %v13511_v7 = vld [vmem:[%s17638_s2 + $0x1c0] sm:$0xff]   ;;  %v3640_v31 = vld [vmem:[#allocation2 + $0x10] sm:$0xc] }
 0x1ab   : > { %v3022_v29 = vsel %vm17672_vm9, %v3012_v40, %v3021_v33  ;;  %1217 = vst [vmem:[#allocation2 + $0x9c] sm:$0xf] %v1209_v38  ;;  %v13503_v40 = vld [vmem:[%s17638_s2 + $0x190] sm:$0xff]   ;;  %v3346_v33 = vsel %vm17673_vm14, %v3343_v45, %v3345_v62  ;;  %v3359_v38 = vrot.slane %v14695_v1, 2 }
 0x1ac   : > { %v1219_v47 = vsel %vm13860_vm3, %v1210_v56, %v1218_v44  ;;  %v3344_v56 = vsel %vm17673_vm14, %v3341_v43, %v3343_v45  ;;  %v3347_v44 = vrot.slane %v14590_v60, 2  ;;  %v3355_v60 = vrot.slane %v14607_v25, 2  ;;  %v14820_v45 = vld [vmem:[#allocation2 + $0x50] sm:$0xff]  }
 0x1ad   : > { %1220 = vst [vmem:[#allocation2 + $0xa0] sm:$0x3] %v1219_v47  ;;  %v3353_v47 = vrot.slane %v14602_v30, 2  ;;  %v14776_v30 = vld [vmem:[#allocation2 + $0x18] sm:$0xff]  }
 0x1ae   : > { %12138 = vmatmul.mubr.bf16.gmra.mrb[24].mxu0 %v2986_v49  ;;  %v3324_v49 = vrot.slane %v10852_v35, 2  ;;  %v13508_v35 = vld [vmem:[%s17638_s2 + $0x1b8] sm:$0xff]   ;;  %v3350_v34 = vsel %vm17673_vm14, %v3347_v44, %v3349_v16  ;;  %v3358_v28 = vsel %vm17673_vm14, %v3355_v60, %v3357_v19  ;;  %v3788_v27 = vrot.slane %v14776_v30, 2 }
 0x1af   : > { %12141 = vmatprep.mubr.bf16.mxu0 %v2995_v36 }
 0x1b0   : > { %v3326_v36 = vsel %vm17673_vm14, %v3324_v49, %v3325_v59  ;;  %v3348_v49 = vsel %vm17673_vm14, %v3345_v62, %v3347_v44  ;;  %v3351_v59 = vrot.slane %v14599_v8, 2  ;;  %v14774_v8 = vcombine.low %v3640_v31, %v14769_v6  ;;  %v14850_v31 = vld [vmem:[%s17638_s2 + $0x200] sm:$0xff]  }
 0x1b2   : > { %v3787_v25 = vrot.slane %v14774_v8, 2 }
 0x1b4   : > { %v1229_v13 = vld [vmem:[#allocation2 + $0xa0] sm:$0x2] }
 0x1b5   : > { %v1230_v9 = vsel %vm17860_vm6, %v10691_v26, %v1229_v13  ;;  %v3356_v26 = vsel %vm17673_vm14, %v3353_v47, %v3355_v60  ;;  %v3360_v13 = vsel %vm17673_vm14, %v3357_v19, %v3359_v38  ;;  %v253_v60 = vld [vmem:[%s17637_s1] sm:$0xff]  ;;  %v14854_v38 = vld [vmem:[#allocation2 + $0x70] sm:$0xff]  }
 0x1b6   : > { %12142 = vmatmul.mubr.bf16.gmra.mrb[28].mxu0 %v3004_v61  ;;  %1231 = vst [vmem:[#allocation2 + $0xa0] sm:$0x2] %v1230_v9  ;;  %v13506_v61 = vld [vmem:[%s17638_s2 + $0x1a8] sm:$0xff]   ;;  %v14782_v9 = vld [vmem:[#allocation2 + $0x20] sm:$0xff]   ;;  %vm289_vm9 = vcmp.gt.f32.partialorder %v253_v60, 0.0 }
 0x1b7   : > { %12145 = vmatprep.mubr.bf16.mxu0 %v3013_v55  ;;  %v3342_v55 = vsel %vm17673_vm14, %v3339_v20, %v3341_v43  ;;  %v3790_v14 = vrot.slane %v14782_v9, 2  ;;  %v14809_v20 = vld [vmem:[#allocation2 + $0x48] sm:$0xff]   ;;  %v13521_v43 = vld [vmem:[%s17638_s2 + $0x1d8] sm:$0xff]  }
 0x1b9   : > { %v3791_v63 = vsel %vm17673_vm14, %v3788_v27, %v3790_v14 }
 0x1be   : > { %12146 = vmatmul.mubr.bf16.gmra.mrb[32].mxu0 %v3022_v29  ;;  %v3352_v29 = vsel %vm17673_vm14, %v3349_v16, %v3351_v59  ;;  %v13530_v16 = vld [vmem:[%s17638_s2 + $0x1f0] sm:$0xff]  }
 0x1bf   : > { %12165 = vmatprep.mubr.bf16.mxu0 %v3326_v36  ;;  %v3354_v36 = vsel %vm17673_vm14, %v3351_v59, %v3353_v47  ;;  %v14837_v47 = vld [vmem:[#allocation2 + $0x68] sm:$0xff]  }
 0x1c0   : > { %v3808_v19 = vrot.slane %v14837_v47, 2 }
 0x1c6   : > { %12166 = vmatmul.mubr.bf16.vlgmr.msra.gmra.mrb[0].mxu0 %v3328_v18  ;;  %v3789_v18 = vsel %vm17673_vm14, %v3787_v25, %v3788_v27  ;;  %v14857_v27 = vld [vmem:[#allocation2 + $0x78] sm:$0xff]  }
 0x1c7   : > { %12202 = vmatpush3.bf16.msra.mxu0 %v14679_v5  ;;  %12169 = vmatprep.mubr.bf16.mxu0 %v3330_v39  ;;  %v13504_v5 = vld [vmem:[%s17638_s2 + $0x198] sm:$0xff]   ;;  %v14785_v39 = vld [vmem:[#allocation2 + $0x28] sm:$0xff]  }
 0x1c8   : > { %12203 = vmatprep.subr.bf16.mxu0 %v13502_v3  ;;  %v3792_v1 = vrot.slane %v14785_v39, 2 }
 0x1cb   : > { %12204 = vmatpush3.bf16.msra.mxu0 %v13502_v3  ;;  %v13723_v3 = vmov 0  }
 0x1cc   : > { %12205 = vmatprep.subr.bf16.mxu0 %v13503_v40  ;;  %13410 = vset.pattern.permute.xlu0 %v13723_v3 }
 0x1cd   : > { %13411 = vset.pattern.permute.xlu1 %v13723_v3 }
 0x1ce   : > { %12170 = vmatmul.mubr.bf16.gmra.mrb[4].mxu0 %v3332_v17  ;;  %v3793_v17 = vsel %vm17673_vm14, %v3790_v14, %v3792_v1  ;;  %v3810_v14 = vrot.slane %v14854_v38, 2 }
 0x1cf   : > { %12173 = vmatprep.mubr.bf16.mxu0 %v3334_v2  ;;  %12206 = vmatpush3.bf16.msra.mxu0 %v13503_v40  ;;  %v14792_v40 = vld [vmem:[#allocation2 + $0x30] sm:$0xff]   ;;  %v13515_v2 = vld [vmem:[%s17638_s2 + $0x1c8] sm:$0xff]  }
 0x1d0   : > { %12207 = vmatprep.subr.bf16.mxu0 %v13504_v5  ;;  %v3794_v50 = vrot.slane %v14792_v40, 2 }
 0x1d3   : > { %12208 = vmatpush3.bf16.msra.mxu0 %v13504_v5  ;;  %v14798_v5 = vld [vmem:[#allocation2 + $0x38] sm:$0xff]  }
 0x1d4   : > { %12209 = vmatprep.subr.bf16.mxu0 %v13505_v15  ;;  %v3796_v48 = vrot.slane %v14798_v5, 2 }
 0x1d6   : > { %12174 = vmatmul.mubr.bf16.gmra.mrb[8].mxu0 %v3336_v37  ;;  %v3795_v37 = vsel %vm17673_vm14, %v3792_v1, %v3794_v50  ;;  %v256_v1 = vld [vmem:[%s17637_s1 + $0x18] sm:$0xff] }
 0x1d7   : > { %12177 = vmatprep.mubr.bf16.mxu0 %v3338_v52  ;;  %12210 = vmatpush3.bf16.msra.mxu0 %v13505_v15  ;;  %v13518_v15 = vld [vmem:[%s17638_s2 + $0x1d0] sm:$0xff]   ;;  %v14806_v52 = vld [vmem:[#allocation2 + $0x40] sm:$0xff]  }
 0x1d8   : > { %12211 = vmatprep.subr.bf16.mxu0 %v13506_v61 }
 0x1db   : > { %12212 = vmatpush3.bf16.msra.mxu0 %v13506_v61  ;;  %v3797_v61 = vsel %vm17673_vm14, %v3794_v50, %v3796_v48 }
 0x1dc   : > { %12213 = vmatprep.subr.bf16.mxu0 %v13507_v58 }
 0x1de   : > { %12178 = vmatmul.mubr.bf16.gmra.mrb[12].mxu0 %v3340_v24  ;;  %v3800_v24 = vrot.slane %v14809_v20, 2 }
 0x1df   : > { %12181 = vmatprep.mubr.bf16.mxu0 %v3342_v55  ;;  %12214 = vmatpush3.bf16.msra.mxu0 %v13507_v58  ;;  %v3798_v58 = vrot.slane %v14806_v52, 2  ;;  %v13524_v55 = vld [vmem:[%s17638_s2 + $0x1e0] sm:$0xff]  }
 0x1e0   : > { %12215 = vmatprep.subr.bf16.mxu0 %v13508_v35 }
 0x1e1   : > { %v3801_v62 = vsel %vm17673_vm14, %v3798_v58, %v3800_v24 }
 0x1e3   : > { %12216 = vmatpush3.bf16.msra.mxu0 %v13508_v35  ;;  %v3799_v35 = vsel %vm17673_vm14, %v3796_v48, %v3798_v58  ;;  %v14882_v58 = vld [vmem:[#allocation2 + $0x88] sm:$0xff]  }
 0x1e4   : > { %12253 = vmatprep.subr.bf16.mxu0 %v13511_v7 }
 0x1e6   : > { %12182 = vmatmul.mubr.bf16.gmra.mrb[16].mxu0 %v3344_v56  ;;  %v13527_v56 = vld [vmem:[%s17638_s2 + $0x1e8] sm:$0xff]  }
 0x1e7   : > { %12185 = vmatprep.mubr.bf16.mxu0 %v3346_v33  ;;  %v3802_v33 = vrot.slane %v14820_v45, 2 }
 0x1ee   : > { %12186 = vmatmul.mubr.bf16.gmra.mrb[20].mxu0 %v3348_v49  ;;  %v3803_v49 = vsel %vm17673_vm14, %v3800_v24, %v3802_v33  ;;  %v258_v24 = vld [vmem:[%s17637_s1 + $0x28] sm:$0xff] }
 0x1ef   : > { %12189 = vmatprep.mubr.bf16.mxu0 %v3350_v34  ;;  %v14834_v34 = vld [vmem:[#allocation2 + $0x60] sm:$0xff]  }
 0x1f6   : > { %12190 = vmatmul.mubr.bf16.gmra.mrb[24].mxu0 %v3352_v29  ;;  %v13533_v29 = vld [vmem:[%s17638_s2 + $0x1f8] sm:$0xff]  }
 0x1f7   : > { %12193 = vmatprep.mubr.bf16.mxu0 %v3354_v36  ;;  %v3806_v36 = vrot.slane %v14834_v34, 2 }
 0x1f9   : > { %v3809_v25 = vsel %vm17673_vm14, %v3806_v36, %v3808_v19 }
 0x1fe   : > { %12194 = vmatmul.mubr.bf16.gmra.mrb[28].mxu0 %v3356_v26  ;;  %v4955_v26 = vsel %vm289_vm9, 1, %v13723_v3 }
 0x1ff   : > { %12197 = vmatprep.mubr.bf16.mxu0 %v3358_v28  ;;  %4992 = vperm.xlu0 %13410, %v4955_v26  }
 0x206   : > { %12198 = vmatmul.mubr.bf16.gmra.mrb[32].mxu0 %v3360_v13  ;;  %v255_v13 = vld [vmem:[%s17637_s1 + $0x10] sm:$0xff] }
 0x207   : > { %12217 = vmatprep.mubr.bf16.mxu0 %v3789_v18  ;;  %v254_v18 = vld [vmem:[%s17637_s1 + $0x8] sm:$0xff]  ;;  %vm291_vm9 = vcmp.gt.f32.partialorder %v255_v13, 0.0 }
 0x208   : > { %vm290_vm1 = vcmp.gt.f32.partialorder %v254_v18, 0.0  ;;  %v262_v13 = vld [vmem:[%s17637_s1 + $0x48] sm:$0xff]  ;;  %v263_v18 = vld [vmem:[%s17637_s1 + $0x50] sm:$0xff] }
 0x209   : > { %v4956_v50 = vsel %vm290_vm1, 1, %v13723_v3 }
 0x20a   : > { %4995 = vperm.xlu0 %13410, %v4956_v50  }
 0x20e   : > { %12218 = vmatmul.mubr.bf16.vlgmr.msra.gmra.mrb[0].mxu0 %v3791_v63  ;;  %v257_v63 = vld [vmem:[%s17637_s1 + $0x20] sm:$0xff] }
 0x20f   : > { %12254 = vmatpush3.bf16.msra.mxu0 %v13511_v7  ;;  %12221 = vmatprep.mubr.bf16.mxu0 %v3793_v17  ;;  %v14823_v7 = vld [vmem:[#allocation2 + $0x58] sm:$0xff]   ;;  %v3812_v17 = vrot.slane %v14857_v27, 2  ;;  %vm293_vm15 = vcmp.gt.f32.partialorder %v257_v63, 0.0 }
 0x210   : > { %12255 = vmatprep.subr.bf16.mxu0 %v13515_v2  ;;  %v3804_v44 = vrot.slane %v14823_v7, 2  ;;  %v264_v63 = vld [vmem:[%s17637_s1 + $0x58] sm:$0xff] }
 0x212   : > { %v3805_v59 = vsel %vm17673_vm14, %v3802_v33, %v3804_v44  ;;  %v3807_v28 = vsel %vm17673_vm14, %v3804_v44, %v3806_v36  ;;  %vm292_vm14 = vcmp.gt.f32.partialorder %v256_v1, 0.0  ;;  %v3816_v33 = vrot.slane %v14882_v58, 2 }
 0x213   : > { %12256 = vmatpush3.bf16.msra.mxu0 %v13515_v2  ;;  %v4957_v2 = vsel %vm291_vm9, 1, %v13723_v3  ;;  %v4958_v48 = vsel %vm292_vm14, 1, %v13723_v3  ;;  %vm17877_vm14 = vcmask 1045504   ;;  %v4137_v1 = vshll.u32 %v14776_v30, 16 }
 0x214   : > { %12257 = vmatprep.subr.bf16.mxu0 %v13518_v15  ;;  %4998 = vperm.xlu1 %13411, %v4957_v2   ;;  %vm17878_vm9 = vmmov %vm17877_vm14 }
 0x216   : > { %12222 = vmatmul.mubr.bf16.gmra.mrb[4].mxu0 %v3795_v37  ;;  %v3811_v37 = vsel %vm17875_vm5, %v3808_v19, %v3810_v14  ;;  %v14906_v19 = vld [vmem:[#allocation2 + $0x98] sm:$0xff]  }
 0x217   : > { %12225 = vmatprep.mubr.bf16.mxu0 %v3797_v61  ;;  %12258 = vmatpush3.bf16.msra.mxu0 %v13518_v15  ;;  %v4959_v15 = vsel %vm293_vm15, 1, %v13723_v3  ;;  %v14879_v61 = vld [vmem:[#allocation2 + $0x80] sm:$0xff]   ;;  %vm294_vm15 = vcmp.gt.f32.partialorder %v258_v24, 0.0 }
 0x218   : > { %12259 = vmatprep.subr.bf16.mxu0 %v13521_v43  ;;  %5001 = vperm.xlu1 %13411, %v4958_v48   ;;  %v4960_v44 = vsel %vm294_vm15, 1, %v13723_v3  ;;  %vm298_vm15 = vcmp.gt.f32.partialorder %v262_v13, 0.0  ;;  %v13535_v48 = vld [vmem:[#allocation2 + $0xa0] ss:$0 sps:$4 sm:$0x33]   ;;  %v4155_v13 = vshll.u32 %v14785_v39, 16 }
 0x219   : > { %5004 = vperm.xlu0 %13410, %v4959_v15   ;;  %v4964_v2 = vsel %vm298_vm15, 1, %v13723_v3 }
 0x21b   : > { %12260 = vmatpush3.bf16.msra.mxu0 %v13521_v43  ;;  %v3813_v43 = vsel %vm17876_vm8, %v3810_v14, %v3812_v17  ;;  %v4134_v14 = vshrl.u32 %v14776_v30, 16 }
 0x21c   : > { %12261 = vmatprep.subr.bf16.mxu0 %v13524_v55  ;;  %5007 = vperm.xlu1 %13411, %v4960_v44   ;;  %v3822_v44 = vrot.slane %v13535_v48, 2 }
 0x21e   : > { %12226 = vmatmul.mubr.bf16.gmra.mrb[8].mxu0 %v3799_v35  ;;  %v3814_v35 = vrot.slane %v14879_v61, 2 }
 0x21f   : > { %12229 = vmatprep.mubr.bf16.mxu0 %v3801_v62  ;;  %12262 = vmatpush3.bf16.msra.mxu0 %v13524_v55  ;;  %v259_v55 = vld [vmem:[%s17637_s1 + $0x30] sm:$0xff]  ;;  %v260_v62 = vld [vmem:[%s17637_s1 + $0x38] sm:$0xff] }
 0x220   : > { %12263 = vmatprep.subr.bf16.mxu0 %v13527_v56  ;;  %vm295_vm5 = vcmp.gt.f32.partialorder %v259_v55, 0.0  ;;  %vm296_vm8 = vcmp.gt.f32.partialorder %v260_v62, 0.0  ;;  %v3815_v36 = vsel %vm17877_vm14, %v3812_v17, %v3814_v35  ;;  %v3817_v60 = vsel %vm17878_vm9, %v3814_v35, %v3816_v33  ;;  %vm17879_vm14 = vmmov %vm17878_vm9 }
 0x221   : > { %v3820_v17 = vrot.slane %v14906_v19, 2  ;;  %v4136_v35 = vrot.slane %v4134_v14, 2  ;;  %v4139_v62 = vrot.slane %v4137_v1, 3 }
 0x223   : > { %12264 = vmatpush3.bf16.msra.mxu0 %v13527_v56  ;;  %v261_v56 = vld [vmem:[%s17637_s1 + $0x40] sm:$0xff] }
 0x224   : > { %12265 = vmatprep.subr.bf16.mxu0 %v13530_v16  ;;  %vm297_vm1 = vcmp.gt.f32.partialorder %v261_v56, 0.0 }
 0x226   : > { %12230 = vmatmul.mubr.bf16.gmra.mrb[12].mxu0 %v3803_v49  ;;  %v14900_v49 = vld [vmem:[#allocation2 + $0x90] sm:$0xff]  }
 0x227   : > { %12233 = vmatprep.mubr.bf16.mxu0 %v3805_v59  ;;  %12266 = vmatpush3.bf16.msra.mxu0 %v13530_v16  ;;  %v4961_v16 = vsel %vm295_vm5, 1, %v13723_v3  ;;  %v4962_v59 = vsel %vm296_vm8, 1, %v13723_v3  ;;  %v3818_v26 = vrot.slane %v14900_v49, 2  ;;  %vm299_vm5 = vcmp.gt.f32.partialorder %v263_v18, 0.0 }
 0x228   : > { %12267 = vmatprep.subr.bf16.mxu0 %v13533_v29  ;;  %5010 = vperm.xlu0 %13410, %v4961_v16   ;;  %v4965_v50 = vsel %vm299_vm5, 1, %v13723_v3  ;;  %vm300_vm8 = vcmp.gt.f32.partialorder %v264_v63, 0.0 }
 0x229   : > { %5013 = vperm.xlu1 %13411, %v4962_v59   ;;  %v3819_v55 = vsel %vm17879_vm14, %v3816_v33, %v3818_v26  ;;  %v3821_v56 = vsel %vm17878_vm9, %v3818_v26, %v3820_v17  ;;  %v4143_v59 = vshrl.u32 %v14782_v9, 16  ;;  %v267_v33 = vld [vmem:[%s17637_s1 + $0x70] sm:$0xff]  ;;  %v4152_v26 = vshrl.u32 %v14785_v39, 16 }
 0x22a   : > { %vm303_vm5 = vcmp.gt.f32.partialorder %v267_v33, 0.0 }
 0x22b   : > { %12268 = vmatpush3.bf16.msra.mxu0 %v13533_v29  ;;  %v4963_v29 = vsel %vm297_vm1, 1, %v13723_v3  ;;  %v4969_v14 = vsel %vm303_vm5, 1, %v13723_v3  ;;  %v4145_v1 = vrot.slane %v4143_v59, 2 }
 0x22c   : > { %12305 = vmatprep.subr.bf16.mxu0 %v14850_v31  ;;  %5016 = vperm.xlu0 %13410, %v4963_v29   ;;  %v4146_v29 = vshll.u32 %v14782_v9, 16 }
 0x22d   : > { %5019 = vperm.xlu1 %13411, %v4964_v2  }
 0x22e   : > { %12234 = vmatmul.mubr.bf16.gmra.mrb[16].mxu0 %v3807_v28  ;;  %v4126_v28 = vshrl.u32 %v14774_v8, 16  ;;  %v4148_v63 = vrot.slane %v4146_v29, 3 }
 0x22f   : > { %12237 = vmatprep.mubr.bf16.mxu0 %v3809_v25  ;;  %v4129_v25 = vshll.u32 %v14774_v8, 16  ;;  %v265_v8 = vld [vmem:[%s17637_s1 + $0x60] sm:$0xff] }
 0x230   : > { %5022 = vperm.xlu0 %13410, %v4965_v50   ;;  %vm301_vm1 = vcmp.gt.f32.partialorder %v265_v8, 0.0  ;;  %v4128_v15 = vrot.slane %v4126_v28, 2  ;;  %v268_v28 = vld [vmem:[%s17637_s1 + $0x78] sm:$0xff]  ;;  %v3823_v50 = vsel %vm17878_vm9, %v3820_v17, %v3822_v44  ;;  %v271_v17 = vld [vmem:[%s17637_s1 + $0x90] sm:$0xff] }
 0x231   : > { %v4967_v24 = vsel %vm301_vm1, 1, %v13723_v3  ;;  %vm17785_vm1 = vsmask.f32 5376  ;;  %vm307_vm5 = vcmp.gt.f32.partialorder %v271_v17, 0.0  ;;  %v272_v44 = vld [vmem:[%s17637_s1 + $0x98] sm:$0xff] }
 0x234   : > { %5028 = vperm.xlu0 %13410, %v4967_v24   ;;  %v4161_v24 = vshrl.u32 %v14792_v40, 16 }
 0x236   : > { %12238 = vmatmul.mubr.bf16.gmra.mrb[20].mxu0 %v3811_v37  ;;  %v4131_v37 = vrot.slane %v4129_v25, 3  ;;  %v269_v25 = vld [vmem:[%s17637_s1 + $0x80] sm:$0xff]  ;;  %v4163_v33 = vrot.slane %v4161_v24, 2 }
 0x237   : > { %12241 = vmatprep.mubr.bf16.mxu0 %v3813_v43  ;;  %v4966_v43 = vsel %vm300_vm8, 1, %v13723_v3  ;;  %vm304_vm8 = vcmp.gt.f32.partialorder %v268_v28, 0.0  ;;  %vm305_vm14 = vcmp.gt.f32.partialorder %v269_v25, 0.0  ;;  %v277_v24 = vld [vmem:[%s17637_s1 + $0xc0] sm:$0xff] }
 0x238   : > { %5025 = vperm.xlu1 %13411, %v4966_v43   ;;  %v4132_v16 = vor.u32 %v4131_v37, %v4128_v15  ;;  %5034 = vperm.xlu0 %13410, %v4969_v14   ;;  %v4970_v8 = vsel %vm304_vm8, 1, %v13723_v3  ;;  %v4971_v2 = vsel %vm305_vm14, 1, %v13723_v3  ;;  %v4154_v15 = vrot.slane %v4152_v26, 2 }
 0x239   : > { %v4157_v37 = vrot.slane %v4155_v13, 3  ;;  %v4149_v43 = vor.u32 %v4148_v63, %v4145_v1  ;;  %vm308_vm8 = vcmp.gt.f32.partialorder %v272_v44, 0.0  ;;  %v13537_v63 = vld [vmem:[%s17638_s2 + $0x208] sm:$0xff]  }
 0x23a   : > { %v4974_v28 = vsel %vm308_vm8, 1, %v13723_v3  ;;  %vm313_vm8 = vcmp.gt.f32.partialorder %v277_v24, 0.0  ;;  %v283_v24 = vld [vmem:[%s17637_s1 + $0xf0] sm:$0xff] }
 0x23b   : > { %v4158_v59 = vor.u32 %v4157_v37, %v4154_v15  ;;  %v4188_v37 = vshrl.u32 %v14809_v20, 16 }
 0x23c   : > { %5040 = vperm.xlu0 %13410, %v4971_v2   ;;  %v4179_v2 = vshrl.u32 %v14806_v52, 16 }
 0x23d   : > { %v4159_v1 = vsel %vm17785_vm1, %v4149_v43, %v4158_v59 }
 0x23e   : > { %12242 = vmatmul.mubr.bf16.gmra.mrb[24].mxu0 %v3815_v36  ;;  %v266_v36 = vld [vmem:[%s17637_s1 + $0x68] sm:$0xff] }
 0x23f   : > { %12245 = vmatprep.mubr.bf16.mxu0 %v3817_v60  ;;  %v4140_v60 = vor.u32 %v4139_v62, %v4136_v35  ;;  %vm302_vm15 = vcmp.gt.f32.partialorder %v266_v36, 0.0  ;;  %v270_v35 = vld [vmem:[%s17637_s1 + $0x88] sm:$0xff]  ;;  %v4170_v62 = vshrl.u32 %v14798_v5, 16  ;;  %v4973_v36 = vsel %vm307_vm5, 1, %v13723_v3 }
 0x240   : > { %v4968_v18 = vsel %vm302_vm15, 1, %v13723_v3  ;;  %vm306_vm15 = vcmp.gt.f32.partialorder %v270_v35, 0.0  ;;  %5046 = vperm.xlu0 %13410, %v4973_v36  }
 0x241   : > { %5031 = vperm.xlu1 %13411, %v4968_v18   ;;  %v4141_v48 = vsel %vm17785_vm1, %v4132_v16, %v4140_v60  ;;  %v273_v16 = vld [vmem:[%s17637_s1 + $0xa0] sm:$0xff]  ;;  %v4972_v29 = vsel %vm306_vm15, 1, %v13723_v3  ;;  %v4150_v13 = vsel %vm17785_vm1, %v4140_v60, %v4149_v43  ;;  %v4172_v18 = vrot.slane %v4170_v62, 2  ;;  %v274_v60 = vld [vmem:[%s17637_s1 + $0xa8] sm:$0xff]  ;;  %v276_v43 = vld [vmem:[%s17637_s1 + $0xb8] sm:$0xff] }
 0x242   : > { %vm309_vm14 = vcmp.gt.f32.partialorder %v273_v16, 0.0  ;;  %vm310_vm9 = vcmp.gt.f32.partialorder %v274_v60, 0.0  ;;  %vm312_vm5 = vcmp.gt.f32.partialorder %v276_v43, 0.0  ;;  %v4181_v62 = vrot.slane %v4179_v2, 2  ;;  %v281_v2 = vld [vmem:[%s17637_s1 + $0xe0] sm:$0xff]  ;;  %v282_v43 = vld [vmem:[%s17637_s1 + $0xe8] sm:$0xff] }
 0x243   : > { %v4975_v25 = vsel %vm309_vm14, 1, %v13723_v3  ;;  %v4976_v35 = vsel %vm310_vm9, 1, %v13723_v3  ;;  %v4978_v44 = vsel %vm312_vm5, 1, %v13723_v3  ;;  %v4979_v16 = vsel %vm313_vm8, 1, %v13723_v3  ;;  %v13540_v60 = vld [vmem:[%s17638_s2 + $0x220] sm:$0xff]  }
 0x244   : > { %5052 = vperm.xlu0 %13410, %v4975_v25   ;;  %vm317_vm5 = vcmp.gt.f32.partialorder %v281_v2, 0.0  ;;  %vm318_vm8 = vcmp.gt.f32.partialorder %v282_v43, 0.0 }
 0x245   : > { %5037 = vperm.xlu1 %13411, %v4970_v8  }
 0x246   : > { %12246 = vmatmul.mubr.bf16.gmra.mrb[28].mxu0 %v3819_v55  ;;  %v4164_v55 = vshll.u32 %v14792_v40, 16 }
 0x247   : > { %12249 = vmatprep.mubr.bf16.mxu0 %v3821_v56  ;;  %v4173_v56 = vshll.u32 %v14798_v5, 16 }
 0x248   : > { %v4166_v26 = vrot.slane %v4164_v55, 3  ;;  %v13538_v55 = vld [vmem:[%s17638_s2 + $0x210] sm:$0xff]  }
 0x249   : > { %5043 = vperm.xlu1 %13411, %v4972_v29   ;;  %v4175_v14 = vrot.slane %v4173_v56, 3 }
 0x24a   : > { %v4167_v8 = vor.u32 %v4166_v26, %v4163_v33  ;;  %v4190_v33 = vrot.slane %v4188_v37, 2 }
 0x24b   : > { %v4176_v15 = vor.u32 %v4175_v14, %v4172_v18  ;;  %v4200_v18 = vshll.u32 %v14820_v45, 16  ;;  %v278_v14 = vld [vmem:[%s17637_s1 + $0xc8] sm:$0xff] }
 0x24c   : > { %v4168_v29 = vsel %vm17785_vm1, %v4158_v59, %v4167_v8  ;;  %v4206_v59 = vshrl.u32 %v14823_v7, 16  ;;  %vm314_vm14 = vcmp.gt.f32.partialorder %v278_v14, 0.0  ;;  %v4227_v14 = vshll.u32 %v14837_v47, 16 }
 0x24d   : > { %5049 = vperm.xlu1 %13411, %v4974_v28   ;;  %v4177_v36 = vsel %vm17785_vm1, %v4167_v8, %v4176_v15  ;;  %v13539_v28 = vld [vmem:[%s17638_s2 + $0x218] sm:$0xff]   ;;  %v4209_v8 = vshll.u32 %v14823_v7, 16 }
 0x24e   : > { %12250 = vmatmul.mubr.bf16.gmra.mrb[32].mxu0 %v3823_v50  ;;  %v4182_v50 = vshll.u32 %v14806_v52, 16 }
 0x24f   : > { %12269 = vmatprep.mubr.bf16.mxu0 %v4141_v48  ;;  %v275_v48 = vld [vmem:[%s17637_s1 + $0xb0] sm:$0xff] }
 0x250   : > { %vm311_vm15 = vcmp.gt.f32.partialorder %v275_v48, 0.0  ;;  %v4184_v56 = vrot.slane %v4182_v50, 3  ;;  %v4980_v48 = vsel %vm314_vm14, 1, %v13723_v3  ;;  %vm319_vm14 = vcmp.gt.f32.partialorder %v283_v24, 0.0 }
 0x251   : > { %v4977_v17 = vsel %vm311_vm15, 1, %v13723_v3  ;;  %5055 = vperm.xlu1 %13411, %v4976_v35  }
 0x252   : > { %5058 = vperm.xlu0 %13410, %v4977_v17   ;;  %v4185_v25 = vor.u32 %v4184_v56, %v4181_v62  ;;  %v4983_v17 = vsel %vm317_vm5, 1, %v13723_v3 }
 0x254   : > { %v4186_v62 = vsel %vm17785_vm1, %v4176_v15, %v4185_v25  ;;  %v285_v15 = vld [vmem:[%s17637_s1 + $0x100] sm:$0xff] }
 0x255   : > { %5061 = vperm.xlu1 %13411, %v4978_v44   ;;  %v4208_v44 = vrot.slane %v4206_v59, 2  ;;  %v4224_v59 = vshrl.u32 %v14837_v47, 16 }
 0x256   : > { %12270 = vmatmul.mubr.bf16.vlgmr.msra.gmra.mrb[0].mxu0 %v4150_v13  ;;  %5064 = vperm.xlu0 %13410, %v4979_v16   ;;  %v4197_v13 = vshrl.u32 %v14820_v45, 16  ;;  %v4211_v16 = vrot.slane %v4209_v8, 3  ;;  %v287_v8 = vld [vmem:[%s17637_s1 + $0x110] sm:$0xff] }
 0x257   : > { %12306 = vmatpush3.bf16.msra.mxu0 %v14850_v31  ;;  %12273 = vmatprep.mubr.bf16.mxu0 %v4159_v1  ;;  %v4191_v31 = vshll.u32 %v14809_v20, 16  ;;  %v279_v1 = vld [vmem:[%s17637_s1 + $0xd0] sm:$0xff] }
 0x258   : > { %12307 = vmatprep.subr.bf16.mxu0 %v13537_v63  ;;  %vm315_vm9 = vcmp.gt.f32.partialorder %v279_v1, 0.0  ;;  %v13542_v1 = vld [vmem:[%s17638_s2 + $0x230] sm:$0xff]  }
 0x259   : > { %v4193_v26 = vrot.slane %v4191_v31, 3  ;;  %v4981_v37 = vsel %vm315_vm9, 1, %v13723_v3  ;;  %5067 = vperm.xlu1 %13411, %v4980_v48   ;;  %v4202_v31 = vrot.slane %v4200_v18, 3  ;;  %v4212_v18 = vor.u32 %v4211_v16, %v4208_v44 }
 0x25a   : > { %5070 = vperm.xlu0 %13410, %v4981_v37   ;;  %v4233_v44 = vshrl.u32 %v14854_v38, 16  ;;  %v4236_v16 = vshll.u32 %v14854_v38, 16 }
 0x25b   : > { %12308 = vmatpush3.bf16.msra.mxu0 %v13537_v63  ;;  %v280_v63 = vld [vmem:[%s17637_s1 + $0xd8] sm:$0xff]  ;;  %v4194_v50 = vor.u32 %v4193_v26, %v4190_v33  ;;  %v4984_v26 = vsel %vm318_vm8, 1, %v13723_v3  ;;  %vm323_vm8 = vcmp.gt.f32.partialorder %v287_v8, 0.0  ;;  %v4254_v8 = vshll.u32 %v14879_v61, 16 }
 0x25c   : > { %12309 = vmatprep.subr.bf16.mxu0 %v13538_v55  ;;  %vm316_vm15 = vcmp.gt.f32.partialorder %v280_v63, 0.0  ;;  %v286_v63 = vld [vmem:[%s17637_s1 + $0x108] sm:$0xff] }
 0x25d   : > { %v4982_v35 = vsel %vm316_vm15, 1, %v13723_v3  ;;  %v4195_v56 = vsel %vm17785_vm1, %v4185_v25, %v4194_v50  ;;  %v4215_v25 = vshrl.u32 %v14834_v34, 16  ;;  %vm321_vm15 = vcmp.gt.f32.partialorder %v285_v15, 0.0 }
 0x25e   : > { %12274 = vmatmul.mubr.bf16.gmra.mrb[4].mxu0 %v4168_v29  ;;  %v13541_v29 = vld [vmem:[%s17638_s2 + $0x228] sm:$0xff]   ;;  %5073 = vperm.xlu1 %13411, %v4982_v35   ;;  %v4987_v48 = vsel %vm321_vm15, 1, %v13723_v3  ;;  %vm322_vm5 = vcmp.gt.f32.partialorder %v286_v63, 0.0  ;;  %v13543_v35 = vld [vmem:[%s17638_s2 + $0x238] sm:$0xff]   ;;  %v4245_v15 = vshll.u32 %v14857_v27, 16  ;;  %v4251_v63 = vshrl.u32 %v14879_v61, 16 }
 0x25f   : > { %12277 = vmatprep.mubr.bf16.mxu0 %v4177_v36  ;;  %12310 = vmatpush3.bf16.msra.mxu0 %v13538_v55  ;;  %v4199_v55 = vrot.slane %v4197_v13, 2  ;;  %v284_v36 = vld [vmem:[%s17637_s1 + $0xf8] sm:$0xff]  ;;  %v4218_v13 = vshll.u32 %v14834_v34, 16  ;;  %v4217_v37 = vrot.slane %v4215_v25, 2  ;;  %v4238_v25 = vrot.slane %v4236_v16, 3 }
 0x260   : > { %12311 = vmatprep.subr.bf16.mxu0 %v13539_v28  ;;  %5076 = vperm.xlu0 %13410, %v4983_v17   ;;  %vm320_vm9 = vcmp.gt.f32.partialorder %v284_v36, 0.0  ;;  %v4988_v17 = vsel %vm322_vm5, 1, %v13723_v3  ;;  %v4242_v36 = vshrl.u32 %v14857_v27, 16 }
 0x261   : > { %v4203_v33 = vor.u32 %v4202_v31, %v4199_v55  ;;  %v4220_v43 = vrot.slane %v4218_v13, 3  ;;  %v4226_v55 = vrot.slane %v4224_v59, 2  ;;  %v4229_v31 = vrot.slane %v4227_v14, 3 }
 0x262   : > { %5079 = vperm.xlu1 %13411, %v4984_v26   ;;  %v4244_v59 = vrot.slane %v4242_v36, 2  ;;  %v4247_v14 = vrot.slane %v4245_v15, 3  ;;  %v15093_v36 = vld [vmem:[#allocation2 + $0xa0] ss:$0 sps:$4 sm:$0x77]  }
 0x263   : > { %12312 = vmatpush3.bf16.msra.mxu0 %v13539_v28  ;;  %v4985_v28 = vsel %vm319_vm14, 1, %v13723_v3  ;;  %v4204_v2 = vsel %vm17785_vm1, %v4194_v50, %v4203_v33  ;;  %v4213_v24 = vsel %vm17785_vm1, %v4203_v33, %v4212_v18  ;;  %v288_v50 = vld [vmem:[%s17637_s1 + $0x118] sm:$0xff] }
 0x264   : > { %12313 = vmatprep.subr.bf16.mxu0 %v13540_v60  ;;  %5082 = vperm.xlu0 %13410, %v4985_v28   ;;  %vm324_vm14 = vcmp.gt.f32.partialorder %v288_v50, 0.0  ;;  %v4235_v28 = vrot.slane %v4233_v44, 2  ;;  %v4272_v50 = vshll.u32 %v14900_v49, 16 }
 0x265   : > { %v4990_v33 = vsel %vm324_vm14, 1, %v13723_v3 }
 0x266   : > { %12278 = vmatmul.mubr.bf16.gmra.mrb[8].mxu0 %v4186_v62  ;;  %v4989_v62 = vsel %vm323_vm8, 1, %v13723_v3 }
 0x267   : > { %12281 = vmatprep.mubr.bf16.mxu0 %v4195_v56  ;;  %12314 = vmatpush3.bf16.msra.mxu0 %v13540_v60  ;;  %v4986_v60 = vsel %vm320_vm9, 1, %v13723_v3  ;;  %v4221_v56 = vor.u32 %v4220_v43, %v4217_v37  ;;  %v4260_v3 = vshrl.u32 %v14882_v58, 16  ;;  %v4256_v37 = vrot.slane %v4254_v8, 3 }
 0x268   : > { %12315 = vmatprep.subr.bf16.mxu0 %v13541_v29  ;;  %5085 = vperm.xlu1 %13411, %v4986_v60   ;;  %vm17784_vm9 = vcmask 1044480  }
 0x269   : > { %5088 = vperm.xlu0 %13410, %v4987_v48   ;;  %v4222_v26 = vsel %vm17785_vm1, %v4212_v18, %v4221_v56  ;;  %v4263_v18 = vshll.u32 %v14882_v58, 16  ;;  %v4253_v48 = vrot.slane %v4251_v63, 2 }
 0x26b   : > { %12316 = vmatpush3.bf16.msra.mxu0 %v13541_v29  ;;  %v4230_v29 = vor.u32 %v4229_v31, %v4226_v55  ;;  %v4265_v55 = vrot.slane %v4263_v18, 3  ;;  %v4257_v31 = vor.u32 %v4256_v37, %v4253_v48  ;;  %v4597_v48 = vrot.slane %v14776_v30, 3 }
 0x26c   : > { %12317 = vmatprep.subr.bf16.mxu0 %v13542_v1  ;;  %5091 = vperm.xlu1 %13411, %v4988_v17   ;;  %v4605_v30 = vrot.slane %v14798_v5, 3  ;;  %v4613_v5 = vrot.slane %v14823_v7, 3  ;;  %v4621_v7 = vrot.slane %v14857_v27, 3  ;;  %v4629_v27 = vrot.slane %v14906_v19, 3 }
 0x26d   : > { %5094 = vperm.xlu0 %13410, %v4989_v62   ;;  %v4231_v13 = vsel %vm17785_vm1, %v4221_v56, %v4230_v29  ;;  %v4278_v62 = vshrl.u32 %v14906_v19, 16  ;;  %v4281_v56 = vshll.u32 %v14906_v19, 16 }
 0x26e   : > { %12282 = vmatmul.mubr.bf16.gmra.mrb[12].mxu0 %v4204_v2  ;;  %v4248_v2 = vor.u32 %v4247_v14, %v4244_v59  ;;  %v4574_v14 = vld [vmem:[#allocation2 + $0x10] sm:$0x8] }
 0x26f   : > { %12285 = vmatprep.mubr.bf16.mxu0 %v4213_v24  ;;  %12318 = vmatpush3.bf16.msra.mxu0 %v13542_v1  ;;  %v4239_v1 = vor.u32 %v4238_v25, %v4235_v28  ;;  %v4262_v24 = vrot.slane %v4260_v3, 2  ;;  %v4287_v25 = vshrl.u32 %v15093_v36, 16  ;;  %v10945_v3 = vcombine.low %v4574_v14, %v14769_v6 }
 0x270   : > { %12319 = vmatprep.subr.bf16.mxu0 %v13543_v35  ;;  %5097 = vperm.xlu1 %13411, %v4990_v33   ;;  %v4258_v44 = vsel %vm17785_vm1, %v4248_v2, %v4257_v31  ;;  %v4280_v33 = vrot.slane %v4278_v62, 2 }
 0x271   : > { %v4240_v60 = vsel %vm17785_vm1, %v4230_v29, %v4239_v1  ;;  %v4249_v43 = vsel %vm17785_vm1, %v4239_v1, %v4248_v2  ;;  %v4266_v17 = vor.u32 %v4265_v55, %v4262_v24  ;;  %v4274_v29 = vrot.slane %v4272_v50, 3 }
 0x272   : > { %v4289_v63 = vrot.slane %v4287_v25, 2  ;;  %v4599_v24 = vrot.slane %v14782_v9, 3  ;;  %v4601_v55 = vrot.slane %v14785_v39, 3  ;;  %v4607_v9 = vrot.slane %v14806_v52, 3 }
 0x273   : > { %12320 = vmatpush3.bf16.msra.mxu0 %v13543_v35  ;;  %v4269_v35 = vshrl.u32 %v14900_v49, 16  ;;  %v4267_v15 = vsel %vm17785_vm1, %v4257_v31, %v4266_v17  ;;  %v4609_v39 = vrot.slane %v14809_v20, 3  ;;  %v4615_v52 = vrot.slane %v14834_v34, 3 }
 0x274   : > { %v4600_v31 = vsel %vm17784_vm9, %v4597_v48, %v4599_v24  ;;  %v4602_v6 = vsel %vm17784_vm9, %v4599_v24, %v4601_v55  ;;  %v4608_v62 = vsel %vm17784_vm9, %v4605_v30, %v4607_v9  ;;  %v4617_v20 = vrot.slane %v14837_v47, 3 }
 0x275   : > { %v4271_v16 = vrot.slane %v4269_v35, 2  ;;  %v4603_v35 = vrot.slane %v14792_v40, 3  ;;  %v4611_v40 = vrot.slane %v14820_v45, 3  ;;  %v4619_v45 = vrot.slane %v14854_v38, 3 }
 0x276   : > { %12286 = vmatmul.mubr.bf16.gmra.mrb[16].mxu0 %v4222_v26  ;;  %v4283_v26 = vrot.slane %v4281_v56, 3  ;;  %v4610_v56 = vsel %vm17784_vm9, %v4607_v9, %v4609_v39  ;;  %v4623_v34 = vrot.slane %v14879_v61, 3  ;;  %v4625_v47 = vrot.slane %v14882_v58, 3 }
 0x277   : > { %12289 = vmatprep.mubr.bf16.mxu0 %v4231_v13  ;;  %v4275_v28 = vor.u32 %v4274_v29, %v4271_v16  ;;  %v4290_v13 = vshll.u32 %v15093_v36, 16  ;;  %v4604_v50 = vsel %vm17784_vm9, %v4601_v55, %v4603_v35  ;;  %v4614_v16 = vsel %vm17784_vm9, %v4611_v40, %v4613_v5 }
 0x278   : > { %v4284_v59 = vor.u32 %v4283_v26, %v4280_v33  ;;  %v4616_v29 = vsel %vm17784_vm9, %v4613_v5, %v4615_v52  ;;  %v4620_v33 = vsel %vm17784_vm9, %v4617_v20, %v4619_v45  ;;  %v4622_v26 = vsel %vm17784_vm9, %v4619_v45, %v4621_v7 }
 0x279   : > { %v4276_v1 = vsel %vm17785_vm1, %v4266_v17, %v4275_v28  ;;  %v4292_v8 = vrot.slane %v4290_v13, 3  ;;  %v4606_v17 = vsel %vm17784_vm9, %v4603_v35, %v4605_v30  ;;  %v4626_v25 = vsel %vm17784_vm9, %v4623_v34, %v4625_v47 }
 0x27a   : > { %v4285_v2 = vsel %vm17785_vm1, %v4275_v28, %v4284_v59  ;;  %v4624_v28 = vsel %vm17784_vm9, %v4621_v7, %v4623_v34  ;;  %v4627_v38 = vrot.slane %v14900_v49, 3  ;;  %v4631_v61 = vrot.slane %v15093_v36, 3 }
 0x27b   : > { %v4293_v18 = vor.u32 %v4292_v8, %v4289_v63 }
 0x27c   : > { %v4628_v13 = vsel %vm17784_vm9, %v4625_v47, %v4627_v38  ;;  %v4632_v58 = vsel %vm17784_vm9, %v4629_v27, %v4631_v61 }
 0x27d   : > { %v4294_v37 = vsel %vm17785_vm1, %v4284_v59, %v4293_v18  ;;  %v4630_v59 = vsel %vm17784_vm9, %v4627_v38, %v4629_v27 }
 0x27e   : > { %12290 = vmatmul.mubr.bf16.gmra.mrb[20].mxu0 %v4240_v60  ;;  %v4596_v60 = vrot.slane %v10945_v3, 3  ;;  %v15138_v14 = vpop.permute.xlu0 %4992 }
 0x27f   : > { %12293 = vmatprep.mubr.bf16.mxu0 %v4249_v43  ;;  %17880 = vst [vmem:[#allocation17_spill] sm:$0xff] %v15138_v14  ;;  %vm17783_vm15 = vcmp.eq.s32.totalorder %v15138_v14, 1 }
 0x280   : > { %v4598_v43 = vsel %vm17784_vm9, %v4596_v60, %v4597_v48 }
 0x286   : > { %12294 = vmatmul.mubr.bf16.gmra.mrb[24].mxu0 %v4258_v44  ;;  %v4612_v44 = vsel %vm17784_vm9, %v4609_v39, %v4611_v40 }
 0x287   : > { %12297 = vmatprep.mubr.bf16.mxu0 %v4267_v15  ;;  %v4618_v15 = vsel %vm17784_vm9, %v4615_v52, %v4617_v20 }
 0x289   : > { %v15142_v63 = vpop.permute.xlu0 %4995 }
 0x28a   : > { %17882 = vst [vmem:[#allocation19_spill] sm:$0xff] %v15142_v63  ;;  %vm17678_vm8 = vcmp.eq.s32.totalorder %v15142_v63, 1 }
 0x28e   : > { %12298 = vmatmul.mubr.bf16.gmra.mrb[28].mxu0 %v4276_v1 }
 0x28f   : > { %12301 = vmatprep.mubr.bf16.mxu0 %v4285_v2 }
 0x293   : > { %v15140_v1 = vpop.permute.xlu1 %4998 }
 0x294   : > { %17881 = vst [vmem:[#allocation18_spill] sm:$0xff] %v15140_v1  ;;  %vm17680_vm5 = vcmp.eq.s32.totalorder %v15140_v1, 1 }
 0x296   : > { %12302 = vmatmul.mubr.bf16.gmra.mrb[32].mxu0 %v4294_v37  ;;  %v15165_v37 = vld [vmem:[%s17639_s3] ss:$0 sm:$0xff] }
 0x297   : > { %12321 = vmatprep.mubr.bf16.mxu0 %v4598_v43  ;;  %v15144_v49 = vpop.permute.xlu1 %5001 }
 0x298   : > { %17883 = vst [vmem:[#allocation20_spill] sm:$0xff] %v15144_v49  ;;  %v15146_v19 = vpop.permute.xlu0 %5004  ;;  %vm17679_vm14 = vcmp.eq.s32.totalorder %v15144_v49, 1 }
 0x299   : > { %17884 = vst [vmem:[#allocation21_spill] sm:$0xff] %v15146_v19 }
 0x29b   : > { %v15148_v8 = vpop.permute.xlu1 %5007 }
 0x29c   : > { %17885 = vst [vmem:[#allocation22_spill] sm:$0xff] %v15148_v8 }
 0x29e   : > { %12322 = vmatmul.mubr.bf16.vlgmr.msra.gmra.mrb[0].mxu0 %v4600_v31 }
 0x29f   : > { %12325 = vmatprep.mubr.bf16.mxu0 %v4602_v6 }
 0x2a6   : > { %12326 = vmatmul.mubr.bf16.gmra.mrb[4].mxu0 %v4604_v50 }
 0x2a7   : > { %12329 = vmatprep.mubr.bf16.mxu0 %v4606_v17  ;;  %v15150_v2 = vpop.permute.xlu0 %5010 }
 0x2a8   : > { %17886 = vst [vmem:[#allocation23_spill] sm:$0xff] %v15150_v2  ;;  %v15152_v3 = vpop.permute.xlu1 %5013 }
 0x2a9   : > { %17887 = vst [vmem:[#allocation24_spill] sm:$0xff] %v15152_v3 }
 0x2ab   : > { %v15154_v36 = vpop.permute.xlu0 %5016 }
 0x2ac   : > { %17888 = vst [vmem:[#allocation25_spill] sm:$0xff] %v15154_v36  ;;  %v15156_v18 = vpop.permute.xlu1 %5019 }
 0x2ad   : > { %17889 = vst [vmem:[#allocation26_spill] sm:$0xff] %v15156_v18 }
 0x2ae   : > { %12330 = vmatmul.mubr.bf16.gmra.mrb[8].mxu0 %v4608_v62 }
 0x2af   : > { %12333 = vmatprep.mubr.bf16.mxu0 %v4610_v56  ;;  %v15158_v60 = vpop.permute.xlu0 %5022 }
 0x2b0   : > { %17890 = vst [vmem:[#allocation27_spill] sm:$0xff] %v15158_v60 }
 0x2b3   : > { %v15167_v43 = vpop.permute.xlu0 %5028 }
 0x2b4   : > { %17892 = vst [vmem:[#allocation29_spill] sm:$0xff] %v15167_v43 }
 0x2b6   : > { %12334 = vmatmul.mubr.bf16.gmra.mrb[12].mxu0 %v4612_v44 }
 0x2b7   : > { %12337 = vmatprep.mubr.bf16.mxu0 %v4614_v16  ;;  %v15160_v48 = vpop.permute.xlu1 %5025  ;;  %v15190_v62 = vpop.permute.xlu0 %5034 }
 0x2b8   : > { %17891 = vst [vmem:[#allocation28_spill] sm:$0xff] %v15160_v48  ;;  %17894 = vst [vmem:[#allocation31_spill] sm:$0xff] %v15190_v62 }
 0x2be   : > { %12338 = vmatmul.mubr.bf16.gmra.mrb[16].mxu0 %v4616_v29 }
 0x2bf   : > { %12341 = vmatprep.mubr.bf16.mxu0 %v4618_v15 }
 0x2c0   : > { %v15169_v31 = vpop.permute.xlu1 %5031 }
 0x2c1   : > { %17893 = vst [vmem:[#allocation30_spill] sm:$0xff] %v15169_v31 }
 0x2c4   : > { %v15198_v52 = vpop.permute.xlu1 %5037 }
 0x2c5   : > { %17895 = vst [vmem:[#allocation32_spill] sm:$0xff] %v15198_v52 }
 0x2c6   : > { %12342 = vmatmul.mubr.bf16.gmra.mrb[20].mxu0 %v4620_v33 }
 0x2c7   : > { %12345 = vmatprep.mubr.bf16.mxu0 %v4622_v26 }
 0x2ce   : > { %12346 = vmatmul.mubr.bf16.gmra.mrb[24].mxu0 %v4624_v28 }
 0x2cf   : > { %12349 = vmatprep.mubr.bf16.mxu0 %v4626_v25 }
 0x2d6   : > { %12350 = vmatmul.mubr.bf16.gmra.mrb[28].mxu0 %v4628_v13  ;;  %v15211_v13 = vpop.permute.xlu0 %5040 }
 0x2d7   : > { %12353 = vmatprep.mubr.bf16.mxu0 %v4630_v59  ;;  %17896 = vst [vmem:[#allocation33_spill] sm:$0xff] %v15211_v13 }
 0x2de   : > { %12354 = vmatmul.mubr.bf16.gmra.mrb[32].mxu0 %v4632_v58 }
 0x371   : > { %v12323_v24 = vpop.f32.mrb[0].mxu0 }
 0x372   : > { %v4733_v55 = vpop.f32.mrb[1].mxu0  ;;  %v15172_v6 = vadd.f32 %v12323_v24, %v15165_v37 }
 0x373   : > { %v15175_v35 = vadd.f32 %v15165_v37, %v4733_v55  ;;  %v12324_v30 = vpop.f32.mrb[2].mxu0 }
 0x374   : > { %v4736_v50 = vpop.f32.mrb[3].mxu0  ;;  %v15183_v9 = vadd.f32 %v12324_v30, %v15165_v37  ;;  %v5137_v56 = vsel %vm17680_vm5, %v15172_v6, 0.0  ;;  %vm17684_vm5 = vcmp.eq.s32.totalorder %v15150_v2, 1 }
 0x375   : > { %v5135_v17 = vsel %vm17783_vm15, %v15175_v35, 0.0  ;;  %v15186_v39 = vadd.f32 %v15165_v37, %v4736_v50  ;;  %v5215_v15 = vmul.f32 %v5137_v56, %v5137_v56  ;;  %v15223_v50 = vpop.permute.xlu1 %5043 }
 0x376   : > { %v5213_v5 = vmul.f32 %v5135_v17, %v5135_v17  ;;  %v5138_v20 = vsel %vm17679_vm14, %v15183_v9, 0.0  ;;  %vm17682_vm14 = vcmp.eq.s32.totalorder %v15148_v8, 1  ;;  %17897 = vst [vmem:[#allocation34_spill] sm:$0xff] %v15223_v50 }
 0x377   : > { %v5136_v40 = vsel %vm17678_vm8, %v15186_v39, 0.0  ;;  %vm17681_vm8 = vcmp.eq.s32.totalorder %v15146_v19, 1  ;;  %v5216_v28 = vmul.f32 %v5138_v20, %v5138_v20 }
 0x378   : > { %v5171_v44 = vadd.f32 %v5136_v40, %v5135_v17  ;;  %v5214_v16 = vmul.f32 %v5136_v40, %v5136_v40 }
 0x379   : > { %v12327_v29 = vpop.f32.mrb[4].mxu0 }
 0x37a   : > { %v5172_v45 = vadd.f32 %v5171_v44, %v5137_v56  ;;  %v5249_v7 = vadd.f32 %v5214_v16, %v5213_v5  ;;  %v4749_v33 = vpop.f32.mrb[5].mxu0  ;;  %v15204_v26 = vadd.f32 %v12327_v29, %v15165_v37 }
 0x37b   : > { %v15207_v34 = vadd.f32 %v15165_v37, %v4749_v33  ;;  %v12328_v47 = vpop.f32.mrb[6].mxu0  ;;  %v15235_v33 = vpop.permute.xlu0 %5046 }
 0x37c   : > { %v5250_v25 = vadd.f32 %v5249_v7, %v5215_v15  ;;  %v5173_v38 = vadd.f32 %v5172_v45, %v5138_v20  ;;  %v4752_v27 = vpop.f32.mrb[7].mxu0  ;;  %v15217_v61 = vadd.f32 %v12328_v47, %v15165_v37  ;;  %v5141_v17 = vsel %vm17684_vm5, %v15204_v26, 0.0  ;;  %17898 = vst [vmem:[#allocation35_spill] sm:$0xff] %v15235_v33 }
 0x37d   : > { %v5139_v59 = vsel %vm17681_vm8, %v15207_v34, 0.0  ;;  %v15220_v58 = vadd.f32 %v15165_v37, %v4752_v27  ;;  %vm17683_vm8 = vcmp.eq.s32.totalorder %v15152_v3, 1  ;;  %v5219_v29 = vmul.f32 %v5141_v17, %v5141_v17 }
 0x37e   : > { %v5174_v24 = vadd.f32 %v5173_v38, %v5139_v59  ;;  %v5217_v55 = vmul.f32 %v5139_v59, %v5139_v59  ;;  %v5251_v30 = vadd.f32 %v5250_v25, %v5216_v28  ;;  %v5142_v16 = vsel %vm17683_vm8, %v15217_v61, 0.0 }
 0x37f   : > { %v5140_v56 = vsel %vm17682_vm14, %v15220_v58, 0.0  ;;  %vm17685_vm14 = vcmp.eq.s32.totalorder %v15154_v36, 1  ;;  %v5220_v38 = vmul.f32 %v5142_v16, %v5142_v16  ;;  %vm17688_vm8 = vcmp.eq.s32.totalorder %v15156_v18, 1 }
 0x380   : > { %v5252_v40 = vadd.f32 %v5251_v30, %v5217_v55  ;;  %v5175_v5 = vadd.f32 %v5174_v24, %v5140_v56  ;;  %v5218_v44 = vmul.f32 %v5140_v56, %v5140_v56  ;;  %v15245_v55 = vpop.permute.xlu1 %5049  ;;  %vm17692_vm5 = vcmp.eq.s32.totalorder %v15158_v60, 1 }
 0x381   : > { %v12331_v20 = vpop.f32.mrb[8].mxu0  ;;  %17899 = vst [vmem:[#allocation36_spill] sm:$0xff] %v15245_v55 }
 0x382   : > { %v5176_v15 = vadd.f32 %v5175_v5, %v5141_v17  ;;  %v5253_v45 = vadd.f32 %v5252_v40, %v5218_v44  ;;  %v4765_v7 = vpop.f32.mrb[9].mxu0  ;;  %v15238_v47 = vadd.f32 %v12331_v20, %v15165_v37 }
 0x383   : > { %v15241_v28 = vadd.f32 %v15165_v37, %v4765_v7  ;;  %v12332_v25 = vpop.f32.mrb[10].mxu0  ;;  %v15264_v7 = vpop.permute.xlu0 %5052 }
 0x384   : > { %v5254_v27 = vadd.f32 %v5253_v45, %v5219_v29  ;;  %v5177_v59 = vadd.f32 %v5176_v15, %v5142_v16  ;;  %v4768_v24 = vpop.f32.mrb[11].mxu0  ;;  %v15251_v17 = vadd.f32 %v12332_v25, %v15165_v37  ;;  %v5145_v16 = vsel %vm17692_vm5, %v15238_v47, 0.0  ;;  %17900 = vst [vmem:[#allocation37_spill] sm:$0xff] %v15264_v7  ;;  %v15269_v60 = vpop.permute.xlu1 %5055 }
 0x385   : > { %v5143_v30 = vsel %vm17685_vm14, %v15241_v28, 0.0  ;;  %v15254_v56 = vadd.f32 %v15165_v37, %v4768_v24  ;;  %vm17691_vm14 = vcmp.eq.s32.totalorder %v15160_v48, 1  ;;  %17901 = vst [vmem:[#allocation38_spill] sm:$0xff] %v15269_v60  ;;  %vm17703_vm5 = vcmp.eq.s32.totalorder %v15190_v62, 1 }
 0x386   : > { %v5178_v40 = vadd.f32 %v5177_v59, %v5143_v30  ;;  %v5221_v5 = vmul.f32 %v5143_v30, %v5143_v30  ;;  %v5255_v44 = vadd.f32 %v5254_v27, %v5220_v38  ;;  %v5146_v25 = vsel %vm17691_vm14, %v15251_v17, 0.0 }
 0x387   : > { %v5144_v20 = vsel %vm17688_vm8, %v15254_v56, 0.0  ;;  %v5223_v27 = vmul.f32 %v5145_v16, %v5145_v16  ;;  %vm17693_vm8 = vcmp.eq.s32.totalorder %v15167_v43, 1  ;;  %vm17699_vm14 = vcmp.eq.s32.totalorder %v15169_v31, 1 }
 0x388   : > { %v5256_v29 = vadd.f32 %v5255_v44, %v5221_v5  ;;  %v5179_v15 = vadd.f32 %v5178_v40, %v5144_v20  ;;  %v5222_v45 = vmul.f32 %v5144_v20, %v5144_v20  ;;  %v5224_v44 = vmul.f32 %v5146_v25, %v5146_v25  ;;  %v15298_v43 = vpop.permute.xlu1 %5061 }
 0x389   : > { %v12335_v38 = vpop.f32.mrb[12].mxu0  ;;  %17903 = vst [vmem:[#allocation40_spill] sm:$0xff] %v15298_v43 }
 0x38a   : > { %v5180_v59 = vadd.f32 %v5179_v15, %v5145_v16  ;;  %v5257_v24 = vadd.f32 %v5256_v29, %v5222_v45  ;;  %v4781_v30 = vpop.f32.mrb[13].mxu0  ;;  %v15272_v18 = vadd.f32 %v12335_v38, %v15165_v37 }
 0x38b   : > { %v15275_v5 = vadd.f32 %v15165_v37, %v4781_v30  ;;  %v12336_v40 = vpop.f32.mrb[14].mxu0 }
 0x38c   : > { %v5258_v20 = vadd.f32 %v5257_v24, %v5223_v27  ;;  %v5181_v48 = vadd.f32 %v5180_v59, %v5146_v25  ;;  %v4784_v36 = vpop.f32.mrb[15].mxu0  ;;  %v15283_v29 = vadd.f32 %v12336_v40, %v15165_v37  ;;  %v15289_v27 = vpop.permute.xlu0 %5058  ;;  %v5149_v25 = vsel %vm17703_vm5, %v15272_v18, 0.0 }
 0x38d   : > { %v5147_v16 = vsel %vm17693_vm8, %v15275_v5, 0.0  ;;  %v15286_v15 = vadd.f32 %v15165_v37, %v4784_v36  ;;  %17902 = vst [vmem:[#allocation39_spill] sm:$0xff] %v15289_v27  ;;  %vm17701_vm8 = vcmp.eq.s32.totalorder %v15198_v52, 1  ;;  %vm17713_vm5 = vcmp.eq.s32.totalorder %v15235_v33, 1 }
 0x38e   : > { %v5182_v45 = vadd.f32 %v5181_v48, %v5147_v16  ;;  %v5225_v38 = vmul.f32 %v5147_v16, %v5147_v16  ;;  %v5259_v30 = vadd.f32 %v5258_v20, %v5224_v44  ;;  %v5150_v48 = vsel %vm17701_vm8, %v15283_v29, 0.0 }
 0x38f   : > { %v5148_v59 = vsel %vm17699_vm14, %v15286_v15, 0.0  ;;  %v5227_v20 = vmul.f32 %v5149_v25, %v5149_v25  ;;  %vm17704_vm14 = vcmp.eq.s32.totalorder %v15211_v13, 1  ;;  %vm17710_vm8 = vcmp.eq.s32.totalorder %v15223_v50, 1 }
 0x390   : > { %v5260_v24 = vadd.f32 %v5259_v30, %v5225_v38  ;;  %v5183_v36 = vadd.f32 %v5182_v45, %v5148_v59  ;;  %v5226_v40 = vmul.f32 %v5148_v59, %v5148_v59  ;;  %v5228_v45 = vmul.f32 %v5150_v48, %v5150_v48  ;;  %v15311_v52 = vpop.permute.xlu0 %5064 }
 0x391   : > { %v12339_v44 = vpop.f32.mrb[16].mxu0  ;;  %17904 = vst [vmem:[#allocation41_spill] sm:$0xff] %v15311_v52 }
 0x392   : > { %v5184_v16 = vadd.f32 %v5183_v36, %v5149_v25  ;;  %v5261_v62 = vadd.f32 %v5260_v24, %v5226_v40  ;;  %v4797_v3 = vpop.f32.mrb[17].mxu0  ;;  %v15304_v8 = vadd.f32 %v12339_v44, %v15165_v37 }
 0x393   : > { %v15307_v31 = vadd.f32 %v15165_v37, %v4797_v3  ;;  %v12340_v38 = vpop.f32.mrb[18].mxu0 }
 0x394   : > { %v5262_v30 = vadd.f32 %v5261_v62, %v5227_v20  ;;  %v5185_v59 = vadd.f32 %v5184_v16, %v5150_v48  ;;  %v4800_v2 = vpop.f32.mrb[19].mxu0  ;;  %v15317_v24 = vadd.f32 %v12340_v38, %v15165_v37  ;;  %v15323_v48 = vpop.permute.xlu1 %5067  ;;  %v5153_v44 = vsel %vm17713_vm5, %v15304_v8, 0.0 }
 0x395   : > { %v5151_v25 = vsel %vm17704_vm14, %v15307_v31, 0.0  ;;  %v15320_v3 = vadd.f32 %v15165_v37, %v4800_v2  ;;  %17905 = vst [vmem:[#allocation42_spill] sm:$0xff] %v15323_v48  ;;  %vm17712_vm14 = vcmp.eq.s32.totalorder %v15245_v55, 1  ;;  %v15335_v33 = vpop.permute.xlu0 %5070  ;;  %vm17724_vm5 = vcmp.eq.s32.totalorder %v15289_v27, 1 }
 0x396   : > { %v5186_v36 = vadd.f32 %v5185_v59, %v5151_v25  ;;  %v5229_v62 = vmul.f32 %v5151_v25, %v5151_v25  ;;  %v5263_v40 = vadd.f32 %v5262_v30, %v5228_v45  ;;  %v5154_v59 = vsel %vm17712_vm14, %v15317_v24, 0.0  ;;  %17906 = vst [vmem:[#allocation43_spill] sm:$0xff] %v15335_v33 }
 0x397   : > { %v5152_v20 = vsel %vm17710_vm8, %v15320_v3, 0.0  ;;  %v5231_v30 = vmul.f32 %v5153_v44, %v5153_v44  ;;  %vm17714_vm8 = vcmp.eq.s32.totalorder %v15264_v7, 1  ;;  %vm17720_vm14 = vcmp.eq.s32.totalorder %v15269_v60, 1 }
 0x398   : > { %v5264_v16 = vadd.f32 %v5263_v40, %v5229_v62  ;;  %v5187_v2 = vadd.f32 %v5186_v36, %v5152_v20  ;;  %v5230_v38 = vmul.f32 %v5152_v20, %v5152_v20  ;;  %v5232_v36 = vmul.f32 %v5154_v59, %v5154_v59 }
 0x399   : > { %v12343_v45 = vpop.f32.mrb[20].mxu0 }
 0x39a   : > { %v5188_v25 = vadd.f32 %v5187_v2, %v5153_v44  ;;  %v5265_v13 = vadd.f32 %v5264_v16, %v5230_v38  ;;  %v4813_v19 = vpop.f32.mrb[21].mxu0  ;;  %v15338_v49 = vadd.f32 %v12343_v45, %v15165_v37  ;;  %v15345_v44 = vpop.permute.xlu1 %5073 }
 0x39b   : > { %v15341_v50 = vadd.f32 %v15165_v37, %v4813_v19  ;;  %v12344_v62 = vpop.f32.mrb[22].mxu0  ;;  %17907 = vst [vmem:[#allocation44_spill] sm:$0xff] %v15345_v44 }
 0x39c   : > { %v5266_v40 = vadd.f32 %v5265_v13, %v5231_v30  ;;  %v5189_v20 = vadd.f32 %v5188_v25, %v5154_v59  ;;  %v4816_v55 = vpop.f32.mrb[23].mxu0  ;;  %v15351_v2 = vadd.f32 %v12344_v62, %v15165_v37  ;;  %v5157_v45 = vsel %vm17724_vm5, %v15338_v49, 0.0 }
 0x39d   : > { %v5155_v16 = vsel %vm17714_vm8, %v15341_v50, 0.0  ;;  %v15354_v19 = vadd.f32 %v15165_v37, %v4816_v55  ;;  %vm17723_vm8 = vcmp.eq.s32.totalorder %v15298_v43, 1  ;;  %v15364_v55 = vpop.permute.xlu0 %5076  ;;  %vm17738_vm5 = vcmp.eq.s32.totalorder %v15335_v33, 1 }
 0x39e   : > { %v5190_v38 = vadd.f32 %v5189_v20, %v5155_v16  ;;  %v5233_v13 = vmul.f32 %v5155_v16, %v5155_v16  ;;  %v5267_v59 = vadd.f32 %v5266_v40, %v5232_v36  ;;  %17908 = vst [vmem:[#allocation45_spill] sm:$0xff] %v15364_v55  ;;  %v5158_v20 = vsel %vm17723_vm8, %v15351_v2, 0.0  ;;  %v15369_v1 = vpop.permute.xlu1 %5079 }
 0x39f   : > { %v5156_v30 = vsel %vm17720_vm14, %v15354_v19, 0.0  ;;  %v5235_v40 = vmul.f32 %v5157_v45, %v5157_v45  ;;  %17909 = vst [vmem:[#allocation46_spill] sm:$0xff] %v15369_v1  ;;  %vm17725_vm14 = vcmp.eq.s32.totalorder %v15311_v52, 1  ;;  %vm17733_vm8 = vcmp.eq.s32.totalorder %v15323_v48, 1 }
 0x3a0   : > { %v5268_v25 = vadd.f32 %v5267_v59, %v5233_v13  ;;  %v5191_v62 = vadd.f32 %v5190_v38, %v5156_v30  ;;  %v5234_v7 = vmul.f32 %v5156_v30, %v5156_v30  ;;  %v5236_v59 = vmul.f32 %v5158_v20, %v5158_v20 }
 0x3a1   : > { %v12347_v36 = vpop.f32.mrb[24].mxu0 }
 0x3a2   : > { %v5192_v16 = vadd.f32 %v5191_v62, %v5157_v45  ;;  %v5269_v27 = vadd.f32 %v5268_v25, %v5234_v7  ;;  %v4829_v63 = vpop.f32.mrb[25].mxu0  ;;  %v15372_v60 = vadd.f32 %v12347_v36, %v15165_v37  ;;  %v15398_v52 = vpop.permute.xlu1 %5085 }
 0x3a3   : > { %v15375_v13 = vadd.f32 %v15165_v37, %v4829_v63  ;;  %v12348_v38 = vpop.f32.mrb[26].mxu0  ;;  %17911 = vst [vmem:[#allocation48_spill] sm:$0xff] %v15398_v52 }
 0x3a4   : > { %v5270_v30 = vadd.f32 %v5269_v27, %v5235_v40  ;;  %v5193_v43 = vadd.f32 %v5192_v16, %v5158_v20  ;;  %v4832_v14 = vpop.f32.mrb[27].mxu0  ;;  %v15383_v45 = vadd.f32 %v12348_v38, %v15165_v37  ;;  %v15389_v27 = vpop.permute.xlu0 %5082  ;;  %v5161_v20 = vsel %vm17738_vm5, %v15372_v60, 0.0 }
 0x3a5   : > { %v5159_v7 = vsel %vm17725_vm14, %v15375_v13, 0.0  ;;  %v15386_v25 = vadd.f32 %v15165_v37, %v4832_v14  ;;  %17910 = vst [vmem:[#allocation47_spill] sm:$0xff] %v15389_v27  ;;  %vm17736_vm14 = vcmp.eq.s32.totalorder %v15345_v44, 1  ;;  %vm17750_vm5 = vcmp.eq.s32.totalorder %v15389_v27, 1 }
 0x3a6   : > { %v5194_v63 = vadd.f32 %v5193_v43, %v5159_v7  ;;  %v5237_v62 = vmul.f32 %v5159_v7, %v5159_v7  ;;  %v5271_v36 = vadd.f32 %v5270_v30, %v5236_v59  ;;  %v5162_v43 = vsel %vm17736_vm14, %v15383_v45, 0.0 }
 0x3a7   : > { %v5160_v40 = vsel %vm17733_vm8, %v15386_v25, 0.0  ;;  %v5239_v30 = vmul.f32 %v5161_v20, %v5161_v20  ;;  %vm17739_vm8 = vcmp.eq.s32.totalorder %v15364_v55, 1  ;;  %vm17747_vm14 = vcmp.eq.s32.totalorder %v15369_v1, 1 }
 0x3a8   : > { %v5272_v16 = vadd.f32 %v5271_v36, %v5237_v62  ;;  %v5195_v14 = vadd.f32 %v5194_v63, %v5160_v40  ;;  %v5238_v38 = vmul.f32 %v5160_v40, %v5160_v40  ;;  %v5240_v63 = vmul.f32 %v5162_v43, %v5162_v43  ;;  %v15411_v44 = vpop.permute.xlu0 %5088 }
 0x3a9   : > { %v12351_v59 = vpop.f32.mrb[28].mxu0  ;;  %17912 = vst [vmem:[#allocation49_spill] sm:$0xff] %v15411_v44 }
 0x3aa   : > { %v5196_v7 = vadd.f32 %v5195_v14, %v5161_v20  ;;  %v5273_v33 = vadd.f32 %v5272_v16, %v5238_v38  ;;  %v4845_v0 = vpop.f32.mrb[29].mxu0  ;;  %v15404_v53 = vadd.f32 %v12351_v59, %v15165_v37 }
 0x3ab   : > { %v15407_v48 = vadd.f32 %v15165_v37, %v4845_v0  ;;  %v12352_v62 = vpop.f32.mrb[30].mxu0 }
 0x3ac   : > { %v5274_v36 = vadd.f32 %v5273_v33, %v5239_v30  ;;  %v5197_v40 = vadd.f32 %v5196_v7, %v5162_v43  ;;  %v4848_v42 = vpop.f32.mrb[31].mxu0  ;;  %v15417_v16 = vadd.f32 %v12352_v62, %v15165_v37  ;;  %v15423_v43 = vpop.permute.xlu1 %5091  ;;  %v5165_v59 = vsel %vm17750_vm5, %v15404_v53, 0.0 }
 0x3ad   : > { %v5163_v20 = vsel %vm17739_vm8, %v15407_v48, 0.0  ;;  %v15420_v0 = vadd.f32 %v15165_v37, %v4848_v42  ;;  %17913 = vst [vmem:[#allocation50_spill] sm:$0xff] %v15423_v43  ;;  %vm17749_vm8 = vcmp.eq.s32.totalorder %v15398_v52, 1  ;;  %v15435_v27 = vpop.permute.xlu0 %5094 }
 0x3ae   : > { %v5198_v14 = vadd.f32 %v5197_v40, %v5163_v20  ;;  %v5241_v33 = vmul.f32 %v5163_v20, %v5163_v20  ;;  %v5275_v38 = vadd.f32 %v5274_v36, %v5240_v63  ;;  %v5166_v40 = vsel %vm17749_vm8, %v15417_v16, 0.0  ;;  %17914 = vst [vmem:[#allocation51_spill] sm:$0xff] %v15435_v27 }
 0x3af   : > { %v5164_v30 = vsel %vm17747_vm14, %v15420_v0, 0.0  ;;  %v5243_v36 = vmul.f32 %v5165_v59, %v5165_v59  ;;  %vm17751_vm14 = vcmp.eq.s32.totalorder %v15411_v44, 1  ;;  %vm17781_vm8 = vcmp.eq.s32.totalorder %v15423_v43, 1 }
 0x3b0   : > { %v5276_v7 = vadd.f32 %v5275_v38, %v5241_v33  ;;  %v5199_v42 = vadd.f32 %v5198_v14, %v5164_v30  ;;  %v5242_v62 = vmul.f32 %v5164_v30, %v5164_v30  ;;  %v5244_v14 = vmul.f32 %v5166_v40, %v5166_v40 }
 0x3b1   : > { %v12355_v63 = vpop.f32.mrb[32].mxu0  ;;  %vm17782_vm5 = vcmp.eq.s32.totalorder %v15435_v27, 1 }
 0x3b2   : > { %v5200_v20 = vadd.f32 %v5199_v42, %v5165_v59  ;;  %v5277_v55 = vadd.f32 %v5276_v7, %v5242_v62  ;;  %v4861_v32 = vpop.f32.mrb[33].mxu0  ;;  %v15438_v10 = vadd.f32 %v12355_v63, %v15165_v37  ;;  %v15445_v59 = vpop.permute.xlu1 %5097 }
 0x3b3   : > { %v15441_v1 = vadd.f32 %v15165_v37, %v4861_v32  ;;  %v12356_v33 = vpop.f32.mrb[34].mxu0  ;;  %17915 = vst [vmem:[#allocation52_spill] sm:$0xff] %v15445_v59 }
 0x3b4   : > { %v5278_v38 = vadd.f32 %v5277_v55, %v5243_v36  ;;  %v5201_v30 = vadd.f32 %v5200_v20, %v5166_v40  ;;  %v4864_v52 = vpop.f32.mrb[35].mxu0  ;;  %v15451_v42 = vadd.f32 %v12356_v33, %v15165_v37  ;;  %v5169_v63 = vsel %vm17782_vm5, %v15438_v10, 0.0 }
 0x3b5   : > { %v5167_v7 = vsel %vm17751_vm14, %v15441_v1, 0.0  ;;  %v15454_v32 = vadd.f32 %v15165_v37, %v4864_v52  ;;  %vm17780_vm14 = vcmp.eq.s32.totalorder %v15445_v59, 1  ;;  %v5247_v52 = vmul.f32 %v5169_v63, %v5169_v63 }
 0x3b6   : > { %v5202_v62 = vadd.f32 %v5201_v30, %v5167_v7  ;;  %v5245_v55 = vmul.f32 %v5167_v7, %v5167_v7  ;;  %v5279_v40 = vadd.f32 %v5278_v38, %v5244_v14  ;;  %v5170_v37 = vsel %vm17780_vm14, %v15451_v42, 0.0 }
 0x3b7   : > { %v5168_v36 = vsel %vm17781_vm8, %v15454_v32, 0.0  ;;  %v5248_v38 = vmul.f32 %v5170_v37, %v5170_v37 }
 0x3b8   : > { %v5280_v20 = vadd.f32 %v5279_v40, %v5245_v55  ;;  %v5203_v33 = vadd.f32 %v5202_v62, %v5168_v36  ;;  %v5246_v44 = vmul.f32 %v5168_v36, %v5168_v36 }
 0x3ba   : > { %v5204_v30 = vadd.f32 %v5203_v33, %v5169_v63  ;;  %v5281_v14 = vadd.f32 %v5280_v20, %v5246_v44 }
 0x3bc   : > { %v5205_v7 = vadd.f32 %v5204_v30, %v5170_v37  ;;  %v5282_v27 = vadd.f32 %v5281_v14, %v5247_v52 }
 0x3be   : > { %v5206_v57 = vrot.slane %v5205_v7, 4  ;;  %v5283_v4 = vadd.f32 %v5282_v27, %v5248_v38 }
 0x3c0   : > { %v5207_v41 = vadd.f32 %v5206_v57, %v5205_v7  ;;  %v5284_v43 = vrot.slane %v5283_v4, 4 }
 0x3c2   : > { %v5208_v22 = vrot.slane %v5207_v41, 2  ;;  %v5285_v23 = vadd.f32 %v5284_v43, %v5283_v4 }
 0x3c4   : > { %v5209_v54 = vadd.f32 %v5208_v22, %v5207_v41  ;;  %v5286_v55 = vrot.slane %v5285_v23, 2 }
 0x3c6   : > { %v5210_v62 = vrot.slane %v5209_v54, 1  ;;  %v5287_v40 = vadd.f32 %v5286_v55, %v5285_v23  ;;  %v13546_v55 = vld [vmem:[%s17640_s4 + $0x40] sm:$0xff]  }
 0x3c7   : > { %12357 = vmatprep.subr.bf16.mxu1 %v13546_v55 }
 0x3c8   : > { %v5211_v36 = vadd.f32 %v5210_v62, %v5209_v54  ;;  %v5288_v51 = vrot.slane %v5287_v40, 1  ;;  %12358 = vmatpush3.bf16.msra.mxu1 %v13546_v55 }
 0x3ca   : > { %v15467_v59 = vmul.f32 0.00390625, %v5211_v36  ;;  %v5289_v12 = vadd.f32 %v5288_v51, %v5287_v40  ;;  %v13547_v36 = vld [vmem:[%s17640_s4 + $0x48] sm:$0xff]  }
 0x3cb   : > { %12359 = vmatprep.subr.bf16.mxu1 %v13547_v36 }
 0x3cc   : > { %v5290_v63 = vmul.f32 0.00390625, %v5289_v12  ;;  %v5291_v44 = vmul.f32 %v15467_v59, %v15467_v59  ;;  %v5326_v27 = vsub.f32 %v15441_v1, %v15467_v59  ;;  %v5327_v57 = vsub.f32 %v15454_v32, %v15467_v59  ;;  %12360 = vmatpush3.bf16.msra.mxu1 %v13547_v36 }
 0x3cd   : > { %v5328_v41 = vsub.f32 %v15438_v10, %v15467_v59  ;;  %v5310_v22 = vsub.f32 %v15307_v31, %v15467_v59  ;;  %v5311_v51 = vsub.f32 %v15320_v3, %v15467_v59  ;;  %v5312_v12 = vsub.f32 %v15304_v8, %v15467_v59 }
 0x3ce   : > { %v5292_v4 = vsub.f32 %v5290_v63, %v5291_v44  ;;  %v5313_v1 = vsub.f32 %v15317_v24, %v15467_v59  ;;  %v5314_v43 = vsub.f32 %v15341_v50, %v15467_v59  ;;  %v5294_v63 = vsub.f32 %v15175_v35, %v15467_v59  ;;  %v13553_v50 = vld [vmem:[%s17640_s4 + $0x78] sm:$0xff]  }
 0x3cf   : > { %v5295_v44 = vsub.f32 %v15186_v39, %v15467_v59  ;;  %v5299_v55 = vsub.f32 %v15220_v58, %v15467_v59  ;;  %v5300_v40 = vsub.f32 %v15204_v26, %v15467_v59  ;;  %v5301_v35 = vsub.f32 %v15217_v61, %v15467_v59  ;;  %v13548_v26 = vld [vmem:[%s17640_s4 + $0x50] sm:$0xff]  }
 0x3d0   : > { %v5293_v23 = vmax.f32 %v5292_v4, 0.0  ;;  %v5296_v4 = vsub.f32 %v15172_v6, %v15467_v59  ;;  %v5302_v6 = vsub.f32 %v15241_v28, %v15467_v59  ;;  %v5304_v39 = vsub.f32 %v15238_v47, %v15467_v59  ;;  %12361 = vmatprep.subr.bf16.mxu1 %v13548_v26 }
 0x3d1   : > { %v5306_v61 = vsub.f32 %v15275_v5, %v15467_v59  ;;  %v5307_v28 = vsub.f32 %v15286_v15, %v15467_v59  ;;  %v5309_v47 = vsub.f32 %v15283_v29, %v15467_v59  ;;  %12362 = vmatpush3.bf16.msra.mxu1 %v13548_v26  ;;  %v17919_v24 = vsub.f32 %v15354_v19, %v15467_v59 }
 0x3d2   : > { %v5330_v54 = vadd.f32 1e-05, %v5293_v23  ;;  %v5297_v23 = vsub.f32 %v15183_v9, %v15467_v59  ;;  %v5303_v9 = vsub.f32 %v15254_v56, %v15467_v59  ;;  %v5308_v56 = vsub.f32 %v15272_v18, %v15467_v59 }
 0x3d4   : > { %13680 = vrsqrt.f32 %v5330_v54  ;;  %v5298_v54 = vsub.f32 %v15207_v34, %v15467_v59  ;;  %v5305_v34 = vsub.f32 %v15251_v17, %v15467_v59 }
 0x3de   : > { %v15544_v58 = vpop.eup %13680 }
 0x3df   : > { %v5364_v17 = vmul.f32 %v15544_v58, %v5326_v27  ;;  %v5365_v36 = vmul.f32 %v15544_v58, %v5327_v57  ;;  %v5366_v62 = vmul.f32 %v15544_v58, %v5328_v41  ;;  %v15558_v7 = vmul.f32 %v15544_v58, %v5294_v63 }
 0x3e0   : > { %v15561_v5 = vmul.f32 %v15544_v58, %v5295_v44  ;;  %v15564_v15 = vmul.f32 %v15544_v58, %v5296_v4  ;;  %v15567_v18 = vmul.f32 %v15544_v58, %v5297_v23  ;;  %v15570_v29 = vmul.f32 %v15544_v58, %v5298_v54  ;;  %v13549_v44 = vld [vmem:[%s17640_s4 + $0x58] sm:$0xff]  }
 0x3e1   : > { %v5400_v27 = vmax.f32 %v5364_v17, 0.0  ;;  %v5401_v57 = vmax.f32 %v5365_v36, 0.0  ;;  %v5402_v41 = vmax.f32 %v5366_v62, 0.0  ;;  %v15573_v63 = vmul.f32 %v15544_v58, %v5299_v55  ;;  %12363 = vmatprep.subr.bf16.mxu1 %v13549_v44 }
 0x3e2   : > { %v15579_v4 = vmul.f32 %v15544_v58, %v5300_v40  ;;  %v15582_v23 = vmul.f32 %v15544_v58, %v5301_v35  ;;  %v15585_v54 = vmul.f32 %v15544_v58, %v5302_v6  ;;  %v15588_v26 = vmul.f32 %v15544_v58, %v5303_v9  ;;  %12364 = vmatpush3.bf16.msra.mxu1 %v13549_v44 }
 0x3e3   : > { %v11416_v62 = vpack.c.bf16 %v5400_v27, %v5400_v27  ;;  %v11417_v17 = vpack.c.bf16 %v5401_v57, %v5401_v57  ;;  %v11419_v55 = vpack.c.bf16 %v5402_v41, %v5402_v41  ;;  %v15591_v36 = vmul.f32 %v15544_v58, %v5304_v39 }
 0x3e4   : > { %v15594_v38 = vmul.f32 %v15544_v58, %v5305_v34  ;;  %v15597_v40 = vmul.f32 %v15544_v58, %v5306_v61  ;;  %v15600_v35 = vmul.f32 %v15544_v58, %v5307_v28  ;;  %v15603_v6 = vmul.f32 %v15544_v58, %v5308_v56  ;;  %v13550_v34 = vld [vmem:[%s17640_s4 + $0x60] sm:$0xff]   ;;  %v13551_v61 = vld [vmem:[%s17640_s4 + $0x68] sm:$0xff]  }
 0x3e5   : > { %v6230_v9 = vshrl.u32 %v11416_v62, 16  ;;  %v6233_v27 = vshll.u32 %v11416_v62, 16  ;;  %v15605_v57 = vshrl.u32 %v11417_v17, 16  ;;  %v15607_v39 = vshll.u32 %v11417_v17, 16  ;;  %12365 = vmatprep.subr.bf16.mxu1 %v13550_v34 }
 0x3e6   : > { %v6288_v28 = vshrl.u32 %v11419_v55, 16  ;;  %v6291_v41 = vshll.u32 %v11419_v55, 16  ;;  %v15616_v56 = vmul.f32 %v15544_v58, %v5309_v47  ;;  %v15622_v44 = vmul.f32 %v15544_v58, %v5310_v22  ;;  %12366 = vmatpush3.bf16.msra.mxu1 %v13550_v34  ;;  %v13552_v22 = vld [vmem:[%s17640_s4 + $0x70] sm:$0xff]  }
 0x3e7   : > { %v6232_v62 = vrot.slane %v6230_v9, 6  ;;  %v6235_v17 = vrot.slane %v6233_v27, 7  ;;  %v6242_v14 = vrot.slane %v15605_v57, 6  ;;  %v6245_v30 = vrot.slane %v15607_v39, 7  ;;  %12367 = vmatprep.subr.bf16.mxu1 %v13551_v61 }
 0x3e8   : > { %v6290_v37 = vrot.slane %v6288_v28, 6  ;;  %v6293_v55 = vrot.slane %v6291_v41, 7  ;;  %v15629_v20 = vrot.slane %v6233_v27, 5  ;;  %v6335_v31 = vrot.slane %v6230_v9, 4  ;;  %v6310_v27 = vld [vmem:[#allocation3 + $0x90] sm:$0xf] }
 0x3e9   : > { %v15627_v47 = vor.u32 %v6235_v17, %v6232_v62  ;;  %v6246_v33 = vor.u32 %v6245_v30, %v6242_v14  ;;  %v6338_v10 = vrot.slane %v15607_v39, 5  ;;  %v6340_v52 = vrot.slane %v15605_v57, 4  ;;  %v6255_v14 = vld [vmem:[#allocation3 + $0x8c] sm:$0xf] }
 0x3ea   : > { %17917 = vst [vmem:[#allocation54_spill] sm:$0xff] %v15629_v20  ;;  %v15634_v32 = vor.u32 %v6293_v55, %v6290_v37  ;;  %v15642_v34 = vmul.f32 %v15544_v58, %v5311_v51  ;;  %v6336_v28 = vor.u32 %v6335_v31, %v15629_v20  ;;  %v15650_v37 = vmul.f32 %v15544_v58, %v5312_v12 }
 0x3eb   : > { %17916 = vst [vmem:[#allocation53_spill] sm:$0xff] %v15627_v47  ;;  %v6238_v30 = vrot.slane %v15627_v47, 4  ;;  %v6286_v9 = vrot.slane %v6246_v33, 4  ;;  %v11011_v41 = vrot.slane %v15605_v57, 11  ;;  %v6341_v62 = vor.u32 %v6340_v52, %v6338_v10  ;;  %12368 = vmatpush3.bf16.msra.mxu1 %v13551_v61  ;;  %v6350_v57 = vld [vmem:[#allocation3 + $0xa0] sm:$0x3] }
 0x3ec   : > { %17918 = vst [vmem:[#allocation55_spill] sm:$0xff] %v15634_v32  ;;  %v15657_v3 = vmul.f32 %v15544_v58, %v5313_v1  ;;  %v15663_v51 = vmul.f32 %v15544_v58, %v5314_v43  ;;  %v6337_v52 = vrot.slane %v6336_v28, 4  ;;  %v15674_v1 = vmul.f32 %v15544_v58, %v17919_v24  ;;  %12369 = vmatprep.subr.bf16.mxu1 %v13552_v22 }
 0x3ed   : > { %v6247_v8 = vsel %vm17874_vm4, %v6238_v30, %v6246_v33  ;;  %v6295_v12 = vsel %vm17874_vm4, %v6286_v9, %v15634_v32  ;;  %v6342_v61 = vrot.slane %v6341_v62, 4  ;;  %v17920_v17 = vsub.f32 %v15338_v49, %v15467_v59 }
 0x3ee   : > { %v6256_v43 = vsel %vm14003_vm0, %v6247_v8, %v6255_v14  ;;  %v6311_v33 = vsel %vm13816_vm10, %v6295_v12, %v6310_v27  ;;  %v6339_v31 = vsel %vm17865_vm2, %v6337_v52, %v6338_v10  ;;  %v17922_v30 = vsub.f32 %v15351_v2, %v15467_v59 }
 0x3ef   : > { %v15687_v19 = vmul.f32 %v15544_v58, %v17920_v17  ;;  %6257 = vst [vmem:[#allocation3 + $0x8c] sm:$0xf] %v6256_v43  ;;  %6312 = vst [vmem:[#allocation3 + $0x90] sm:$0xf] %v6311_v33  ;;  %v17923_v9 = vsub.f32 %v15375_v13, %v15467_v59  ;;  %v17924_v49 = vsub.f32 %v15386_v25, %v15467_v59  ;;  %12370 = vmatpush3.bf16.msra.mxu1 %v13552_v22 }
 0x3f0   : > { %v15695_v14 = vmul.f32 %v15544_v58, %v17922_v30  ;;  %6349 = vst [vmem:[#allocation3 + $0x9c] sm:$0xf] %v6339_v31  ;;  %v6351_v62 = vsel %vm13860_vm3, %v6342_v61, %v6350_v57  ;;  %v17926_v2 = vsub.f32 %v15372_v60, %v15467_v59  ;;  %v17927_v13 = vsub.f32 %v15383_v45, %v15467_v59 }
 0x3f1   : > { %v15701_v27 = vmul.f32 %v15544_v58, %v17923_v9  ;;  %v15707_v28 = vmul.f32 %v15544_v58, %v17924_v49  ;;  %v17928_v25 = vsub.f32 %v15407_v48, %v15467_v59  ;;  %6352 = vst [vmem:[#allocation3 + $0xa0] sm:$0x3] %v6351_v62  ;;  %v17930_v60 = vsub.f32 %v15420_v0, %v15467_v59  ;;  %v5490_v9 = vld [vmem:[#allocation3 + $0x8] sm:$0xe] }
 0x3f2   : > { %v15715_v8 = vmul.f32 %v15544_v58, %v17926_v2  ;;  %v15721_v12 = vmul.f32 %v15544_v58, %v17927_v13  ;;  %v17932_v45 = vsub.f32 %v15404_v53, %v15467_v59  ;;  %v17934_v48 = vsub.f32 %v15417_v16, %v15467_v59  ;;  %12371 = vmatprep.subr.bf16.mxu1 %v13553_v50  ;;  %v13556_v53 = vld [vmem:[%s17640_s4] sm:$0xff]  }
 0x3f3   : > { %v15727_v52 = vmul.f32 %v15544_v58, %v17928_v25  ;;  %v15733_v57 = vmul.f32 %v15544_v58, %v17930_v60  ;;  %v17936_v22 = vsub.f32 %v15451_v42, %v15467_v59  ;;  %v5368_v33 = vmax.f32 %v15558_v7, 0.0  ;;  %12372 = vmatpush3.bf16.msra.mxu1 %v13553_v50 }
 0x3f4   : > { %v15739_v24 = vmul.f32 %v15544_v58, %v17932_v45  ;;  %v15745_v43 = vmul.f32 %v15544_v58, %v17934_v48  ;;  %v5369_v61 = vmax.f32 %v15561_v5, 0.0  ;;  %v5370_v16 = vmax.f32 %v15564_v15, 0.0  ;;  %12409 = vmatprep.subr.bf16.mxu1 %v13556_v53 }
 0x3f5   : > { %17929 = vst [vmem:[#allocation15_spill] sm:$0xff] %v15727_v52  ;;  %17931 = vst [vmem:[#allocation6_spill] sm:$0xff] %v15733_v57  ;;  %v15751_v0 = vmul.f32 %v15544_v58, %v17936_v22  ;;  %v5371_v17 = vmax.f32 %v15567_v18, 0.0  ;;  %v5372_v31 = vmax.f32 %v15570_v29, 0.0  ;;  %v17937_v60 = vrot.slane %v15607_v39, 6 }
 0x3f6   : > { %17933 = vst [vmem:[#allocation56_spill] sm:$0xff] %v15739_v24  ;;  %17935 = vst [vmem:[#allocation57_spill] sm:$0xff] %v15745_v43  ;;  %v6265_v62 = vld [vmem:[#allocation3 + $0x8c] sm:$0x8]  ;;  %v6320_v2 = vld [vmem:[#allocation3 + $0x90] sm:$0x1]  ;;  %v11377_v18 = vpack.c.bf16 %v5370_v16, %v5370_v16  ;;  %v11381_v13 = vpack.c.bf16 %v5369_v61, %v5369_v61 }
 0x3f7   : > { %v6266_v50 = vsel %vm13962_vm13, %v17937_v60, %v6265_v62  ;;  %v6321_v22 = vsel %vm13823_vm12, %v11011_v41, %v6320_v2  ;;  %v11378_v15 = vpack.c.bf16 %v5371_v17, %v5371_v17  ;;  %v5449_v60 = vld [vmem:[#allocation3 + $0x8] sm:$0x1]  ;;  %v5445_v17 = vld [vmem:[#allocation3] sm:$0xf] }
 0x3f8   : > { %6267 = vst [vmem:[#allocation3 + $0x8c] sm:$0x8] %v6266_v50  ;;  %6322 = vst [vmem:[#allocation3 + $0x90] sm:$0x1] %v6321_v22  ;;  %v6360_v49 = vld [vmem:[#allocation3 + $0xa0] sm:$0x2] }
 0x3f9   : > { %v6361_v62 = vsel %vm17860_vm6, %v15607_v39, %v6360_v49  ;;  %v11379_v39 = vpack.c.bf16 %v5372_v31, %v5372_v31  ;;  %v15796_v49 = vshrl.u32 %v11377_v18, 16  ;;  %v5418_v41 = vshll.u32 %v11377_v18, 16  ;;  %v5524_v18 = vld [vmem:[#allocation3 + $0x10] sm:$0xc] }
 0x3fa   : > { %6362 = vst [vmem:[#allocation3 + $0xa0] sm:$0x2] %v6361_v62  ;;  %v5424_v29 = vshll.u32 %v11378_v15, 16  ;;  %v5428_v16 = vshrl.u32 %v11378_v15, 16  ;;  %v11380_v62 = vpack.c.bf16 %v5368_v33, %v5368_v33  ;;  %v5478_v42 = vshrl.u32 %v11381_v13, 16 }
 0x3fb   : > { %v5417_v2 = vrot.slane %v15796_v49, 4  ;;  %v15800_v53 = vshll.u32 %v11379_v39, 16  ;;  %v15802_v50 = vshrl.u32 %v11379_v39, 16  ;;  %v5420_v22 = vrot.slane %v5418_v41, 5 }
 0x3fc   : > { %v5426_v25 = vrot.slane %v5424_v29, 5  ;;  %v5430_v7 = vrot.slane %v5428_v16, 4  ;;  %v5469_v15 = vshrl.u32 %v11380_v62, 16  ;;  %v5472_v33 = vshll.u32 %v11380_v62, 16 }
 0x3fd   : > { %v5450_v31 = vsel %vm13823_vm12, %v15802_v50, %v5449_v60  ;;  %v5421_v30 = vor.u32 %v5420_v22, %v5417_v2  ;;  %v5481_v39 = vshll.u32 %v11381_v13, 16  ;;  %v5436_v59 = vrot.slane %v15800_v53, 5 }
 0x3fe   : > { %v5431_v58 = vor.u32 %v5430_v7, %v5426_v25  ;;  %5451 = vst [vmem:[#allocation3 + $0x8] sm:$0x1] %v5450_v31  ;;  %v5471_v20 = vrot.slane %v5469_v15, 6  ;;  %v5474_v47 = vrot.slane %v5472_v33, 7  ;;  %v5508_v61 = vrot.slane %v15796_v49, 6 }
 0x3ff   : > { %v5422_v43 = vrot.slane %v5421_v30, 4  ;;  %v5480_v60 = vrot.slane %v5478_v42, 6  ;;  %v5483_v57 = vrot.slane %v5481_v39, 7  ;;  %v15810_v62 = vrot.slane %v5469_v15, 7  ;;  %v5494_v33 = vld [vmem:[#allocation3 + $0x10] sm:$0x3] }
 0x400   : > { %v5432_v24 = vrot.slane %v5431_v58, 4  ;;  %v5475_v32 = vor.u32 %v5474_v47, %v5471_v20  ;;  %v5509_v52 = vrot.slane %v5418_v41, 7  ;;  %v5512_v2 = vrot.slane %v5428_v16, 6 }
 0x401   : > { %v5427_v7 = vsel %vm17865_vm2, %v5422_v43, %v5426_v25  ;;  %v5484_v22 = vor.u32 %v5483_v57, %v5480_v60  ;;  %v5513_v31 = vrot.slane %v5424_v29, 7  ;;  %v5517_v43 = vrot.slane %v15802_v50, 6  ;;  %v5582_v57 = vld [vmem:[#allocation3 + $0x18] sm:$0x8] }
 0x402   : > { %v5437_v13 = vsel %vm17865_vm2, %v5432_v24, %v5436_v59  ;;  %v5446_v58 = vsel %vm13816_vm10, %v5427_v7, %v5445_v17  ;;  %v5476_v42 = vrot.slane %v5475_v32, 4  ;;  %v5491_v20 = vsel %vm17873_vm7, %v5475_v32, %v5490_v9  ;;  %v5528_v32 = vld [vmem:[#allocation3 + $0x18] sm:$0x7] }
 0x403   : > { %5448 = vst [vmem:[#allocation3 + $0x4] sm:$0xf] %v5437_v13  ;;  %v5510_v47 = vor.u32 %v5509_v52, %v5508_v61  ;;  %5447 = vst [vmem:[#allocation3] sm:$0xf] %v5446_v58  ;;  %v5486_v41 = vrot.slane %v5484_v22, 4  ;;  %v5514_v16 = vor.u32 %v5513_v31, %v5512_v2  ;;  %v5518_v24 = vrot.slane %v15800_v53, 7 }
 0x404   : > { %5492 = vst [vmem:[#allocation3 + $0x8] sm:$0xe] %v5491_v20  ;;  %v5485_v29 = vsel %vm17874_vm4, %v5476_v42, %v5484_v22  ;;  %v10962_v25 = vrot.slane %v5481_v39, 10  ;;  %v17943_v52 = vld [vmem:[#allocation7_spill] sm:$0xff]  ;;  %v5531_v13 = vrot.slane %v15796_v49, 7  ;;  %v17946_v31 = vmax.f32 %v15579_v4, 0.0 }
 0x405   : > { %v5459_v59 = vld [vmem:[#allocation3 + $0x8] sm:$0x1]  ;;  %v5511_v17 = vrot.slane %v5510_v47, 4  ;;  %v5525_v60 = vsel %vm17867_vm11, %v5510_v47, %v5524_v18  ;;  %vm17944_vm14 = vnez %v17943_v52  ;;  %5493 = vst [vmem:[#allocation3 + $0xc] sm:$0xf] %v5485_v29  ;;  %v5495_v61 = vsel %vm13860_vm3, %v5486_v41, %v5494_v33  ;;  %v17947_v41 = vld [vmem:[#allocation9_spill] sm:$0xff] }
 0x406   : > { %v5460_v9 = vsel %vm17944_vm14, %v15800_v53, %v5459_v59  ;;  %v5516_v2 = vrot.slane %v5514_v16, 4  ;;  %v5519_v7 = vor.u32 %v5518_v24, %v5517_v43  ;;  %5526 = vst [vmem:[#allocation3 + $0x10] sm:$0xc] %v5525_v60  ;;  %5496 = vst [vmem:[#allocation3 + $0x10] sm:$0x3] %v5495_v61  ;;  %v17945_v18 = vmax.f32 %v15573_v63, 0.0 }
 0x407   : > { %5461 = vst [vmem:[#allocation3 + $0x8] sm:$0x1] %v5460_v9  ;;  %v5515_v39 = vsel %vm17874_vm4, %v5511_v17, %v5514_v16  ;;  %v15840_v58 = vpack.c.bf16 %v17946_v31, %v17946_v31  ;;  %v5536_v42 = vrot.slane %v15800_v53, 6  ;;  %v5583_v47 = vsel %vm13962_vm13, %v5518_v24, %v5582_v57 }
 0x408   : > { %v11383_v22 = vpack.c.bf16 %v17945_v18, %v17945_v18  ;;  %v5520_v33 = vsel %vm17874_vm4, %v5516_v2, %v5519_v7  ;;  %5527 = vst [vmem:[#allocation3 + $0x14] sm:$0xf] %v5515_v39  ;;  %v5559_v20 = vrot.slane %v5519_v7, 4  ;;  %vm17948_vm8 = vnez %v17947_v41  ;;  %5584 = vst [vmem:[#allocation3 + $0x18] sm:$0x8] %v5583_v47  ;;  %v17953_v39 = vld [vmem:[#allocation10_spill] sm:$0xff] }
 0x409   : > { %v5529_v63 = vsel %vm17948_vm8, %v5520_v33, %v5528_v32  ;;  %v5571_v4 = vshrl.u32 %v15840_v58, 16  ;;  %v5574_v59 = vshll.u32 %v15840_v58, 16  ;;  %v5589_v29 = vrot.slane %v15802_v50, 7 }
 0x40a   : > { %v5561_v16 = vshrl.u32 %v11383_v22, 16  ;;  %v5564_v43 = vshll.u32 %v11383_v22, 16  ;;  %5530 = vst [vmem:[#allocation3 + $0x18] sm:$0x7] %v5529_v63  ;;  %v17949_v17 = vmax.f32 %v15582_v23, 0.0  ;;  %v17950_v60 = vmax.f32 %v15585_v54, 0.0 }
 0x40b   : > { %v5455_v57 = vld [vmem:[#allocation3] sm:$0x1]  ;;  %v5499_v32 = vld [vmem:[#allocation3 + $0x8] sm:$0x2]  ;;  %v17951_v2 = vmax.f32 %v15588_v26, 0.0  ;;  %v17952_v50 = vrot.slane %v15796_v49, 9  ;;  %vm17954_vm5 = vnez %v17953_v39 }
 0x40c   : > { %v11386_v53 = vpack.c.bf16 %v17949_v17, %v17949_v17  ;;  %v15858_v24 = vpack.c.bf16 %v17950_v60, %v17950_v60  ;;  %v5563_v9 = vrot.slane %v5561_v16, 6  ;;  %v5566_v61 = vrot.slane %v5564_v43, 7  ;;  %v17956_v43 = vld [vmem:[#allocation12_spill] sm:$0xff] }
 0x40d   : > { %v15863_v7 = vpack.c.bf16 %v17951_v2, %v17951_v2  ;;  %v5456_v23 = vsel %vm13823_vm12, %v17952_v50, %v5455_v57  ;;  %v5500_v54 = vsel %vm17954_vm5, %v15810_v62, %v5499_v32  ;;  %v5573_v18 = vrot.slane %v5571_v4, 6  ;;  %v5533_v26 = vld [vmem:[#allocation3 + $0x10] sm:$0x4]  ;;  %v5505_v16 = vld [vmem:[#allocation3 + $0x10] sm:$0x2] }
 0x40e   : > { %v5576_v22 = vrot.slane %v5574_v59, 7  ;;  %5457 = vst [vmem:[#allocation3] sm:$0x1] %v5456_v23  ;;  %5501 = vst [vmem:[#allocation3 + $0x8] sm:$0x2] %v5500_v54  ;;  %v5567_v31 = vor.u32 %v5566_v61, %v5563_v9  ;;  %v5619_v33 = vshrl.u32 %v11386_v53, 16  ;;  %vm17957_vm15 = vnez %v17956_v43 }
 0x40f   : > { %v5622_v47 = vshll.u32 %v11386_v53, 16  ;;  %v17955_v49 = vmax.f32 %v15591_v36, 0.0  ;;  %v5534_v62 = vsel %vm17957_vm15, %v5531_v13, %v5533_v26  ;;  %v5629_v60 = vshrl.u32 %v15858_v24, 16  ;;  %v5586_v32 = vld [vmem:[#allocation3 + $0x20] sm:$0xf]  ;;  %v17958_v26 = vld [vmem:[#allocation16_spill] sm:$0xff] }
 0x410   : > { %v5577_v17 = vor.u32 %v5576_v22, %v5573_v18  ;;  %v5632_v57 = vshll.u32 %v15858_v24, 16  ;;  %v5506_v9 = vsel %vm17860_vm6, %v10962_v25, %v5505_v16  ;;  %5535 = vst [vmem:[#allocation3 + $0x10] sm:$0x4] %v5534_v62  ;;  %v5568_v36 = vsel %vm17874_vm4, %v5559_v20, %v5567_v31  ;;  %v5591_v2 = vld [vmem:[#allocation3 + $0x18] sm:$0x8]  ;;  %v13560_v43 = vld [vmem:[%s17640_s4 + $0x8] sm:$0xff]  }
 0x411   : > { %v15879_v63 = vpack.c.bf16 %v17955_v49, %v17955_v49  ;;  %v5569_v53 = vrot.slane %v5567_v31, 4  ;;  %v5621_v61 = vrot.slane %v5619_v33, 6  ;;  %5507 = vst [vmem:[#allocation3 + $0x10] sm:$0x2] %v5506_v9  ;;  %5585 = vst [vmem:[#allocation3 + $0x1c] sm:$0xf] %v5568_v36  ;;  %vm17959_vm9 = vnez %v17958_v26 }
 0x412   : > { %v5617_v50 = vrot.slane %v5577_v17, 4  ;;  %v5624_v13 = vrot.slane %v5622_v47, 7  ;;  %v5631_v23 = vrot.slane %v5629_v60, 6  ;;  %v5634_v54 = vrot.slane %v5632_v57, 7  ;;  %v5538_v22 = vld [vmem:[#allocation3 + $0x18] sm:$0x4] }
 0x413   : > { %v5403_v18 = vmax.f32 %v15751_v0, 0.0  ;;  %v5578_v25 = vsel %vm17874_vm4, %v5569_v53, %v5577_v17  ;;  %v5592_v20 = vsel %vm17959_vm9, %v5589_v29, %v5591_v2  ;;  %v17960_v31 = vmax.f32 %v15594_v38, 0.0  ;;  %v5641_v49 = vld [vmem:[#allocation3 + $0x24] sm:$0xf]  ;;  %v5645_v47 = vld [vmem:[#allocation3 + $0x2c] sm:$0x1] }
 0x414   : > { %v17961_v16 = vld [vmem:[#allocation14_spill] sm:$0xff]  ;;  %v5587_v60 = vsel %vm14003_vm0, %v5578_v25, %v5586_v32  ;;  %5593 = vst [vmem:[#allocation3 + $0x18] sm:$0x8] %v5592_v20  ;;  %v5625_v9 = vor.u32 %v5624_v13, %v5621_v61  ;;  %v5635_v36 = vor.u32 %v5634_v54, %v5631_v23  ;;  %v5637_v17 = vrot.slane %v5631_v23, 4 }
 0x415   : > { %v15899_v33 = vpack.c.bf16 %v17960_v31, %v17960_v31  ;;  %vm17962_vm1 = vnez %v17961_v16  ;;  %5588 = vst [vmem:[#allocation3 + $0x20] sm:$0xf] %v5587_v60  ;;  %v5667_v29 = vshrl.u32 %v15863_v7, 16  ;;  %v5670_v38 = vshll.u32 %v15863_v7, 16  ;;  %v13564_v16 = vld [vmem:[%s17640_s4 + $0x10] sm:$0xff]  }
 0x416   : > { %v5539_v62 = vsel %vm17962_vm1, %v5536_v42, %v5538_v22  ;;  %v5676_v53 = vshrl.u32 %v15879_v63, 16  ;;  %v5626_v2 = vsel %vm17874_vm4, %v5617_v50, %v5625_v9  ;;  %v5627_v31 = vrot.slane %v5625_v9, 4  ;;  %v5688_v22 = vld [vmem:[#allocation3 + $0x2c] sm:$0xe] }
 0x417   : > { %5540 = vst [vmem:[#allocation3 + $0x18] sm:$0x4] %v5539_v62  ;;  %v5679_v42 = vshll.u32 %v15879_v63, 16  ;;  %v17963_v32 = vmax.f32 %v15597_v40, 0.0  ;;  %v5642_v13 = vsel %vm13816_vm10, %v5626_v2, %v5641_v49  ;;  %v5646_v23 = vsel %vm13823_vm12, %v5637_v17, %v5645_v47  ;;  %v5692_v62 = vld [vmem:[#allocation3 + $0x34] sm:$0x3] }
 0x418   : > { %v5669_v54 = vrot.slane %v5667_v29, 6  ;;  %v5672_v7 = vrot.slane %v5670_v38, 7  ;;  %v5594_v25 = vrot.slane %v5574_v59, 6  ;;  %v5636_v50 = vsel %vm17874_vm4, %v5627_v31, %v5635_v36  ;;  %5643 = vst [vmem:[#allocation3 + $0x24] sm:$0xf] %v5642_v13 }
 0x419   : > { %v11391_v61 = vpack.c.bf16 %v17963_v32, %v17963_v32  ;;  %5647 = vst [vmem:[#allocation3 + $0x2c] sm:$0x1] %v5646_v23  ;;  %v5678_v40 = vrot.slane %v5676_v53, 6  ;;  %v5681_v20 = vrot.slane %v5679_v42, 7  ;;  %5644 = vst [vmem:[#allocation3 + $0x28] sm:$0xf] %v5636_v50 }
 0x41a   : > { %v10969_v49 = vrot.slane %v5571_v4, 11  ;;  %v5673_v47 = vor.u32 %v5672_v7, %v5669_v54  ;;  %v17964_v60 = vmax.f32 %v15600_v35, 0.0  ;;  %v5717_v59 = vshrl.u32 %v15899_v33, 16  ;;  %v5747_v35 = vld [vmem:[#allocation3 + $0x34] sm:$0xc] }
 0x41b   : > { %v5682_v36 = vor.u32 %v5681_v20, %v5678_v40  ;;  %v5720_v17 = vshll.u32 %v15899_v33, 16  ;;  %v5726_v38 = vshrl.u32 %v11391_v61, 16  ;;  %v5729_v53 = vshll.u32 %v11391_v61, 16  ;;  %v5805_v50 = vld [vmem:[#allocation3 + $0x3c] sm:$0x8] }
 0x41c   : > { %v15929_v9 = vpack.c.bf16 %v17964_v60, %v17964_v60  ;;  %v5674_v2 = vrot.slane %v5673_v47, 4  ;;  %v5689_v31 = vsel %vm17873_vm7, %v5673_v47, %v5688_v22  ;;  %v5719_v58 = vrot.slane %v5717_v59, 6  ;;  %v5596_v32 = vld [vmem:[#allocation3 + $0x20] sm:$0x8] }
 0x41d   : > { %v5684_v13 = vrot.slane %v5682_v36, 4  ;;  %5690 = vst [vmem:[#allocation3 + $0x2c] sm:$0xe] %v5689_v31  ;;  %v5722_v23 = vrot.slane %v5720_v17, 7  ;;  %v5728_v54 = vrot.slane %v5726_v38, 6  ;;  %v5731_v7 = vrot.slane %v5729_v53, 7 }
 0x41e   : > { %v5736_v4 = vshrl.u32 %v15929_v9, 16  ;;  %v5597_v61 = vsel %vm13962_vm13, %v5594_v25, %v5596_v32  ;;  %v5683_v40 = vsel %vm17874_vm4, %v5674_v2, %v5682_v36  ;;  %v5739_v20 = vshll.u32 %v15929_v9, 16 }
 0x41f   : > { %5598 = vst [vmem:[#allocation3 + $0x20] sm:$0x8] %v5597_v61  ;;  %v10970_v47 = vrot.slane %v5632_v57, 10  ;;  %5691 = vst [vmem:[#allocation3 + $0x30] sm:$0xf] %v5683_v40  ;;  %v5693_v60 = vsel %vm13860_vm3, %v5684_v13, %v5692_v62  ;;  %v5723_v17 = vor.u32 %v5722_v23, %v5719_v58  ;;  %v5732_v38 = vor.u32 %v5731_v7, %v5728_v54 }
 0x420   : > { %v5738_v22 = vrot.slane %v5736_v4, 6  ;;  %v5651_v53 = vld [vmem:[#allocation3 + $0x24] sm:$0x1]  ;;  %v5657_v31 = vld [vmem:[#allocation3 + $0x2c] sm:$0x1]  ;;  %v5695_v25 = vrot.slane %v5667_v29, 7 }
 0x421   : > { %5694 = vst [vmem:[#allocation3 + $0x34] sm:$0x3] %v5693_v60  ;;  %v5741_v36 = vrot.slane %v5739_v20, 7  ;;  %v17965_v2 = vmax.f32 %v15603_v6, 0.0  ;;  %v17966_v24 = vmax.f32 %v15616_v56, 0.0  ;;  %v5652_v62 = vsel %vm13823_vm12, %v10969_v49, %v5651_v53 }
 0x422   : > { %v5658_v58 = vsel %vm17944_vm14, %v10970_v47, %v5657_v31  ;;  %v5724_v13 = vrot.slane %v5723_v17, 4  ;;  %v5734_v29 = vrot.slane %v5732_v38, 4  ;;  %v5751_v23 = vld [vmem:[#allocation3 + $0x3c] sm:$0x7]  ;;  %5653 = vst [vmem:[#allocation3 + $0x24] sm:$0x1] %v5652_v62  ;;  %v5748_v6 = vsel %vm17867_vm11, %v5723_v17, %v5747_v35 }
 0x423   : > { %v11394_v32 = vpack.c.bf16 %v17965_v2, %v17965_v2  ;;  %v15955_v57 = vpack.c.bf16 %v17966_v24, %v17966_v24  ;;  %5659 = vst [vmem:[#allocation3 + $0x2c] sm:$0x1] %v5658_v58  ;;  %v5742_v54 = vor.u32 %v5741_v36, %v5738_v22  ;;  %5749 = vst [vmem:[#allocation3 + $0x34] sm:$0xc] %v5748_v6  ;;  %v5754_v24 = vrot.slane %v5717_v59, 7 }
 0x424   : > { %v5733_v61 = vsel %vm17874_vm4, %v5724_v13, %v5732_v38  ;;  %v5806_v47 = vsel %vm13962_vm13, %v5741_v36, %v5805_v50  ;;  %v5697_v60 = vld [vmem:[#allocation3 + $0x2c] sm:$0x2]  ;;  %v5809_v50 = vld [vmem:[#allocation3 + $0x44] sm:$0xf]  ;;  %v10973_v36 = vrot.slane %v5679_v42, 10  ;;  %v17967_v58 = vmax.f32 %v15622_v44, 0.0 }
 0x425   : > { %v5784_v7 = vshrl.u32 %v11394_v32, 16  ;;  %v5787_v56 = vshll.u32 %v11394_v32, 16  ;;  %v5794_v49 = vshrl.u32 %v15955_v57, 16  ;;  %v5797_v40 = vshll.u32 %v15955_v57, 16  ;;  %5750 = vst [vmem:[#allocation3 + $0x38] sm:$0xf] %v5733_v61 }
 0x426   : > { %v5743_v22 = vsel %vm17874_vm4, %v5734_v29, %v5742_v54  ;;  %v5782_v53 = vrot.slane %v5742_v54, 4  ;;  %5807 = vst [vmem:[#allocation3 + $0x3c] sm:$0x8] %v5806_v47  ;;  %v5698_v38 = vsel %vm17954_vm5, %v5695_v25, %v5697_v60  ;;  %v11397_v25 = vpack.c.bf16 %v17967_v58, %v17967_v58  ;;  %v5868_v47 = vld [vmem:[#allocation3 + $0x50] sm:$0x1] }
 0x427   : > { %v5786_v35 = vrot.slane %v5784_v7, 6  ;;  %v5789_v17 = vrot.slane %v5787_v56, 7  ;;  %v5752_v31 = vsel %vm17948_vm8, %v5743_v22, %v5751_v23  ;;  %v5796_v2 = vrot.slane %v5794_v49, 6  ;;  %5699 = vst [vmem:[#allocation3 + $0x2c] sm:$0x2] %v5698_v38 }
 0x428   : > { %v5799_v32 = vrot.slane %v5797_v40, 7  ;;  %5753 = vst [vmem:[#allocation3 + $0x3c] sm:$0x7] %v5752_v31  ;;  %v5703_v13 = vld [vmem:[#allocation3 + $0x34] sm:$0x2]  ;;  %v5812_v23 = vrot.slane %v5736_v4, 7 }
 0x429   : > { %v5790_v62 = vor.u32 %v5789_v17, %v5786_v35  ;;  %v17968_v54 = vmax.f32 %v15642_v34, 0.0  ;;  %v17969_v7 = vmax.f32 %v15650_v37, 0.0  ;;  %v5704_v33 = vsel %vm17860_vm6, %v10973_v36, %v5703_v13  ;;  %v5864_v38 = vld [vmem:[#allocation3 + $0x48] sm:$0xf]  ;;  %v16225_v41 = vld [vmem:[#allocation3 + $0x20] sm:$0xff]  }
 0x42a   : > { %v5800_v29 = vor.u32 %v5799_v32, %v5796_v2  ;;  %v5842_v59 = vshrl.u32 %v11397_v25, 16  ;;  %5705 = vst [vmem:[#allocation3 + $0x34] sm:$0x2] %v5704_v33  ;;  %v5845_v56 = vshll.u32 %v11397_v25, 16  ;;  %v5756_v60 = vld [vmem:[#allocation3 + $0x34] sm:$0x4] }
 0x42b   : > { %v11398_v6 = vpack.c.bf16 %v17968_v54, %v17968_v54  ;;  %v15990_v63 = vpack.c.bf16 %v17969_v7, %v17969_v7  ;;  %v5791_v44 = vsel %vm17874_vm4, %v5782_v53, %v5790_v62  ;;  %v5792_v42 = vrot.slane %v5790_v62, 4 }
 0x42c   : > { %5808 = vst [vmem:[#allocation3 + $0x40] sm:$0xf] %v5791_v44  ;;  %v5840_v4 = vrot.slane %v5800_v29, 4  ;;  %v5844_v22 = vrot.slane %v5842_v59, 6  ;;  %v17970_v35 = vmax.f32 %v15657_v3, 0.0  ;;  %v5757_v31 = vsel %vm17957_vm15, %v5754_v24, %v5756_v60 }
 0x42d   : > { %v5852_v34 = vshrl.u32 %v11398_v6, 16  ;;  %v5855_v61 = vshll.u32 %v11398_v6, 16  ;;  %v5801_v37 = vsel %vm17874_vm4, %v5792_v42, %v5800_v29  ;;  %v5890_v53 = vshrl.u32 %v15990_v63, 16  ;;  %v5814_v32 = vld [vmem:[#allocation3 + $0x3c] sm:$0x8] }
 0x42e   : > { %v16001_v17 = vpack.c.bf16 %v17970_v35, %v17970_v35  ;;  %v5810_v2 = vsel %vm14003_vm0, %v5801_v37, %v5809_v50  ;;  %v5847_v36 = vrot.slane %v5845_v56, 7  ;;  %5758 = vst [vmem:[#allocation3 + $0x34] sm:$0x4] %v5757_v31  ;;  %v5759_v58 = vrot.slane %v5739_v20, 6 }
 0x42f   : > { %v5854_v62 = vrot.slane %v5852_v34, 6  ;;  %5811 = vst [vmem:[#allocation3 + $0x44] sm:$0xf] %v5810_v2  ;;  %v5815_v3 = vsel %vm17959_vm9, %v5812_v23, %v5814_v32  ;;  %v5857_v25 = vrot.slane %v5855_v61, 7  ;;  %v5892_v13 = vrot.slane %v5890_v53, 6 }
 0x430   : > { %v5761_v29 = vld [vmem:[#allocation3 + $0x3c] sm:$0x4]  ;;  %5816 = vst [vmem:[#allocation3 + $0x3c] sm:$0x8] %v5815_v3  ;;  %v5848_v24 = vor.u32 %v5847_v36, %v5844_v22  ;;  %v5893_v50 = vshll.u32 %v15990_v63, 16  ;;  %v5899_v6 = vshrl.u32 %v16001_v17, 16 }
 0x431   : > { %v5860_v54 = vrot.slane %v5854_v62, 4  ;;  %v5762_v9 = vsel %vm17962_vm1, %v5759_v58, %v5761_v29  ;;  %v5817_v20 = vrot.slane %v5797_v40, 6  ;;  %v5858_v7 = vor.u32 %v5857_v25, %v5854_v62  ;;  %v5911_v23 = vld [vmem:[#allocation3 + $0x50] sm:$0xe]  ;;  %v5915_v2 = vld [vmem:[#allocation3 + $0x58] sm:$0x3] }
 0x432   : > { %v5902_v33 = vshll.u32 %v16001_v17, 16  ;;  %5763 = vst [vmem:[#allocation3 + $0x3c] sm:$0x4] %v5762_v9  ;;  %v5849_v44 = vsel %vm17874_vm4, %v5840_v4, %v5848_v24  ;;  %v5850_v42 = vrot.slane %v5848_v24, 4  ;;  %v5895_v56 = vrot.slane %v5893_v50, 7 }
 0x433   : > { %v5869_v59 = vsel %vm13823_vm12, %v5860_v54, %v5868_v47  ;;  %v5865_v34 = vsel %vm13816_vm10, %v5849_v44, %v5864_v38  ;;  %v10984_v60 = vrot.slane %v5855_v61, 10  ;;  %v5901_v37 = vrot.slane %v5899_v6, 6  ;;  %v5970_v24 = vld [vmem:[#allocation3 + $0x58] sm:$0xc]  ;;  %v6028_v44 = vld [vmem:[#allocation3 + $0x60] sm:$0x8] }
 0x434   : > { %5870 = vst [vmem:[#allocation3 + $0x50] sm:$0x1] %v5869_v59  ;;  %v5904_v40 = vrot.slane %v5902_v33, 7  ;;  %v5859_v22 = vsel %vm17874_vm4, %v5850_v42, %v5858_v7  ;;  %5866 = vst [vmem:[#allocation3 + $0x48] sm:$0xf] %v5865_v34  ;;  %v5896_v35 = vor.u32 %v5895_v56, %v5892_v13  ;;  %v17971_v4 = vmax.f32 %v15663_v51, 0.0 }
 0x435   : > { %v17972_v47 = vmax.f32 %v15674_v1, 0.0  ;;  %5867 = vst [vmem:[#allocation3 + $0x4c] sm:$0xf] %v5859_v22  ;;  %v17973_v32 = vmax.f32 %v15687_v19, 0.0  ;;  %v17974_v62 = vmax.f32 %v15695_v14, 0.0  ;;  %v17975_v51 = vmax.f32 %v15701_v27, 0.0 }
 0x436   : > { %v16032_v31 = vpack.c.bf16 %v17971_v4, %v17971_v4  ;;  %v5905_v61 = vor.u32 %v5904_v40, %v5901_v37  ;;  %v5819_v1 = vld [vmem:[#allocation3 + $0x44] sm:$0x8]  ;;  %v5897_v25 = vrot.slane %v5896_v35, 4  ;;  %v5912_v13 = vsel %vm17873_vm7, %v5896_v35, %v5911_v23  ;;  %v5974_v4 = vld [vmem:[#allocation3 + $0x60] sm:$0x7] }
 0x437   : > { %v11402_v38 = vpack.c.bf16 %v17972_v47, %v17972_v47  ;;  %v16040_v36 = vpack.c.bf16 %v17973_v32, %v17973_v32  ;;  %v11405_v58 = vpack.c.bf16 %v17974_v62, %v17974_v62  ;;  %v16048_v3 = vpack.c.bf16 %v17975_v51, %v17975_v51  ;;  %5913 = vst [vmem:[#allocation3 + $0x50] sm:$0xe] %v5912_v13 }
 0x438   : > { %v5940_v29 = vshrl.u32 %v16032_v31, 16  ;;  %v5943_v19 = vshll.u32 %v16032_v31, 16  ;;  %v5820_v14 = vsel %vm13962_vm13, %v5817_v20, %v5819_v1  ;;  %v5907_v54 = vrot.slane %v5905_v61, 4 }
 0x439   : > { %v5949_v50 = vshrl.u32 %v11402_v38, 16  ;;  %v5952_v27 = vshll.u32 %v11402_v38, 16  ;;  %5821 = vst [vmem:[#allocation3 + $0x44] sm:$0x8] %v5820_v14  ;;  %v5906_v6 = vsel %vm17874_vm4, %v5897_v25, %v5905_v61  ;;  %v5959_v23 = vshrl.u32 %v16040_v36, 16 }
 0x43a   : > { %v5942_v9 = vrot.slane %v5940_v29, 6  ;;  %v5945_v7 = vrot.slane %v5943_v19, 7  ;;  %5914 = vst [vmem:[#allocation3 + $0x54] sm:$0xf] %v5906_v6  ;;  %v5916_v42 = vsel %vm13860_vm3, %v5907_v54, %v5915_v2  ;;  %v5962_v20 = vshll.u32 %v16040_v36, 16 }
 0x43b   : > { %v5951_v59 = vrot.slane %v5949_v50, 6  ;;  %v5954_v56 = vrot.slane %v5952_v27, 7  ;;  %v10983_v34 = vrot.slane %v5794_v49, 11  ;;  %v5880_v37 = vld [vmem:[#allocation3 + $0x50] sm:$0x1]  ;;  %v5961_v22 = vrot.slane %v5959_v23, 6 }
 0x43c   : > { %5917 = vst [vmem:[#allocation3 + $0x58] sm:$0x3] %v5916_v42  ;;  %v5946_v40 = vor.u32 %v5945_v7, %v5942_v9  ;;  %v6007_v35 = vshrl.u32 %v11405_v58, 16  ;;  %v5874_v31 = vld [vmem:[#allocation3 + $0x48] sm:$0x1]  ;;  %v5881_v47 = vsel %vm17944_vm14, %v10984_v60, %v5880_v37  ;;  %v5918_v38 = vrot.slane %v5890_v53, 7 }
 0x43d   : > { %v5955_v2 = vor.u32 %v5954_v56, %v5951_v59  ;;  %v5964_v61 = vrot.slane %v5962_v20, 7  ;;  %v5875_v57 = vsel %vm13823_vm12, %v10983_v34, %v5874_v31  ;;  %5882 = vst [vmem:[#allocation3 + $0x50] sm:$0x1] %v5881_v47  ;;  %v6010_v60 = vshll.u32 %v11405_v58, 16  ;;  %v6032_v9 = vld [vmem:[#allocation3 + $0x68] sm:$0xf] }
 0x43e   : > { %v5947_v49 = vrot.slane %v5946_v40, 4  ;;  %v5971_v32 = vsel %vm17867_vm11, %v5946_v40, %v5970_v24  ;;  %v6009_v62 = vrot.slane %v6007_v35, 6  ;;  %5876 = vst [vmem:[#allocation3 + $0x48] sm:$0x1] %v5875_v57  ;;  %v6017_v63 = vshrl.u32 %v16048_v3, 16 }
 0x43f   : > { %v5957_v51 = vrot.slane %v5955_v2, 4  ;;  %v5965_v1 = vor.u32 %v5964_v61, %v5961_v22  ;;  %5972 = vst [vmem:[#allocation3 + $0x58] sm:$0xc] %v5971_v32  ;;  %v5920_v53 = vld [vmem:[#allocation3 + $0x50] sm:$0x2]  ;;  %v10987_v25 = vrot.slane %v5902_v33, 10  ;;  %v6029_v24 = vsel %vm13962_vm13, %v5964_v61, %v6028_v44 }
 0x440   : > { %v5956_v13 = vsel %vm17874_vm4, %v5947_v49, %v5955_v2  ;;  %v6020_v19 = vshll.u32 %v16048_v3, 16  ;;  %v5921_v14 = vsel %vm17954_vm5, %v5918_v38, %v5920_v53  ;;  %v6012_v50 = vrot.slane %v6010_v60, 7  ;;  %6030 = vst [vmem:[#allocation3 + $0x60] sm:$0x8] %v6029_v24  ;;  %v6091_v32 = vld [vmem:[#allocation3 + $0x74] sm:$0x1] }
 0x441   : > { %v5966_v58 = vsel %vm17874_vm4, %v5957_v51, %v5965_v1  ;;  %5973 = vst [vmem:[#allocation3 + $0x5c] sm:$0xf] %v5956_v13  ;;  %v6005_v54 = vrot.slane %v5965_v1, 4  ;;  %5922 = vst [vmem:[#allocation3 + $0x50] sm:$0x2] %v5921_v14  ;;  %v5977_v33 = vrot.slane %v5940_v29, 7 }
 0x442   : > { %v5975_v17 = vsel %vm17948_vm8, %v5966_v58, %v5974_v4  ;;  %v6019_v27 = vrot.slane %v6017_v63, 6  ;;  %v6022_v6 = vrot.slane %v6020_v19, 7  ;;  %v6013_v44 = vor.u32 %v6012_v50, %v6009_v62  ;;  %v17979_v4 = vld [vmem:[#allocation15_spill] sm:$0xff]  ;;  %v6087_v58 = vld [vmem:[#allocation3 + $0x6c] sm:$0xf] }
 0x443   : > { %v5926_v7 = vld [vmem:[#allocation3 + $0x58] sm:$0x2]  ;;  %5976 = vst [vmem:[#allocation3 + $0x60] sm:$0x7] %v5975_v17  ;;  %v6035_v42 = vrot.slane %v5959_v23, 7  ;;  %v17976_v59 = vmax.f32 %v15707_v28, 0.0 }
 0x444   : > { %v17977_v34 = vmax.f32 %v15715_v8, 0.0  ;;  %v5927_v29 = vsel %vm17860_vm6, %v10987_v25, %v5926_v7  ;;  %v6023_v40 = vor.u32 %v6022_v6, %v6019_v27  ;;  %v17978_v22 = vmax.f32 %v15721_v12, 0.0 }
 0x445   : > { %v11408_v56 = vpack.c.bf16 %v17976_v59, %v17976_v59  ;;  %v17980_v23 = vmax.f32 %v17979_v4, 0.0  ;;  %5928 = vst [vmem:[#allocation3 + $0x58] sm:$0x2] %v5927_v29  ;;  %v6014_v8 = vsel %vm17874_vm4, %v6005_v54, %v6013_v44  ;;  %v6015_v31 = vrot.slane %v6013_v44, 4  ;;  %v17981_v4 = vld [vmem:[#allocation55_spill] sm:$0xff] }
 0x446   : > { %v16098_v37 = vpack.c.bf16 %v17977_v34, %v17977_v34  ;;  %v16105_v35 = vpack.c.bf16 %v17978_v22, %v17978_v22  ;;  %v5979_v2 = vld [vmem:[#allocation3 + $0x58] sm:$0x4]  ;;  %6031 = vst [vmem:[#allocation3 + $0x64] sm:$0xf] %v6014_v8  ;;  %v6063_v61 = vrot.slane %v6023_v40, 4  ;;  %v5982_v53 = vrot.slane %v5962_v20, 6 }
 0x447   : > { %v16110_v28 = vpack.c.bf16 %v17980_v23, %v17980_v23  ;;  %v6065_v47 = vshrl.u32 %v11408_v56, 16  ;;  %v6068_v38 = vshll.u32 %v11408_v56, 16  ;;  %v5980_v62 = vsel %vm17957_vm15, %v5977_v33, %v5979_v2  ;;  %v6037_v13 = vld [vmem:[#allocation3 + $0x60] sm:$0x8]  ;;  %v6134_v20 = vld [vmem:[#allocation3 + $0x74] sm:$0xe] }
 0x448   : > { %v6075_v12 = vshrl.u32 %v16098_v37, 16  ;;  %v6078_v57 = vshll.u32 %v16098_v37, 16  ;;  %v6113_v49 = vshrl.u32 %v16105_v35, 16  ;;  %v6024_v51 = vsel %vm17874_vm4, %v6015_v31, %v6023_v40  ;;  %5981 = vst [vmem:[#allocation3 + $0x58] sm:$0x4] %v5980_v62 }
 0x449   : > { %v6067_v1 = vrot.slane %v6065_v47, 6  ;;  %v6070_v60 = vrot.slane %v6068_v38, 7  ;;  %v6033_v25 = vsel %vm14003_vm0, %v6024_v51, %v6032_v9  ;;  %v6038_v54 = vsel %vm17959_vm9, %v6035_v42, %v6037_v13  ;;  %v6138_v22 = vld [vmem:[#allocation3 + $0x7c] sm:$0x3]  ;;  %v17982_v38 = vld [vmem:[#allocation6_spill] sm:$0xff]  ;;  %v17986_v51 = vld [vmem:[#allocation57_spill] sm:$0xff] }
 0x44a   : > { %v6077_v24 = vrot.slane %v6075_v12, 6  ;;  %v6080_v14 = vrot.slane %v6078_v57, 7  ;;  %6034 = vst [vmem:[#allocation3 + $0x68] sm:$0xf] %v6033_v25  ;;  %v6115_v17 = vrot.slane %v6113_v49, 6  ;;  %v6116_v36 = vshll.u32 %v16105_v35, 16 }
 0x44b   : > { %v6071_v50 = vor.u32 %v6070_v60, %v6067_v1  ;;  %v5984_v33 = vld [vmem:[#allocation3 + $0x60] sm:$0x4]  ;;  %6039 = vst [vmem:[#allocation3 + $0x60] sm:$0x8] %v6038_v54  ;;  %v6122_v6 = vshrl.u32 %v16110_v28, 16  ;;  %v6125_v9 = vshll.u32 %v16110_v28, 16  ;;  %v16167_v13 = vpack.c.bf16 %v5403_v18, %v5403_v18 }
 0x44c   : > { %v6081_v11 = vor.u32 %v6080_v14, %v6077_v24  ;;  %v6083_v27 = vrot.slane %v6077_v24, 4  ;;  %v5985_v7 = vsel %vm17962_vm1, %v5982_v53, %v5984_v33  ;;  %v6118_v59 = vrot.slane %v6116_v36, 7  ;;  %v17984_v12 = vld [vmem:[#allocation56_spill] sm:$0xff]  ;;  %v6363_v18 = vld [vmem:[#allocation3] sm:$0xf] }
 0x44d   : > { %v6072_v44 = vsel %vm17874_vm4, %v6063_v61, %v6071_v50  ;;  %v6073_v42 = vrot.slane %v6071_v50, 4  ;;  %5986 = vst [vmem:[#allocation3 + $0x60] sm:$0x4] %v5985_v7  ;;  %v6124_v29 = vrot.slane %v6122_v6, 6  ;;  %v6127_v40 = vrot.slane %v6125_v9, 7 }
 0x44e   : > { %v6088_v56 = vsel %vm13816_vm10, %v6072_v44, %v6087_v58  ;;  %v6092_v34 = vsel %vm13823_vm12, %v6083_v27, %v6091_v32  ;;  %v6296_v23 = vrot.slane %v17981_v4, 4  ;;  %v6040_v8 = vrot.slane %v6020_v19, 6 }
 0x44f   : > { %v6082_v31 = vsel %vm17874_vm4, %v6073_v42, %v6081_v11  ;;  %6089 = vst [vmem:[#allocation3 + $0x6c] sm:$0xf] %v6088_v56  ;;  %6093 = vst [vmem:[#allocation3 + $0x74] sm:$0x1] %v6092_v34  ;;  %v6119_v21 = vor.u32 %v6118_v59, %v6115_v17  ;;  %v6128_v47 = vor.u32 %v6127_v40, %v6124_v29  ;;  %v17983_v2 = vmax.f32 %v17982_v38, 0.0 }
 0x450   : > { %6090 = vst [vmem:[#allocation3 + $0x70] sm:$0xf] %v6082_v31  ;;  %v17985_v32 = vmax.f32 %v17984_v12, 0.0  ;;  %v17987_v1 = vmax.f32 %v17986_v51, 0.0  ;;  %v10997_v60 = vrot.slane %v6017_v63, 11  ;;  %v10998_v7 = vrot.slane %v6078_v57, 10 }
 0x451   : > { %v16152_v61 = vpack.c.bf16 %v17983_v2, %v17983_v2  ;;  %v6120_v53 = vrot.slane %v6119_v21, 4  ;;  %v6135_v25 = vsel %vm17873_vm7, %v6119_v21, %v6134_v20  ;;  %v6042_v24 = vld [vmem:[#allocation3 + $0x68] sm:$0x8]  ;;  %v6130_v14 = vrot.slane %v6128_v47, 4  ;;  %v6193_v17 = vld [vmem:[#allocation3 + $0x7c] sm:$0xc] }
 0x452   : > { %v11413_v62 = vpack.c.bf16 %v17985_v32, %v17985_v32  ;;  %v11414_v19 = vpack.c.bf16 %v17987_v1, %v17987_v1  ;;  %6136 = vst [vmem:[#allocation3 + $0x74] sm:$0xe] %v6135_v25  ;;  %v6043_v3 = vsel %vm13962_vm13, %v6040_v8, %v6042_v24  ;;  %v6251_v20 = vld [vmem:[#allocation3 + $0x84] sm:$0x8]  ;;  %v6141_v29 = vrot.slane %v6113_v49, 7 }
 0x453   : > { %v6163_v58 = vshrl.u32 %v16152_v61, 16  ;;  %v6166_v54 = vshll.u32 %v16152_v61, 16  ;;  %v6129_v63 = vsel %vm17874_vm4, %v6120_v53, %v6128_v47  ;;  %6044 = vst [vmem:[#allocation3 + $0x68] sm:$0x8] %v6043_v3  ;;  %v6139_v33 = vsel %vm13860_vm3, %v6130_v14, %v6138_v22  ;;  %v6197_v22 = vld [vmem:[#allocation3 + $0x84] sm:$0x7] }
 0x454   : > { %v6172_v50 = vshrl.u32 %v11413_v62, 16  ;;  %v6175_v36 = vshll.u32 %v11413_v62, 16  ;;  %v16175_v0 = vshrl.u32 %v11414_v19, 16  ;;  %6137 = vst [vmem:[#allocation3 + $0x78] sm:$0xf] %v6129_v63  ;;  %v16182_v59 = vshll.u32 %v11414_v19, 16 }
 0x455   : > { %v6165_v11 = vrot.slane %v6163_v58, 6  ;;  %v6168_v27 = vrot.slane %v6166_v54, 7  ;;  %6140 = vst [vmem:[#allocation3 + $0x7c] sm:$0x3] %v6139_v33  ;;  %v6298_v10 = vshrl.u32 %v16167_v13, 16  ;;  %v16196_v61 = vld [vmem:[#allocation3 + $0x8] sm:$0xff]  }
 0x456   : > { %v6174_v6 = vrot.slane %v6172_v50, 6  ;;  %v6177_v44 = vrot.slane %v6175_v36, 7  ;;  %v6184_v42 = vrot.slane %v16175_v0, 6  ;;  %v6097_v56 = vld [vmem:[#allocation3 + $0x6c] sm:$0x1]  ;;  %v6187_v21 = vrot.slane %v16182_v59, 7 }
 0x457   : > { %v6103_v34 = vld [vmem:[#allocation3 + $0x74] sm:$0x1]  ;;  %v6169_v40 = vor.u32 %v6168_v27, %v6165_v11  ;;  %v6314_v8 = vld [vmem:[#allocation3 + $0x98] sm:$0x1]  ;;  %v6098_v37 = vsel %vm13823_vm12, %v10997_v60, %v6097_v56  ;;  %v6364_v47 = vld [vmem:[#allocation3 + $0x4] sm:$0xf] }
 0x458   : > { %v6104_v57 = vsel %vm17944_vm14, %v10998_v7, %v6103_v34  ;;  %v6178_v31 = vor.u32 %v6177_v44, %v6174_v6  ;;  %6099 = vst [vmem:[#allocation3 + $0x6c] sm:$0x1] %v6098_v37  ;;  %v6300_v49 = vrot.slane %v6298_v10, 6  ;;  %v16194_v2 = vcombine.low %v6363_v18, %v6364_v47  ;;  %v16201_v19 = vld [vmem:[#allocation3 + $0x10] sm:$0xff]   ;;  %v16212_v54 = vld [vmem:[#allocation3 + $0x18] sm:$0xff]  }
 0x459   : > { %6105 = vst [vmem:[#allocation3 + $0x74] sm:$0x1] %v6104_v57  ;;  %v6170_v38 = vrot.slane %v6169_v40, 4  ;;  %v6194_v35 = vsel %vm17867_vm11, %v6169_v40, %v6193_v17  ;;  %v6143_v12 = vld [vmem:[#allocation3 + $0x74] sm:$0x2]  ;;  %v6188_v62 = vor.u32 %v6187_v21, %v6184_v42  ;;  %v6252_v51 = vsel %vm13962_vm13, %v6187_v21, %v6251_v20 }
 0x45a   : > { %v6180_v32 = vrot.slane %v6178_v31, 4  ;;  %6195 = vst [vmem:[#allocation3 + $0x7c] sm:$0xc] %v6194_v35  ;;  %v6301_v1 = vshll.u32 %v16167_v13, 16  ;;  %v6144_v15 = vsel %vm17954_vm5, %v6141_v29, %v6143_v12  ;;  %6253 = vst [vmem:[#allocation3 + $0x84] sm:$0x8] %v6252_v51 }
 0x45b   : > { %v6179_v60 = vsel %vm17874_vm4, %v6170_v38, %v6178_v31  ;;  %v6306_v53 = vrot.slane %v6300_v49, 4  ;;  %v6329_v25 = vrot.slane %v16175_v0, 4  ;;  %6145 = vst [vmem:[#allocation3 + $0x74] sm:$0x2] %v6144_v15  ;;  %v11001_v24 = vrot.slane %v6125_v9, 10  ;;  %v17988_v9 = vld [vmem:[#allocation53_spill] sm:$0xff] }
 0x45c   : > { %v6189_v45 = vsel %vm17874_vm4, %v6180_v32, %v6188_v62  ;;  %6196 = vst [vmem:[#allocation3 + $0x80] sm:$0xf] %v6179_v60  ;;  %v6228_v13 = vrot.slane %v6188_v62, 4  ;;  %v6303_v14 = vrot.slane %v6301_v1, 7  ;;  %v6149_v50 = vld [vmem:[#allocation3 + $0x7c] sm:$0x2] }
 0x45d   : > { %v6198_v17 = vsel %vm17948_vm8, %v6189_v45, %v6197_v22  ;;  %v6200_v3 = vrot.slane %v6163_v58, 7  ;;  %v6315_v63 = vsel %vm13823_vm12, %v6306_v53, %v6314_v8  ;;  %v6330_v36 = vrot.slane %v16182_v59, 5  ;;  %v6346_v58 = vld [vmem:[#allocation3 + $0x98] sm:$0xe]  ;;  %v16253_v62 = vld [vmem:[#allocation3 + $0x28] sm:$0xff]   ;;  %v16261_v60 = vld [vmem:[#allocation3 + $0x30] sm:$0xff]  }
 0x45e   : > { %v6150_v28 = vsel %vm17860_vm6, %v11001_v24, %v6149_v50  ;;  %6199 = vst [vmem:[#allocation3 + $0x84] sm:$0x7] %v6198_v17  ;;  %v6237_v18 = vsel %vm17874_vm4, %v6228_v13, %v17988_v9  ;;  %v6258_v20 = vrot.slane %v16175_v0, 7  ;;  %v6304_v33 = vor.u32 %v6303_v14, %v6300_v49  ;;  %6316 = vst [vmem:[#allocation3 + $0x98] sm:$0x1] %v6315_v63  ;;  %v17989_v57 = vld [vmem:[#allocation54_spill] sm:$0xff] }
 0x45f   : > { %6151 = vst [vmem:[#allocation3 + $0x7c] sm:$0x2] %v6150_v28  ;;  %6254 = vst [vmem:[#allocation3 + $0x88] sm:$0xf] %v6237_v18  ;;  %v6331_v48 = vor.u32 %v6330_v36, %v6329_v25  ;;  %v6527_v11 = vshrl.u32 %v16194_v2, 16  ;;  %v6529_v5 = vshll.u32 %v16194_v2, 16 }
 0x460   : > { %v6534_v27 = vshll.u32 %v16196_v61, 16  ;;  %v6305_v6 = vsel %vm17874_vm4, %v6296_v23, %v6304_v33  ;;  %v6538_v7 = vshrl.u32 %v16196_v61, 16  ;;  %v6542_v44 = vshll.u32 %v16201_v19, 16  ;;  %v13697_v53 = vld [vmem:[%s17640_s4] sm:$0xff]   ;;  %v13567_v28 = vld [vmem:[%s17640_s4 + $0x18] sm:$0xff]  }
 0x461   : > { %v6550_v42 = vshll.u32 %v16212_v54, 16  ;;  %v6202_v56 = vld [vmem:[#allocation3 + $0x7c] sm:$0x4]  ;;  %6313 = vst [vmem:[#allocation3 + $0x94] sm:$0xf] %v6305_v6  ;;  %v6332_v34 = vrot.slane %v6331_v48, 4 }
 0x462   : > { %v6531_v29 = vrot.slane %v6529_v5, 1  ;;  %v6536_v40 = vrot.slane %v6534_v27, 1  ;;  %v6546_v10 = vshrl.u32 %v16201_v19, 16  ;;  %v6203_v22 = vsel %vm17957_vm15, %v6200_v3, %v6202_v56  ;;  %v6260_v4 = vld [vmem:[#allocation3 + $0x84] sm:$0x8]  ;;  %v16274_v17 = vld [vmem:[#allocation3 + $0x38] sm:$0xff]  }
 0x463   : > { %v6544_v8 = vrot.slane %v6542_v44, 1  ;;  %v6552_v46 = vrot.slane %v6550_v42, 1  ;;  %v6558_v23 = vshll.u32 %v16225_v41, 16  ;;  %6204 = vst [vmem:[#allocation3 + $0x7c] sm:$0x4] %v6203_v22  ;;  %v6261_v37 = vsel %vm17959_vm9, %v6258_v20, %v6260_v4  ;;  %v16284_v33 = vld [vmem:[#allocation3 + $0x40] sm:$0xff]  }
 0x464   : > { %v6334_v31 = vsel %vm17865_vm2, %v6332_v34, %v17989_v57  ;;  %v6532_v21 = vor.u32 %v6531_v29, %v6527_v11  ;;  %v6540_v47 = vor.u32 %v6538_v7, %v6536_v40  ;;  %v6205_v38 = vrot.slane %v16182_v59, 6  ;;  %6262 = vst [vmem:[#allocation3 + $0x84] sm:$0x8] %v6261_v37  ;;  %v13570_v48 = vld [vmem:[%s17640_s4 + $0x20] sm:$0xff]   ;;  %v13573_v7 = vld [vmem:[%s17640_s4 + $0x28] sm:$0xff]   ;;  %v16299_v29 = vld [vmem:[#allocation3 + $0x50] sm:$0xff]  }
 0x465   : > { %v11012_v35 = vrot.slane %v6301_v1, 10  ;;  %v6347_v49 = vsel %vm17873_vm7, %v6334_v31, %v6346_v58  ;;  %v6548_v12 = vor.u32 %v6546_v10, %v6544_v8  ;;  %v6207_v26 = vld [vmem:[#allocation3 + $0x84] sm:$0x4]  ;;  %v6326_v32 = vld [vmem:[#allocation3 + $0x98] sm:$0x1]  ;;  %v6560_v1 = vrot.slane %v6558_v23, 1 }
 0x466   : > { %6348 = vst [vmem:[#allocation3 + $0x98] sm:$0xe] %v6347_v49  ;;  %vm17990_vm10 = vsmask.f32 7424  ;;  %v6208_v51 = vsel %vm17962_vm1, %v6205_v38, %v6207_v26  ;;  %v6554_v52 = vshrl.u32 %v16212_v54, 16  ;;  %v6562_v25 = vshrl.u32 %v16225_v41, 16 }
 0x467   : > { %v6537_v55 = vsel %vm17990_vm10, %v6532_v21, %v6536_v40  ;;  %v6327_v15 = vsel %vm17944_vm14, %v11012_v35, %v6326_v32  ;;  %vm17991_vm12 = vmmov %vm17990_vm10  ;;  %6209 = vst [vmem:[#allocation3 + $0x84] sm:$0x4] %v6208_v51  ;;  %v6566_v24 = vshll.u32 %v16253_v62, 16  ;;  %v11013_v13 = vrot.slane %v16175_v0, 9  ;;  %v16295_v44 = vld [vmem:[#allocation3 + $0x48] sm:$0xff]   ;;  %v16302_v10 = vld [vmem:[#allocation3 + $0x58] sm:$0xff]  }
 0x468   : > { %12373 = vmatprep.mubr.bf16.mxu1 %v6537_v55  ;;  %v6545_v59 = vsel %vm17991_vm12, %v6540_v47, %v6544_v8  ;;  %6328 = vst [vmem:[#allocation3 + $0x98] sm:$0x1] %v6327_v15  ;;  %vm17992_vm3 = vmmov %vm17990_vm10  ;;  %v6556_v45 = vor.u32 %v6554_v52, %v6552_v46  ;;  %v6564_v14 = vor.u32 %v6562_v25, %v6560_v1  ;;  %v6574_v50 = vshll.u32 %v16261_v60, 16  ;;  %v16306_v8 = vld [vmem:[#allocation3 + $0x60] sm:$0xff]   ;;  %v13576_v23 = vld [vmem:[%s17640_s4 + $0x30] sm:$0xff]  }
 0x469   : > { %12374 = vmatmul.mubr.bf16.vlgmr.msra.gmra.mrb[0].mxu1 %v6545_v59  ;;  %v6553_v30 = vsel %vm17992_vm3, %v6548_v12, %v6552_v46  ;;  %v6568_v36 = vrot.slane %v6566_v24, 1  ;;  %vm17993_vm0 = vmmov %vm17992_vm3  ;;  %v6582_v20 = vshll.u32 %v16274_v17, 16  ;;  %v6570_v39 = vshrl.u32 %v16253_v62, 16  ;;  %v16308_v46 = vld [vmem:[#allocation3 + $0x68] sm:$0xff]   ;;  %v16313_v57 = vld [vmem:[#allocation3 + $0x70] sm:$0xff]  }
 0x46a   : > { %12410 = vmatpush3.bf16.msra.mxu1 %v13697_v53  ;;  %12377 = vmatprep.mubr.bf16.mxu1 %v6553_v30  ;;  %v6561_v9 = vsel %vm17993_vm0, %v6556_v45, %v6560_v1  ;;  %vm17994_vm13 = vmmov %vm17993_vm0  ;;  %v6576_v18 = vrot.slane %v6574_v50, 1  ;;  %v6578_v58 = vshrl.u32 %v16261_v60, 16  ;;  %v6590_v6 = vshll.u32 %v16284_v33, 16  ;;  %v16315_v31 = vld [vmem:[#allocation3 + $0x78] sm:$0xff]   ;;  %v16332_v52 = vld [vmem:[#allocation3 + $0x88] sm:$0xff]  }
 0x46b   : > { %12411 = vmatprep.subr.bf16.mxu1 %v13560_v43  ;;  %v6569_v0 = vsel %vm17994_vm13, %v6564_v14, %v6568_v36  ;;  %v6572_v11 = vor.u32 %v6570_v39, %v6568_v36  ;;  %v6584_v27 = vrot.slane %v6582_v20, 1  ;;  %vm17995_vm6 = vmmov %vm17993_vm0  ;;  %v6586_v40 = vshrl.u32 %v16274_v17, 16  ;;  %v13579_v26 = vld [vmem:[%s17640_s4 + $0x38] sm:$0xff]   ;;  %v16338_v45 = vld [vmem:[%s17640_s4 + $0x80] sm:$0xff]  }
 0x46c   : > { %v6580_v5 = vor.u32 %v6578_v58, %v6576_v18  ;;  %vm17996_vm2 = vmmov %vm17993_vm0  ;;  %v6592_v34 = vrot.slane %v6590_v6, 1  ;;  %v6594_v22 = vshrl.u32 %v16284_v33, 16  ;;  %v6598_v4 = vshll.u32 %v16295_v44, 16  ;;  %v16350_v6 = vld [vmem:[#allocation3 + $0xc] sm:$0xf] }
 0x46d   : > { %v6356_v3 = vld [vmem:[#allocation3 + $0x98] sm:$0x2]  ;;  %v6577_v42 = vsel %vm17995_vm6, %v6572_v11, %v6576_v18  ;;  %v6588_v37 = vor.u32 %v6586_v40, %v6584_v27  ;;  %v6606_v47 = vshll.u32 %v16299_v29, 16  ;;  %v6614_v38 = vshll.u32 %v16302_v10, 16  ;;  %vm17997_vm11 = vmmov %vm17993_vm0 }
 0x46e   : > { %12412 = vmatpush3.bf16.msra.mxu1 %v13560_v43  ;;  %v6357_v63 = vsel %vm17954_vm5, %v11013_v13, %v6356_v3  ;;  %v6585_v56 = vsel %vm17996_vm2, %v6580_v5, %v6584_v27  ;;  %v6596_v21 = vor.u32 %v6594_v22, %v6592_v34  ;;  %v16318_v43 = vld [vmem:[#allocation3 + $0x80] sm:$0xff]   ;;  %v6600_v35 = vrot.slane %v6598_v4, 1  ;;  %vm17998_vm4 = vmmov %vm17993_vm0  ;;  %v16347_v27 = vld [vmem:[#allocation3 + $0x90] ss:$0 sps:$4 sm:$0x11]  }
 0x46f   : > { %12413 = vmatprep.subr.bf16.mxu1 %v13564_v16  ;;  %6358 = vst [vmem:[#allocation3 + $0x98] sm:$0x2] %v6357_v63  ;;  %v6622_v49 = vshll.u32 %v16306_v8, 16  ;;  %v6630_v12 = vshll.u32 %v16308_v46, 16  ;;  %v6593_v32 = vsel %vm17997_vm11, %v6588_v37, %v6592_v34  ;;  %v6638_v55 = vshll.u32 %v16313_v57, 16  ;;  %vm17999_vm7 = vmmov %vm17993_vm0  ;;  %v16357_v4 = vld [vmem:[#allocation3 + $0x10] sm:$0xff]  }
 0x470   : > { %v6646_v51 = vshll.u32 %v16315_v31, 16  ;;  %v6601_v15 = vsel %vm17998_vm4, %v6596_v21, %v6600_v35  ;;  %v6608_v59 = vrot.slane %v6606_v47, 1  ;;  %v6654_v30 = vshll.u32 %v16318_v43, 16  ;;  %vm18000_vm1 = vmmov %vm17993_vm0 }
 0x471   : > { %12378 = vmatmul.mubr.bf16.gmra.mrb[4].mxu1 %v6561_v9  ;;  %v6602_v1 = vshrl.u32 %v16295_v44, 16  ;;  %v6616_v53 = vrot.slane %v6614_v38, 1  ;;  %v6624_v25 = vrot.slane %v6622_v49, 1  ;;  %v6632_v24 = vrot.slane %v6630_v12, 1  ;;  %vm18001_vm9 = vmmov %vm17993_vm0  ;;  %v16368_v12 = vld [vmem:[#allocation3 + $0x20] sm:$0xff]  }
 0x472   : > { %12381 = vmatprep.mubr.bf16.mxu1 %v6569_v0  ;;  %12414 = vmatpush3.bf16.msra.mxu1 %v13564_v16  ;;  %v6610_v16 = vshrl.u32 %v16299_v29, 16  ;;  %v6618_v14 = vshrl.u32 %v16302_v10, 16  ;;  %v6640_v50 = vrot.slane %v6638_v55, 1  ;;  %v6648_v3 = vrot.slane %v6646_v51, 1  ;;  %v7497_v0 = vld [vmem:[#allocation3 + $0x8] sm:$0xe]  ;;  %vm18002_vm15 = vmmov %vm17993_vm0 }
 0x473   : > { %12415 = vmatprep.subr.bf16.mxu1 %v13567_v28  ;;  %v6604_v13 = vor.u32 %v6602_v1, %v6600_v35  ;;  %v6626_v36 = vshrl.u32 %v16306_v8, 16  ;;  %v6656_v9 = vrot.slane %v6654_v30, 1  ;;  %v6642_v20 = vshrl.u32 %v16313_v57, 16  ;;  %vm18003_vm5 = vmmov %vm17993_vm0  ;;  %v16376_v55 = vld [vmem:[#allocation3 + $0x28] sm:$0xff]   ;;  %v16383_v30 = vld [vmem:[#allocation3 + $0x30] sm:$0xff]  }
 0x474   : > { %v6612_v63 = vor.u32 %v6610_v16, %v6608_v59  ;;  %v6620_v18 = vor.u32 %v6618_v14, %v6616_v53  ;;  %v6650_v39 = vshrl.u32 %v16315_v31, 16  ;;  %v6662_v58 = vshll.u32 %v16332_v52, 16  ;;  %vm18004_vm8 = vmmov %vm17993_vm0  ;;  %v16451_v49 = vld [vmem:[#allocation3 + $0x80] sm:$0xff]  }
 0x475   : > { %v6658_v5 = vshrl.u32 %v16318_v43, 16  ;;  %v16354_v34 = vcombine.low %v7497_v0, %v16350_v6  ;;  %v6666_v35 = vshrl.u32 %v16332_v52, 16  ;;  %vm18005_vm14 = vmmov %vm17993_vm0  ;;  %v7990_v1 = vshrl.u32 %v16357_v4, 16  ;;  %18021 = vst [vmem:[#allocation10_spill] sm:$0xff] %v16451_v49 }
 0x476   : > { %12416 = vmatpush3.bf16.msra.mxu1 %v13567_v28  ;;  %v6634_v28 = vshrl.u32 %v16308_v46, 16  ;;  %v6617_v40 = vsel %vm18000_vm1, %v6612_v63, %v6616_v53  ;;  %v6625_v37 = vsel %vm18001_vm9, %v6620_v18, %v6624_v25  ;;  %v6664_v21 = vrot.slane %v6662_v58, 1  ;;  %vm18006_vm10 = vmmov %vm17993_vm0 }
 0x477   : > { %12417 = vmatprep.subr.bf16.mxu1 %v13570_v48  ;;  %v6660_v22 = vor.u32 %v6658_v5, %v6656_v9  ;;  %v7982_v51 = vshrl.u32 %v16354_v34, 16  ;;  %v7993_v53 = vshll.u32 %v16357_v4, 16  ;;  %v8011_v18 = vshll.u32 %v16368_v12, 16 }
 0x478   : > { %v6636_v11 = vor.u32 %v6634_v28, %v6632_v24  ;;  %v8008_v28 = vshrl.u32 %v16368_v12, 16  ;;  %v8026_v5 = vshrl.u32 %v16383_v30, 16  ;;  %vm18007_vm12 = vsmask.f32 6400 }
 0x479   : > { %12382 = vmatmul.mubr.bf16.gmra.mrb[8].mxu1 %v6577_v42  ;;  %v6644_v42 = vor.u32 %v6642_v20, %v6640_v50  ;;  %v7995_v63 = vrot.slane %v7993_v53, 2  ;;  %v8017_v20 = vshrl.u32 %v16376_v55, 16  ;;  %vm18009_vm3 = vmmov %vm18007_vm12 }
 0x47a   : > { %12385 = vmatprep.mubr.bf16.mxu1 %v6585_v56  ;;  %12418 = vmatpush3.bf16.msra.mxu1 %v13570_v48  ;;  %v6628_v48 = vor.u32 %v6626_v36, %v6624_v25  ;;  %v6652_v56 = vor.u32 %v6650_v39, %v6648_v3  ;;  %v16364_v38 = vsel %vm18003_vm5, %v6636_v11, %v6640_v50  ;;  %v16391_v50 = vld [vmem:[#allocation3 + $0x38] sm:$0xff]   ;;  %v16396_v39 = vld [vmem:[#allocation3 + $0x40] sm:$0xff]   ;;  %v8020_v11 = vshll.u32 %v16376_v55, 16  ;;  %vm18011_vm0 = vmmov %vm18009_vm3 }
 0x47b   : > { %12419 = vmatprep.subr.bf16.mxu1 %v13573_v7  ;;  %v16388_v25 = vor.u32 %v6666_v35, %v6664_v21  ;;  %v8028_v35 = vrot.slane %v8026_v5, 1  ;;  %vm18013_vm13 = vmmov %vm18011_vm0  ;;  %v16427_v5 = vld [vmem:[#allocation3 + $0x68] sm:$0xff]  }
 0x47c   : > { %v6633_v47 = vsel %vm18002_vm15, %v6628_v48, %v6632_v24  ;;  %v7984_v24 = vrot.slane %v7982_v51, 1  ;;  %v8010_v48 = vrot.slane %v8008_v28, 1  ;;  %v8035_v51 = vshrl.u32 %v16391_v50, 16  ;;  %vm18015_vm6 = vmmov %vm18011_vm0 }
 0x47d   : > { %vm18017_vm2 = vmmov %vm18011_vm0 }
 0x47e   : > { %12420 = vmatpush3.bf16.msra.mxu1 %v13573_v7  ;;  %v6609_v7 = vsel %vm17999_vm7, %v6604_v13, %v6608_v59  ;;  %v16381_v59 = vsel %vm18006_vm10, %v6660_v22, %v6664_v21  ;;  %v8029_v22 = vshll.u32 %v16383_v30, 16  ;;  %vm18019_vm11 = vmmov %vm18011_vm0 }
 0x47f   : > { %12421 = vmatprep.subr.bf16.mxu1 %v13576_v23  ;;  %vm18022_vm4 = vmmov %vm18011_vm0 }
 0x480   : > { %v8031_v53 = vrot.slane %v8029_v22, 2  ;;  %vm18025_vm7 = vmmov %vm18011_vm0 }
 0x481   : > { %12386 = vmatmul.mubr.bf16.gmra.mrb[12].mxu1 %v6593_v32  ;;  %v16374_v32 = vsel %vm18005_vm14, %v6652_v56, %v6656_v9  ;;  %v8013_v56 = vrot.slane %v8011_v18, 2  ;;  %vm18028_vm1 = vmmov %vm18011_vm0 }
 0x482   : > { %12389 = vmatprep.mubr.bf16.mxu1 %v6601_v15  ;;  %12422 = vmatpush3.bf16.msra.mxu1 %v13576_v23  ;;  %v16359_v23 = vld [vmem:[#allocation3 + $0x18] sm:$0xff]   ;;  %v7985_v15 = vshll.u32 %v16354_v34, 16  ;;  %vm18030_vm9 = vmmov %vm18011_vm0 }
 0x483   : > { %12423 = vmatprep.subr.bf16.mxu1 %v13579_v26  ;;  %v7999_v16 = vshrl.u32 %v16359_v23, 16  ;;  %v8002_v14 = vshll.u32 %v16359_v23, 16  ;;  %vm18032_vm15 = vmmov %vm18011_vm0 }
 0x484   : > { %v7987_v13 = vrot.slane %v7985_v15, 2  ;;  %v16407_v15 = vld [vmem:[#allocation3 + $0x50] sm:$0xff]   ;;  %vm18034_vm5 = vmmov %vm18011_vm0 }
 0x485   : > { %v8001_v36 = vrot.slane %v7999_v16, 1  ;;  %v8004_v0 = vrot.slane %v8002_v14, 2  ;;  %v8038_v16 = vshll.u32 %v16391_v50, 16  ;;  %v8037_v14 = vrot.slane %v8035_v51, 1  ;;  %vm18039_vm14 = vmmov %vm18011_vm0 }
 0x486   : > { %12424 = vmatpush3.bf16.msra.mxu1 %v13579_v26  ;;  %v16371_v26 = vsel %vm18004_vm8, %v6644_v42, %v6648_v3  ;;  %v7992_v3 = vrot.slane %v7990_v1, 1  ;;  %v7988_v9 = vor.u32 %v7987_v13, %v7984_v24  ;;  %v16413_v24 = vld [vmem:[#allocation3 + $0x58] sm:$0xff]   ;;  %vm18037_vm8 = vmmov %vm18011_vm0 }
 0x487   : > { %12461 = vmatprep.subr.bf16.mxu1 %v16338_v45  ;;  %v8005_v42 = vor.u32 %v8004_v0, %v8001_v36  ;;  %v16417_v36 = vld [vmem:[#allocation3 + $0x60] sm:$0xff]   ;;  %v8040_v0 = vrot.slane %v8038_v16, 2 }
 0x488   : > { %v7996_v58 = vor.u32 %v7995_v63, %v7992_v3  ;;  %v8044_v3 = vshrl.u32 %v16396_v39, 16  ;;  %v8047_v63 = vshll.u32 %v16396_v39, 16 }
 0x489   : > { %12390 = vmatmul.mubr.bf16.gmra.mrb[16].mxu1 %v6609_v7  ;;  %v16400_v7 = vld [vmem:[#allocation3 + $0x48] sm:$0xff]  }
 0x48a   : > { %12393 = vmatprep.mubr.bf16.mxu1 %v6617_v40  ;;  %v8019_v40 = vrot.slane %v8017_v20, 1  ;;  %v16404_v21 = vsel %vm18007_vm12, %v7988_v9, %v7996_v58  ;;  %v16410_v1 = vsel %vm18009_vm3, %v7996_v58, %v8005_v42  ;;  %v8032_v9 = vor.u32 %v8031_v53, %v8028_v35  ;;  %vm18041_vm12 = vmmov %vm18011_vm0 }
 0x48b   : > { %18008 = vst [vmem:[#allocation13_spill] sm:$0xff] %v16404_v21  ;;  %18010 = vst [vmem:[#allocation4_spill] sm:$0xff] %v16410_v1  ;;  %v8053_v18 = vshrl.u32 %v16400_v7, 16  ;;  %v8046_v58 = vrot.slane %v8044_v3, 1  ;;  %v8071_v53 = vshrl.u32 %v16413_v24, 16  ;;  %v8080_v3 = vshrl.u32 %v16417_v36, 16 }
 0x48c   : > { %vm18044_vm3 = vcmask 1045504  }
 0x48d   : > { %v8055_v22 = vrot.slane %v8053_v18, 1 }
 0x491   : > { %12394 = vmatmul.mubr.bf16.gmra.mrb[20].mxu1 %v6625_v37  ;;  %v8022_v37 = vrot.slane %v8020_v11, 2  ;;  %v8056_v11 = vshll.u32 %v16400_v7, 16 }
 0x492   : > { %12397 = vmatprep.mubr.bf16.mxu1 %v6633_v47  ;;  %v8014_v47 = vor.u32 %v8013_v56, %v8010_v48  ;;  %v8049_v48 = vrot.slane %v8047_v63, 2  ;;  %v16444_v63 = vld [vmem:[#allocation3 + $0x78] sm:$0xff]  }
 0x493   : > { %v8023_v13 = vor.u32 %v8022_v37, %v8019_v40  ;;  %v8041_v40 = vor.u32 %v8040_v0, %v8037_v14  ;;  %v16434_v37 = vld [vmem:[#allocation3 + $0x70] sm:$0xff]   ;;  %v8058_v51 = vrot.slane %v8056_v11, 2  ;;  %v8074_v14 = vshll.u32 %v16413_v24, 16 }
 0x494   : > { %v16420_v28 = vsel %vm18011_vm0, %v8005_v42, %v8014_v47  ;;  %v8062_v42 = vshrl.u32 %v16407_v15, 16  ;;  %v8050_v35 = vor.u32 %v8049_v48, %v8046_v58  ;;  %v8073_v58 = vrot.slane %v8071_v53, 1  ;;  %vm18046_vm0 = vmmov %vm18044_vm3 }
 0x495   : > { %18012 = vst [vmem:[#allocation11_spill] sm:$0xff] %v16420_v28  ;;  %v16424_v20 = vsel %vm18013_vm13, %v8014_v47, %v8023_v13  ;;  %v16430_v56 = vsel %vm18015_vm6, %v8023_v13, %v8032_v9  ;;  %v8065_v47 = vshll.u32 %v16407_v15, 16  ;;  %v16440_v16 = vsel %vm18017_vm2, %v8032_v9, %v8041_v40  ;;  %vm18048_vm13 = vmmov %vm18028_vm1 }
 0x496   : > { %18014 = vst [vmem:[#allocation5_spill] sm:$0xff] %v16424_v20  ;;  %18016 = vst [vmem:[#allocation8_spill] sm:$0xff] %v16430_v56  ;;  %v8064_v13 = vrot.slane %v8062_v42, 1  ;;  %v8059_v0 = vor.u32 %v8058_v51, %v8055_v22  ;;  %v8076_v48 = vrot.slane %v8074_v14, 2  ;;  %v8082_v11 = vrot.slane %v8080_v3, 1 }
 0x497   : > { %18018 = vst [vmem:[#allocation7_spill] sm:$0xff] %v16440_v16  ;;  %v8067_v18 = vrot.slane %v8065_v47, 2  ;;  %v8089_v9 = vshrl.u32 %v16427_v5, 16  ;;  %v8092_v56 = vshll.u32 %v16427_v5, 16  ;;  %v8101_v53 = vshll.u32 %v16434_v37, 16  ;;  %vm18050_vm6 = vmmov %vm18046_vm0 }
 0x498   : > { %v16454_v42 = vsel %vm18022_vm4, %v8050_v35, %v8059_v0  ;;  %v8077_v22 = vor.u32 %v8076_v48, %v8073_v58  ;;  %v8110_v58 = vshll.u32 %v16444_v63, 16  ;;  %vm18052_vm2 = vmmov %vm18046_vm0 }
 0x499   : > { %12398 = vmatmul.mubr.bf16.gmra.mrb[24].mxu1 %v16364_v38  ;;  %v16447_v38 = vsel %vm18019_vm11, %v8041_v40, %v8050_v35  ;;  %18023 = vst [vmem:[#allocation12_spill] sm:$0xff] %v16454_v42  ;;  %v8068_v16 = vor.u32 %v8067_v18, %v8064_v13  ;;  %v8098_v40 = vshrl.u32 %v16434_v37, 16  ;;  %v8091_v47 = vrot.slane %v8089_v9, 1  ;;  %v16465_v42 = vld [vmem:[#allocation3 + $0x90] sm:$0xff]   ;;  %vm18054_vm11 = vmmov %vm18046_vm0 }
 0x49a   : > { %12401 = vmatprep.mubr.bf16.mxu1 %v16371_v26  ;;  %18020 = vst [vmem:[#allocation9_spill] sm:$0xff] %v16447_v38  ;;  %v8083_v26 = vshll.u32 %v16417_v36, 16  ;;  %v16458_v38 = vld [vmem:[#allocation3 + $0x88] sm:$0xff]   ;;  %v8094_v3 = vrot.slane %v8092_v56, 2  ;;  %v8107_v35 = vshrl.u32 %v16444_v63, 16  ;;  %18027 = vst [vmem:[#allocation15_spill] sm:$0xff] %v16465_v42 }
 0x49b   : > { %18024 = vst [vmem:[#allocation16_spill] sm:$0xff] %v16458_v38  ;;  %v16462_v14 = vsel %vm18025_vm7, %v8059_v0, %v8068_v16  ;;  %v8100_v20 = vrot.slane %v8098_v40, 1  ;;  %v16468_v13 = vsel %vm18028_vm1, %v8068_v16, %v8077_v22  ;;  %v8103_v28 = vrot.slane %v8101_v53, 2  ;;  %vm18057_vm4 = vmmov %vm18046_vm0 }
 0x49c   : > { %v8085_v51 = vrot.slane %v8083_v26, 2  ;;  %18026 = vst [vmem:[#allocation14_spill] sm:$0xff] %v16462_v14  ;;  %18029 = vst [vmem:[#allocation55_spill] sm:$0xff] %v16468_v13  ;;  %v8095_v48 = vor.u32 %v8094_v3, %v8091_v47  ;;  %v8109_v26 = vrot.slane %v8107_v35, 1  ;;  %v8116_v0 = vshrl.u32 %v16451_v49, 16 }
 0x49d   : > { %v8119_v56 = vshll.u32 %v16451_v49, 16  ;;  %v8104_v40 = vor.u32 %v8103_v28, %v8100_v20  ;;  %v8112_v16 = vrot.slane %v8110_v58, 2  ;;  %v8128_v47 = vshll.u32 %v16458_v38, 16  ;;  %v8430_v20 = vld [vmem:[#allocation3 + $0x8] sm:$0xc]  ;;  %vm18059_vm7 = vmmov %vm18046_vm0 }
 0x49e   : > { %v8086_v18 = vor.u32 %v8085_v51, %v8082_v11  ;;  %v8125_v11 = vshrl.u32 %v16458_v38, 16  ;;  %v8118_v53 = vrot.slane %v8116_v0, 1  ;;  %v8137_v28 = vshll.u32 %v16465_v42, 16  ;;  %vm18061_vm1 = vmmov %vm18046_vm0 }
 0x49f   : > { %v16484_v3 = vsel %vm18034_vm5, %v8095_v48, %v8104_v40  ;;  %v8113_v35 = vor.u32 %v8112_v16, %v8109_v26  ;;  %v18036_v58 = vshll.u32 %v16347_v27, 16  ;;  %vm18067_vm5 = vmmov %vm18046_vm0 }
 0x4a0   : > { %v16476_v9 = vsel %vm18030_vm9, %v8077_v22, %v8086_v18  ;;  %v16480_v51 = vsel %vm18032_vm15, %v8086_v18, %v8095_v48  ;;  %18035 = vst [vmem:[#allocation57_spill] sm:$0xff] %v16484_v3  ;;  %v8127_v13 = vrot.slane %v8125_v11, 1  ;;  %v8139_v16 = vrot.slane %v8137_v28, 2  ;;  %vm18063_vm9 = vmmov %vm18046_vm0 }
 0x4a1   : > { %12402 = vmatmul.mubr.bf16.gmra.mrb[28].mxu1 %v16374_v32  ;;  %18031 = vst [vmem:[#allocation6_spill] sm:$0xff] %v16476_v9  ;;  %18033 = vst [vmem:[#allocation56_spill] sm:$0xff] %v16480_v51  ;;  %v8121_v32 = vrot.slane %v8119_v56, 2  ;;  %v8130_v9 = vrot.slane %v8128_v47, 2  ;;  %v6672_v18 = vrot.slane %v18036_v58, 1  ;;  %v16491_v0 = vsel %vm18037_vm8, %v8104_v40, %v8113_v35 }
 0x4a2   : > { %12405 = vmatprep.mubr.bf16.mxu1 %v16381_v59  ;;  %v8134_v59 = vshrl.u32 %v16465_v42, 16  ;;  %18038 = vst [vmem:[#allocation53_spill] sm:$0xff] %v16491_v0  ;;  %v11174_v51 = vcombine.low %v8430_v20, %v16350_v6  ;;  %v8454_v47 = vrot.slane %v16359_v23, 2  ;;  %v8456_v6 = vrot.slane %v16368_v12, 2  ;;  %vm18065_vm15 = vmmov %vm18046_vm0 }
 0x4a3   : > { %v8122_v22 = vor.u32 %v8121_v32, %v8118_v53  ;;  %v8131_v26 = vor.u32 %v8130_v9, %v8127_v13  ;;  %v6673_v11 = vsel %vm18006_vm10, %v16388_v25, %v6672_v18  ;;  %v8452_v32 = vrot.slane %v16357_v4, 2  ;;  %vm18069_vm8 = vmmov %vm18046_vm0 }
 0x4a4   : > { %v8136_v56 = vrot.slane %v8134_v59, 1  ;;  %v8451_v53 = vrot.slane %v11174_v51, 2  ;;  %v8460_v9 = vrot.slane %v16383_v30, 2  ;;  %v8464_v58 = vrot.slane %v16396_v39, 2  ;;  %vm18073_vm10 = vmmov %vm18046_vm0 }
 0x4a5   : > { %v16495_v48 = vsel %vm18039_vm14, %v8113_v35, %v8122_v22  ;;  %v16502_v40 = vsel %vm18041_vm12, %v8122_v22, %v8131_v26  ;;  %v8458_v35 = vrot.slane %v16376_v55, 2  ;;  %v16513_v25 = vsel %vm18046_vm0, %v8452_v32, %v8454_v47  ;;  %vm18071_vm14 = vmmov %vm18046_vm0 }
 0x4a6   : > { %18040 = vst [vmem:[#allocation54_spill] sm:$0xff] %v16495_v48  ;;  %18042 = vst [vmem:[#allocation58_spill] sm:$0xff] %v16502_v40  ;;  %v16504_v59 = vor.u32 %v8139_v16, %v8136_v56  ;;  %v16510_v13 = vsel %vm18044_vm3, %v8451_v53, %v8452_v32  ;;  %v16521_v22 = vsel %vm18050_vm6, %v8454_v47, %v8456_v6  ;;  %v8466_v18 = vrot.slane %v16400_v7, 2  ;;  %v16532_v56 = vld [vmem:[#allocation3 + $0x98] ss:$0 sps:$4 sm:$0x33]  }
 0x4a7   : > { %18045 = vst [vmem:[#allocation60_spill] sm:$0xff] %v16510_v13  ;;  %18047 = vst [vmem:[#allocation61_spill] sm:$0xff] %v16513_v25  ;;  %v16524_v28 = vsel %vm18052_vm2, %v8456_v6, %v8458_v35  ;;  %v16528_v20 = vsel %vm18054_vm11, %v8458_v35, %v8460_v9  ;;  %v8468_v16 = vrot.slane %v16407_v15, 2  ;;  %v8472_v53 = vrot.slane %v16417_v36, 2  ;;  %v16629_v40 = vld [vmem:[#allocation3 + $0x48] sm:$0xff]  }
 0x4a8   : > { %18043 = vst [vmem:[#allocation59_spill] sm:$0xff] %v16504_v59  ;;  %v16518_v51 = vsel %vm18048_vm13, %v8131_v26, %v16504_v59  ;;  %18051 = vst [vmem:[#allocation63_spill] sm:$0xff] %v16521_v22  ;;  %v16544_v47 = vsel %vm18061_vm1, %v8464_v58, %v8466_v18  ;;  %v8474_v6 = vrot.slane %v16427_v5, 2  ;;  %v8476_v35 = vrot.slane %v16434_v37, 2 }
 0x4a9   : > { %12406 = vmatmul.mubr.bf16.gmra.mrb[32].mxu1 %v6673_v11  ;;  %18049 = vst [vmem:[#allocation62_spill] sm:$0xff] %v16518_v51  ;;  %18053 = vst [vmem:[#allocation64_spill] sm:$0xff] %v16524_v28  ;;  %v8470_v11 = vrot.slane %v16413_v24, 2  ;;  %v8480_v28 = vrot.slane %v16451_v49, 2  ;;  %v8482_v22 = vrot.slane %v16458_v38, 2  ;;  %v9317_v1 = vshll.u32 %v16629_v40, 16 }
 0x4aa   : > { %12425 = vmatprep.mubr.bf16.mxu1 %v16194_v2  ;;  %v8462_v2 = vrot.slane %v16391_v50, 2  ;;  %18055 = vst [vmem:[#allocation65_spill] sm:$0xff] %v16528_v20  ;;  %18056 = vst [vmem:[#allocation66_spill] sm:$0xff] %v16532_v56  ;;  %vm18083_vm6 = vsmask.f32 5376 }
 0x4ab   : > { %18062 = vst [vmem:[#allocation69_spill] sm:$0xff] %v16544_v47  ;;  %v16555_v20 = vsel %vm18065_vm15, %v8468_v16, %v8470_v11  ;;  %v16562_v47 = vsel %vm18069_vm8, %v8472_v53, %v8474_v6  ;;  %vm18075_vm12 = vmmov %vm18046_vm0 }
 0x4ac   : > { %v16535_v26 = vsel %vm18057_vm4, %v8460_v9, %v8462_v2  ;;  %v16541_v32 = vsel %vm18059_vm7, %v8462_v2, %v8464_v58  ;;  %v13582_v9 = vld [vmem:[%s17640_s4 + $0x88] sm:$0xff]   ;;  %18066 = vst [vmem:[#allocation71_spill] sm:$0xff] %v16555_v20  ;;  %v16558_v2 = vsel %vm18067_vm5, %v8470_v11, %v8472_v53  ;;  %v8478_v58 = vrot.slane %v16444_v63, 2  ;;  %18070 = vst [vmem:[#allocation73_spill] sm:$0xff] %v16562_v47 }
 0x4ad   : > { %18058 = vst [vmem:[#allocation67_spill] sm:$0xff] %v16535_v26  ;;  %18060 = vst [vmem:[#allocation68_spill] sm:$0xff] %v16541_v32  ;;  %v16552_v26 = vsel %vm18063_vm9, %v8466_v18, %v8468_v16  ;;  %v16565_v32 = vsel %vm18071_vm14, %v8474_v6, %v8476_v35  ;;  %v8484_v16 = vrot.slane %v16465_v42, 2  ;;  %v8486_v11 = vrot.slane %v16532_v56, 2  ;;  %v16621_v47 = vld [vmem:[#allocation3 + $0x40] sm:$0xff]  }
 0x4ae   : > { %18064 = vst [vmem:[#allocation70_spill] sm:$0xff] %v16552_v26  ;;  %18068 = vst [vmem:[#allocation72_spill] sm:$0xff] %v16558_v2  ;;  %v16571_v18 = vsel %vm18073_vm10, %v8476_v35, %v8478_v58  ;;  %v16578_v53 = vsel %vm18075_vm12, %v8478_v58, %v8480_v28 }
 0x4af   : > { %18072 = vst [vmem:[#allocation74_spill] sm:$0xff] %v16565_v32  ;;  %18074 = vst [vmem:[#allocation75_spill] sm:$0xff] %v16571_v18  ;;  %v16587_v35 = vsel %vm18046_vm0, %v8482_v22, %v8484_v16 }
 0x4b0   : > { %18076 = vst [vmem:[#allocation76_spill] sm:$0xff] %v16578_v53  ;;  %vm18077_vm3 = vmmov %vm18046_vm0  ;;  %v16617_v53 = vld [vmem:[#allocation3 + $0x38] sm:$0xff]  }
 0x4b1   : > { %12426 = vmatmul.mubr.bf16.vlgmr.msra.gmra.mrb[0].mxu1 %v16196_v61  ;;  %v16581_v6 = vsel %vm18077_vm3, %v8480_v28, %v8482_v22  ;;  %v13583_v61 = vld [vmem:[%s17640_s4 + $0x90] sm:$0xff]   ;;  %18079 = vst [vmem:[#allocation78_spill] sm:$0xff] %v16587_v35  ;;  %vm18080_vm13 = vmmov %vm18046_vm0  ;;  %v13584_v28 = vld [vmem:[%s17640_s4 + $0x98] sm:$0xff]  }
 0x4b2   : > { %12462 = vmatpush3.bf16.msra.mxu1 %v16338_v45  ;;  %12429 = vmatprep.mubr.bf16.mxu1 %v16201_v19  ;;  %18078 = vst [vmem:[#allocation77_spill] sm:$0xff] %v16581_v6  ;;  %v16590_v18 = vsel %vm18080_vm13, %v8484_v16, %v8486_v11  ;;  %v8767_v45 = vld [vmem:[#allocation3 + $0x10] sm:$0xc]  ;;  %v16592_v19 = vld [vmem:[#allocation3 + $0x14] sm:$0xf]  ;;  %v16600_v6 = vld [vmem:[#allocation3 + $0x18] sm:$0xff]  }
 0x4b3   : > { %12463 = vmatprep.subr.bf16.mxu1 %v13582_v9  ;;  %18081 = vst [vmem:[#allocation79_spill] sm:$0xff] %v16590_v18  ;;  %v16598_v58 = vcombine.low %v8767_v45, %v16592_v19  ;;  %v16603_v22 = vld [vmem:[#allocation3 + $0x20] sm:$0xff]   ;;  %v16611_v11 = vld [vmem:[#allocation3 + $0x30] sm:$0xff]   ;;  %v9263_v35 = vshll.u32 %v16600_v6, 16  ;;  %vm18085_vm2 = vmmov %vm18083_vm6 }
 0x4b4   : > { %v13585_v16 = vld [vmem:[%s17640_s4 + $0xa0] sm:$0xff]   ;;  %v9272_v32 = vshll.u32 %v16603_v22, 16  ;;  %v9287_v51 = vshrl.u32 %v16611_v11, 16  ;;  %vm18087_vm11 = vmmov %vm18085_vm2 }
 0x4b5   : > { %18082 = vst [vmem:[#allocation80_spill] sm:$0xff] %v16598_v58  ;;  %v9252_v45 = vshrl.u32 %v16598_v58, 16  ;;  %v9255_v18 = vshll.u32 %v16598_v58, 16  ;;  %v9265_v26 = vrot.slane %v9263_v35, 3  ;;  %v13586_v58 = vld [vmem:[%s17640_s4 + $0xa8] sm:$0xff]   ;;  %v9290_v35 = vshll.u32 %v16611_v11, 16  ;;  %vm18089_vm4 = vmmov %vm18085_vm2 }
 0x4b6   : > { %12464 = vmatpush3.bf16.msra.mxu1 %v13582_v9  ;;  %v16606_v9 = vld [vmem:[#allocation3 + $0x28] sm:$0xff]   ;;  %v9274_v59 = vrot.slane %v9272_v32, 3  ;;  %v9289_v3 = vrot.slane %v9287_v51, 2  ;;  %v9296_v32 = vshrl.u32 %v16617_v53, 16  ;;  %vm18091_vm7 = vmmov %vm18085_vm2 }
 0x4b7   : > { %12465 = vmatprep.subr.bf16.mxu1 %v13583_v61  ;;  %v9257_v2 = vrot.slane %v9255_v18, 3  ;;  %v9278_v25 = vshrl.u32 %v16606_v9, 16  ;;  %vm18093_vm1 = vmmov %vm18085_vm2 }
 0x4b8   : > { %v9298_v51 = vrot.slane %v9296_v32, 2  ;;  %vm18095_vm9 = vmmov %vm18093_vm1 }
 0x4b9   : > { %12430 = vmatmul.mubr.bf16.gmra.mrb[4].mxu1 %v16212_v54  ;;  %v9260_v54 = vshrl.u32 %v16600_v6, 16  ;;  %v9280_v18 = vrot.slane %v9278_v25, 2  ;;  %v9299_v25 = vshll.u32 %v16617_v53, 16  ;;  %vm18097_vm15 = vmmov %vm18093_vm1 }
 0x4ba   : > { %12433 = vmatprep.mubr.bf16.mxu1 %v16225_v41  ;;  %12466 = vmatpush3.bf16.msra.mxu1 %v13583_v61  ;;  %v9254_v41 = vrot.slane %v9252_v45, 2  ;;  %v9269_v61 = vshrl.u32 %v16603_v22, 16  ;;  %v9281_v45 = vshll.u32 %v16606_v9, 16  ;;  %vm18099_vm5 = vmmov %vm18093_vm1 }
 0x4bb   : > { %12467 = vmatprep.subr.bf16.mxu1 %v13584_v28  ;;  %v9262_v20 = vrot.slane %v9260_v54, 2  ;;  %v16633_v54 = vld [vmem:[#allocation3 + $0x50] sm:$0xff]   ;;  %vm18101_vm8 = vmmov %vm18093_vm1 }
 0x4bc   : > { %v9271_v13 = vrot.slane %v9269_v61, 2  ;;  %v9283_v0 = vrot.slane %v9281_v45, 3  ;;  %v9301_v45 = vrot.slane %v9299_v25, 3  ;;  %v16668_v25 = vld [vmem:[#allocation3 + $0x70] sm:$0xff]   ;;  %vm18102_vm14 = vmmov %vm18093_vm1 }
 0x4bd   : > { %v9266_v56 = vor.u32 %v9265_v26, %v9262_v20  ;;  %v9305_v20 = vshrl.u32 %v16621_v47, 16  ;;  %v9308_v26 = vshll.u32 %v16621_v47, 16  ;;  %vm18104_vm10 = vmmov %vm18093_vm1 }
 0x4be   : > { %12468 = vmatpush3.bf16.msra.mxu1 %v13584_v28  ;;  %v9258_v28 = vor.u32 %v9257_v2, %v9254_v41  ;;  %v9275_v48 = vor.u32 %v9274_v59, %v9271_v13  ;;  %v9292_v2 = vrot.slane %v9290_v35, 3  ;;  %v16645_v59 = vld [vmem:[#allocation3 + $0x58] sm:$0xff]   ;;  %v9314_v35 = vshrl.u32 %v16629_v40, 16  ;;  %vm18106_vm12 = vmmov %vm18093_vm1 }
 0x4bf   : > { %12469 = vmatprep.subr.bf16.mxu1 %v13585_v16  ;;  %v9310_v14 = vrot.slane %v9308_v26, 3  ;;  %v9302_v32 = vor.u32 %v9301_v45, %v9298_v51  ;;  %v9319_v26 = vrot.slane %v9317_v1, 3  ;;  %v9335_v51 = vshll.u32 %v16645_v59, 16  ;;  %vm18107_vm3 = vmmov %vm18093_vm1 }
 0x4c0   : > { %v16638_v61 = vsel %vm18083_vm6, %v9258_v28, %v9266_v56  ;;  %v16648_v13 = vsel %vm18085_vm2, %v9266_v56, %v9275_v48  ;;  %v9293_v41 = vor.u32 %v9292_v2, %v9289_v3  ;;  %v9307_v28 = vrot.slane %v9305_v20, 2  ;;  %vm18108_vm0 = vmmov %vm18093_vm1 }
 0x4c1   : > { %12434 = vmatmul.mubr.bf16.gmra.mrb[8].mxu1 %v16253_v62  ;;  %18084 = vst [vmem:[#allocation81_spill] sm:$0xff] %v16638_v61  ;;  %v13587_v62 = vld [vmem:[%s17640_s4 + $0xb0] sm:$0xff]   ;;  %18086 = vst [vmem:[#allocation82_spill] sm:$0xff] %v16648_v13  ;;  %v9323_v56 = vshrl.u32 %v16633_v54, 16  ;;  %v9316_v3 = vrot.slane %v9314_v35, 2  ;;  %v9326_v2 = vshll.u32 %v16633_v54, 16 }
 0x4c2   : > { %12437 = vmatprep.mubr.bf16.mxu1 %v16261_v60  ;;  %12470 = vmatpush3.bf16.msra.mxu1 %v13585_v16  ;;  %v9284_v60 = vor.u32 %v9283_v0, %v9280_v18  ;;  %v16651_v16 = vld [vmem:[#allocation3 + $0x60] sm:$0xff]   ;;  %v16659_v0 = vld [vmem:[#allocation3 + $0x68] sm:$0xff]   ;;  %v9311_v20 = vor.u32 %v9310_v14, %v9307_v28  ;;  %v16672_v13 = vsel %vm18091_vm7, %v9293_v41, %v9302_v32  ;;  %v16677_v35 = vld [vmem:[#allocation3 + $0x78] sm:$0xff]   ;;  %vm18110_vm6 = vcmask 1044480  }
 0x4c3   : > { %12471 = vmatprep.subr.bf16.mxu1 %v13586_v58  ;;  %18092 = vst [vmem:[#allocation85_spill] sm:$0xff] %v16672_v13  ;;  %v9341_v45 = vshrl.u32 %v16651_v16, 16  ;;  %v9320_v14 = vor.u32 %v9319_v26, %v9316_v3  ;;  %v9344_v28 = vshll.u32 %v16651_v16, 16  ;;  %v9350_v21 = vshrl.u32 %v16659_v0, 16  ;;  %v16697_v26 = vld [vmem:[#allocation3 + $0x88] sm:$0xff]   ;;  %vm18109_vm13 = vmmov %vm18108_vm0 }
 0x4c4   : > { %v16655_v61 = vsel %vm18087_vm11, %v9275_v48, %v9284_v60  ;;  %v16662_v18 = vsel %vm18089_vm4, %v9284_v60, %v9293_v41  ;;  %v13588_v48 = vld [vmem:[%s17640_s4 + $0xb8] sm:$0xff]   ;;  %v9328_v60 = vrot.slane %v9326_v2, 3  ;;  %v16684_v41 = vld [vmem:[#allocation3 + $0x80] sm:$0xff]   ;;  %v9337_v2 = vrot.slane %v9335_v51, 3  ;;  %vm18111_vm2 = vmmov %vm18108_vm0 }
 0x4c5   : > { %18088 = vst [vmem:[#allocation83_spill] sm:$0xff] %v16655_v61  ;;  %18090 = vst [vmem:[#allocation84_spill] sm:$0xff] %v16662_v18  ;;  %v9325_v61 = vrot.slane %v9323_v56, 2  ;;  %v16680_v18 = vsel %vm18093_vm1, %v9302_v32, %v9311_v20  ;;  %v9343_v13 = vrot.slane %v9341_v45, 2  ;;  %v16693_v32 = vsel %vm18095_vm9, %v9311_v20, %v9320_v14  ;;  %v16703_v45 = vld [vmem:[#allocation3 + $0x90] sm:$0xff]  }
 0x4c6   : > { %12472 = vmatpush3.bf16.msra.mxu1 %v13586_v58  ;;  %v9332_v58 = vshrl.u32 %v16645_v59, 16  ;;  %18094 = vst [vmem:[#allocation86_spill] sm:$0xff] %v16680_v18  ;;  %18096 = vst [vmem:[#allocation87_spill] sm:$0xff] %v16693_v32  ;;  %v9346_v3 = vrot.slane %v9344_v28, 3  ;;  %v9362_v51 = vshll.u32 %v16668_v25, 16  ;;  %v9368_v28 = vshrl.u32 %v16677_v35, 16 }
 0x4c7   : > { %12473 = vmatprep.subr.bf16.mxu1 %v13587_v62  ;;  %v9329_v56 = vor.u32 %v9328_v60, %v9325_v61  ;;  %v9352_v60 = vrot.slane %v9350_v21, 2  ;;  %v9371_v49 = vshll.u32 %v16677_v35, 16  ;;  %v16712_v21 = vld [vmem:[#allocation3 + $0x98] sm:$0xff]   ;;  %vm18112_vm11 = vmmov %vm18110_vm6 }
 0x4c8   : > { %v9334_v1 = vrot.slane %v9332_v58, 2  ;;  %v9347_v18 = vor.u32 %v9346_v3, %v9343_v13  ;;  %v9364_v38 = vrot.slane %v9362_v51, 3  ;;  %v9380_v3 = vshll.u32 %v16684_v41, 16  ;;  %vm18113_vm4 = vmmov %vm18110_vm6 }
 0x4c9   : > { %12438 = vmatmul.mubr.bf16.gmra.mrb[12].mxu1 %v16274_v17  ;;  %v16690_v17 = vld [vmem:[%s17640_s4 + $0xc0] sm:$0xff]   ;;  %v16700_v61 = vsel %vm18097_vm15, %v9320_v14, %v9329_v56  ;;  %v9377_v14 = vshrl.u32 %v16684_v41, 16  ;;  %vm18114_vm7 = vmmov %vm18113_vm4 }
 0x4ca   : > { %12441 = vmatprep.mubr.bf16.mxu1 %v16284_v33  ;;  %12474 = vmatpush3.bf16.msra.mxu1 %v13587_v62  ;;  %v9353_v33 = vshll.u32 %v16659_v0, 16  ;;  %v9359_v62 = vshrl.u32 %v16668_v25, 16  ;;  %18098 = vst [vmem:[#allocation88_spill] sm:$0xff] %v16700_v61  ;;  %v9338_v58 = vor.u32 %v9337_v2, %v9334_v1  ;;  %v9370_v2 = vrot.slane %v9368_v28, 2  ;;  %vm18116_vm1 = vmmov %vm18113_vm4 }
 0x4cb   : > { %12475 = vmatprep.subr.bf16.mxu1 %v13588_v48  ;;  %v9389_v61 = vshll.u32 %v16697_v26, 16  ;;  %vm18118_vm9 = vmmov %vm18116_vm1 }
 0x4cc   : > { %v9355_v42 = vrot.slane %v9353_v33, 3  ;;  %v9361_v20 = vrot.slane %v9359_v62, 2  ;;  %v16707_v32 = vsel %vm18099_vm5, %v9329_v56, %v9338_v58  ;;  %v16715_v1 = vsel %vm18101_vm8, %v9338_v58, %v9347_v18  ;;  %vm18120_vm15 = vmmov %vm18116_vm1 }
 0x4cd   : > { %18100 = vst [vmem:[#allocation89_spill] sm:$0xff] %v16707_v32  ;;  %v9373_v33 = vrot.slane %v9371_v49, 3  ;;  %v9379_v56 = vrot.slane %v9377_v14, 2  ;;  %v9386_v62 = vshrl.u32 %v16697_v26, 16  ;;  %v9382_v32 = vrot.slane %v9380_v3, 3  ;;  %vm18122_vm5 = vmmov %vm18116_vm1 }
 0x4ce   : > { %12476 = vmatpush3.bf16.msra.mxu1 %v13588_v48  ;;  %v9356_v13 = vor.u32 %v9355_v42, %v9352_v60  ;;  %v9365_v48 = vor.u32 %v9364_v38, %v9361_v20  ;;  %v9395_v58 = vshrl.u32 %v16703_v45, 16  ;;  %v9398_v60 = vshll.u32 %v16703_v45, 16  ;;  %vm18124_vm8 = vmmov %vm18116_vm1 }
 0x4cf   : > { %12513 = vmatprep.subr.bf16.mxu1 %v16690_v17  ;;  %v9374_v38 = vor.u32 %v9373_v33, %v9370_v2  ;;  %v9388_v49 = vrot.slane %v9386_v62, 2  ;;  %v9383_v20 = vor.u32 %v9382_v32, %v9379_v56  ;;  %v9391_v28 = vrot.slane %v9389_v61, 3  ;;  %v9700_v2 = vld [vmem:[#allocation3 + $0x10] sm:$0x8] }
 0x4d0   : > { %v16721_v51 = vsel %vm18102_vm14, %v9347_v18, %v9356_v13  ;;  %v16727_v42 = vsel %vm18104_vm10, %v9356_v13, %v9365_v48  ;;  %v9404_v18 = vshrl.u32 %v16712_v21, 16  ;;  %v9400_v3 = vrot.slane %v9398_v60, 3  ;;  %vm18125_vm14 = vmmov %vm18116_vm1 }
 0x4d1   : > { %12442 = vmatmul.mubr.bf16.gmra.mrb[16].mxu1 %v16295_v44  ;;  %18103 = vst [vmem:[#allocation90_spill] sm:$0xff] %v16721_v51  ;;  %18105 = vst [vmem:[#allocation91_spill] sm:$0xff] %v16727_v42  ;;  %v9397_v44 = vrot.slane %v9395_v58, 2  ;;  %v16732_v14 = vsel %vm18106_vm12, %v9365_v48, %v9374_v38  ;;  %v9407_v51 = vshll.u32 %v16712_v21, 16  ;;  %v9392_v13 = vor.u32 %v9391_v28, %v9388_v49 }
 0x4d2   : > { %12445 = vmatprep.mubr.bf16.mxu1 %v16299_v29  ;;  %v16736_v29 = vsel %vm18107_vm3, %v9374_v38, %v9383_v20  ;;  %v9406_v42 = vrot.slane %v9404_v18, 2  ;;  %v11267_v32 = vcombine.low %v9700_v2, %v16592_v19  ;;  %v9722_v56 = vrot.slane %v16600_v6, 3  ;;  %vm18127_vm10 = vmmov %vm18116_vm1 }
 0x4d3   : > { %v9401_v33 = vor.u32 %v9400_v3, %v9397_v44  ;;  %v9409_v62 = vrot.slane %v9407_v51, 3  ;;  %v16740_v61 = vsel %vm18108_vm0, %v9383_v20, %v9392_v13  ;;  %v9724_v48 = vrot.slane %v16603_v22, 3  ;;  %vm18128_vm12 = vmmov %vm18116_vm1 }
 0x4d4   : > { %v9721_v38 = vrot.slane %v11267_v32, 3  ;;  %v9726_v49 = vrot.slane %v16606_v9, 3  ;;  %v9728_v19 = vrot.slane %v16611_v11, 3  ;;  %v9730_v20 = vrot.slane %v16617_v53, 3  ;;  %vm18130_vm3 = vmmov %vm18116_vm1 }
 0x4d5   : > { %v16745_v58 = vsel %vm18109_vm13, %v9392_v13, %v9401_v33  ;;  %v16747_v60 = vor.u32 %v9409_v62, %v9406_v42  ;;  %v16752_v51 = vsel %vm18110_vm6, %v9722_v56, %v9724_v48  ;;  %v16775_v13 = vld [vmem:[#allocation3 + $0xa0] ss:$0 sps:$4 sm:$0x77]   ;;  %v9738_v62 = vrot.slane %v16645_v59, 3  ;;  %vm18132_vm0 = vmmov %vm18116_vm1 }
 0x4d6   : > { %v16762_v42 = vsel %vm18112_vm11, %v9721_v38, %v9722_v56  ;;  %v16765_v44 = vsel %vm18113_vm4, %v9724_v48, %v9726_v49  ;;  %v16769_v18 = vsel %vm18114_vm7, %v9726_v49, %v9728_v19  ;;  %v16772_v3 = vsel %vm18116_vm1, %v9728_v19, %v9730_v20  ;;  %vm18134_vm13 = vmmov %vm18132_vm0 }
 0x4d7   : > { %v16759_v28 = vsel %vm18111_vm2, %v9401_v33, %v16747_v60  ;;  %18115 = vst [vmem:[#allocation92_spill] sm:$0xff] %v16769_v18  ;;  %18117 = vst [vmem:[#allocation93_spill] sm:$0xff] %v16772_v3  ;;  %v9736_v33 = vrot.slane %v16633_v54, 3  ;;  %v9740_v32 = vrot.slane %v16651_v16, 3  ;;  %v9742_v48 = vrot.slane %v16659_v0, 3 }
 0x4d8   : > { %v9744_v38 = vrot.slane %v16668_v25, 3  ;;  %v9746_v49 = vrot.slane %v16677_v35, 3  ;;  %v9748_v3 = vrot.slane %v16684_v41, 3  ;;  %vm18136_vm6 = vmmov %vm18132_vm0  ;;  %vm18141_vm4 = vcmask 1046528  }
 0x4d9   : > { %12446 = vmatmul.mubr.bf16.gmra.mrb[20].mxu1 %v16302_v10  ;;  %v9732_v10 = vrot.slane %v16621_v47, 3  ;;  %vm18137_vm2 = vmmov %vm18132_vm0 }
 0x4da   : > { %12449 = vmatprep.mubr.bf16.mxu1 %v16306_v8  ;;  %v9734_v8 = vrot.slane %v16629_v40, 3  ;;  %v16806_v18 = vsel %vm18130_vm3, %v9744_v38, %v9746_v49  ;;  %vm18139_vm11 = vmmov %vm18132_vm0 }
 0x4db   : > { %v16778_v2 = vsel %vm18118_vm9, %v9730_v20, %v9732_v10  ;;  %v16793_v20 = vsel %vm18124_vm8, %v9736_v33, %v9738_v62  ;;  %18131 = vst [vmem:[#allocation99_spill] sm:$0xff] %v16806_v18  ;;  %vm18142_vm7 = vmmov %vm18141_vm4 }
 0x4dc   : > { %18119 = vst [vmem:[#allocation94_spill] sm:$0xff] %v16778_v2  ;;  %v16784_v56 = vsel %vm18120_vm15, %v9732_v10, %v9734_v8  ;;  %v16790_v19 = vsel %vm18122_vm5, %v9734_v8, %v9736_v33  ;;  %v16796_v2 = vsel %vm18125_vm14, %v9738_v62, %v9740_v32  ;;  %v16800_v10 = vsel %vm18127_vm10, %v9740_v32, %v9742_v48  ;;  %vm18143_vm1 = vmmov %vm18141_vm4 }
 0x4dd   : > { %18121 = vst [vmem:[#allocation95_spill] sm:$0xff] %v16784_v56  ;;  %18123 = vst [vmem:[#allocation96_spill] sm:$0xff] %v16790_v19  ;;  %v16803_v56 = vsel %vm18128_vm12, %v9742_v48, %v9744_v38  ;;  %v9750_v8 = vrot.slane %v16697_v26, 3  ;;  %v16810_v19 = vsel %vm18132_vm0, %v9746_v49, %v9748_v3  ;;  %v9752_v33 = vrot.slane %v16703_v45, 3 }
 0x4de   : > { %18126 = vst [vmem:[#allocation97_spill] sm:$0xff] %v16796_v2  ;;  %18129 = vst [vmem:[#allocation98_spill] sm:$0xff] %v16803_v56  ;;  %v9754_v62 = vrot.slane %v16712_v21, 3  ;;  %v9756_v2 = vrot.slane %v16775_v13, 3 }
 0x4df   : > { %18133 = vst [vmem:[#allocation100_spill] sm:$0xff] %v16810_v19  ;;  %v16817_v32 = vsel %vm18134_vm13, %v9748_v3, %v9750_v8  ;;  %v16821_v48 = vsel %vm18136_vm6, %v9750_v8, %v9752_v33  ;;  %v7160_v19 = vld [vmem:[#allocation3] sm:$0xe]  ;;  %v13699_v3 = vld [vmem:[#allocation3 + $0x8] sm:$0xff]   ;;  %v13700_v8 = vld [vmem:[#allocation3 + $0x10] sm:$0xff]  }
 0x4e0   : > { %18135 = vst [vmem:[#allocation101_spill] sm:$0xff] %v16817_v32  ;;  %v16824_v38 = vsel %vm18137_vm2, %v9752_v33, %v9754_v62  ;;  %v16827_v49 = vsel %vm18139_vm11, %v9754_v62, %v9756_v2  ;;  %v7182_v32 = vrot.slane %v13699_v3, 1  ;;  %v7184_v33 = vrot.slane %v13700_v8, 1  ;;  %vm18144_vm9 = vmmov %vm18143_vm1  ;;  %v13704_v8 = vld [vmem:[#allocation3 + $0x30] sm:$0xff]  }
 0x4e1   : > { %12450 = vmatmul.mubr.bf16.gmra.mrb[24].mxu1 %v16308_v46  ;;  %18138 = vst [vmem:[#allocation102_spill] sm:$0xff] %v16824_v38  ;;  %18140 = vst [vmem:[#allocation103_spill] sm:$0xff] %v16827_v49  ;;  %v13698_v46 = vld [vmem:[#allocation3 + $0x4] sm:$0xf]  ;;  %v13701_v38 = vld [vmem:[#allocation3 + $0x18] sm:$0xff]  }
 0x4e2   : > { %12453 = vmatprep.mubr.bf16.mxu1 %v16313_v57  ;;  %v11081_v18 = vcombine.low %v7160_v19, %v13698_v46  ;;  %v7186_v2 = vrot.slane %v13701_v38, 1  ;;  %v13703_v38 = vld [vmem:[#allocation3 + $0x28] sm:$0xff]   ;;  %vm18145_vm15 = vmmov %vm18143_vm1 }
 0x4e3   : > { %v7190_v46 = vrot.slane %v13703_v38, 1  ;;  %vm18146_vm5 = vmmov %vm18143_vm1 }
 0x4e4   : > { %v7181_v56 = vrot.slane %v11081_v18, 1  ;;  %v7187_v19 = vsel %vm18143_vm1, %v7184_v33, %v7186_v2  ;;  %v13592_v18 = vld [vmem:[%s17640_s4 + $0xd0] sm:$0xff]   ;;  %vm18147_vm8 = vmmov %vm18143_vm1 }
 0x4e5   : > { %vm18148_vm14 = vmmov %vm18143_vm1 }
 0x4e6   : > { %v7183_v57 = vsel %vm18141_vm4, %v7181_v56, %v7182_v32  ;;  %v13702_v56 = vld [vmem:[#allocation3 + $0x20] sm:$0xff]   ;;  %vm18149_vm10 = vmmov %vm18143_vm1 }
 0x4e7   : > { %v7188_v62 = vrot.slane %v13702_v56, 1  ;;  %v13596_v56 = vld [vmem:[%s17640_s4 + $0xf0] sm:$0xff]   ;;  %vm18150_vm12 = vmmov %vm18143_vm1 }
 0x4e8   : > { %vm18151_vm3 = vmmov %vm18143_vm1 }
 0x4e9   : > { %12454 = vmatmul.mubr.bf16.gmra.mrb[28].mxu1 %v16315_v31  ;;  %v13591_v31 = vld [vmem:[%s17640_s4 + $0xc8] sm:$0xff]   ;;  %v7189_v3 = vsel %vm18144_vm9, %v7186_v2, %v7188_v62  ;;  %vm18152_vm0 = vmmov %vm18143_vm1 }
 0x4ea   : > { %12457 = vmatprep.mubr.bf16.mxu1 %v16318_v43  ;;  %v7185_v43 = vsel %vm18142_vm7, %v7182_v32, %v7184_v33  ;;  %v13593_v32 = vld [vmem:[%s17640_s4 + $0xd8] sm:$0xff]   ;;  %v7192_v33 = vrot.slane %v13704_v8, 1  ;;  %v13595_v2 = vld [vmem:[%s17640_s4 + $0xe8] sm:$0xff]   ;;  %v13600_v8 = vld [vmem:[%s17640_s4 + $0x100] sm:$0xff]  }
 0x4eb   : > { %vm18153_vm13 = vmmov %vm18152_vm0 }
 0x4ec   : > { %vm18154_vm6 = vmmov %vm18152_vm0 }
 0x4ed   : > { %vm18155_vm2 = vmmov %vm18152_vm0 }
 0x4ee   : > { %vm18156_vm11 = vmmov %vm18152_vm0 }
 0x4ef   : > { %vm18157_vm4 = vmmov %vm18152_vm0 }
 0x4f0   : > { %vm18158_vm7 = vmmov %vm18152_vm0 }
 0x4f1   : > { %12458 = vmatmul.mubr.bf16.gmra.mrb[32].mxu1 %v16332_v52  ;;  %vm18159_vm1 = vmmov %vm18152_vm0 }
 0x4f2   : > { %12477 = vmatprep.mubr.bf16.mxu1 %v7183_v57  ;;  %v13594_v57 = vld [vmem:[%s17640_s4 + $0xe0] sm:$0xff]   ;;  %vm18160_vm9 = vmmov %vm18152_vm0 }
 0x4f9   : > { %12478 = vmatmul.mubr.bf16.vlgmr.msra.gmra.mrb[0].mxu1 %v7185_v43 }
 0x4fa   : > { %12514 = vmatpush3.bf16.msra.mxu1 %v16690_v17  ;;  %12481 = vmatprep.mubr.bf16.mxu1 %v7187_v19  ;;  %v7191_v17 = vsel %vm18145_vm15, %v7188_v62, %v7190_v46  ;;  %v7193_v19 = vsel %vm18146_vm5, %v7190_v46, %v7192_v33  ;;  %v13706_v62 = vld [vmem:[#allocation3 + $0x40] sm:$0xff]   ;;  %v13597_v46 = vld [vmem:[%s17640_s4 + $0xf8] sm:$0xff]   ;;  %vm18161_vm15 = vmmov %vm18152_vm0 }
 0x4fb   : > { %12515 = vmatprep.subr.bf16.mxu1 %v13591_v31  ;;  %v7196_v38 = vrot.slane %v13706_v62, 1  ;;  %v13710_v62 = vld [vmem:[#allocation3 + $0x60] sm:$0xff]   ;;  %vm18162_vm5 = vmmov %vm18152_vm0 }
 0x4fe   : > { %12516 = vmatpush3.bf16.msra.mxu1 %v13591_v31  ;;  %v13705_v31 = vld [vmem:[#allocation3 + $0x38] sm:$0xff]  }
 0x4ff   : > { %12517 = vmatprep.subr.bf16.mxu1 %v13592_v18  ;;  %v7194_v43 = vrot.slane %v13705_v31, 1 }
 0x501   : > { %12482 = vmatmul.mubr.bf16.gmra.mrb[4].mxu1 %v7189_v3 }
 0x502   : > { %12485 = vmatprep.mubr.bf16.mxu1 %v7191_v17  ;;  %12518 = vmatpush3.bf16.msra.mxu1 %v13592_v18  ;;  %v7195_v18 = vsel %vm18147_vm8, %v7192_v33, %v7194_v43  ;;  %v7197_v17 = vsel %vm18148_vm14, %v7194_v43, %v7196_v38  ;;  %v13708_v33 = vld [vmem:[#allocation3 + $0x58] sm:$0xff]   ;;  %vm18163_vm8 = vmmov %vm18152_vm0 }
 0x503   : > { %12519 = vmatprep.subr.bf16.mxu1 %v13593_v32  ;;  %v7202_v31 = vrot.slane %v13708_v33, 1  ;;  %v13712_v33 = vld [vmem:[#allocation3 + $0x78] sm:$0xff]   ;;  %vm18164_vm14 = vmmov %vm18152_vm0 }
 0x506   : > { %12520 = vmatpush3.bf16.msra.mxu1 %v13593_v32  ;;  %v13707_v32 = vld [vmem:[#allocation3 + $0x48] sm:$0xff]  }
 0x507   : > { %12521 = vmatprep.subr.bf16.mxu1 %v13594_v57  ;;  %v7198_v3 = vrot.slane %v13707_v32, 1 }
 0x509   : > { %12486 = vmatmul.mubr.bf16.gmra.mrb[8].mxu1 %v7193_v19 }
 0x50a   : > { %12489 = vmatprep.mubr.bf16.mxu1 %v7195_v18  ;;  %12522 = vmatpush3.bf16.msra.mxu1 %v13594_v57  ;;  %v7199_v57 = vsel %vm18149_vm10, %v7196_v38, %v7198_v3  ;;  %v7204_v38 = vrot.slane %v13710_v62, 1  ;;  %v7214_v62 = vrot.slane %v16332_v52, 1  ;;  %v7647_v52 = vrot.slane %v16359_v23, 1  ;;  %vm18165_vm10 = vmmov %vm18152_vm0 }
 0x50b   : > { %12523 = vmatprep.subr.bf16.mxu1 %v13595_v2  ;;  %v7653_v23 = vrot.slane %v16383_v30, 1  ;;  %v13614_v30 = vld [vmem:[%s17640_s4 + $0x120] sm:$0xff]  }
 0x50e   : > { %12524 = vmatpush3.bf16.msra.mxu1 %v13595_v2  ;;  %v13709_v2 = vld [vmem:[#allocation3 + $0x50] sm:$0xff]  }
 0x50f   : > { %12525 = vmatprep.subr.bf16.mxu1 %v13596_v56  ;;  %v7200_v19 = vrot.slane %v13709_v2, 1  ;;  %v7210_v2 = vrot.slane %v13712_v33, 1  ;;  %v7649_v33 = vrot.slane %v16368_v12, 1  ;;  %v7651_v12 = vrot.slane %v16376_v55, 1 }
 0x510   : > { %v7655_v55 = vrot.slane %v16391_v50, 1  ;;  %v13620_v50 = vld [vmem:[%s17640_s4 + $0x130] sm:$0xff]  }
 0x511   : > { %12490 = vmatmul.mubr.bf16.gmra.mrb[12].mxu1 %v7197_v17  ;;  %v7201_v18 = vsel %vm18150_vm12, %v7198_v3, %v7200_v19  ;;  %v7203_v43 = vsel %vm18151_vm3, %v7200_v19, %v7202_v31  ;;  %v7205_v17 = vsel %vm18152_vm0, %v7202_v31, %v7204_v38  ;;  %vm18166_vm12 = vmmov %vm18152_vm0 }
 0x512   : > { %12493 = vmatprep.mubr.bf16.mxu1 %v7199_v57  ;;  %12526 = vmatpush3.bf16.msra.mxu1 %v13596_v56  ;;  %v13711_v56 = vld [vmem:[#allocation3 + $0x68] sm:$0xff]   ;;  %vm18167_vm3 = vmmov %vm18152_vm0 }
 0x513   : > { %12527 = vmatprep.subr.bf16.mxu1 %v13597_v46  ;;  %v7206_v32 = vrot.slane %v13711_v56, 1  ;;  %v7216_v56 = vrot.slane %v16347_v27, 1 }
 0x515   : > { %v7207_v57 = vsel %vm18153_vm13, %v7204_v38, %v7206_v32  ;;  %vm18168_vm13 = vmmov %vm18152_vm0 }
 0x516   : > { %12528 = vmatpush3.bf16.msra.mxu1 %v13597_v46  ;;  %v13713_v46 = vld [vmem:[#allocation3 + $0x70] sm:$0xff]  }
 0x517   : > { %12565 = vmatprep.subr.bf16.mxu1 %v13600_v8  ;;  %v7208_v49 = vrot.slane %v13713_v46, 1  ;;  %v13611_v46 = vld [vmem:[%s17640_s4 + $0x118] sm:$0xff]  }
 0x519   : > { %12494 = vmatmul.mubr.bf16.gmra.mrb[16].mxu1 %v7201_v18  ;;  %v7209_v3 = vsel %vm18154_vm6, %v7206_v32, %v7208_v49  ;;  %v7211_v19 = vsel %vm18155_vm2, %v7208_v49, %v7210_v2  ;;  %v13714_v18 = vld [vmem:[#allocation3 + $0x80] sm:$0xff]   ;;  %v7645_v32 = vrot.slane %v16357_v4, 1  ;;  %v13608_v4 = vld [vmem:[%s17640_s4 + $0x110] sm:$0xff]   ;;  %vm18169_vm6 = vmmov %vm18152_vm0 }
 0x51a   : > { %12497 = vmatprep.mubr.bf16.mxu1 %v7203_v43  ;;  %v7212_v43 = vrot.slane %v13714_v18, 1  ;;  %v13617_v18 = vld [vmem:[%s17640_s4 + $0x128] sm:$0xff]   ;;  %vm18170_vm2 = vmmov %vm18152_vm0 }
 0x51b   : > { %v7648_v27 = vsel %vm18160_vm9, %v7645_v32, %v7647_v52  ;;  %vm18178_vm9 = vmmov %vm18152_vm0 }
 0x51c   : > { %v7213_v31 = vsel %vm18156_vm11, %v7210_v2, %v7212_v43  ;;  %v7215_v38 = vsel %vm18157_vm4, %v7212_v43, %v7214_v62  ;;  %v13604_v2 = vld [vmem:[%s17640_s4 + $0x108] sm:$0xff]   ;;  %v7656_v43 = vsel %vm18164_vm14, %v7653_v23, %v7655_v55  ;;  %vm18172_vm11 = vmmov %vm18152_vm0 }
 0x51d   : > { %vm18173_vm4 = vmmov %vm18152_vm0 }
 0x521   : > { %12498 = vmatmul.mubr.bf16.gmra.mrb[20].mxu1 %v7205_v17  ;;  %v7644_v17 = vrot.slane %v16354_v34, 1  ;;  %v7650_v34 = vsel %vm18161_vm15, %v7647_v52, %v7649_v33  ;;  %v7667_v52 = vrot.slane %v16427_v5, 1  ;;  %vm18198_vm15 = vsmask.f32 6400 }
 0x522   : > { %12501 = vmatprep.mubr.bf16.mxu1 %v7207_v57  ;;  %v7217_v57 = vsel %vm18158_vm7, %v7214_v62, %v7216_v56  ;;  %vm18176_vm7 = vmmov %vm18152_vm0 }
 0x523   : > { %v7646_v49 = vsel %vm18159_vm1, %v7644_v17, %v7645_v32  ;;  %v7663_v32 = vrot.slane %v16413_v24, 1  ;;  %v7671_v24 = vrot.slane %v16444_v63, 1  ;;  %vm18177_vm1 = vmmov %vm18152_vm0 }
 0x529   : > { %12502 = vmatmul.mubr.bf16.gmra.mrb[24].mxu1 %v7209_v3  ;;  %v7652_v3 = vsel %vm18162_vm5, %v7649_v33, %v7651_v12  ;;  %v7669_v33 = vrot.slane %v16434_v37, 1  ;;  %vm18218_vm5 = vcmask 1045504  }
 0x52a   : > { %12505 = vmatprep.mubr.bf16.mxu1 %v7211_v19  ;;  %v7657_v19 = vrot.slane %v16396_v39, 1  ;;  %v7659_v39 = vrot.slane %v16400_v7, 1  ;;  %v13625_v7 = vld [vmem:[%s17640_s4 + $0x140] sm:$0xff]   ;;  %vm18220_vm14 = vmmov %vm18218_vm5 }
 0x52c   : > { %v7658_v62 = vsel %vm18165_vm10, %v7655_v55, %v7657_v19  ;;  %v7660_v56 = vsel %vm18166_vm12, %v7657_v19, %v7659_v39  ;;  %v18179_v19 = vld [vmem:[#allocation13_spill] sm:$0xff]  ;;  %vm18221_vm10 = vmmov %vm18218_vm5 }
 0x52d   : > { %vm18222_vm12 = vmmov %vm18218_vm5 }
 0x531   : > { %12506 = vmatmul.mubr.bf16.gmra.mrb[28].mxu1 %v7213_v31  ;;  %v7661_v31 = vrot.slane %v16407_v15, 1  ;;  %v7665_v15 = vrot.slane %v16417_v36, 1  ;;  %v18171_v36 = vld [vmem:[#allocation10_spill] sm:$0xff] }
 0x532   : > { %12509 = vmatprep.mubr.bf16.mxu1 %v7215_v38  ;;  %v13623_v38 = vld [vmem:[%s17640_s4 + $0x138] sm:$0xff]  }
 0x533   : > { %v7662_v17 = vsel %vm18167_vm3, %v7659_v39, %v7661_v31  ;;  %v13628_v39 = vld [vmem:[%s17640_s4 + $0x158] sm:$0xff]   ;;  %vm18223_vm3 = vmmov %vm18218_vm5 }
 0x539   : > { %12510 = vmatmul.mubr.bf16.gmra.mrb[32].mxu1 %v7217_v57  ;;  %v7664_v57 = vsel %vm18152_vm0, %v7661_v31, %v7663_v32  ;;  %v18182_v31 = vld [vmem:[#allocation5_spill] sm:$0xff]  ;;  %vm18224_vm0 = vmmov %vm18223_vm3 }
 0x53a   : > { %12529 = vmatprep.mubr.bf16.mxu1 %v7646_v49  ;;  %v7666_v49 = vsel %vm18168_vm13, %v7663_v32, %v7665_v15  ;;  %v18185_v32 = vld [vmem:[#allocation9_spill] sm:$0xff]  ;;  %vm18225_vm13 = vmmov %vm18224_vm0 }
 0x541   : > { %12530 = vmatmul.mubr.bf16.vlgmr.msra.gmra.mrb[0].mxu1 %v7648_v27  ;;  %v7670_v27 = vsel %vm18170_vm2, %v7667_v52, %v7669_v33  ;;  %vm18227_vm2 = vmmov %vm18224_vm0 }
 0x542   : > { %12566 = vmatpush3.bf16.msra.mxu1 %v13600_v8  ;;  %12533 = vmatprep.mubr.bf16.mxu1 %v7650_v34  ;;  %v7654_v8 = vsel %vm18163_vm8, %v7651_v12, %v7653_v23  ;;  %v7673_v34 = vrot.slane %v18171_v36, 1  ;;  %v18174_v12 = vld [vmem:[#allocation16_spill] sm:$0xff]  ;;  %v18191_v36 = vld [vmem:[#allocation57_spill] sm:$0xff]  ;;  %vm18219_vm8 = vmmov %vm18218_vm5 }
 0x543   : > { %12567 = vmatprep.subr.bf16.mxu1 %v13604_v2  ;;  %v7675_v5 = vrot.slane %v18174_v12, 1 }
 0x544   : > { %v7674_v23 = vsel %vm18173_vm4, %v7671_v24, %v7673_v34  ;;  %vm18229_vm4 = vmmov %vm18224_vm0 }
 0x546   : > { %12568 = vmatpush3.bf16.msra.mxu1 %v13604_v2  ;;  %v7668_v2 = vsel %vm18169_vm6, %v7665_v15, %v7667_v52  ;;  %v13631_v15 = vld [vmem:[%s17640_s4 + $0x170] sm:$0xff]   ;;  %v18187_v52 = vld [vmem:[#allocation14_spill] sm:$0xff]  ;;  %vm18226_vm6 = vmmov %vm18224_vm0 }
 0x547   : > { %12569 = vmatprep.subr.bf16.mxu1 %v13608_v4 }
 0x549   : > { %12534 = vmatmul.mubr.bf16.gmra.mrb[4].mxu1 %v7652_v3  ;;  %v7676_v3 = vsel %vm18176_vm7, %v7673_v34, %v7675_v5  ;;  %v18192_v34 = vld [vmem:[#allocation53_spill] sm:$0xff]  ;;  %vm18230_vm7 = vmmov %vm18224_vm0 }
 0x54a   : > { %12537 = vmatprep.mubr.bf16.mxu1 %v7654_v8  ;;  %12570 = vmatpush3.bf16.msra.mxu1 %v13608_v4  ;;  %v7672_v4 = vsel %vm18172_vm11, %v7669_v33, %v7671_v24  ;;  %v13635_v33 = vld [vmem:[%s17640_s4 + $0x180] sm:$0xff]   ;;  %v18190_v24 = vld [vmem:[#allocation56_spill] sm:$0xff]  ;;  %vm18228_vm11 = vmmov %vm18224_vm0 }
 0x54b   : > { %12571 = vmatprep.subr.bf16.mxu1 %v13611_v46 }
 0x54e   : > { %12572 = vmatpush3.bf16.msra.mxu1 %v13611_v46  ;;  %v18175_v46 = vld [vmem:[#allocation15_spill] sm:$0xff] }
 0x54f   : > { %12573 = vmatprep.subr.bf16.mxu1 %v13614_v30  ;;  %v7677_v37 = vrot.slane %v18175_v46, 1 }
 0x551   : > { %12538 = vmatmul.mubr.bf16.gmra.mrb[8].mxu1 %v7656_v43  ;;  %v7678_v8 = vsel %vm18177_vm1, %v7675_v5, %v7677_v37  ;;  %v18180_v43 = vld [vmem:[#allocation4_spill] sm:$0xff]  ;;  %vm18231_vm1 = vmmov %vm18224_vm0 }
 0x552   : > { %12541 = vmatprep.mubr.bf16.mxu1 %v7658_v62  ;;  %12574 = vmatpush3.bf16.msra.mxu1 %v13614_v30  ;;  %v13624_v30 = vld [vmem:[#allocation3 + $0x98] ss:$0 sps:$4 sm:$0x11]   ;;  %v18181_v62 = vld [vmem:[#allocation11_spill] sm:$0xff] }
 0x553   : > { %12575 = vmatprep.subr.bf16.mxu1 %v13617_v18  ;;  %v7679_v63 = vrot.slane %v13624_v30, 1 }
 0x555   : > { %v7680_v55 = vsel %vm18178_vm9, %v7677_v37, %v7679_v63  ;;  %v18197_v63 = vld [vmem:[#allocation59_spill] sm:$0xff]  ;;  %vm18232_vm9 = vmmov %vm18224_vm0 }
 0x556   : > { %12576 = vmatpush3.bf16.msra.mxu1 %v13617_v18  ;;  %v13626_v18 = vld [vmem:[%s17640_s4 + $0x148] sm:$0xff]  }
 0x557   : > { %12577 = vmatprep.subr.bf16.mxu1 %v13620_v50 }
 0x559   : > { %12542 = vmatmul.mubr.bf16.gmra.mrb[12].mxu1 %v7660_v56  ;;  %v13629_v56 = vld [vmem:[%s17640_s4 + $0x160] sm:$0xff]  }
 0x55a   : > { %12545 = vmatprep.mubr.bf16.mxu1 %v7662_v17  ;;  %12578 = vmatpush3.bf16.msra.mxu1 %v13620_v50  ;;  %v13627_v50 = vld [vmem:[%s17640_s4 + $0x150] sm:$0xff]   ;;  %v13630_v17 = vld [vmem:[%s17640_s4 + $0x168] sm:$0xff]  }
 0x55b   : > { %12579 = vmatprep.subr.bf16.mxu1 %v13623_v38 }
 0x55e   : > { %12580 = vmatpush3.bf16.msra.mxu1 %v13623_v38  ;;  %v18183_v38 = vld [vmem:[#allocation8_spill] sm:$0xff] }
 0x55f   : > { %12617 = vmatprep.subr.bf16.mxu1 %v13625_v7 }
 0x561   : > { %12546 = vmatmul.mubr.bf16.gmra.mrb[16].mxu1 %v7664_v57  ;;  %v13632_v57 = vld [vmem:[%s17640_s4 + $0x178] sm:$0xff]  }
 0x562   : > { %12549 = vmatprep.mubr.bf16.mxu1 %v7666_v49  ;;  %v18186_v49 = vld [vmem:[#allocation12_spill] sm:$0xff] }
 0x569   : > { %12550 = vmatmul.mubr.bf16.gmra.mrb[20].mxu1 %v7668_v2  ;;  %v18188_v2 = vld [vmem:[#allocation55_spill] sm:$0xff] }
 0x56a   : > { %12553 = vmatprep.mubr.bf16.mxu1 %v7670_v27  ;;  %v18189_v27 = vld [vmem:[#allocation6_spill] sm:$0xff] }
 0x571   : > { %12554 = vmatmul.mubr.bf16.gmra.mrb[24].mxu1 %v7672_v4  ;;  %v18193_v4 = vld [vmem:[#allocation54_spill] sm:$0xff] }
 0x572   : > { %12557 = vmatprep.mubr.bf16.mxu1 %v7674_v23  ;;  %v18194_v23 = vld [vmem:[#allocation66_spill] sm:$0xff] }
 0x573   : > { %v8143_v12 = vshrl.u32 %v18194_v23, 16  ;;  %v8146_v5 = vshll.u32 %v18194_v23, 16  ;;  %v18214_v23 = vld [vmem:[#allocation77_spill] sm:$0xff] }
 0x575   : > { %v8145_v46 = vrot.slane %v8143_v12, 1  ;;  %v8148_v37 = vrot.slane %v8146_v5, 2  ;;  %v18215_v12 = vld [vmem:[#allocation78_spill] sm:$0xff]  ;;  %v8915_v5 = vrot.slane %v16600_v6, 2 }
 0x577   : > { %v8149_v30 = vor.u32 %v8148_v37, %v8145_v46  ;;  %v18216_v46 = vld [vmem:[#allocation80_spill] sm:$0xff] }
 0x578   : > { %v8914_v37 = vrot.slane %v18216_v46, 2  ;;  %v13671_v46 = vld [vmem:[%s17640_s4 + $0x208] sm:$0xff]  }
 0x579   : > { %12558 = vmatmul.mubr.bf16.gmra.mrb[28].mxu1 %v7676_v3  ;;  %v18195_v3 = vld [vmem:[#allocation58_spill] sm:$0xff] }
 0x57a   : > { %12561 = vmatprep.mubr.bf16.mxu1 %v7678_v8  ;;  %v18196_v8 = vld [vmem:[#allocation62_spill] sm:$0xff] }
 0x581   : > { %12562 = vmatmul.mubr.bf16.gmra.mrb[32].mxu1 %v7680_v55  ;;  %v8150_v55 = vsel %vm18198_vm15, %v18197_v63, %v8149_v30  ;;  %v8917_v30 = vrot.slane %v16603_v22, 2  ;;  %v8919_v63 = vrot.slane %v16606_v9, 2  ;;  %v8921_v22 = vrot.slane %v16611_v11, 2  ;;  %v13659_v11 = vld [vmem:[%s17640_s4 + $0x1e0] sm:$0xff]   ;;  %vm18233_vm15 = vmmov %vm18224_vm0 }
 0x582   : > { %12581 = vmatprep.mubr.bf16.mxu1 %v18179_v19  ;;  %v18199_v19 = vld [vmem:[#allocation60_spill] sm:$0xff]  ;;  %v8923_v9 = vrot.slane %v16617_v53, 2  ;;  %v8925_v53 = vrot.slane %v16621_v47, 2  ;;  %v13665_v47 = vld [vmem:[%s17640_s4 + $0x1f0] sm:$0xff]  }
 0x583   : > { %v8920_v6 = vsel %vm18220_vm14, %v8917_v30, %v8919_v63  ;;  %vm18247_vm14 = vsmask.f32 5376 }
 0x589   : > { %12582 = vmatmul.mubr.bf16.vlgmr.msra.gmra.mrb[0].mxu1 %v18180_v43  ;;  %v18200_v43 = vld [vmem:[#allocation61_spill] sm:$0xff] }
 0x58a   : > { %12618 = vmatpush3.bf16.msra.mxu1 %v13625_v7  ;;  %12585 = vmatprep.mubr.bf16.mxu1 %v18181_v62  ;;  %v18184_v7 = vld [vmem:[#allocation7_spill] sm:$0xff] }
 0x58b   : > { %12619 = vmatprep.subr.bf16.mxu1 %v13626_v18  ;;  %v18201_v62 = vld [vmem:[#allocation63_spill] sm:$0xff] }
 0x58e   : > { %12620 = vmatpush3.bf16.msra.mxu1 %v13626_v18  ;;  %v13636_v18 = vld [vmem:[%s17640_s4 + $0x188] sm:$0xff]  }
 0x58f   : > { %12621 = vmatprep.subr.bf16.mxu1 %v13627_v50 }
 0x591   : > { %12586 = vmatmul.mubr.bf16.gmra.mrb[4].mxu1 %v18182_v31  ;;  %v18202_v31 = vld [vmem:[#allocation64_spill] sm:$0xff] }
 0x592   : > { %12589 = vmatprep.mubr.bf16.mxu1 %v18183_v38  ;;  %12622 = vmatpush3.bf16.msra.mxu1 %v13627_v50  ;;  %v13637_v50 = vld [vmem:[%s17640_s4 + $0x190] sm:$0xff]  }
 0x593   : > { %12623 = vmatprep.subr.bf16.mxu1 %v13628_v39  ;;  %v18203_v38 = vld [vmem:[#allocation65_spill] sm:$0xff] }
 0x596   : > { %12624 = vmatpush3.bf16.msra.mxu1 %v13628_v39  ;;  %v13638_v39 = vld [vmem:[%s17640_s4 + $0x198] sm:$0xff]  }
 0x597   : > { %12625 = vmatprep.subr.bf16.mxu1 %v13629_v56 }
 0x599   : > { %12590 = vmatmul.mubr.bf16.gmra.mrb[8].mxu1 %v18184_v7  ;;  %v18204_v7 = vld [vmem:[#allocation67_spill] sm:$0xff] }
 0x59a   : > { %12593 = vmatprep.mubr.bf16.mxu1 %v18185_v32  ;;  %12626 = vmatpush3.bf16.msra.mxu1 %v13629_v56  ;;  %v13639_v56 = vld [vmem:[%s17640_s4 + $0x1a0] sm:$0xff]   ;;  %v18205_v32 = vld [vmem:[#allocation68_spill] sm:$0xff] }
 0x59b   : > { %12627 = vmatprep.subr.bf16.mxu1 %v13630_v17 }
 0x59e   : > { %12628 = vmatpush3.bf16.msra.mxu1 %v13630_v17  ;;  %v13640_v17 = vld [vmem:[%s17640_s4 + $0x1a8] sm:$0xff]  }
 0x59f   : > { %12629 = vmatprep.subr.bf16.mxu1 %v13631_v15 }
 0x5a1   : > { %12594 = vmatmul.mubr.bf16.gmra.mrb[12].mxu1 %v18186_v49  ;;  %v18206_v49 = vld [vmem:[#allocation69_spill] sm:$0xff] }
 0x5a2   : > { %12597 = vmatprep.mubr.bf16.mxu1 %v18187_v52  ;;  %12630 = vmatpush3.bf16.msra.mxu1 %v13631_v15  ;;  %v13641_v15 = vld [vmem:[%s17640_s4 + $0x1b0] sm:$0xff]   ;;  %v18207_v52 = vld [vmem:[#allocation70_spill] sm:$0xff] }
 0x5a3   : > { %12631 = vmatprep.subr.bf16.mxu1 %v13632_v57 }
 0x5a6   : > { %12632 = vmatpush3.bf16.msra.mxu1 %v13632_v57  ;;  %v13642_v57 = vld [vmem:[%s17640_s4 + $0x1b8] sm:$0xff]  }
 0x5a7   : > { %12669 = vmatprep.subr.bf16.mxu1 %v13635_v33 }
 0x5a9   : > { %12598 = vmatmul.mubr.bf16.gmra.mrb[16].mxu1 %v18188_v2  ;;  %v18208_v2 = vld [vmem:[#allocation71_spill] sm:$0xff] }
 0x5aa   : > { %12601 = vmatprep.mubr.bf16.mxu1 %v18189_v27  ;;  %v18209_v27 = vld [vmem:[#allocation72_spill] sm:$0xff] }
 0x5b1   : > { %12602 = vmatmul.mubr.bf16.gmra.mrb[20].mxu1 %v18190_v24  ;;  %v18210_v24 = vld [vmem:[#allocation73_spill] sm:$0xff] }
 0x5b2   : > { %12605 = vmatprep.mubr.bf16.mxu1 %v18191_v36  ;;  %v18211_v36 = vld [vmem:[#allocation74_spill] sm:$0xff] }
 0x5b9   : > { %12606 = vmatmul.mubr.bf16.gmra.mrb[24].mxu1 %v18192_v34  ;;  %v18212_v34 = vld [vmem:[#allocation75_spill] sm:$0xff] }
 0x5ba   : > { %12609 = vmatprep.mubr.bf16.mxu1 %v18193_v4  ;;  %v18213_v4 = vld [vmem:[#allocation76_spill] sm:$0xff] }
 0x5c1   : > { %12610 = vmatmul.mubr.bf16.gmra.mrb[28].mxu1 %v18195_v3  ;;  %v18217_v3 = vld [vmem:[#allocation79_spill] sm:$0xff] }
 0x5c2   : > { %12613 = vmatprep.mubr.bf16.mxu1 %v18196_v8  ;;  %v8916_v8 = vsel %vm18218_vm5, %v8914_v37, %v8915_v5  ;;  %vm18234_vm5 = vmmov %vm18224_vm0  ;;  %v13672_v37 = vld [vmem:[%s17640_s4 + $0x210] sm:$0xff]  }
 0x5c9   : > { %12614 = vmatmul.mubr.bf16.gmra.mrb[32].mxu1 %v8150_v55  ;;  %v13649_v55 = vld [vmem:[%s17640_s4 + $0x1c8] sm:$0xff]  }
 0x5ca   : > { %12633 = vmatprep.mubr.bf16.mxu1 %v18199_v19  ;;  %v8918_v19 = vsel %vm18219_vm8, %v8915_v5, %v8917_v30  ;;  %vm18235_vm8 = vmmov %vm18224_vm0  ;;  %v18236_v5 = vld [vmem:[#allocation81_spill] sm:$0xff] }
 0x5cb   : > { %v18240_v30 = vld [vmem:[#allocation85_spill] sm:$0xff] }
 0x5d1   : > { %12634 = vmatmul.mubr.bf16.vlgmr.msra.gmra.mrb[0].mxu1 %v18200_v43  ;;  %v13656_v43 = vld [vmem:[%s17640_s4 + $0x1d8] sm:$0xff]  }
 0x5d2   : > { %12670 = vmatpush3.bf16.msra.mxu1 %v13635_v33  ;;  %12637 = vmatprep.mubr.bf16.mxu1 %v18201_v62  ;;  %v13645_v33 = vld [vmem:[%s17640_s4 + $0x1c0] sm:$0xff]   ;;  %v8922_v62 = vsel %vm18221_vm10, %v8919_v63, %v8921_v22 }
 0x5d3   : > { %12671 = vmatprep.subr.bf16.mxu1 %v13636_v18  ;;  %v13674_v63 = vld [vmem:[%s17640_s4 + $0x220] sm:$0xff]  }
 0x5d6   : > { %12672 = vmatpush3.bf16.msra.mxu1 %v13636_v18  ;;  %v13653_v18 = vld [vmem:[%s17640_s4 + $0x1d0] sm:$0xff]  }
 0x5d7   : > { %12673 = vmatprep.subr.bf16.mxu1 %v13637_v50 }
 0x5d9   : > { %12638 = vmatmul.mubr.bf16.gmra.mrb[4].mxu1 %v18202_v31  ;;  %v13662_v31 = vld [vmem:[%s17640_s4 + $0x1e8] sm:$0xff]  }
 0x5da   : > { %12641 = vmatprep.mubr.bf16.mxu1 %v18203_v38  ;;  %12674 = vmatpush3.bf16.msra.mxu1 %v13637_v50  ;;  %v8924_v50 = vsel %vm18222_vm12, %v8921_v22, %v8923_v9  ;;  %v8926_v38 = vsel %vm18223_vm3, %v8923_v9, %v8925_v53  ;;  %v13677_v22 = vld [vmem:[%s17640_s4 + $0x238] sm:$0xff]   ;;  %v18243_v9 = vld [vmem:[#allocation88_spill] sm:$0xff] }
 0x5db   : > { %12675 = vmatprep.subr.bf16.mxu1 %v13638_v39 }
 0x5de   : > { %12676 = vmatpush3.bf16.msra.mxu1 %v13638_v39  ;;  %v8927_v39 = vrot.slane %v16629_v40, 2  ;;  %v8931_v40 = vrot.slane %v16645_v59, 2  ;;  %v13670_v59 = vld [vmem:[%s17640_s4 + $0x200] sm:$0xff]  }
 0x5df   : > { %12677 = vmatprep.subr.bf16.mxu1 %v13639_v56 }
 0x5e1   : > { %12642 = vmatmul.mubr.bf16.gmra.mrb[8].mxu1 %v18204_v7  ;;  %v13668_v7 = vld [vmem:[%s17640_s4 + $0x1f8] sm:$0xff]  }
 0x5e2   : > { %12645 = vmatprep.mubr.bf16.mxu1 %v18205_v32  ;;  %12678 = vmatpush3.bf16.msra.mxu1 %v13639_v56  ;;  %v8928_v56 = vsel %vm18224_vm0, %v8925_v53, %v8927_v39  ;;  %v9416_v53 = vshll.u32 %v16775_v13, 16 }
 0x5e3   : > { %12679 = vmatprep.subr.bf16.mxu1 %v13640_v17 }
 0x5e6   : > { %12680 = vmatpush3.bf16.msra.mxu1 %v13640_v17  ;;  %v8929_v17 = vrot.slane %v16633_v54, 2  ;;  %v8933_v54 = vrot.slane %v16651_v16, 2  ;;  %v8941_v16 = vrot.slane %v16684_v41, 2 }
 0x5e7   : > { %12681 = vmatprep.subr.bf16.mxu1 %v13641_v15 }
 0x5e8   : > { %v8930_v32 = vsel %vm18225_vm13, %v8927_v39, %v8929_v17 }
 0x5e9   : > { %12646 = vmatmul.mubr.bf16.gmra.mrb[12].mxu1 %v18206_v49  ;;  %v8934_v49 = vsel %vm18227_vm2, %v8931_v40, %v8933_v54 }
 0x5ea   : > { %12649 = vmatprep.mubr.bf16.mxu1 %v18207_v52  ;;  %12682 = vmatpush3.bf16.msra.mxu1 %v13641_v15  ;;  %v8932_v15 = vsel %vm18226_vm6, %v8929_v17, %v8931_v40 }
 0x5eb   : > { %12683 = vmatprep.subr.bf16.mxu1 %v13642_v57 }
 0x5ee   : > { %12684 = vmatpush3.bf16.msra.mxu1 %v13642_v57  ;;  %v8935_v57 = vrot.slane %v16659_v0, 2  ;;  %v8943_v0 = vrot.slane %v16697_v26, 2 }
 0x5ef   : > { %12721 = vmatprep.subr.bf16.mxu1 %v13645_v33 }
 0x5f0   : > { %v8936_v52 = vsel %vm18228_vm11, %v8933_v54, %v8935_v57 }
 0x5f1   : > { %12650 = vmatmul.mubr.bf16.gmra.mrb[16].mxu1 %v18208_v2  ;;  %v8937_v2 = vrot.slane %v16668_v25, 2  ;;  %v8947_v25 = vrot.slane %v16712_v21, 2  ;;  %v18238_v21 = vld [vmem:[#allocation83_spill] sm:$0xff] }
 0x5f2   : > { %12653 = vmatprep.mubr.bf16.mxu1 %v18209_v27 }
 0x5f3   : > { %v8938_v27 = vsel %vm18229_vm4, %v8935_v57, %v8937_v2 }
 0x5f9   : > { %12654 = vmatmul.mubr.bf16.gmra.mrb[20].mxu1 %v18210_v24 }
 0x5fa   : > { %12657 = vmatprep.mubr.bf16.mxu1 %v18211_v36 }
 0x601   : > { %12658 = vmatmul.mubr.bf16.gmra.mrb[24].mxu1 %v18212_v34  ;;  %v8944_v34 = vsel %vm18232_vm9, %v8941_v16, %v8943_v0 }
 0x602   : > { %12661 = vmatprep.mubr.bf16.mxu1 %v18213_v4 }
 0x609   : > { %12662 = vmatmul.mubr.bf16.gmra.mrb[28].mxu1 %v18214_v23  ;;  %v13669_v23 = vld [vmem:[#allocation3 + $0xa0] ss:$0 sps:$4 sm:$0x33]  }
 0x60a   : > { %12665 = vmatprep.mubr.bf16.mxu1 %v18215_v12  ;;  %v8949_v41 = vrot.slane %v13669_v23, 2 }
 0x60c   : > { %v8950_v26 = vsel %vm18235_vm8, %v8947_v25, %v8949_v41 }
 0x611   : > { %12666 = vmatmul.mubr.bf16.gmra.mrb[32].mxu1 %v18217_v3  ;;  %v13673_v3 = vld [vmem:[%s17640_s4 + $0x218] sm:$0xff]  }
 0x612   : > { %12685 = vmatprep.mubr.bf16.mxu1 %v8916_v8  ;;  %v18239_v8 = vld [vmem:[#allocation84_spill] sm:$0xff] }
 0x619   : > { %12686 = vmatmul.mubr.bf16.vlgmr.msra.gmra.mrb[0].mxu1 %v8918_v19  ;;  %v18241_v19 = vld [vmem:[#allocation86_spill] sm:$0xff] }
 0x61a   : > { %12722 = vmatpush3.bf16.msra.mxu1 %v13645_v33  ;;  %12689 = vmatprep.mubr.bf16.mxu1 %v8920_v6  ;;  %v8939_v33 = vrot.slane %v16677_v35, 2  ;;  %v8945_v35 = vrot.slane %v16703_v45, 2  ;;  %v18237_v45 = vld [vmem:[#allocation82_spill] sm:$0xff]  ;;  %v18242_v6 = vld [vmem:[#allocation87_spill] sm:$0xff] }
 0x61b   : > { %12723 = vmatprep.subr.bf16.mxu1 %v13649_v55 }
 0x61c   : > { %v8940_v24 = vsel %vm18230_vm7, %v8937_v2, %v8939_v33  ;;  %v8942_v36 = vsel %vm18231_vm1, %v8939_v33, %v8941_v16  ;;  %v8946_v4 = vsel %vm18233_vm15, %v8943_v0, %v8945_v35  ;;  %v8948_v12 = vsel %vm18234_vm5, %v8945_v35, %v8947_v25  ;;  %v18264_v33 = vld [vmem:[#allocation19_spill] sm:$0xff]  ;;  %v18266_v0 = vld [vmem:[#allocation20_spill] sm:$0xff] }
 0x61d   : > { %vm18265_vm3 = vcmp.eq.s32.totalorder %v18264_v33, 1  ;;  %vm18267_vm0 = vcmp.eq.s32.totalorder %v18266_v0, 1 }
 0x61e   : > { %12724 = vmatpush3.bf16.msra.mxu1 %v13649_v55  ;;  %v13675_v55 = vld [vmem:[%s17640_s4 + $0x228] sm:$0xff]  }
 0x61f   : > { %12725 = vmatprep.subr.bf16.mxu1 %v13653_v18 }
 0x621   : > { %12690 = vmatmul.mubr.bf16.gmra.mrb[4].mxu1 %v8922_v62  ;;  %v18245_v62 = vld [vmem:[#allocation90_spill] sm:$0xff] }
 0x622   : > { %12693 = vmatprep.mubr.bf16.mxu1 %v8924_v50  ;;  %12726 = vmatpush3.bf16.msra.mxu1 %v13653_v18  ;;  %v13676_v18 = vld [vmem:[%s17640_s4 + $0x230] sm:$0xff]   ;;  %v18246_v50 = vld [vmem:[#allocation91_spill] sm:$0xff] }
 0x623   : > { %12727 = vmatprep.subr.bf16.mxu1 %v13656_v43 }
 0x626   : > { %12728 = vmatpush3.bf16.msra.mxu1 %v13656_v43  ;;  %v18244_v43 = vld [vmem:[#allocation89_spill] sm:$0xff] }
 0x627   : > { %12729 = vmatprep.subr.bf16.mxu1 %v13659_v11 }
 0x629   : > { %12694 = vmatmul.mubr.bf16.gmra.mrb[8].mxu1 %v8926_v38 }
 0x62a   : > { %12697 = vmatprep.mubr.bf16.mxu1 %v8928_v56  ;;  %12730 = vmatpush3.bf16.msra.mxu1 %v13659_v11  ;;  %v9413_v11 = vshrl.u32 %v16775_v13, 16  ;;  %v18257_v13 = vld [vmem:[#allocation101_spill] sm:$0xff]  ;;  %v18258_v56 = vld [vmem:[#allocation102_spill] sm:$0xff] }
 0x62b   : > { %12731 = vmatprep.subr.bf16.mxu1 %v13662_v31 }
 0x62c   : > { %v9415_v39 = vrot.slane %v9413_v11, 2  ;;  %v18274_v11 = vld [vmem:[#allocation24_spill] sm:$0xff] }
 0x62d   : > { %vm18275_vm11 = vcmp.eq.s32.totalorder %v18274_v11, 1 }
 0x62e   : > { %12732 = vmatpush3.bf16.msra.mxu1 %v13662_v31  ;;  %v9418_v31 = vrot.slane %v9416_v53, 3 }
 0x62f   : > { %12733 = vmatprep.subr.bf16.mxu1 %v13665_v47 }
 0x631   : > { %12698 = vmatmul.mubr.bf16.gmra.mrb[12].mxu1 %v8930_v32 }
 0x632   : > { %12701 = vmatprep.mubr.bf16.mxu1 %v8932_v15  ;;  %12734 = vmatpush3.bf16.msra.mxu1 %v13665_v47  ;;  %v18259_v47 = vld [vmem:[#allocation103_spill] sm:$0xff] }
 0x633   : > { %12735 = vmatprep.subr.bf16.mxu1 %v13668_v7 }
 0x636   : > { %12736 = vmatpush3.bf16.msra.mxu1 %v13668_v7 }
 0x637   : > { %12773 = vmatprep.subr.bf16.mxu1 %v13670_v59 }
 0x639   : > { %12702 = vmatmul.mubr.bf16.gmra.mrb[16].mxu1 %v8934_v49  ;;  %v18262_v49 = vld [vmem:[#allocation18_spill] sm:$0xff] }
 0x63a   : > { %12705 = vmatprep.mubr.bf16.mxu1 %v8936_v52  ;;  %vm18263_vm12 = vcmp.eq.s32.totalorder %v18262_v49, 1 }
 0x641   : > { %12706 = vmatmul.mubr.bf16.gmra.mrb[20].mxu1 %v8938_v27 }
 0x642   : > { %12709 = vmatprep.mubr.bf16.mxu1 %v8940_v24 }
 0x649   : > { %12710 = vmatmul.mubr.bf16.gmra.mrb[24].mxu1 %v8942_v36 }
 0x64a   : > { %12713 = vmatprep.mubr.bf16.mxu1 %v8944_v34 }
 0x651   : > { %12714 = vmatmul.mubr.bf16.gmra.mrb[28].mxu1 %v8946_v4 }
 0x652   : > { %12717 = vmatprep.mubr.bf16.mxu1 %v8948_v12 }
 0x659   : > { %12718 = vmatmul.mubr.bf16.gmra.mrb[32].mxu1 %v8950_v26 }
 0x65a   : > { %12737 = vmatprep.mubr.bf16.mxu1 %v18236_v5 }
 0x661   : > { %12738 = vmatmul.mubr.bf16.vlgmr.msra.gmra.mrb[0].mxu1 %v18237_v45 }
 0x662   : > { %12774 = vmatpush3.bf16.msra.mxu1 %v13670_v59  ;;  %12741 = vmatprep.mubr.bf16.mxu1 %v18238_v21 }
 0x663   : > { %12775 = vmatprep.subr.bf16.mxu1 %v13671_v46 }
 0x666   : > { %12776 = vmatpush3.bf16.msra.mxu1 %v13671_v46 }
 0x667   : > { %12777 = vmatprep.subr.bf16.mxu1 %v13672_v37 }
 0x669   : > { %12742 = vmatmul.mubr.bf16.gmra.mrb[4].mxu1 %v18239_v8 }
 0x66a   : > { %12745 = vmatprep.mubr.bf16.mxu1 %v18240_v30  ;;  %12778 = vmatpush3.bf16.msra.mxu1 %v13672_v37  ;;  %v18268_v37 = vld [vmem:[#allocation21_spill] sm:$0xff] }
 0x66b   : > { %12779 = vmatprep.subr.bf16.mxu1 %v13673_v3  ;;  %vm18269_vm13 = vcmp.eq.s32.totalorder %v18268_v37, 1 }
 0x66e   : > { %12780 = vmatpush3.bf16.msra.mxu1 %v13673_v3 }
 0x66f   : > { %12781 = vmatprep.subr.bf16.mxu1 %v13674_v63 }
 0x671   : > { %12746 = vmatmul.mubr.bf16.gmra.mrb[8].mxu1 %v18241_v19 }
 0x672   : > { %12749 = vmatprep.mubr.bf16.mxu1 %v18242_v6  ;;  %12782 = vmatpush3.bf16.msra.mxu1 %v13674_v63  ;;  %v18270_v6 = vld [vmem:[#allocation23_spill] sm:$0xff] }
 0x673   : > { %12783 = vmatprep.subr.bf16.mxu1 %v13675_v55  ;;  %vm18271_vm6 = vcmp.eq.s32.totalorder %v18270_v6, 1 }
 0x676   : > { %12784 = vmatpush3.bf16.msra.mxu1 %v13675_v55 }
 0x677   : > { %12785 = vmatprep.subr.bf16.mxu1 %v13676_v18 }
 0x679   : > { %12750 = vmatmul.mubr.bf16.gmra.mrb[12].mxu1 %v18243_v9 }
 0x67a   : > { %12753 = vmatprep.mubr.bf16.mxu1 %v18244_v43  ;;  %12786 = vmatpush3.bf16.msra.mxu1 %v13676_v18 }
 0x67b   : > { %12787 = vmatprep.subr.bf16.mxu1 %v13677_v22 }
 0x67e   : > { %12788 = vmatpush3.bf16.msra.mxu1 %v13677_v22  ;;  %v18272_v22 = vld [vmem:[#allocation22_spill] sm:$0xff] }
 0x67f   : > { %vm18273_vm2 = vcmp.eq.s32.totalorder %v18272_v22, 1 }
 0x681   : > { %12754 = vmatmul.mubr.bf16.gmra.mrb[16].mxu1 %v16715_v1  ;;  %v9419_v1 = vor.u32 %v9418_v31, %v9415_v39 }
 0x682   : > { %12757 = vmatprep.mubr.bf16.mxu1 %v18245_v62 }
 0x683   : > { %v9420_v38 = vsel %vm18247_vm14, %v16747_v60, %v9419_v1  ;;  %v18253_v60 = vld [vmem:[#allocation97_spill] sm:$0xff] }
 0x689   : > { %12758 = vmatmul.mubr.bf16.gmra.mrb[20].mxu1 %v18246_v50 }
 0x68a   : > { %12761 = vmatprep.mubr.bf16.mxu1 %v16732_v14  ;;  %v18248_v14 = vld [vmem:[#allocation92_spill] sm:$0xff] }
 0x691   : > { %12762 = vmatmul.mubr.bf16.gmra.mrb[24].mxu1 %v16736_v29  ;;  %v18249_v29 = vld [vmem:[#allocation93_spill] sm:$0xff] }
 0x692   : > { %12765 = vmatprep.mubr.bf16.mxu1 %v16740_v61  ;;  %v18250_v61 = vld [vmem:[#allocation94_spill] sm:$0xff] }
 0x699   : > { %12766 = vmatmul.mubr.bf16.gmra.mrb[28].mxu1 %v16745_v58  ;;  %v18251_v58 = vld [vmem:[#allocation95_spill] sm:$0xff] }
 0x69a   : > { %12769 = vmatprep.mubr.bf16.mxu1 %v16759_v28  ;;  %v18252_v28 = vld [vmem:[#allocation96_spill] sm:$0xff] }
 0x6a1   : > { %12770 = vmatmul.mubr.bf16.gmra.mrb[32].mxu1 %v9420_v38 }
 0x6a2   : > { %12789 = vmatprep.mubr.bf16.mxu1 %v16762_v42  ;;  %v18254_v42 = vld [vmem:[#allocation98_spill] sm:$0xff] }
 0x6a9   : > { %12790 = vmatmul.mubr.bf16.vlgmr.msra.gmra.mrb[0].mxu1 %v16752_v51  ;;  %v18255_v51 = vld [vmem:[#allocation99_spill] sm:$0xff] }
 0x6aa   : > { %12793 = vmatprep.mubr.bf16.mxu1 %v16765_v44  ;;  %v18256_v44 = vld [vmem:[#allocation100_spill] sm:$0xff] }
 0x6b1   : > { %12794 = vmatmul.mubr.bf16.gmra.mrb[4].mxu1 %v18248_v14 }
 0x6b2   : > { %12797 = vmatprep.mubr.bf16.mxu1 %v18249_v29 }
 0x6b9   : > { %12798 = vmatmul.mubr.bf16.gmra.mrb[8].mxu1 %v18250_v61 }
 0x6ba   : > { %12801 = vmatprep.mubr.bf16.mxu1 %v18251_v58 }
 0x6c1   : > { %12802 = vmatmul.mubr.bf16.gmra.mrb[12].mxu1 %v18252_v28 }
 0x6c2   : > { %12805 = vmatprep.mubr.bf16.mxu1 %v16793_v20  ;;  %v17147_v20 = vld [vmem:[%s17641_s5] ss:$0 sm:$0xff] }
 0x6c9   : > { %12806 = vmatmul.mubr.bf16.gmra.mrb[16].mxu1 %v18253_v60 }
 0x6ca   : > { %12809 = vmatprep.mubr.bf16.mxu1 %v16800_v10 }
 0x6d1   : > { %12810 = vmatmul.mubr.bf16.gmra.mrb[20].mxu1 %v18254_v42 }
 0x6d2   : > { %12813 = vmatprep.mubr.bf16.mxu1 %v18255_v51 }
 0x6d9   : > { %12814 = vmatmul.mubr.bf16.gmra.mrb[24].mxu1 %v18256_v44  ;;  %v18276_v44 = vld [vmem:[#allocation25_spill] sm:$0xff] }
 0x6da   : > { %12817 = vmatprep.mubr.bf16.mxu1 %v18257_v13  ;;  %vm18277_vm4 = vcmp.eq.s32.totalorder %v18276_v44, 1 }
 0x6e1   : > { %12818 = vmatmul.mubr.bf16.gmra.mrb[28].mxu1 %v16821_v48  ;;  %v18260_v48 = vld [vmem:[#allocation17_spill] sm:$0xff] }
 0x6e2   : > { %12821 = vmatprep.mubr.bf16.mxu1 %v18258_v56  ;;  %vm18261_vm10 = vcmp.eq.s32.totalorder %v18260_v48, 1 }
 0x6e9   : > { %12822 = vmatmul.mubr.bf16.gmra.mrb[32].mxu1 %v18259_v47 }
 0x77c   : > { %v12791_v10 = vpop.f32.mrb[0].mxu1 }
 0x77d   : > { %v9858_v40 = vpop.f32.mrb[1].mxu1  ;;  %v17150_v17 = vadd.f32 %v12791_v10, %v17147_v20 }
 0x77e   : > { %v17153_v7 = vadd.f32 %v17147_v20, %v9858_v40  ;;  %v12792_v32 = vpop.f32.mrb[2].mxu1 }
 0x77f   : > { %v9861_v15 = vpop.f32.mrb[3].mxu1  ;;  %v17159_v54 = vadd.f32 %v12792_v32, %v17147_v20  ;;  %v10082_v52 = vsel %vm18263_vm12, %v17150_v17, 0.0 }
 0x780   : > { %v10080_v59 = vsel %vm18261_vm10, %v17153_v7, 0.0  ;;  %v17162_v57 = vadd.f32 %v17147_v20, %v9861_v15  ;;  %v10160_v35 = vmul.f32 %v10082_v52, %v10082_v52  ;;  %v18278_v15 = vld [vmem:[#allocation27_spill] sm:$0xff] }
 0x781   : > { %v10158_v27 = vmul.f32 %v10080_v59, %v10080_v59  ;;  %v10083_v36 = vsel %vm18267_vm0, %v17159_v54, 0.0  ;;  %vm18279_vm7 = vcmp.eq.s32.totalorder %v18278_v15, 1 }
 0x782   : > { %v10081_v2 = vsel %vm18265_vm3, %v17162_v57, 0.0  ;;  %v10161_v5 = vmul.f32 %v10083_v36, %v10083_v36 }
 0x783   : > { %v10116_v24 = vadd.f32 %v10081_v2, %v10080_v59  ;;  %v10159_v16 = vmul.f32 %v10081_v2, %v10081_v2  ;;  %v18280_v59 = vld [vmem:[#allocation26_spill] sm:$0xff] }
 0x784   : > { %v12795_v34 = vpop.f32.mrb[4].mxu1  ;;  %vm18281_vm1 = vcmp.eq.s32.totalorder %v18280_v59, 1 }
 0x785   : > { %v10117_v25 = vadd.f32 %v10116_v24, %v10082_v52  ;;  %v10194_v4 = vadd.f32 %v10159_v16, %v10158_v27  ;;  %v9874_v23 = vpop.f32.mrb[5].mxu1  ;;  %v17174_v12 = vadd.f32 %v12795_v34, %v17147_v20  ;;  %v18282_v27 = vld [vmem:[#allocation28_spill] sm:$0xff] }
 0x786   : > { %v17177_v41 = vadd.f32 %v17147_v20, %v9874_v23  ;;  %v12796_v26 = vpop.f32.mrb[6].mxu1  ;;  %vm18283_vm9 = vcmp.eq.s32.totalorder %v18282_v27, 1  ;;  %v18296_v27 = vld [vmem:[#allocation34_spill] sm:$0xff] }
 0x787   : > { %v10195_v46 = vadd.f32 %v10194_v4, %v10160_v35  ;;  %v10118_v45 = vadd.f32 %v10117_v25, %v10083_v36  ;;  %v9877_v21 = vpop.f32.mrb[7].mxu1  ;;  %v17183_v8 = vadd.f32 %v12796_v26, %v17147_v20  ;;  %v10086_v18 = vsel %vm18271_vm6, %v17174_v12, 0.0 }
 0x788   : > { %v10084_v3 = vsel %vm18269_vm13, %v17177_v41, 0.0  ;;  %v17186_v30 = vadd.f32 %v17147_v20, %v9877_v21  ;;  %v10164_v31 = vmul.f32 %v10086_v18, %v10086_v18  ;;  %v18284_v21 = vld [vmem:[#allocation29_spill] sm:$0xff]  ;;  %vm18297_vm3 = vcmp.eq.s32.totalorder %v18296_v27, 1 }
 0x789   : > { %v10119_v63 = vadd.f32 %v10118_v45, %v10084_v3  ;;  %v10162_v55 = vmul.f32 %v10084_v3, %v10084_v3  ;;  %v10196_v19 = vadd.f32 %v10195_v46, %v10161_v5  ;;  %v10087_v53 = vsel %vm18275_vm11, %v17183_v8, 0.0 }
 0x78a   : > { %v10085_v9 = vsel %vm18273_vm2, %v17186_v30, 0.0  ;;  %v10165_v28 = vmul.f32 %v10087_v53, %v10087_v53  ;;  %vm18285_vm15 = vcmp.eq.s32.totalorder %v18284_v21, 1 }
 0x78b   : > { %v10197_v43 = vadd.f32 %v10196_v19, %v10162_v55  ;;  %v10120_v62 = vadd.f32 %v10119_v63, %v10085_v9  ;;  %v10163_v50 = vmul.f32 %v10085_v9, %v10085_v9  ;;  %v18288_v9 = vld [vmem:[#allocation30_spill] sm:$0xff] }
 0x78c   : > { %v12799_v39 = vpop.f32.mrb[8].mxu1  ;;  %vm18289_vm8 = vcmp.eq.s32.totalorder %v18288_v9, 1  ;;  %v18300_v9 = vld [vmem:[#allocation37_spill] sm:$0xff] }
 0x78d   : > { %v10121_v1 = vadd.f32 %v10120_v62, %v10086_v18  ;;  %v10198_v38 = vadd.f32 %v10197_v43, %v10163_v50  ;;  %v9890_v14 = vpop.f32.mrb[9].mxu1  ;;  %v17198_v29 = vadd.f32 %v12799_v39, %v17147_v20  ;;  %v18286_v18 = vld [vmem:[#allocation31_spill] sm:$0xff]  ;;  %vm18301_vm13 = vcmp.eq.s32.totalorder %v18300_v9, 1 }
 0x78e   : > { %v17201_v61 = vadd.f32 %v17147_v20, %v9890_v14  ;;  %v12800_v58 = vpop.f32.mrb[10].mxu1  ;;  %vm18287_vm5 = vcmp.eq.s32.totalorder %v18286_v18, 1 }
 0x78f   : > { %v10199_v60 = vadd.f32 %v10198_v38, %v10164_v31  ;;  %v10122_v42 = vadd.f32 %v10121_v1, %v10087_v53  ;;  %v9893_v51 = vpop.f32.mrb[11].mxu1  ;;  %v17207_v56 = vadd.f32 %v12800_v58, %v17147_v20  ;;  %v10090_v48 = vsel %vm18279_vm7, %v17198_v29, 0.0  ;;  %v18290_v53 = vld [vmem:[#allocation32_spill] sm:$0xff] }
 0x790   : > { %v10088_v13 = vsel %vm18277_vm4, %v17201_v61, 0.0  ;;  %v17210_v47 = vadd.f32 %v17147_v20, %v9893_v51  ;;  %v10168_v0 = vmul.f32 %v10090_v48, %v10090_v48  ;;  %vm18291_vm14 = vcmp.eq.s32.totalorder %v18290_v53, 1 }
 0x791   : > { %v10123_v10 = vadd.f32 %v10122_v42, %v10088_v13  ;;  %v10166_v40 = vmul.f32 %v10088_v13, %v10088_v13  ;;  %v10200_v32 = vadd.f32 %v10199_v60, %v10165_v28  ;;  %v10091_v24 = vsel %vm18283_vm9, %v17207_v56, 0.0 }
 0x792   : > { %v10089_v49 = vsel %vm18281_vm1, %v17210_v47, 0.0  ;;  %v10169_v26 = vmul.f32 %v10091_v24, %v10091_v24 }
 0x793   : > { %v10201_v52 = vadd.f32 %v10200_v32, %v10166_v40  ;;  %v10124_v33 = vadd.f32 %v10123_v10, %v10089_v49  ;;  %v10167_v2 = vmul.f32 %v10089_v49, %v10089_v49  ;;  %v18292_v40 = vld [vmem:[#allocation33_spill] sm:$0xff] }
 0x794   : > { %v12803_v16 = vpop.f32.mrb[12].mxu1  ;;  %vm18293_vm10 = vcmp.eq.s32.totalorder %v18292_v40, 1 }
 0x795   : > { %v10125_v36 = vadd.f32 %v10124_v33, %v10090_v48  ;;  %v10202_v34 = vadd.f32 %v10201_v52, %v10167_v2  ;;  %v9906_v35 = vpop.f32.mrb[13].mxu1  ;;  %v17222_v25 = vadd.f32 %v12803_v16, %v17147_v20  ;;  %v18294_v33 = vld [vmem:[#allocation35_spill] sm:$0xff] }
 0x796   : > { %v17225_v4 = vadd.f32 %v17147_v20, %v9906_v35  ;;  %v12804_v23 = vpop.f32.mrb[14].mxu1  ;;  %vm18295_vm12 = vcmp.eq.s32.totalorder %v18294_v33, 1 }
 0x797   : > { %v10203_v5 = vadd.f32 %v10202_v34, %v10168_v0  ;;  %v10126_v46 = vadd.f32 %v10125_v36, %v10091_v24  ;;  %v9909_v45 = vpop.f32.mrb[15].mxu1  ;;  %v17231_v3 = vadd.f32 %v12804_v23, %v17147_v20  ;;  %v10094_v22 = vsel %vm18287_vm5, %v17222_v25, 0.0  ;;  %v18298_v34 = vld [vmem:[#allocation36_spill] sm:$0xff] }
 0x798   : > { %v10092_v37 = vsel %vm18285_vm15, %v17225_v4, 0.0  ;;  %v17234_v63 = vadd.f32 %v17147_v20, %v9909_v45  ;;  %v10172_v1 = vmul.f32 %v10094_v22, %v10094_v22  ;;  %vm18299_vm0 = vcmp.eq.s32.totalorder %v18298_v34, 1 }
 0x799   : > { %v10127_v55 = vadd.f32 %v10126_v46, %v10092_v37  ;;  %v10170_v19 = vmul.f32 %v10092_v37, %v10092_v37  ;;  %v10204_v6 = vadd.f32 %v10203_v5, %v10169_v26  ;;  %v10095_v39 = vsel %vm18291_vm14, %v17231_v3, 0.0 }
 0x79a   : > { %v10093_v43 = vsel %vm18289_vm8, %v17234_v63, 0.0  ;;  %v10173_v51 = vmul.f32 %v10095_v39, %v10095_v39 }
 0x79b   : > { %v10205_v62 = vadd.f32 %v10204_v6, %v10170_v19  ;;  %v10128_v50 = vadd.f32 %v10127_v55, %v10093_v43  ;;  %v10171_v11 = vmul.f32 %v10093_v43, %v10093_v43 }
 0x79c   : > { %v12807_v31 = vpop.f32.mrb[16].mxu1 }
 0x79d   : > { %v10129_v38 = vadd.f32 %v10128_v50, %v10094_v22  ;;  %v10206_v14 = vadd.f32 %v10205_v62, %v10171_v11  ;;  %v9922_v58 = vpop.f32.mrb[17].mxu1  ;;  %v17246_v28 = vadd.f32 %v12807_v31, %v17147_v20  ;;  %v18302_v31 = vld [vmem:[#allocation39_spill] sm:$0xff] }
 0x79e   : > { %v17249_v60 = vadd.f32 %v17147_v20, %v9922_v58  ;;  %v12808_v42 = vpop.f32.mrb[18].mxu1  ;;  %vm18303_vm6 = vcmp.eq.s32.totalorder %v18302_v31, 1 }
 0x79f   : > { %v10207_v44 = vadd.f32 %v10206_v14, %v10172_v1  ;;  %v10130_v13 = vadd.f32 %v10129_v38, %v10095_v39  ;;  %v9925_v10 = vpop.f32.mrb[19].mxu1  ;;  %v17255_v15 = vadd.f32 %v12808_v42, %v17147_v20  ;;  %v10098_v2 = vsel %vm18295_vm12, %v17246_v28, 0.0  ;;  %v18304_v38 = vld [vmem:[#allocation38_spill] sm:$0xff] }
 0x7a0   : > { %v10096_v32 = vsel %vm18293_vm10, %v17249_v60, 0.0  ;;  %v17258_v48 = vadd.f32 %v17147_v20, %v9925_v10  ;;  %v10176_v26 = vmul.f32 %v10098_v2, %v10098_v2  ;;  %vm18305_vm2 = vcmp.eq.s32.totalorder %v18304_v38, 1 }
 0x7a1   : > { %v10131_v59 = vadd.f32 %v10130_v13, %v10096_v32  ;;  %v10174_v49 = vmul.f32 %v10096_v32, %v10096_v32  ;;  %v10208_v52 = vadd.f32 %v10207_v44, %v10173_v51  ;;  %v10099_v35 = vsel %vm18299_vm0, %v17255_v15, 0.0  ;;  %v18306_v44 = vld [vmem:[#allocation40_spill] sm:$0xff] }
 0x7a2   : > { %v10097_v24 = vsel %vm18297_vm3, %v17258_v48, 0.0  ;;  %v10177_v19 = vmul.f32 %v10099_v35, %v10099_v35  ;;  %vm18307_vm11 = vcmp.eq.s32.totalorder %v18306_v44, 1 }
 0x7a3   : > { %v10209_v16 = vadd.f32 %v10208_v52, %v10174_v49  ;;  %v10132_v0 = vadd.f32 %v10131_v59, %v10097_v24  ;;  %v10175_v36 = vmul.f32 %v10097_v24, %v10097_v24 }
 0x7a4   : > { %v12811_v23 = vpop.f32.mrb[20].mxu1 }
 0x7a5   : > { %v10133_v5 = vadd.f32 %v10132_v0, %v10098_v2  ;;  %v10210_v46 = vadd.f32 %v10209_v16, %v10175_v36  ;;  %v9938_v45 = vpop.f32.mrb[21].mxu1  ;;  %v17270_v21 = vadd.f32 %v12811_v23, %v17147_v20  ;;  %v18308_v36 = vld [vmem:[#allocation41_spill] sm:$0xff] }
 0x7a6   : > { %v17273_v37 = vadd.f32 %v17147_v20, %v9938_v45  ;;  %v12812_v55 = vpop.f32.mrb[22].mxu1  ;;  %vm18309_vm4 = vcmp.eq.s32.totalorder %v18308_v36, 1  ;;  %v18310_v45 = vld [vmem:[#allocation43_spill] sm:$0xff]  ;;  %v18320_v36 = vld [vmem:[#allocation46_spill] sm:$0xff] }
 0x7a7   : > { %v10211_v6 = vadd.f32 %v10210_v46, %v10176_v26  ;;  %v10134_v18 = vadd.f32 %v10133_v5, %v10099_v35  ;;  %v9941_v22 = vpop.f32.mrb[23].mxu1  ;;  %v17279_v62 = vadd.f32 %v12812_v55, %v17147_v20  ;;  %v10102_v1 = vsel %vm18303_vm6, %v17270_v21, 0.0 }
 0x7a8   : > { %v10100_v43 = vsel %vm18301_vm13, %v17273_v37, 0.0  ;;  %v17282_v50 = vadd.f32 %v17147_v20, %v9941_v22  ;;  %v10180_v40 = vmul.f32 %v10102_v1, %v10102_v1  ;;  %vm18311_vm7 = vcmp.eq.s32.totalorder %v18310_v45, 1  ;;  %v18322_v45 = vld [vmem:[#allocation48_spill] sm:$0xff] }
 0x7a9   : > { %v10135_v11 = vadd.f32 %v10134_v18, %v10100_v43  ;;  %v10178_v53 = vmul.f32 %v10100_v43, %v10100_v43  ;;  %v10212_v39 = vadd.f32 %v10211_v6, %v10177_v19  ;;  %v10103_v13 = vsel %vm18307_vm11, %v17279_v62, 0.0  ;;  %v18312_v19 = vld [vmem:[#allocation42_spill] sm:$0xff]  ;;  %v18314_v43 = vld [vmem:[#allocation44_spill] sm:$0xff] }
 0x7aa   : > { %v10101_v14 = vsel %vm18305_vm2, %v17282_v50, 0.0  ;;  %v10181_v27 = vmul.f32 %v10103_v13, %v10103_v13  ;;  %vm18313_vm1 = vcmp.eq.s32.totalorder %v18312_v19, 1  ;;  %vm18315_vm9 = vcmp.eq.s32.totalorder %v18314_v43, 1 }
 0x7ab   : > { %v10213_v58 = vadd.f32 %v10212_v39, %v10178_v53  ;;  %v10136_v42 = vadd.f32 %v10135_v11, %v10101_v14  ;;  %v10179_v51 = vmul.f32 %v10101_v14, %v10101_v14  ;;  %vm18321_vm8 = vcmp.eq.s32.totalorder %v18320_v36, 1 }
 0x7ac   : > { %v12815_v10 = vpop.f32.mrb[24].mxu1  ;;  %vm18323_vm14 = vcmp.eq.s32.totalorder %v18322_v45, 1  ;;  %vm18332_vm13 = vcmask 1045504   ;;  %vm18334_vm2 = vcmask 1043456  }
 0x7ad   : > { %v10137_v32 = vadd.f32 %v10136_v42, %v10102_v1  ;;  %v10214_v59 = vadd.f32 %v10213_v58, %v10179_v51  ;;  %v9954_v49 = vpop.f32.mrb[25].mxu1  ;;  %v17294_v52 = vadd.f32 %v12815_v10, %v17147_v20  ;;  %vm18333_vm6 = vmmov %vm18332_vm13 }
 0x7ae   : > { %v17297_v33 = vadd.f32 %v17147_v20, %v9954_v49  ;;  %v12816_v2 = vpop.f32.mrb[26].mxu1  ;;  %vm18335_vm11 = vmmov %vm18334_vm2 }
 0x7af   : > { %v10215_v24 = vadd.f32 %v10214_v59, %v10180_v40  ;;  %v10138_v16 = vadd.f32 %v10137_v32, %v10103_v13  ;;  %v9957_v0 = vpop.f32.mrb[27].mxu1  ;;  %v17303_v35 = vadd.f32 %v12816_v2, %v17147_v20  ;;  %v10106_v55 = vsel %vm18311_vm7, %v17294_v52, 0.0  ;;  %v18316_v40 = vld [vmem:[#allocation45_spill] sm:$0xff] }
 0x7b0   : > { %v10104_v34 = vsel %vm18309_vm4, %v17297_v33, 0.0  ;;  %v17306_v23 = vadd.f32 %v17147_v20, %v9957_v0  ;;  %v10184_v39 = vmul.f32 %v10106_v55, %v10106_v55  ;;  %vm18317_vm15 = vcmp.eq.s32.totalorder %v18316_v40, 1 }
 0x7b1   : > { %v10139_v26 = vadd.f32 %v10138_v16, %v10104_v34  ;;  %v10182_v5 = vmul.f32 %v10104_v34, %v10104_v34  ;;  %v10216_v46 = vadd.f32 %v10215_v24, %v10181_v27  ;;  %v10107_v11 = vsel %vm18315_vm9, %v17303_v35, 0.0  ;;  %v18318_v16 = vld [vmem:[#allocation47_spill] sm:$0xff] }
 0x7b2   : > { %v10105_v6 = vsel %vm18313_vm1, %v17306_v23, 0.0  ;;  %v10185_v51 = vmul.f32 %v10107_v11, %v10107_v11  ;;  %vm18319_vm5 = vcmp.eq.s32.totalorder %v18318_v16, 1  ;;  %vm18336_vm4 = vcmask 1041408   ;;  %vm18338_vm1 = vmmov %vm18333_vm6 }
 0x7b3   : > { %v10217_v18 = vadd.f32 %v10216_v46, %v10182_v5  ;;  %v10140_v22 = vadd.f32 %v10139_v26, %v10105_v6  ;;  %v10183_v9 = vmul.f32 %v10105_v6, %v10105_v6  ;;  %vm18337_vm7 = vmmov %vm18336_vm4 }
 0x7b4   : > { %v12819_v53 = vpop.f32.mrb[28].mxu1  ;;  %vm18339_vm9 = vmmov %vm18338_vm1 }
 0x7b5   : > { %v10141_v31 = vadd.f32 %v10140_v22, %v10106_v55  ;;  %v10218_v1 = vadd.f32 %v10217_v18, %v10183_v9  ;;  %v9970_v38 = vpop.f32.mrb[29].mxu1  ;;  %v17318_v14 = vadd.f32 %v12819_v53, %v17147_v20 }
 0x7b6   : > { %v17321_v58 = vadd.f32 %v17147_v20, %v9970_v38  ;;  %v12820_v42 = vpop.f32.mrb[30].mxu1 }
 0x7b7   : > { %v10219_v44 = vadd.f32 %v10218_v1, %v10184_v39  ;;  %v10142_v13 = vadd.f32 %v10141_v31, %v10107_v11  ;;  %v9973_v10 = vpop.f32.mrb[31].mxu1  ;;  %v17327_v59 = vadd.f32 %v12820_v42, %v17147_v20  ;;  %v10110_v0 = vsel %vm18319_vm5, %v17318_v14, 0.0  ;;  %v18324_v42 = vld [vmem:[#allocation49_spill] sm:$0xff]  ;;  %vm18341_vm5 = vmmov %vm18334_vm2 }
 0x7b8   : > { %v10108_v32 = vsel %vm18317_vm15, %v17321_v58, 0.0  ;;  %v17330_v49 = vadd.f32 %v17147_v20, %v9973_v10  ;;  %v10188_v6 = vmul.f32 %v10110_v0, %v10110_v0  ;;  %vm18325_vm10 = vcmp.eq.s32.totalorder %v18324_v42, 1  ;;  %vm18340_vm15 = vmmov %vm18334_vm2 }
 0x7b9   : > { %v10143_v2 = vadd.f32 %v10142_v13, %v10108_v32  ;;  %v10186_v27 = vmul.f32 %v10108_v32, %v10108_v32  ;;  %v10220_v24 = vadd.f32 %v10219_v44, %v10185_v51  ;;  %v10111_v55 = vsel %vm18323_vm14, %v17327_v59, 0.0  ;;  %vm18343_vm14 = vmmov %vm18336_vm4 }
 0x7ba   : > { %v10109_v34 = vsel %vm18321_vm8, %v17330_v49, 0.0  ;;  %v10189_v39 = vmul.f32 %v10111_v55, %v10111_v55  ;;  %vm18342_vm8 = vmmov %vm18336_vm4 }
 0x7bb   : > { %v10221_v26 = vadd.f32 %v10220_v24, %v10186_v27  ;;  %v10144_v5 = vadd.f32 %v10143_v2, %v10109_v34  ;;  %v10187_v46 = vmul.f32 %v10109_v34, %v10109_v34  ;;  %v18326_v2 = vld [vmem:[#allocation51_spill] sm:$0xff]  ;;  %v18328_v24 = vld [vmem:[#allocation50_spill] sm:$0xff] }
 0x7bc   : > { %v12823_v19 = vpop.f32.mrb[32].mxu1  ;;  %vm18327_vm12 = vcmp.eq.s32.totalorder %v18326_v2, 1  ;;  %vm18329_vm3 = vcmp.eq.s32.totalorder %v18328_v24, 1 }
 0x7bd   : > { %v10145_v18 = vadd.f32 %v10144_v5, %v10110_v0  ;;  %v10222_v22 = vadd.f32 %v10221_v26, %v10187_v46  ;;  %v9986_v9 = vpop.f32.mrb[33].mxu1  ;;  %v17342_v43 = vadd.f32 %v12823_v19, %v17147_v20  ;;  %v18330_v26 = vld [vmem:[#allocation52_spill] sm:$0xff] }
 0x7be   : > { %v17345_v11 = vadd.f32 %v17147_v20, %v9986_v9  ;;  %v12824_v53 = vpop.f32.mrb[34].mxu1  ;;  %vm18331_vm0 = vcmp.eq.s32.totalorder %v18330_v26, 1 }
 0x7bf   : > { %v10223_v31 = vadd.f32 %v10222_v22, %v10188_v6  ;;  %v10146_v1 = vadd.f32 %v10145_v18, %v10111_v55  ;;  %v9989_v38 = vpop.f32.mrb[35].mxu1  ;;  %v17351_v44 = vadd.f32 %v12824_v53, %v17147_v20  ;;  %v10114_v27 = vsel %vm18327_vm12, %v17342_v43, 0.0  ;;  %vm18345_vm12 = vmmov %vm18338_vm1 }
 0x7c0   : > { %v10112_v51 = vsel %vm18325_vm10, %v17345_v11, 0.0  ;;  %v17354_v13 = vadd.f32 %v17147_v20, %v9989_v38  ;;  %v10192_v20 = vmul.f32 %v10114_v27, %v10114_v27  ;;  %vm18344_vm10 = vmmov %vm18338_vm1 }
 0x7c1   : > { %v10147_v10 = vadd.f32 %v10146_v1, %v10112_v51  ;;  %v10190_v40 = vmul.f32 %v10112_v51, %v10112_v51  ;;  %v10224_v32 = vadd.f32 %v10223_v31, %v10189_v39  ;;  %v10115_v5 = vsel %vm18331_vm0, %v17351_v44, 0.0  ;;  %vm18347_vm0 = vmmov %vm18334_vm2 }
 0x7c2   : > { %v10113_v16 = vsel %vm18329_vm3, %v17354_v13, 0.0  ;;  %v10193_v55 = vmul.f32 %v10115_v5, %v10115_v5  ;;  %vm18346_vm3 = vmmov %vm18334_vm2 }
 0x7c3   : > { %v10225_v0 = vadd.f32 %v10224_v32, %v10190_v40  ;;  %v10148_v36 = vadd.f32 %v10147_v10, %v10113_v16  ;;  %v10191_v34 = vmul.f32 %v10113_v16, %v10113_v16 }
 0x7c5   : > { %v10149_v46 = vadd.f32 %v10148_v36, %v10114_v27  ;;  %v10226_v45 = vadd.f32 %v10225_v0, %v10191_v34 }
 0x7c7   : > { %v10150_v19 = vadd.f32 %v10149_v46, %v10115_v5  ;;  %v10227_v6 = vadd.f32 %v10226_v45, %v10192_v20 }
 0x7c9   : > { %v10151_v18 = vrot.slane %v10150_v19, 4  ;;  %v10228_v22 = vadd.f32 %v10227_v6, %v10193_v55 }
 0x7cb   : > { %v10152_v9 = vadd.f32 %v10151_v18, %v10150_v19  ;;  %v10229_v53 = vrot.slane %v10228_v22, 4 }
 0x7cd   : > { %v10153_v39 = vrot.slane %v10152_v9, 2  ;;  %v10230_v31 = vadd.f32 %v10229_v53, %v10228_v22 }
 0x7cf   : > { %v10154_v1 = vadd.f32 %v10153_v39, %v10152_v9  ;;  %v10231_v38 = vrot.slane %v10230_v31, 2 }
 0x7d1   : > { %v10155_v42 = vrot.slane %v10154_v1, 1  ;;  %v10232_v51 = vadd.f32 %v10231_v38, %v10230_v31 }
 0x7d3   : > { %v10156_v10 = vadd.f32 %v10155_v42, %v10154_v1  ;;  %v10233_v40 = vrot.slane %v10232_v51, 1 }
 0x7d5   : > { %v17365_v32 = vmul.f32 0.00390625, %v10156_v10  ;;  %v10234_v2 = vadd.f32 %v10233_v40, %v10232_v51 }
 0x7d7   : > { %v10235_v27 = vmul.f32 0.00390625, %v10234_v2  ;;  %v10236_v24 = vmul.f32 %v17365_v32, %v17365_v32  ;;  %v10255_v36 = vsub.f32 %v17249_v60, %v17365_v32  ;;  %v10256_v34 = vsub.f32 %v17258_v48, %v17365_v32 }
 0x7d8   : > { %v10257_v26 = vsub.f32 %v17246_v28, %v17365_v32  ;;  %v10258_v5 = vsub.f32 %v17255_v15, %v17365_v32  ;;  %v10259_v20 = vsub.f32 %v17273_v37, %v17365_v32  ;;  %v10260_v46 = vsub.f32 %v17282_v50, %v17365_v32 }
 0x7d9   : > { %v10237_v16 = vsub.f32 %v10235_v27, %v10236_v24  ;;  %v10261_v45 = vsub.f32 %v17270_v21, %v17365_v32  ;;  %v10262_v60 = vsub.f32 %v17279_v62, %v17365_v32  ;;  %v10263_v48 = vsub.f32 %v17297_v33, %v17365_v32 }
 0x7da   : > { %v10264_v28 = vsub.f32 %v17306_v23, %v17365_v32  ;;  %v10265_v15 = vsub.f32 %v17294_v52, %v17365_v32  ;;  %v10266_v37 = vsub.f32 %v17303_v35, %v17365_v32  ;;  %v10267_v50 = vsub.f32 %v17321_v58, %v17365_v32 }
 0x7db   : > { %v10238_v0 = vmax.f32 %v10237_v16, 0.0  ;;  %v10268_v21 = vsub.f32 %v17330_v49, %v17365_v32  ;;  %v10269_v62 = vsub.f32 %v17318_v14, %v17365_v32  ;;  %v10270_v33 = vsub.f32 %v17327_v59, %v17365_v32 }
 0x7dc   : > { %v10271_v23 = vsub.f32 %v17345_v11, %v17365_v32  ;;  %v10272_v52 = vsub.f32 %v17354_v13, %v17365_v32  ;;  %v10273_v35 = vsub.f32 %v17342_v43, %v17365_v32  ;;  %v10274_v58 = vsub.f32 %v17351_v44, %v17365_v32 }
 0x7dd   : > { %v10275_v55 = vadd.f32 1e-05, %v10238_v0  ;;  %v10239_v14 = vsub.f32 %v17153_v7, %v17365_v32  ;;  %v10240_v59 = vsub.f32 %v17162_v57, %v17365_v32  ;;  %v10241_v49 = vsub.f32 %v17150_v17, %v17365_v32 }
 0x7de   : > { %v10242_v11 = vsub.f32 %v17159_v54, %v17365_v32  ;;  %v10243_v43 = vsub.f32 %v17177_v41, %v17365_v32  ;;  %v10244_v44 = vsub.f32 %v17186_v30, %v17365_v32  ;;  %v10245_v13 = vsub.f32 %v17174_v12, %v17365_v32 }
 0x7df   : > { %13682 = vrsqrt.f32 %v10275_v55  ;;  %v10246_v7 = vsub.f32 %v17183_v8, %v17365_v32  ;;  %v10247_v57 = vsub.f32 %v17201_v61, %v17365_v32  ;;  %v10248_v17 = vsub.f32 %v17210_v47, %v17365_v32 }
 0x7e0   : > { %v10249_v54 = vsub.f32 %v17198_v29, %v17365_v32  ;;  %v10250_v41 = vsub.f32 %v17207_v56, %v17365_v32  ;;  %v10251_v30 = vsub.f32 %v17225_v4, %v17365_v32  ;;  %v10252_v12 = vsub.f32 %v17234_v63, %v17365_v32 }
 0x7e1   : > { %v10253_v8 = vsub.f32 %v17222_v25, %v17365_v32  ;;  %v10254_v61 = vsub.f32 %v17231_v3, %v17365_v32 }
 0x7e9   : > { %v13683_v19 = vpop.eup %13682 }
 0x7ea   : > { %v10277_v47 = vmul.f32 %v13683_v19, %v10239_v14  ;;  %v10278_v6 = vmul.f32 %v13683_v19, %v10240_v59  ;;  %v10279_v18 = vmul.f32 %v13683_v19, %v10241_v49  ;;  %v10280_v29 = vmul.f32 %v13683_v19, %v10242_v11  ;;  %v11282_v49 = vld [vmem:[%s13784_s8 + $0x28] sm:$0xff] }
 0x7eb   : > { %v10281_v22 = vmul.f32 %v13683_v19, %v10243_v43  ;;  %v10282_v9 = vmul.f32 %v13683_v19, %v10244_v44  ;;  %v17441_v56 = vmul.f32 %v13683_v19, %v10245_v13  ;;  %v17443_v53 = vmul.f32 %v13683_v19, %v10246_v7  ;;  %v11285_v43 = vld [vmem:[%s13784_s8 + $0x30] sm:$0xff] }
 0x7ec   : > { %v17445_v4 = vmul.f32 %v13683_v19, %v10247_v57  ;;  %v17447_v39 = vmul.f32 %v13683_v19, %v10248_v17  ;;  %v17449_v63 = vmul.f32 %v13683_v19, %v10249_v54  ;;  %v17451_v25 = vmul.f32 %v13683_v19, %v10250_v41  ;;  %v11289_v57 = vld [vmem:[%s13784_s8 + $0x40] sm:$0xff]  ;;  %v11290_v17 = vld [vmem:[%s13784_s8 + $0x48] sm:$0xff] }
 0x7ed   : > { %v17453_v31 = vmul.f32 %v13683_v19, %v10251_v30  ;;  %v17455_v3 = vmul.f32 %v13683_v19, %v10252_v12  ;;  %v17457_v1 = vmul.f32 %v13683_v19, %v10253_v8  ;;  %v17459_v38 = vmul.f32 %v13683_v19, %v10254_v61  ;;  %v11286_v12 = vld [vmem:[%s13784_s8 + $0x38] sm:$0xff] }
 0x7ee   : > { %v17461_v42 = vmul.f32 %v13683_v19, %v10255_v36  ;;  %v17463_v51 = vmul.f32 %v13683_v19, %v10256_v34  ;;  %v17465_v10 = vmul.f32 %v13683_v19, %v10257_v26  ;;  %v17467_v40 = vmul.f32 %v13683_v19, %v10258_v5  ;;  %v10313_v26 = vld [vmem:[%s13784_s8] sm:$0xff]  ;;  %v10314_v5 = vld [vmem:[%s13784_s8 + $0x8] sm:$0xff] }
 0x7ef   : > { %v17469_v32 = vmul.f32 %v13683_v19, %v10259_v20  ;;  %v17471_v2 = vmul.f32 %v13683_v19, %v10260_v46  ;;  %v17473_v27 = vmul.f32 %v13683_v19, %v10261_v45  ;;  %v17475_v24 = vmul.f32 %v13683_v19, %v10262_v60 }
 0x7f0   : > { %v17477_v16 = vmul.f32 %v13683_v19, %v10263_v48  ;;  %v17479_v0 = vmul.f32 %v13683_v19, %v10264_v28  ;;  %v17481_v36 = vmul.f32 %v13683_v19, %v10265_v15  ;;  %v17483_v34 = vmul.f32 %v13683_v19, %v10266_v37 }
 0x7f1   : > { %v17487_v20 = vmul.f32 %v13683_v19, %v10267_v50  ;;  %v17489_v46 = vmul.f32 %v13683_v19, %v10268_v21  ;;  %v17491_v45 = vmul.f32 %v13683_v19, %v10269_v62  ;;  %v17493_v60 = vmul.f32 %v13683_v19, %v10270_v33  ;;  %v11277_v62 = vld [vmem:[%s13784_s8 + $0x10] sm:$0xff]  ;;  %v11278_v33 = vld [vmem:[%s13784_s8 + $0x18] sm:$0xff] }
 0x7f2   : > { %v17502_v48 = vmul.f32 %v13683_v19, %v10271_v23  ;;  %v17504_v28 = vmul.f32 %v13683_v19, %v10272_v52  ;;  %v17506_v15 = vmul.f32 %v13683_v19, %v10273_v35  ;;  %v17508_v37 = vmul.f32 %v13683_v19, %v10274_v58  ;;  %v11281_v23 = vld [vmem:[%s13784_s8 + $0x20] sm:$0xff] }
 0x7f3   : > { %v10315_v50 = vadd.f32 %v10313_v26, %v10277_v47  ;;  %v10316_v21 = vadd.f32 %v10314_v5, %v10278_v6  ;;  %v10325_v55 = vrot.slane %v10279_v18, 2  ;;  %v10326_v14 = vrot.slane %v10280_v29, 2 }
 0x7f4   : > { %v10328_v59 = vrot.slane %v10281_v22, 2  ;;  %v10342_v11 = vrot.slane %v10281_v22, 4  ;;  %v10343_v52 = vrot.slane %v10282_v9, 4  ;;  %v10345_v35 = vrot.slane %v17441_v56, 4 }
 0x7f5   : > { %10317 = vst [vmem:[%s17500_s11] sm:$0xff] %v10315_v50  ;;  %10318 = vst [vmem:[%s17500_s11 + $0x8] sm:$0xff] %v10316_v21  ;;  %v10327_v58 = vsel %vm18332_vm13, %v10325_v55, %v10326_v14  ;;  %v10359_v44 = vrot.slane %v17441_v56, 6  ;;  %v10360_v13 = vrot.slane %v17443_v53, 6  ;;  %v10362_v7 = vrot.slane %v17445_v4, 6  ;;  %v11293_v53 = vld [vmem:[%s13784_s8 + $0x50] sm:$0xff]  ;;  %v11294_v4 = vld [vmem:[%s13784_s8 + $0x58] sm:$0xff] }
 0x7f6   : > { %v10329_v54 = vsel %vm18333_vm6, %v10326_v14, %v10328_v59  ;;  %v10332_v41 = vadd.f32 %v11277_v62, %v10327_v58  ;;  %v10344_v19 = vsel %vm18334_vm2, %v10342_v11, %v10343_v52  ;;  %v10346_v30 = vsel %vm18335_vm11, %v10343_v52, %v10345_v35  ;;  %v11297_v21 = vld [vmem:[%s13784_s8 + $0x60] sm:$0xff]  ;;  %v11301_v55 = vld [vmem:[%s13784_s8 + $0x70] sm:$0xff]  ;;  %v11302_v59 = vld [vmem:[%s13784_s8 + $0x78] sm:$0xff] }
 0x7f7   : > { %v10333_v8 = vadd.f32 %v11278_v33, %v10329_v54  ;;  %v10349_v61 = vadd.f32 %v11281_v23, %v10344_v19  ;;  %v10350_v47 = vadd.f32 %v11282_v49, %v10346_v30  ;;  %v10361_v6 = vsel %vm18336_vm4, %v10359_v44, %v10360_v13  ;;  %v11309_v54 = vld [vmem:[%s13784_s8 + $0x90] sm:$0xff]  ;;  %vm18348_vm13 = vmmov %vm18336_vm4 }
 0x7f8   : > { %11279 = vst [vmem:[%s17500_s11 + $0x10] sm:$0xff] %v10332_v41  ;;  %v10363_v18 = vsel %vm18337_vm7, %v10360_v13, %v10362_v7  ;;  %v10366_v29 = vadd.f32 %v11285_v43, %v10361_v6  ;;  %v10373_v22 = vadd.f32 %v11289_v57, %v17447_v39  ;;  %v10374_v9 = vadd.f32 %v11290_v17, %v17449_v63  ;;  %v11298_v39 = vld [vmem:[%s13784_s8 + $0x68] sm:$0xff]  ;;  %v11321_v17 = vld [vmem:[%s13784_s8 + $0xc0] sm:$0xff]  ;;  %v11310_v41 = vld [vmem:[%s13784_s8 + $0x98] sm:$0xff] }
 0x7f9   : > { %11280 = vst [vmem:[%s17500_s11 + $0x18] sm:$0xff] %v10333_v8  ;;  %11283 = vst [vmem:[%s17500_s11 + $0x20] sm:$0xff] %v10349_v61  ;;  %v10367_v56 = vadd.f32 %v11286_v12, %v10363_v18  ;;  %v10383_v26 = vrot.slane %v17451_v25, 2  ;;  %v10384_v5 = vrot.slane %v17453_v31, 2  ;;  %v10386_v50 = vrot.slane %v17455_v3, 2  ;;  %v11317_v18 = vld [vmem:[%s13784_s8 + $0xb0] sm:$0xff] }
 0x7fa   : > { %11284 = vst [vmem:[%s17500_s11 + $0x28] sm:$0xff] %v10350_v47  ;;  %11287 = vst [vmem:[%s17500_s11 + $0x30] sm:$0xff] %v10366_v29  ;;  %v10399_v63 = vrot.slane %v17455_v3, 4  ;;  %v10400_v62 = vrot.slane %v17457_v1, 4  ;;  %v10402_v33 = vrot.slane %v17459_v38, 4  ;;  %v10415_v25 = vrot.slane %v17459_v38, 6 }
 0x7fb   : > { %11291 = vst [vmem:[%s17500_s11 + $0x40] sm:$0xff] %v10373_v22  ;;  %11292 = vst [vmem:[%s17500_s11 + $0x48] sm:$0xff] %v10374_v9  ;;  %v10385_v31 = vsel %vm18338_vm1, %v10383_v26, %v10384_v5  ;;  %v10387_v14 = vsel %vm18339_vm9, %v10384_v5, %v10386_v50  ;;  %v10416_v23 = vrot.slane %v17461_v42, 6  ;;  %v10418_v49 = vrot.slane %v17463_v51, 6  ;;  %v11305_v3 = vld [vmem:[%s13784_s8 + $0x80] sm:$0xff]  ;;  %v11306_v1 = vld [vmem:[%s13784_s8 + $0x88] sm:$0xff] }
 0x7fc   : > { %11288 = vst [vmem:[%s17500_s11 + $0x38] sm:$0xff] %v10367_v56  ;;  %v10390_v11 = vadd.f32 %v11293_v53, %v10385_v31  ;;  %v10391_v52 = vadd.f32 %v11294_v4, %v10387_v14  ;;  %v10401_v38 = vsel %vm18340_vm15, %v10399_v63, %v10400_v62  ;;  %v10403_v35 = vsel %vm18341_vm5, %v10400_v62, %v10402_v33  ;;  %v11318_v29 = vld [vmem:[%s13784_s8 + $0xb8] sm:$0xff]  ;;  %v11322_v9 = vld [vmem:[%s13784_s8 + $0xc8] sm:$0xff]  ;;  %vm18349_vm6 = vmmov %vm18336_vm4 }
 0x7fd   : > { %v10406_v58 = vadd.f32 %v11297_v21, %v10401_v38  ;;  %v10407_v43 = vadd.f32 %v11298_v39, %v10403_v35  ;;  %v10417_v44 = vsel %vm18342_vm8, %v10415_v25, %v10416_v23  ;;  %v10419_v42 = vsel %vm18343_vm14, %v10416_v23, %v10418_v49  ;;  %v11325_v39 = vld [vmem:[%s13784_s8 + $0xd0] sm:$0xff]  ;;  %v11326_v62 = vld [vmem:[%s13784_s8 + $0xd8] sm:$0xff]  ;;  %v11329_v25 = vld [vmem:[%s13784_s8 + $0xe0] sm:$0xff] }
 0x7fe   : > { %11295 = vst [vmem:[%s17500_s11 + $0x50] sm:$0xff] %v10390_v11  ;;  %11296 = vst [vmem:[%s17500_s11 + $0x58] sm:$0xff] %v10391_v52  ;;  %v10422_v51 = vadd.f32 %v11301_v55, %v10417_v44  ;;  %v10423_v13 = vadd.f32 %v11302_v59, %v10419_v42  ;;  %v10429_v7 = vadd.f32 %v11305_v3, %v17465_v10  ;;  %v10439_v19 = vrot.slane %v17469_v32, 2  ;;  %v11313_v10 = vld [vmem:[%s13784_s8 + $0xa0] sm:$0xff]  ;;  %v11333_v3 = vld [vmem:[%s13784_s8 + $0xf0] sm:$0xff] }
 0x7ff   : > { %v10430_v57 = vadd.f32 %v11306_v1, %v17467_v40  ;;  %11299 = vst [vmem:[%s17500_s11 + $0x60] sm:$0xff] %v10406_v58  ;;  %11300 = vst [vmem:[%s17500_s11 + $0x68] sm:$0xff] %v10407_v43  ;;  %v10440_v30 = vrot.slane %v17471_v2, 2  ;;  %v10442_v12 = vrot.slane %v17473_v27, 2  ;;  %v10455_v8 = vrot.slane %v17473_v27, 4  ;;  %v11314_v40 = vld [vmem:[%s13784_s8 + $0xa8] sm:$0xff] }
 0x800   : > { %11303 = vst [vmem:[%s17500_s11 + $0x70] sm:$0xff] %v10422_v51  ;;  %11304 = vst [vmem:[%s17500_s11 + $0x78] sm:$0xff] %v10423_v13  ;;  %v10456_v61 = vrot.slane %v17475_v24, 4  ;;  %v10458_v47 = vrot.slane %v17477_v16, 4  ;;  %v10471_v32 = vrot.slane %v17477_v16, 6  ;;  %v10472_v2 = vrot.slane %v17479_v0, 6 }
 0x801   : > { %11307 = vst [vmem:[%s17500_s11 + $0x80] sm:$0xff] %v10429_v7  ;;  %11308 = vst [vmem:[%s17500_s11 + $0x88] sm:$0xff] %v10430_v57  ;;  %v10441_v6 = vsel %vm18344_vm10, %v10439_v19, %v10440_v30  ;;  %v10443_v27 = vsel %vm18345_vm12, %v10440_v30, %v10442_v12  ;;  %v10474_v22 = vrot.slane %v17481_v36, 6  ;;  %v10485_v24 = vadd.f32 %v11321_v17, %v17483_v34  ;;  %v11334_v1 = vld [vmem:[%s13784_s8 + $0xf8] sm:$0xff] }
 0x802   : > { %v10446_v56 = vadd.f32 %v11309_v54, %v10441_v6  ;;  %v10447_v16 = vadd.f32 %v11310_v41, %v10443_v27  ;;  %v10457_v0 = vsel %vm18346_vm3, %v10455_v8, %v10456_v61  ;;  %v10459_v53 = vsel %vm18347_vm0, %v10456_v61, %v10458_v47  ;;  %vm18350_vm2 = vmmov %vm18338_vm1 }
 0x803   : > { %v10462_v4 = vadd.f32 %v11313_v10, %v10457_v0  ;;  %v10463_v26 = vadd.f32 %v11314_v40, %v10459_v53  ;;  %v10473_v5 = vsel %vm18348_vm13, %v10471_v32, %v10472_v2  ;;  %v10475_v36 = vsel %vm18349_vm6, %v10472_v2, %v10474_v22  ;;  %11323 = vst [vmem:[%s17500_s11 + $0xc0] sm:$0xff] %v10485_v24  ;;  %vm18351_vm11 = vmmov %vm18338_vm1 }
 0x804   : > { %11311 = vst [vmem:[%s17500_s11 + $0x90] sm:$0xff] %v10446_v56  ;;  %11312 = vst [vmem:[%s17500_s11 + $0x98] sm:$0xff] %v10447_v16  ;;  %v10478_v34 = vadd.f32 %v11317_v18, %v10473_v5  ;;  %v10479_v50 = vadd.f32 %v11318_v29, %v10475_v36  ;;  %v10486_v21 = vadd.f32 %v11322_v9, %v17487_v20  ;;  %v10495_v63 = vrot.slane %v17489_v46, 2  ;;  %v11330_v20 = vld [vmem:[%s13784_s8 + $0xe8] sm:$0xff] }
 0x805   : > { %11315 = vst [vmem:[%s17500_s11 + $0xa0] sm:$0xff] %v10462_v4  ;;  %11316 = vst [vmem:[%s17500_s11 + $0xa8] sm:$0xff] %v10463_v26  ;;  %v10496_v33 = vrot.slane %v17491_v45, 2  ;;  %v10498_v55 = vrot.slane %v17493_v60, 2  ;;  %v10511_v31 = vrot.slane %v17493_v60, 4  ;;  %v10512_v14 = vrot.slane %v17502_v48, 4 }
 0x806   : > { %11319 = vst [vmem:[%s17500_s11 + $0xb0] sm:$0xff] %v10478_v34  ;;  %11320 = vst [vmem:[%s17500_s11 + $0xb8] sm:$0xff] %v10479_v50  ;;  %v10514_v46 = vrot.slane %v17504_v28, 4  ;;  %v10527_v59 = vrot.slane %v17504_v28, 6  ;;  %v10528_v45 = vrot.slane %v17506_v15, 6  ;;  %v10530_v23 = vrot.slane %v17508_v37, 6 }
 0x807   : > { %11324 = vst [vmem:[%s17500_s11 + $0xc8] sm:$0xff] %v10486_v21  ;;  %v10497_v49 = vsel %vm18350_vm2, %v10495_v63, %v10496_v33  ;;  %v10499_v60 = vsel %vm18351_vm11, %v10496_v33, %v10498_v55  ;;  %vm18352_vm4 = vmmov %vm18347_vm0 }
 0x808   : > { %v10513_v48 = vsel %vm18352_vm4, %v10511_v31, %v10512_v14  ;;  %v10502_v11 = vadd.f32 %v11325_v39, %v10497_v49  ;;  %v10503_v52 = vadd.f32 %v11326_v62, %v10499_v60  ;;  %vm18353_vm7 = vmmov %vm18347_vm0 }
 0x809   : > { %v10515_v28 = vsel %vm18353_vm7, %v10512_v14, %v10514_v46  ;;  %v10518_v38 = vadd.f32 %v11329_v25, %v10513_v48  ;;  %vm18354_vm1 = vmmov %vm18349_vm6 }
 0x80a   : > { %v10519_v15 = vadd.f32 %v11330_v20, %v10515_v28  ;;  %v10529_v35 = vsel %vm18354_vm1, %v10527_v59, %v10528_v45  ;;  %vm18355_vm9 = vmmov %vm18354_vm1  ;;  %11327 = vst [vmem:[%s17500_s11 + $0xd0] sm:$0xff] %v10502_v11 }
 0x80b   : > { %v10531_v37 = vsel %vm18355_vm9, %v10528_v45, %v10530_v23  ;;  %11328 = vst [vmem:[%s17500_s11 + $0xd8] sm:$0xff] %v10503_v52  ;;  %11331 = vst [vmem:[%s17500_s11 + $0xe0] sm:$0xff] %v10518_v38  ;;  %v10534_v58 = vadd.f32 %v11333_v3, %v10529_v35 }
 0x80c   : > { %v10535_v43 = vadd.f32 %v11334_v1, %v10531_v37  ;;  %11332 = vst [vmem:[%s17500_s11 + $0xe8] sm:$0xff] %v10519_v15 }
 0x80d   : > { %11335 = vst [vmem:[%s17500_s11 + $0xf0] sm:$0xff] %v10534_v58 }
 0x80e   : > { %11336 = vst [vmem:[%s17500_s11 + $0xf8] sm:$0xff] %v10535_v43 }
 0x80f PF: > { %s16_s21 = sadd.s32 1, %s13721_s21  }
 0x810   : > { %p13_p4 = scmp.ge.s32.totalorder %s16_s21, 4  }
 0x812   :  { %15 = sbr.rel (!%p13_p4) target bundleno = 1 (0x1), region = 120 }

</bundles_post_ra>
